<compile_context>
chip_gen: v7x
topology: tpu7x:2x2x1
jax: 0.10.0
libtpu: 0.0.40
codegen_flags: <defaults>
</compile_context>

<pallas_src>
import functools
import math

import jax
import jax.numpy as jnp
import numpy as np
from jax.experimental import pallas as pl
from jax.experimental.pallas import tpu as pltpu


# ----------------------------- matmul kernels ------------------------------

def _make_mm_kernel_single(has_bias, has_res, relu):
    """Single K-step matmul with fused bias / residual / ReLU epilogue."""
    def kernel(*refs):
        a_ref, b_ref = refs[0], refs[1]
        idx = 2
        bias_ref = None
        res_ref = None
        if has_bias:
            bias_ref = refs[idx]
            idx += 1
        if has_res:
            res_ref = refs[idx]
            idx += 1
        o_ref = refs[idx]
        y = jnp.dot(a_ref[...], b_ref[...],
                    preferred_element_type=jnp.float32)
        if has_bias:
            y = y + bias_ref[...].astype(jnp.float32)
        if has_res:
            y = y + res_ref[...].astype(jnp.float32)
        if relu:
            y = jnp.maximum(y, 0.0)
        o_ref[...] = y.astype(o_ref.dtype)
    return kernel


def _make_mm_kernel_ktiled(has_bias, has_res, relu):
    """K-tiled matmul (f32 VMEM accumulator) with fused epilogue at last k."""
    def kernel(*refs):
        a_ref, b_ref = refs[0], refs[1]
        idx = 2
        bias_ref = None
        res_ref = None
        if has_bias:
            bias_ref = refs[idx]
            idx += 1
        if has_res:
            res_ref = refs[idx]
            idx += 1
        o_ref = refs[idx]
        acc_ref = refs[idx + 1]

        @pl.when(pl.program_id(2) == 0)
        def _():
            acc_ref[...] = jnp.zeros_like(acc_ref)

        acc_ref[...] += jnp.dot(a_ref[...], b_ref[...],
                                preferred_element_type=jnp.float32)

        @pl.when(pl.program_id(2) == pl.num_programs(2) - 1)
        def _():
            y = acc_ref[...]
            if has_bias:
                y = y + bias_ref[...].astype(jnp.float32)
            if has_res:
                y = y + res_ref[...].astype(jnp.float32)
            if relu:
                y = jnp.maximum(y, 0.0)
            o_ref[...] = y.astype(o_ref.dtype)
    return kernel


def fused_matmul(a, b, bias=None, residual=None, relu=False):
    """y = a @ b (+bias) (+residual) (ReLU).  Operands go to the MXU as bf16,
    accumulation is f32.  Small dims use full-extent blocks (no zero pad)."""
    M, K = a.shape
    K2, N = b.shape
    assert K == K2
    a = a.astype(jnp.bfloat16)
    b = b.astype(jnp.bfloat16)

    tm = M if M <= 256 else 256
    tn = N if N <= 512 else 256
    tk = K if K <= 2048 else 512
    Mp = pl.cdiv(M, tm) * tm
    Np = pl.cdiv(N, tn) * tn
    Kp = pl.cdiv(K, tk) * tk
    if (Mp, Kp) != (M, K):
        a = jnp.pad(a, ((0, Mp - M), (0, Kp - K)))
    if (Kp, Np) != (K, N):
        b = jnp.pad(b, ((0, Kp - K), (0, Np - N)))

    has_bias = bias is not None
    has_res = residual is not None
    inputs = [a, b]
    if has_bias:
        bias = bias.reshape(1, N).astype(jnp.float32)
        if Np != N:
            bias = jnp.pad(bias, ((0, 0), (0, Np - N)))
        inputs.append(bias)
    if has_res:
        residual = residual.astype(jnp.float32)
        if (Mp, Np) != (M, N):
            residual = jnp.pad(residual, ((0, Mp - M), (0, Np - N)))
        inputs.append(residual)

    nk = Kp // tk
    if nk == 1:
        in_specs = [pl.BlockSpec((tm, tk), lambda i, j: (i, 0)),
                    pl.BlockSpec((tk, tn), lambda i, j: (0, j))]
        if has_bias:
            in_specs.append(pl.BlockSpec((1, tn), lambda i, j: (0, j)))
        if has_res:
            in_specs.append(pl.BlockSpec((tm, tn), lambda i, j: (i, j)))
        out = pl.pallas_call(
            _make_mm_kernel_single(has_bias, has_res, relu),
            out_shape=jax.ShapeDtypeStruct((Mp, Np), jnp.float32),
            grid=(Mp // tm, Np // tn),
            in_specs=in_specs,
            out_specs=pl.BlockSpec((tm, tn), lambda i, j: (i, j)),
            compiler_params=pltpu.CompilerParams(
                dimension_semantics=("parallel", "parallel")),
        )(*inputs)
    else:
        in_specs = [pl.BlockSpec((tm, tk), lambda i, j, k: (i, k)),
                    pl.BlockSpec((tk, tn), lambda i, j, k: (k, j))]
        if has_bias:
            in_specs.append(pl.BlockSpec((1, tn), lambda i, j, k: (0, j)))
        if has_res:
            in_specs.append(pl.BlockSpec((tm, tn), lambda i, j, k: (i, j)))
        out = pl.pallas_call(
            _make_mm_kernel_ktiled(has_bias, has_res, relu),
            out_shape=jax.ShapeDtypeStruct((Mp, Np), jnp.float32),
            grid=(Mp // tm, Np // tn, nk),
            in_specs=in_specs,
            out_specs=pl.BlockSpec((tm, tn), lambda i, j, k: (i, j)),
            scratch_shapes=[pltpu.VMEM((tm, tn), jnp.float32)],
            compiler_params=pltpu.CompilerParams(
                dimension_semantics=("parallel", "parallel", "arbitrary")),
        )(*inputs)
    if (Mp, Np) != (M, N):
        out = out[:M, :N]
    return out


# ------------------ batched phase matmul (conv-transpose) ------------------

def _make_phase_kernel(relu):
    def kernel(a_ref, b_ref, bias_ref, o_ref):
        y = jnp.dot(a_ref[0], b_ref[0], preferred_element_type=jnp.float32)
        y = y + bias_ref[...].astype(jnp.float32)
        if relu:
            y = jnp.maximum(y, 0.0)
        o_ref[0] = y
    return kernel


def phase_batched_matmul(a, b, bias, relu):
    """a: [P, M, K] bf16, b: [P, K, Cout] bf16, bias: [1, Cout] f32.
    One grid step per (phase, M-tile); bias/ReLU fused in the epilogue."""
    P, M, K = a.shape
    Cout = b.shape[-1]
    tm = M if M <= 256 else 128
    Mp = pl.cdiv(M, tm) * tm
    if Mp != M:
        a = jnp.pad(a, ((0, 0), (0, Mp - M), (0, 0)))
    out = pl.pallas_call(
        _make_phase_kernel(relu),
        out_shape=jax.ShapeDtypeStruct((P, Mp, Cout), jnp.float32),
        grid=(P, Mp // tm),
        in_specs=[pl.BlockSpec((1, tm, K), lambda p, i: (p, i, 0)),
                  pl.BlockSpec((1, K, Cout), lambda p, i: (p, 0, 0)),
                  pl.BlockSpec((1, Cout), lambda p, i: (0, 0))],
        out_specs=pl.BlockSpec((1, tm, Cout), lambda p, i: (p, i, 0)),
        compiler_params=pltpu.CompilerParams(
            dimension_semantics=("parallel", "parallel")),
    )(a, b, bias)
    if Mp != M:
        out = out[:, :M]
    return out


# --------------------------- batchnorm + ReLU -------------------------------

def _bn_relu_kernel(x_ref, g_ref, b_ref, f_ref, o_ref, *, eps, relu, n_total):
    # x_ref: [Mr, fold*C]  (channel c lives in columns j*C + c, j < fold)
    x = x_ref[...]
    s1 = jnp.sum(x, axis=0, keepdims=True)          # [1, fold*C] partial sums
    s2 = jnp.sum(x * x, axis=0, keepdims=True)
    fm = f_ref[...]                                 # fold-combine + re-tile
    s1 = jnp.dot(s1, fm, preferred_element_type=jnp.float32)
    s2 = jnp.dot(s2, fm, preferred_element_type=jnp.float32)
    mean = s1 / n_total
    var = jnp.maximum(s2 / n_total - mean * mean, 0.0)
    scale = jax.lax.rsqrt(var + eps) * g_ref[...]
    shift = b_ref[...] - mean * scale
    y = x * scale + shift
    if relu:
        y = jnp.maximum(y, 0.0)
    o_ref[...] = y


def batchnorm_relu(x, gamma, beta, eps=1e-5, relu=True):
    """Training-mode BatchNorm3d (batch statistics, biased variance) with
    fused ReLU.  The [M, C] view is folded to a >=128-wide lane axis when
    possible so VPU ops and stores are lane-dense."""
    shape = x.shape
    C = shape[-1]
    x2 = x.reshape(-1, C)
    M = x2.shape[0]
    fold = 1
    if C < 128 and 128 % C == 0 and M % (128 // C) == 0:
        fold = 128 // C
    CL = fold * C
    Mr = M // fold
    xr = x2.reshape(Mr, CL)
    g = jnp.tile(gamma.astype(jnp.float32).reshape(1, C), (1, fold))
    b = jnp.tile(beta.astype(jnp.float32).reshape(1, C), (1, fold))
    fm = jnp.tile(jnp.eye(C, dtype=jnp.float32), (fold, fold))
    # TODO(synk): single-block BN assumes the latent fits VMEM; a two-pass
    # M-tiled reduction is needed for very large latents (v7x 64 MiB VMEM).
    y = pl.pallas_call(
        functools.partial(_bn_relu_kernel, eps=eps, relu=relu,
                          n_total=float(M)),
        out_shape=jax.ShapeDtypeStruct((Mr, CL), jnp.float32),
        grid=(1,),
        in_specs=[pl.BlockSpec((Mr, CL), lambda i: (0, 0)),
                  pl.BlockSpec((1, CL), lambda i: (0, 0)),
                  pl.BlockSpec((1, CL), lambda i: (0, 0)),
                  pl.BlockSpec((CL, CL), lambda i: (0, 0))],
        out_specs=pl.BlockSpec((Mr, CL), lambda i: (0, 0)),
    )(xr, g, b, fm)
    return y.reshape(shape)


# ------------------------------ attention -----------------------------------

def _attn_kernel(q_ref, k_ref, v_ref, o_ref):
    # blocks: [L, dk, Bb]  (batch packed on the 128-lane axis).
    # 1/sqrt(dk) is folded into the Q projection weights.
    q = q_ref[...]
    k = k_ref[...]
    v = v_ref[...]
    s = jnp.sum(q[:, None, :, :] * k[None, :, :, :], axis=2)   # [L, L, Bb]
    s = s - jnp.max(s, axis=1, keepdims=True)
    p = jnp.exp(s)
    p = p * pl.reciprocal(jnp.sum(p, axis=1, keepdims=True), approx=True)
    o_ref[...] = jnp.sum(p[:, :, None, :] * v[None, :, :, :], axis=1)


def pallas_attention(q, k, v):
    """q, k, v: [L, dk, B] f32 -> softmax(q k^T) v, softmax over keys."""
    L, dk, B = q.shape
    if B > 128:
        Bb = 128
        Bp = pl.cdiv(B, 128) * 128
        if Bp != B:
            pad = ((0, 0), (0, 0), (0, Bp - B))
            q, k, v = jnp.pad(q, pad), jnp.pad(k, pad), jnp.pad(v, pad)
    else:
        Bb, Bp = B, B
    spec = pl.BlockSpec((L, dk, Bb), lambda i: (0, 0, i))
    out = pl.pallas_call(
        _attn_kernel,
        out_shape=jax.ShapeDtypeStruct((L, dk, Bp), jnp.float32),
        grid=(Bp // Bb,),
        in_specs=[spec, spec, spec],
        out_specs=spec,
        compiler_params=pltpu.CompilerParams(
            dimension_semantics=("parallel",)),
    )(q, k, v)
    if Bp != B:
        out = out[:, :, :B]
    return out


# ------------------------------- conv glue ----------------------------------

def _same_pad(x, kernel, stride):
    # x: [N, T, H, W, C]; F.pad of SamePadConv(Transpose)3d: per dim
    # total p = k - s, split (p//2 + p%2, p//2) low/high.
    pads = [(0, 0)]
    for kd, sd in zip(kernel, stride):
        p = kd - sd
        pads.append((p // 2 + p % 2, p // 2))
    pads.append((0, 0))
    return jnp.pad(x, pads)


def conv3d_same(x, wm, ksize):
    """SamePadConv3d, stride 1, no bias.  wm: pre-packed [k^3*Cin, Cout] bf16."""
    kt, kh, kw = ksize
    if (kt, kh, kw) == (1, 1, 1):
        N, T, H, W, Cin = x.shape
        a = x.reshape(-1, Cin)
        out = fused_matmul(a, wm)
        return out.reshape(N, T, H, W, -1)
    xp = _same_pad(x, ksize, (1, 1, 1))
    N, Tp, Hp, Wp, Cin = xp.shape
    To, Ho, Wo = Tp - kt + 1, Hp - kh + 1, Wp - kw + 1
    pats = [xp[:, dt:dt + To, dh:dh + Ho, dw:dw + Wo, :]
            for dt in range(kt) for dh in range(kh) for dw in range(kw)]
    a = jnp.stack(pats, axis=-2).reshape(N * To * Ho * Wo, kt * kh * kw * Cin)
    out = fused_matmul(a, wm)
    return out.reshape(N, To, Ho, Wo, -1)


def same_pad_conv_transpose3d(x, w_phases, bias, stride, phase_meta, relu):
    """SamePadConvTranspose3d via subpixel (phase) decomposition: stride^3
    small VALID convs on the un-dilated padded input (no zero-FLOP waste),
    batched into one pallas_call; bias/ReLU fused in the epilogue."""
    k = 4
    st, sh, sw = stride
    xp = _same_pad(x, (k, k, k), stride)
    N, Tp, Hp, Wp, Cin = xp.shape
    To = (Tp - 1) * st - k + 2
    Ho = (Hp - 1) * sh - k + 2
    Wo = (Wp - 1) * sw - k + 2
    Mot, Moh, Mow = To // st, Ho // sh, Wo // sw

    a_list = []
    for (pt, dts), (ph, dhs), (pw, dws) in phase_meta:
        pats = [xp[:, dt:dt + Mot, dh:dh + Moh, dw:dw + Mow, :]
                for dt in dts for dh in dhs for dw in dws]
        pmat = jnp.stack(pats, axis=-2).reshape(N * Mot * Moh * Mow, -1)
        a_list.append(pmat)
    A = jnp.stack(a_list, 0).astype(jnp.bfloat16)          # [P, M, Kp]

    out = phase_batched_matmul(A, w_phases, bias, relu)    # [P, M, Cout]
    Cout = w_phases.shape[-1]
    out = out.reshape(st, sh, sw, N, Mot, Moh, Mow, Cout)
    out = jnp.transpose(out, (3, 4, 0, 5, 1, 6, 2, 7))
    return out.reshape(N, To, Ho, Wo, Cout)


# ----------------------------- attention glue --------------------------------

def axial_attention_outputs(qkv, n_head):
    """qkv: [N, T, H, W, 3(axial), 3(q/k/v), nh, dk] -> list of 3 per-axial
    attention outputs [N, T, H, W, C] (heads merged head-major)."""
    N, T, H, W = qkv.shape[:4]
    dk = qkv.shape[-1]
    spatial_axes = (3, 2, 1)       # attn_w (W), attn_h (H), attn_t (T)
    entries = []
    for idx, ax in enumerate(spatial_axes):
        t = qkv[:, :, :, :, idx]                     # [N,T,H,W,3,nh,dk]
        other = tuple(a for a in (1, 2, 3) if a != ax)
        perm = (4, ax, 6, 0) + other + (5,)
        t = jnp.transpose(t, perm)                   # [3, L, dk, N, o1, o2, nh]
        L = t.shape[1]
        entries.append(dict(ax=ax, other=other, L=L, oshape=t.shape[3:],
                            q=t[0].reshape(L, dk, -1),
                            k=t[1].reshape(L, dk, -1),
                            v=t[2].reshape(L, dk, -1)))

    outs = [None] * 3
    for L in sorted(set(e['L'] for e in entries)):
        idxs = [i for i, e in enumerate(entries) if e['L'] == L]
        q = jnp.concatenate([entries[i]['q'] for i in idxs], axis=-1)
        k = jnp.concatenate([entries[i]['k'] for i in idxs], axis=-1)
        v = jnp.concatenate([entries[i]['v'] for i in idxs], axis=-1)
        o = pallas_attention(q, k, v)                # [L, dk, B_total]
        off = 0
        for i in idxs:
            e = entries[i]
            Ba = e['q'].shape[-1]
            oa = o[:, :, off:off + Ba]
            off += Ba
            oa = oa.reshape((L, dk) + e['oshape'])   # [L, dk, N, o1, o2, nh]
            src = [e['ax'], 6, 0, e['other'][0], e['other'][1], 5]
            back = tuple(src.index(d) for d in (0, 1, 2, 3, 5, 6))
            oa = jnp.transpose(oa, back)             # [N, T, H, W, nh, dk]
            outs[i] = oa.reshape(N, T, H, W, -1)
    return outs


def attention_residual_block(x, p, n_head):
    N, T, H, W, C = x.shape
    M = N * T * H * W
    h = batchnorm_relu(x, p['bn1_g'], p['bn1_b'])
    h = conv3d_same(h, p['conv1_w'], (3, 3, 3))      # C -> C//2
    h = batchnorm_relu(h, p['bn2_g'], p['bn2_b'])
    h = conv3d_same(h, p['conv2_w'], (1, 1, 1))      # C//2 -> C
    h = batchnorm_relu(h, p['bn3_g'], p['bn3_b'])
    dk = C // n_head
    # single QKV projection for all three axial attentions (scale folded in)
    qkv = fused_matmul(h.reshape(M, C), p['w_qkv'])              # [M, 9C]
    qkv = qkv.reshape(N, T, H, W, 3, 3, n_head, dk)
    outs = axial_attention_outputs(qkv, n_head)
    # single output projection == sum of the three per-axial projections,
    # with (bo_w + bo_h + bo_t) and the block residual fused in the epilogue.
    o_cat = jnp.concatenate(outs, axis=-1).reshape(M, 3 * C)
    y = fused_matmul(o_cat, p['w_out'], bias=p['bo'],
                     residual=x.reshape(M, C))
    return y.reshape(N, T, H, W, C)


# --------------------------- weight pre-packing ------------------------------

def _pack_conv_weight(w):
    # w: [Cout, Cin, kt, kh, kw] -> [kt*kh*kw*Cin, Cout] bf16 (matches the
    # (dt, dh, dw, cin) patch order of conv3d_same).
    Cout, Cin, kt, kh, kw = w.shape
    return jnp.transpose(w, (2, 3, 4, 1, 0)).reshape(
        kt * kh * kw * Cin, Cout).astype(jnp.bfloat16)


def _pack_convt_weight(w, stride):
    # w: [Cin, Cout, kt, kh, kw] (torch ConvTranspose3d layout).
    # Returns per-phase weight matrices [P, Kp, Cout] (bf16) and static
    # per-phase tap-offset metadata for the subpixel decomposition.
    Cin, Cout, kt, kh, kw = w.shape
    wc = jnp.transpose(jnp.flip(w, axis=(2, 3, 4)), (1, 0, 2, 3, 4))
    st, sh, sw = stride
    mats, meta = [], []
    for pt in range(st):
        jt = [j for j in range(kt) if (pt + j) % st == 0]
        for ph in range(sh):
            jh = [j for j in range(kh) if (ph + j) % sh == 0]
            for pw in range(sw):
                jw = [j for j in range(kw) if (pw + j) % sw == 0]
                sub = wc[:, :, jt][:, :, :, jh][:, :, :, :, jw]
                mats.append(jnp.transpose(sub, (2, 3, 4, 1, 0))
                            .reshape(-1, Cout))
                meta.append(((pt, [(pt + j) // st for j in jt]),
                             (ph, [(ph + j) // sh for j in jh]),
                             (pw, [(pw + j) // sw for j in jw])))
    w_phases = jnp.stack(mats, 0).astype(jnp.bfloat16)
    return w_phases, meta


# -------------------------------- Decoder ------------------------------------

def make_decoder(n_hiddens, n_res_layers, upsample, key):
    C = n_hiddens
    n_head = 2
    dk = C // n_head
    keys = iter(jax.random.split(key, 4096))

    def nrm(shape, std):
        return jax.random.normal(next(keys), shape, jnp.float32) * std

    res_blocks = []
    for _ in range(n_res_layers):
        qkv_cols, wo_rows = [], []
        bo_sum = jnp.zeros((1, C), jnp.float32)
        for _ in range(3):                 # attn_w, attn_h, attn_t
            wq = nrm((C, C), 1.0 / np.sqrt(C)) * (1.0 / np.sqrt(dk))
            wk = nrm((C, C), 1.0 / np.sqrt(C))
            wv = nrm((C, C), 1.0 / np.sqrt(C))
            wo = nrm((C, C), 1.0 / np.sqrt(C))          # n_layer = 1
            bo = nrm((1, C), 0.02)
            qkv_cols.append(jnp.concatenate([wq, wk, wv], axis=1))
            wo_rows.append(wo)
            bo_sum = bo_sum + bo
        conv1_w = nrm((C // 2, C, 3, 3, 3), 1.0 / np.sqrt(C * 27))
        conv2_w = nrm((C, C // 2, 1, 1, 1), 1.0 / np.sqrt(C // 2))
        res_blocks.append(dict(
            bn1_g=jnp.ones((1, C)), bn1_b=jnp.zeros((1, C)),
            conv1_w=_pack_conv_weight(conv1_w),
            bn2_g=jnp.ones((1, C // 2)), bn2_b=jnp.zeros((1, C // 2)),
            bn3_g=jnp.ones((1, C)), bn3_b=jnp.zeros((1, C)),
            conv2_w=_pack_conv_weight(conv2_w),
            w_qkv=jnp.concatenate(qkv_cols, axis=1).astype(jnp.bfloat16),
            w_out=jnp.concatenate(wo_rows, axis=0).astype(jnp.bfloat16),
            bo=bo_sum,
        ))

    n_times = [int(math.log2(d)) for d in upsample]
    max_us = max(n_times)
    convts, convt_meta = [], []
    nt = list(n_times)
    for i in range(max_us):
        out_c = 3 if i == max_us - 1 else C
        stride = tuple(2 if d > 0 else 1 for d in nt)
        w = nrm((C, out_c, 4, 4, 4), 1.0 / np.sqrt(C * 64))
        b = nrm((1, out_c), 0.02)
        w_phases, meta = _pack_convt_weight(w, stride)
        convts.append(dict(w_phases=w_phases, bias=b))
        convt_meta.append((stride, meta))
        nt = [d - 1 for d in nt]

    params = dict(res_blocks=res_blocks,
                  bn_final_g=jnp.ones((1, C)), bn_final_b=jnp.zeros((1, C)),
                  convts=convts)

    def forward(params, x_ncdhw):
        h = jnp.transpose(x_ncdhw, (0, 2, 3, 4, 1))     # NCDHW -> NDHWC
        for bp in params['res_blocks']:
            h = attention_residual_block(h, bp, n_head)
        h = batchnorm_relu(h, params['bn_final_g'], params['bn_final_b'])
        n_ct = len(params['convts'])
        for i, (cp, (stride, meta)) in enumerate(zip(params['convts'],
                                                     convt_meta)):
            h = same_pad_conv_transpose3d(h, cp['w_phases'], cp['bias'],
                                          stride, meta,
                                          relu=(i < n_ct - 1))
        return jnp.transpose(h, (0, 4, 1, 2, 3))        # back to NCDHW

    # TODO(synk): decode_step / KV-cache incremental decoding paths and the
    # FullAttention / SparseAttention branches are never reached by
    # Decoder.forward and are omitted; attention dropout is p=0.0 (identity).
    return params, jax.jit(forward)


if __name__ == "__main__":
    key = jax.random.PRNGKey(0)
    pkey, xkey = jax.random.split(key)

    n_hiddens, n_res_layers, upsample = 32, 2, (2, 2, 2)
    params, forward = make_decoder(n_hiddens, n_res_layers, upsample, pkey)

    # input: [N, C, T, H, W] = [2, 32, 4, 4, 4] -> output [2, 3, 8, 8, 8]
    x = jax.random.normal(xkey, (2, n_hiddens, 4, 4, 4), jnp.float32)

    out = jax.block_until_ready(forward(params, x))

    assert out.shape == (2, 3, 8, 8, 8), out.shape
    assert bool(jnp.all(jnp.isfinite(out)))
    print("KERNEL_OK")
</pallas_src>

<mosaic_0001>
module attributes {stable_mosaic.version = 11 : i64} {
  func.func @_bn_relu_kernel(%arg0: i32, %arg1: memref<32x128xf32, #tpu.memory_space<vmem>>, %arg2: memref<1x128xf32, #tpu.memory_space<vmem>>, %arg3: memref<1x128xf32, #tpu.memory_space<vmem>>, %arg4: memref<128x128xf32, #tpu.memory_space<vmem>>, %arg5: memref<32x128xf32, #tpu.memory_space<vmem>>) attributes {dimension_semantics = [#tpu.dimension_semantics<arbitrary>], iteration_bounds = array<i64: 1>, scalar_prefetch = 0 : i64, scratch_operands = 0 : i64, tpu.core_type = #tpu.core_type<tc>, window_params = [{pipeline_mode = #tpu.pipeline_mode<synchronous>, transform_indices = @transform_0, window_bounds = array<i64: 32, 128>}, {pipeline_mode = #tpu.pipeline_mode<synchronous>, transform_indices = @transform_1, window_bounds = array<i64: 1, 128>}, {pipeline_mode = #tpu.pipeline_mode<synchronous>, transform_indices = @transform_2, window_bounds = array<i64: 1, 128>}, {pipeline_mode = #tpu.pipeline_mode<synchronous>, transform_indices = @transform_3, window_bounds = array<i64: 128, 128>}, {pipeline_mode = #tpu.pipeline_mode<synchronous>, transform_indices = @transform_4, window_bounds = array<i64: 32, 128>}]} {
    %c0 = arith.constant 0 : index
    %c0_0 = arith.constant 0 : index
    %0 = vector.load %arg1[%c0, %c0_0] : memref<32x128xf32, #tpu.memory_space<vmem>>, vector<32x128xf32>
    %cst = arith.constant dense<0.000000e+00> : vector<128xf32>
    %1 = vector.multi_reduction <add>, %0, %cst [0] : vector<32x128xf32> to vector<128xf32>
    %2 = vector.shape_cast %1 : vector<128xf32> to vector<1x128xf32>
    %3 = arith.mulf %0, %0 : vector<32x128xf32>
    %cst_1 = arith.constant dense<0.000000e+00> : vector<128xf32>
    %4 = vector.multi_reduction <add>, %3, %cst_1 [0] : vector<32x128xf32> to vector<128xf32>
    %5 = vector.shape_cast %4 : vector<128xf32> to vector<1x128xf32>
    %c0_2 = arith.constant 0 : index
    %c0_3 = arith.constant 0 : index
    %6 = vector.load %arg4[%c0_2, %c0_3] : memref<128x128xf32, #tpu.memory_space<vmem>>, vector<128x128xf32>
    %cst_4 = arith.constant dense<0.000000e+00> : vector<1x128xf32>
    %7 = tpu.matmul %2, %6, %cst_4 {dimension_numbers = #tpu.dot_dimension_numbers<[1], [0], [0], [1], [0, 0, 1, 1], [], []>} : vector<1x128xf32>, vector<128x128xf32>, vector<1x128xf32> -> vector<1x128xf32>
    %cst_5 = arith.constant dense<0.000000e+00> : vector<1x128xf32>
    %8 = tpu.matmul %5, %6, %cst_5 {dimension_numbers = #tpu.dot_dimension_numbers<[1], [0], [0], [1], [0, 0, 1, 1], [], []>} : vector<1x128xf32>, vector<128x128xf32>, vector<1x128xf32> -> vector<1x128xf32>
    %cst_6 = arith.constant 1.280000e+02 : f32
    %9 = vector.broadcast %cst_6 : f32 to vector<1x128xf32>
    %10 = arith.divf %7, %9 : vector<1x128xf32>
    %cst_7 = arith.constant 1.280000e+02 : f32
    %11 = vector.broadcast %cst_7 : f32 to vector<1x128xf32>
    %12 = arith.divf %8, %11 : vector<1x128xf32>
    %13 = arith.mulf %10, %10 : vector<1x128xf32>
    %14 = arith.subf %12, %13 : vector<1x128xf32>
    %cst_8 = arith.constant 0.000000e+00 : f32
    %15 = vector.broadcast %cst_8 : f32 to vector<1x128xf32>
    %16 = arith.maximumf %14, %15 : vector<1x128xf32>
    %cst_9 = arith.constant 9.99999974E-6 : f32
    %17 = vector.broadcast %cst_9 : f32 to vector<1x128xf32>
    %18 = arith.addf %16, %17 : vector<1x128xf32>
    %19 = math.rsqrt %18 : vector<1x128xf32>
    %c0_10 = arith.constant 0 : index
    %c0_11 = arith.constant 0 : index
    %20 = vector.load %arg2[%c0_10, %c0_11] : memref<1x128xf32, #tpu.memory_space<vmem>>, vector<1x128xf32>
    %21 = arith.mulf %19, %20 : vector<1x128xf32>
    %c0_12 = arith.constant 0 : index
    %c0_13 = arith.constant 0 : index
    %22 = vector.load %arg3[%c0_12, %c0_13] : memref<1x128xf32, #tpu.memory_space<vmem>>, vector<1x128xf32>
    %23 = arith.mulf %10, %21 : vector<1x128xf32>
    %24 = arith.subf %22, %23 : vector<1x128xf32>
    %25 = vector.broadcast %21 : vector<1x128xf32> to vector<32x128xf32>
    %26 = arith.mulf %0, %25 : vector<32x128xf32>
    %27 = vector.broadcast %24 : vector<1x128xf32> to vector<32x128xf32>
    %28 = arith.addf %26, %27 : vector<32x128xf32>
    %cst_14 = arith.constant 0.000000e+00 : f32
    %29 = vector.broadcast %cst_14 : f32 to vector<32x128xf32>
    %30 = arith.maximumf %28, %29 : vector<32x128xf32>
    %c0_15 = arith.constant 0 : index
    %c0_16 = arith.constant 0 : index
    %31 = vector.load %arg5[%c0_15, %c0_16] : memref<32x128xf32, #tpu.memory_space<vmem>>, vector<32x128xf32>
    tpu.vector_store %arg5[%c0_15, %c0_16], %30 {strides = array<i32>} : memref<32x128xf32, #tpu.memory_space<vmem>>, vector<32x128xf32>,
    return
  }
  func.func @transform_0(%arg0: i32) -> (i32, i32) {
    %c0_i32 = arith.constant 0 : i32
    %c0_i32_0 = arith.constant 0 : i32
    %c0_i32_1 = arith.constant 0 : i32
    return %c0_i32, %c0_i32_0 : i32, i32
  }
  func.func @transform_1(%arg0: i32) -> (i32, i32) {
    %c0_i32 = arith.constant 0 : i32
    %c0_i32_0 = arith.constant 0 : i32
    %c0_i32_1 = arith.constant 0 : i32
    return %c0_i32, %c0_i32_0 : i32, i32
  }
  func.func @transform_2(%arg0: i32) -> (i32, i32) {
    %c0_i32 = arith.constant 0 : i32
    %c0_i32_0 = arith.constant 0 : i32
    %c0_i32_1 = arith.constant 0 : i32
    return %c0_i32, %c0_i32_0 : i32, i32
  }
  func.func @transform_3(%arg0: i32) -> (i32, i32) {
    %c0_i32 = arith.constant 0 : i32
    %c0_i32_0 = arith.constant 0 : i32
    %c0_i32_1 = arith.constant 0 : i32
    return %c0_i32, %c0_i32_0 : i32, i32
  }
  func.func @transform_4(%arg0: i32) -> (i32, i32) {
    %c0_i32 = arith.constant 0 : i32
    %c0_i32_0 = arith.constant 0 : i32
    %c0_i32_1 = arith.constant 0 : i32
    return %c0_i32, %c0_i32_0 : i32, i32
  }
}

module attributes {stable_mosaic.version = 11 : i64} {
  func.func @kernel(%arg0: i32, %arg1: i32, %arg2: memref<128x864xbf16, #tpu.memory_space<vmem>>, %arg3: memref<864x16xbf16, #tpu.memory_space<vmem>>, %arg4: memref<128x16xf32, #tpu.memory_space<vmem>>) attributes {dimension_semantics = [#tpu.dimension_semantics<parallel>, #tpu.dimension_semantics<parallel>], iteration_bounds = array<i64: 1, 1>, scalar_prefetch = 0 : i64, scratch_operands = 0 : i64, tpu.core_type = #tpu.core_type<tc>, window_params = [{transform_indices = @transform_0, window_bounds = array<i64: 128, 864>}, {transform_indices = @transform_1, window_bounds = array<i64: 864, 16>}, {transform_indices = @transform_2, window_bounds = array<i64: 128, 16>}]} {
    %c0 = arith.constant 0 : index
    %c0_0 = arith.constant 0 : index
    %0 = vector.load %arg2[%c0, %c0_0] : memref<128x864xbf16, #tpu.memory_space<vmem>>, vector<128x864xbf16>
    %c0_1 = arith.constant 0 : index
    %c0_2 = arith.constant 0 : index
    %1 = vector.load %arg3[%c0_1, %c0_2] : memref<864x16xbf16, #tpu.memory_space<vmem>>, vector<864x16xbf16>
    %cst = arith.constant dense<0.000000e+00> : vector<128x16xf32>
    %2 = tpu.matmul %0, %1, %cst {dimension_numbers = #tpu.dot_dimension_numbers<[1], [0], [0], [1], [0, 0, 1, 1], [], []>} : vector<128x864xbf16>, vector<864x16xbf16>, vector<128x16xf32> -> vector<128x16xf32>
    %c0_3 = arith.constant 0 : index
    %c0_4 = arith.constant 0 : index
    %3 = vector.load %arg4[%c0_3, %c0_4] : memref<128x16xf32, #tpu.memory_space<vmem>>, vector<128x16xf32>
    tpu.vector_store %arg4[%c0_3, %c0_4], %2 {strides = array<i32>} : memref<128x16xf32, #tpu.memory_space<vmem>>, vector<128x16xf32>,
    return
  }
  func.func @transform_0(%arg0: i32, %arg1: i32) -> (i32, i32) {
    %c0_i32 = arith.constant 0 : i32
    %c0_i32_0 = arith.constant 0 : i32
    return %arg0, %c0_i32 : i32, i32
  }
  func.func @transform_1(%arg0: i32, %arg1: i32) -> (i32, i32) {
    %c0_i32 = arith.constant 0 : i32
    %c0_i32_0 = arith.constant 0 : i32
    return %c0_i32, %arg1 : i32, i32
  }
  func.func @transform_2(%arg0: i32, %arg1: i32) -> (i32, i32) {
    %c0_i32 = arith.constant 0 : i32
    return %arg0, %arg1 : i32, i32
  }
}

module attributes {stable_mosaic.version = 11 : i64} {
  func.func @_bn_relu_kernel(%arg0: i32, %arg1: memref<16x128xf32, #tpu.memory_space<vmem>>, %arg2: memref<1x128xf32, #tpu.memory_space<vmem>>, %arg3: memref<1x128xf32, #tpu.memory_space<vmem>>, %arg4: memref<128x128xf32, #tpu.memory_space<vmem>>, %arg5: memref<16x128xf32, #tpu.memory_space<vmem>>) attributes {dimension_semantics = [#tpu.dimension_semantics<arbitrary>], iteration_bounds = array<i64: 1>, scalar_prefetch = 0 : i64, scratch_operands = 0 : i64, tpu.core_type = #tpu.core_type<tc>, window_params = [{pipeline_mode = #tpu.pipeline_mode<synchronous>, transform_indices = @transform_0, window_bounds = array<i64: 16, 128>}, {pipeline_mode = #tpu.pipeline_mode<synchronous>, transform_indices = @transform_1, window_bounds = array<i64: 1, 128>}, {pipeline_mode = #tpu.pipeline_mode<synchronous>, transform_indices = @transform_2, window_bounds = array<i64: 1, 128>}, {pipeline_mode = #tpu.pipeline_mode<synchronous>, transform_indices = @transform_3, window_bounds = array<i64: 128, 128>}, {pipeline_mode = #tpu.pipeline_mode<synchronous>, transform_indices = @transform_4, window_bounds = array<i64: 16, 128>}]} {
    %c0 = arith.constant 0 : index
    %c0_0 = arith.constant 0 : index
    %0 = vector.load %arg1[%c0, %c0_0] : memref<16x128xf32, #tpu.memory_space<vmem>>, vector<16x128xf32>
    %cst = arith.constant dense<0.000000e+00> : vector<128xf32>
    %1 = vector.multi_reduction <add>, %0, %cst [0] : vector<16x128xf32> to vector<128xf32>
    %2 = vector.shape_cast %1 : vector<128xf32> to vector<1x128xf32>
    %3 = arith.mulf %0, %0 : vector<16x128xf32>
    %cst_1 = arith.constant dense<0.000000e+00> : vector<128xf32>
    %4 = vector.multi_reduction <add>, %3, %cst_1 [0] : vector<16x128xf32> to vector<128xf32>
    %5 = vector.shape_cast %4 : vector<128xf32> to vector<1x128xf32>
    %c0_2 = arith.constant 0 : index
    %c0_3 = arith.constant 0 : index
    %6 = vector.load %arg4[%c0_2, %c0_3] : memref<128x128xf32, #tpu.memory_space<vmem>>, vector<128x128xf32>
    %cst_4 = arith.constant dense<0.000000e+00> : vector<1x128xf32>
    %7 = tpu.matmul %2, %6, %cst_4 {dimension_numbers = #tpu.dot_dimension_numbers<[1], [0], [0], [1], [0, 0, 1, 1], [], []>} : vector<1x128xf32>, vector<128x128xf32>, vector<1x128xf32> -> vector<1x128xf32>
    %cst_5 = arith.constant dense<0.000000e+00> : vector<1x128xf32>
    %8 = tpu.matmul %5, %6, %cst_5 {dimension_numbers = #tpu.dot_dimension_numbers<[1], [0], [0], [1], [0, 0, 1, 1], [], []>} : vector<1x128xf32>, vector<128x128xf32>, vector<1x128xf32> -> vector<1x128xf32>
    %cst_6 = arith.constant 1.280000e+02 : f32
    %9 = vector.broadcast %cst_6 : f32 to vector<1x128xf32>
    %10 = arith.divf %7, %9 : vector<1x128xf32>
    %cst_7 = arith.constant 1.280000e+02 : f32
    %11 = vector.broadcast %cst_7 : f32 to vector<1x128xf32>
    %12 = arith.divf %8, %11 : vector<1x128xf32>
    %13 = arith.mulf %10, %10 : vector<1x128xf32>
    %14 = arith.subf %12, %13 : vector<1x128xf32>
    %cst_8 = arith.constant 0.000000e+00 : f32
    %15 = vector.broadcast %cst_8 : f32 to vector<1x128xf32>
    %16 = arith.maximumf %14, %15 : vector<1x128xf32>
    %cst_9 = arith.constant 9.99999974E-6 : f32
    %17 = vector.broadcast %cst_9 : f32 to vector<1x128xf32>
    %18 = arith.addf %16, %17 : vector<1x128xf32>
    %19 = math.rsqrt %18 : vector<1x128xf32>
    %c0_10 = arith.constant 0 : index
    %c0_11 = arith.constant 0 : index
    %20 = vector.load %arg2[%c0_10, %c0_11] : memref<1x128xf32, #tpu.memory_space<vmem>>, vector<1x128xf32>
    %21 = arith.mulf %19, %20 : vector<1x128xf32>
    %c0_12 = arith.constant 0 : index
    %c0_13 = arith.constant 0 : index
    %22 = vector.load %arg3[%c0_12, %c0_13] : memref<1x128xf32, #tpu.memory_space<vmem>>, vector<1x128xf32>
    %23 = arith.mulf %10, %21 : vector<1x128xf32>
    %24 = arith.subf %22, %23 : vector<1x128xf32>
    %25 = vector.broadcast %21 : vector<1x128xf32> to vector<16x128xf32>
    %26 = arith.mulf %0, %25 : vector<16x128xf32>
    %27 = vector.broadcast %24 : vector<1x128xf32> to vector<16x128xf32>
    %28 = arith.addf %26, %27 : vector<16x128xf32>
    %cst_14 = arith.constant 0.000000e+00 : f32
    %29 = vector.broadcast %cst_14 : f32 to vector<16x128xf32>
    %30 = arith.maximumf %28, %29 : vector<16x128xf32>
    %c0_15 = arith.constant 0 : index
    %c0_16 = arith.constant 0 : index
    %31 = vector.load %arg5[%c0_15, %c0_16] : memref<16x128xf32, #tpu.memory_space<vmem>>, vector<16x128xf32>
    tpu.vector_store %arg5[%c0_15, %c0_16], %30 {strides = array<i32>} : memref<16x128xf32, #tpu.memory_space<vmem>>, vector<16x128xf32>,
    return
  }
  func.func @transform_0(%arg0: i32) -> (i32, i32) {
    %c0_i32 = arith.constant 0 : i32
    %c0_i32_0 = arith.constant 0 : i32
    %c0_i32_1 = arith.constant 0 : i32
    return %c0_i32, %c0_i32_0 : i32, i32
  }
  func.func @transform_1(%arg0: i32) -> (i32, i32) {
    %c0_i32 = arith.constant 0 : i32
    %c0_i32_0 = arith.constant 0 : i32
    %c0_i32_1 = arith.constant 0 : i32
    return %c0_i32, %c0_i32_0 : i32, i32
  }
  func.func @transform_2(%arg0: i32) -> (i32, i32) {
    %c0_i32 = arith.constant 0 : i32
    %c0_i32_0 = arith.constant 0 : i32
    %c0_i32_1 = arith.constant 0 : i32
    return %c0_i32, %c0_i32_0 : i32, i32
  }
  func.func @transform_3(%arg0: i32) -> (i32, i32) {
    %c0_i32 = arith.constant 0 : i32
    %c0_i32_0 = arith.constant 0 : i32
    %c0_i32_1 = arith.constant 0 : i32
    return %c0_i32, %c0_i32_0 : i32, i32
  }
  func.func @transform_4(%arg0: i32) -> (i32, i32) {
    %c0_i32 = arith.constant 0 : i32
    %c0_i32_0 = arith.constant 0 : i32
    %c0_i32_1 = arith.constant 0 : i32
    return %c0_i32, %c0_i32_0 : i32, i32
  }
}

module attributes {stable_mosaic.version = 11 : i64} {
  func.func @kernel(%arg0: i32, %arg1: i32, %arg2: memref<128x16xbf16, #tpu.memory_space<vmem>>, %arg3: memref<16x32xbf16, #tpu.memory_space<vmem>>, %arg4: memref<128x32xf32, #tpu.memory_space<vmem>>) attributes {dimension_semantics = [#tpu.dimension_semantics<parallel>, #tpu.dimension_semantics<parallel>], iteration_bounds = array<i64: 1, 1>, scalar_prefetch = 0 : i64, scratch_operands = 0 : i64, tpu.core_type = #tpu.core_type<tc>, window_params = [{transform_indices = @transform_0, window_bounds = array<i64: 128, 16>}, {transform_indices = @transform_1, window_bounds = array<i64: 16, 32>}, {transform_indices = @transform_2, window_bounds = array<i64: 128, 32>}]} {
    %c0 = arith.constant 0 : index
    %c0_0 = arith.constant 0 : index
    %0 = vector.load %arg2[%c0, %c0_0] : memref<128x16xbf16, #tpu.memory_space<vmem>>, vector<128x16xbf16>
    %c0_1 = arith.constant 0 : index
    %c0_2 = arith.constant 0 : index
    %1 = vector.load %arg3[%c0_1, %c0_2] : memref<16x32xbf16, #tpu.memory_space<vmem>>, vector<16x32xbf16>
    %cst = arith.constant dense<0.000000e+00> : vector<128x32xf32>
    %2 = tpu.matmul %0, %1, %cst {dimension_numbers = #tpu.dot_dimension_numbers<[1], [0], [0], [1], [0, 0, 1, 1], [], []>} : vector<128x16xbf16>, vector<16x32xbf16>, vector<128x32xf32> -> vector<128x32xf32>
    %c0_3 = arith.constant 0 : index
    %c0_4 = arith.constant 0 : index
    %3 = vector.load %arg4[%c0_3, %c0_4] : memref<128x32xf32, #tpu.memory_space<vmem>>, vector<128x32xf32>
    tpu.vector_store %arg4[%c0_3, %c0_4], %2 {strides = array<i32>} : memref<128x32xf32, #tpu.memory_space<vmem>>, vector<128x32xf32>,
    return
  }
  func.func @transform_0(%arg0: i32, %arg1: i32) -> (i32, i32) {
    %c0_i32 = arith.constant 0 : i32
    %c0_i32_0 = arith.constant 0 : i32
    return %arg0, %c0_i32 : i32, i32
  }
  func.func @transform_1(%arg0: i32, %arg1: i32) -> (i32, i32) {
    %c0_i32 = arith.constant 0 : i32
    %c0_i32_0 = arith.constant 0 : i32
    return %c0_i32, %arg1 : i32, i32
  }
  func.func @transform_2(%arg0: i32, %arg1: i32) -> (i32, i32) {
    %c0_i32 = arith.constant 0 : i32
    return %arg0, %arg1 : i32, i32
  }
}

module attributes {stable_mosaic.version = 11 : i64} {
  func.func @kernel(%arg0: i32, %arg1: i32, %arg2: memref<128x32xbf16, #tpu.memory_space<vmem>>, %arg3: memref<32x288xbf16, #tpu.memory_space<vmem>>, %arg4: memref<128x288xf32, #tpu.memory_space<vmem>>) attributes {dimension_semantics = [#tpu.dimension_semantics<parallel>, #tpu.dimension_semantics<parallel>], iteration_bounds = array<i64: 1, 1>, scalar_prefetch = 0 : i64, scratch_operands = 0 : i64, tpu.core_type = #tpu.core_type<tc>, window_params = [{transform_indices = @transform_0, window_bounds = array<i64: 128, 32>}, {transform_indices = @transform_1, window_bounds = array<i64: 32, 288>}, {transform_indices = @transform_2, window_bounds = array<i64: 128, 288>}]} {
    %c0 = arith.constant 0 : index
    %c0_0 = arith.constant 0 : index
    %0 = vector.load %arg2[%c0, %c0_0] : memref<128x32xbf16, #tpu.memory_space<vmem>>, vector<128x32xbf16>
    %c0_1 = arith.constant 0 : index
    %c0_2 = arith.constant 0 : index
    %1 = vector.load %arg3[%c0_1, %c0_2] : memref<32x288xbf16, #tpu.memory_space<vmem>>, vector<32x288xbf16>
    %cst = arith.constant dense<0.000000e+00> : vector<128x288xf32>
    %2 = tpu.matmul %0, %1, %cst {dimension_numbers = #tpu.dot_dimension_numbers<[1], [0], [0], [1], [0, 0, 1, 1], [], []>} : vector<128x32xbf16>, vector<32x288xbf16>, vector<128x288xf32> -> vector<128x288xf32>
    %c0_3 = arith.constant 0 : index
    %c0_4 = arith.constant 0 : index
    %3 = vector.load %arg4[%c0_3, %c0_4] : memref<128x288xf32, #tpu.memory_space<vmem>>, vector<128x288xf32>
    tpu.vector_store %arg4[%c0_3, %c0_4], %2 {strides = array<i32>} : memref<128x288xf32, #tpu.memory_space<vmem>>, vector<128x288xf32>,
    return
  }
  func.func @transform_0(%arg0: i32, %arg1: i32) -> (i32, i32) {
    %c0_i32 = arith.constant 0 : i32
    %c0_i32_0 = arith.constant 0 : i32
    return %arg0, %c0_i32 : i32, i32
  }
  func.func @transform_1(%arg0: i32, %arg1: i32) -> (i32, i32) {
    %c0_i32 = arith.constant 0 : i32
    %c0_i32_0 = arith.constant 0 : i32
    return %c0_i32, %arg1 : i32, i32
  }
  func.func @transform_2(%arg0: i32, %arg1: i32) -> (i32, i32) {
    %c0_i32 = arith.constant 0 : i32
    return %arg0, %arg1 : i32, i32
  }
}

module attributes {stable_mosaic.version = 11 : i64} {
  func.func @_attn_kernel(%arg0: i32, %arg1: memref<4x16x128xf32, #tpu.memory_space<vmem>>, %arg2: memref<4x16x128xf32, #tpu.memory_space<vmem>>, %arg3: memref<4x16x128xf32, #tpu.memory_space<vmem>>, %arg4: memref<4x16x128xf32, #tpu.memory_space<vmem>>) attributes {dimension_semantics = [#tpu.dimension_semantics<parallel>], iteration_bounds = array<i64: 2>, scalar_prefetch = 0 : i64, scratch_operands = 0 : i64, tpu.core_type = #tpu.core_type<tc>, window_params = [{transform_indices = @transform_0, window_bounds = array<i64: 4, 16, 128>}, {transform_indices = @transform_1, window_bounds = array<i64: 4, 16, 128>}, {transform_indices = @transform_2, window_bounds = array<i64: 4, 16, 128>}, {transform_indices = @transform_3, window_bounds = array<i64: 4, 16, 128>}]} {
    %c0 = arith.constant 0 : index
    %c0_0 = arith.constant 0 : index
    %c0_1 = arith.constant 0 : index
    %0 = vector.load %arg1[%c0, %c0_0, %c0_1] : memref<4x16x128xf32, #tpu.memory_space<vmem>>, vector<4x16x128xf32>
    %c0_2 = arith.constant 0 : index
    %c0_3 = arith.constant 0 : index
    %c0_4 = arith.constant 0 : index
    %1 = vector.load %arg2[%c0_2, %c0_3, %c0_4] : memref<4x16x128xf32, #tpu.memory_space<vmem>>, vector<4x16x128xf32>
    %c0_5 = arith.constant 0 : index
    %c0_6 = arith.constant 0 : index
    %c0_7 = arith.constant 0 : index
    %2 = vector.load %arg3[%c0_5, %c0_6, %c0_7] : memref<4x16x128xf32, #tpu.memory_space<vmem>>, vector<4x16x128xf32>
    %3 = vector.shape_cast %0 : vector<4x16x128xf32> to vector<4x1x16x128xf32>
    %4 = vector.shape_cast %1 : vector<4x16x128xf32> to vector<1x4x16x128xf32>
    %5 = vector.broadcast %3 : vector<4x1x16x128xf32> to vector<4x4x16x128xf32>
    %6 = vector.broadcast %4 : vector<1x4x16x128xf32> to vector<4x4x16x128xf32>
    %7 = arith.mulf %5, %6 : vector<4x4x16x128xf32>
    %cst = arith.constant dense<0.000000e+00> : vector<4x4x128xf32>
    %8 = vector.multi_reduction <add>, %7, %cst [2] : vector<4x4x16x128xf32> to vector<4x4x128xf32>
    %cst_8 = arith.constant dense<0xFF800000> : vector<4x128xf32>
    %9 = vector.multi_reduction <maximumf>, %8, %cst_8 [1] : vector<4x4x128xf32> to vector<4x128xf32>
    %10 = vector.shape_cast %9 : vector<4x128xf32> to vector<4x1x128xf32>
    %11 = vector.broadcast %10 : vector<4x1x128xf32> to vector<4x4x128xf32>
    %12 = arith.subf %8, %11 : vector<4x4x128xf32>
    %13 = math.exp %12 : vector<4x4x128xf32>
    %cst_9 = arith.constant dense<0.000000e+00> : vector<4x128xf32>
    %14 = vector.multi_reduction <add>, %13, %cst_9 [1] : vector<4x4x128xf32> to vector<4x128xf32>
    %15 = vector.shape_cast %14 : vector<4x128xf32> to vector<4x1x128xf32>
    %16 = tpu.reciprocal %15 {approx = true} : vector<4x1x128xf32> -> vector<4x1x128xf32>
    %17 = vector.broadcast %16 : vector<4x1x128xf32> to vector<4x4x128xf32>
    %18 = arith.mulf %13, %17 : vector<4x4x128xf32>
    %19 = vector.shape_cast %18 : vector<4x4x128xf32> to vector<4x4x1x128xf32>
    %20 = vector.shape_cast %2 : vector<4x16x128xf32> to vector<1x4x16x128xf32>
    %21 = vector.broadcast %19 : vector<4x4x1x128xf32> to vector<4x4x16x128xf32>
    %22 = vector.broadcast %20 : vector<1x4x16x128xf32> to vector<4x4x16x128xf32>
    %23 = arith.mulf %21, %22 : vector<4x4x16x128xf32>
    %cst_10 = arith.constant dense<0.000000e+00> : vector<4x16x128xf32>
    %24 = vector.multi_reduction <add>, %23, %cst_10 [1] : vector<4x4x16x128xf32> to vector<4x16x128xf32>
    %c0_11 = arith.constant 0 : index
    %c0_12 = arith.constant 0 : index
    %c0_13 = arith.constant 0 : index
    %25 = vector.load %arg4[%c0_11, %c0_12, %c0_13] : memref<4x16x128xf32, #tpu.memory_space<vmem>>, vector<4x16x128xf32>
    tpu.vector_store %arg4[%c0_11, %c0_12, %c0_13], %24 {strides = array<i32>} : memref<4x16x128xf32, #tpu.memory_space<vmem>>, vector<4x16x128xf32>,
    return
  }
  func.func @transform_0(%arg0: i32) -> (i32, i32, i32) {
    %c0_i32 = arith.constant 0 : i32
    %c0_i32_0 = arith.constant 0 : i32
    %c0_i32_1 = arith.constant 0 : i32
    return %c0_i32, %c0_i32_0, %arg0 : i32, i32, i32
  }
  func.func @transform_1(%arg0: i32) -> (i32, i32, i32) {
    %c0_i32 = arith.constant 0 : i32
    %c0_i32_0 = arith.constant 0 : i32
    %c0_i32_1 = arith.constant 0 : i32
    return %c0_i32, %c0_i32_0, %arg0 : i32, i32, i32
  }
  func.func @transform_2(%arg0: i32) -> (i32, i32, i32) {
    %c0_i32 = arith.constant 0 : i32
    %c0_i32_0 = arith.constant 0 : i32
    %c0_i32_1 = arith.constant 0 : i32
    return %c0_i32, %c0_i32_0, %arg0 : i32, i32, i32
  }
  func.func @transform_3(%arg0: i32) -> (i32, i32, i32) {
    %c0_i32 = arith.constant 0 : i32
    %c0_i32_0 = arith.constant 0 : i32
    %c0_i32_1 = arith.constant 0 : i32
    return %c0_i32, %c0_i32_0, %arg0 : i32, i32, i32
  }
}

module attributes {stable_mosaic.version = 11 : i64} {
  func.func @kernel(%arg0: i32, %arg1: i32, %arg2: memref<128x96xbf16, #tpu.memory_space<vmem>>, %arg3: memref<96x32xbf16, #tpu.memory_space<vmem>>, %arg4: memref<1x32xf32, #tpu.memory_space<vmem>>, %arg5: memref<128x32xf32, #tpu.memory_space<vmem>>, %arg6: memref<128x32xf32, #tpu.memory_space<vmem>>) attributes {dimension_semantics = [#tpu.dimension_semantics<parallel>, #tpu.dimension_semantics<parallel>], iteration_bounds = array<i64: 1, 1>, scalar_prefetch = 0 : i64, scratch_operands = 0 : i64, tpu.core_type = #tpu.core_type<tc>, window_params = [{transform_indices = @transform_0, window_bounds = array<i64: 128, 96>}, {transform_indices = @transform_1, window_bounds = array<i64: 96, 32>}, {transform_indices = @transform_2, window_bounds = array<i64: 1, 32>}, {transform_indices = @transform_3, window_bounds = array<i64: 128, 32>}, {transform_indices = @transform_4, window_bounds = array<i64: 128, 32>}]} {
    %c0 = arith.constant 0 : index
    %c0_0 = arith.constant 0 : index
    %0 = vector.load %arg2[%c0, %c0_0] : memref<128x96xbf16, #tpu.memory_space<vmem>>, vector<128x96xbf16>
    %c0_1 = arith.constant 0 : index
    %c0_2 = arith.constant 0 : index
    %1 = vector.load %arg3[%c0_1, %c0_2] : memref<96x32xbf16, #tpu.memory_space<vmem>>, vector<96x32xbf16>
    %cst = arith.constant dense<0.000000e+00> : vector<128x32xf32>
    %2 = tpu.matmul %0, %1, %cst {dimension_numbers = #tpu.dot_dimension_numbers<[1], [0], [0], [1], [0, 0, 1, 1], [], []>} : vector<128x96xbf16>, vector<96x32xbf16>, vector<128x32xf32> -> vector<128x32xf32>
    %c0_3 = arith.constant 0 : index
    %c0_4 = arith.constant 0 : index
    %3 = vector.load %arg4[%c0_3, %c0_4] : memref<1x32xf32, #tpu.memory_space<vmem>>, vector<1x32xf32>
    %4 = vector.broadcast %3 : vector<1x32xf32> to vector<128x32xf32>
    %5 = arith.addf %2, %4 : vector<128x32xf32>
    %c0_5 = arith.constant 0 : index
    %c0_6 = arith.constant 0 : index
    %6 = vector.load %arg5[%c0_5, %c0_6] : memref<128x32xf32, #tpu.memory_space<vmem>>, vector<128x32xf32>
    %7 = arith.addf %5, %6 : vector<128x32xf32>
    %c0_7 = arith.constant 0 : index
    %c0_8 = arith.constant 0 : index
    %8 = vector.load %arg6[%c0_7, %c0_8] : memref<128x32xf32, #tpu.memory_space<vmem>>, vector<128x32xf32>
    tpu.vector_store %arg6[%c0_7, %c0_8], %7 {strides = array<i32>} : memref<128x32xf32, #tpu.memory_space<vmem>>, vector<128x32xf32>,
    return
  }
  func.func @transform_0(%arg0: i32, %arg1: i32) -> (i32, i32) {
    %c0_i32 = arith.constant 0 : i32
    %c0_i32_0 = arith.constant 0 : i32
    return %arg0, %c0_i32 : i32, i32
  }
  func.func @transform_1(%arg0: i32, %arg1: i32) -> (i32, i32) {
    %c0_i32 = arith.constant 0 : i32
    %c0_i32_0 = arith.constant 0 : i32
    return %c0_i32, %arg1 : i32, i32
  }
  func.func @transform_2(%arg0: i32, %arg1: i32) -> (i32, i32) {
    %c0_i32 = arith.constant 0 : i32
    %c0_i32_0 = arith.constant 0 : i32
    return %c0_i32, %arg1 : i32, i32
  }
  func.func @transform_3(%arg0: i32, %arg1: i32) -> (i32, i32) {
    %c0_i32 = arith.constant 0 : i32
    return %arg0, %arg1 : i32, i32
  }
  func.func @transform_4(%arg0: i32, %arg1: i32) -> (i32, i32) {
    %c0_i32 = arith.constant 0 : i32
    return %arg0, %arg1 : i32, i32
  }
}

module attributes {stable_mosaic.version = 11 : i64} {
  func.func @kernel(%arg0: i32, %arg1: i32, %arg2: memref<1x128x256xbf16, #tpu.memory_space<vmem>>, %arg3: memref<1x256x3xbf16, #tpu.memory_space<vmem>>, %arg4: memref<1x3xf32, #tpu.memory_space<vmem>>, %arg5: memref<1x128x3xf32, #tpu.memory_space<vmem>>) attributes {dimension_semantics = [#tpu.dimension_semantics<parallel>, #tpu.dimension_semantics<parallel>], iteration_bounds = array<i64: 8, 1>, scalar_prefetch = 0 : i64, scratch_operands = 0 : i64, tpu.core_type = #tpu.core_type<tc>, window_params = [{transform_indices = @transform_0, window_bounds = array<i64: 1, 128, 256>}, {transform_indices = @transform_1, window_bounds = array<i64: 1, 256, 3>}, {pipeline_mode = #tpu.pipeline_mode<synchronous>, transform_indices = @transform_2, window_bounds = array<i64: 1, 3>}, {transform_indices = @transform_3, window_bounds = array<i64: 1, 128, 3>}]} {
    %c0 = arith.constant 0 : index
    %c0_0 = arith.constant 0 : index
    %c0_1 = arith.constant 0 : index
    %0 = vector.load %arg2[%c0, %c0_0, %c0_1] : memref<1x128x256xbf16, #tpu.memory_space<vmem>>, vector<1x128x256xbf16>
    %1 = vector.shape_cast %0 : vector<1x128x256xbf16> to vector<128x256xbf16>
    %c0_2 = arith.constant 0 : index
    %c0_3 = arith.constant 0 : index
    %c0_4 = arith.constant 0 : index
    %2 = vector.load %arg3[%c0_2, %c0_3, %c0_4] : memref<1x256x3xbf16, #tpu.memory_space<vmem>>, vector<1x256x3xbf16>
    %3 = vector.shape_cast %2 : vector<1x256x3xbf16> to vector<256x3xbf16>
    %cst = arith.constant dense<0.000000e+00> : vector<128x3xf32>
    %4 = tpu.matmul %1, %3, %cst {dimension_numbers = #tpu.dot_dimension_numbers<[1], [0], [0], [1], [0, 0, 1, 1], [], []>} : vector<128x256xbf16>, vector<256x3xbf16>, vector<128x3xf32> -> vector<128x3xf32>
    %c0_5 = arith.constant 0 : index
    %c0_6 = arith.constant 0 : index
    %5 = vector.load %arg4[%c0_5, %c0_6] : memref<1x3xf32, #tpu.memory_space<vmem>>, vector<1x3xf32>
    %6 = vector.broadcast %5 : vector<1x3xf32> to vector<128x3xf32>
    %7 = arith.addf %4, %6 : vector<128x3xf32>
    %c0_7 = arith.constant 0 : index
    %c0_8 = arith.constant 0 : index
    %c0_9 = arith.constant 0 : index
    %8 = vector.load %arg5[%c0_7, %c0_8, %c0_9] : memref<1x128x3xf32, #tpu.memory_space<vmem>>, vector<1x128x3xf32>
    %9 = vector.shape_cast %8 : vector<1x128x3xf32> to vector<128x3xf32>
    %10 = vector.shape_cast %7 : vector<128x3xf32> to vector<1x128x3xf32>
    tpu.vector_store %arg5[%c0_7, %c0_8, %c0_9], %10 {strides = array<i32>} : memref<1x128x3xf32, #tpu.memory_space<vmem>>, vector<1x128x3xf32>,
    return
  }
  func.func @transform_0(%arg0: i32, %arg1: i32) -> (i32, i32, i32) {
    %c0_i32 = arith.constant 0 : i32
    %c0_i32_0 = arith.constant 0 : i32
    return %arg0, %arg1, %c0_i32 : i32, i32, i32
  }
  func.func @transform_1(%arg0: i32, %arg1: i32) -> (i32, i32, i32) {
    %c0_i32 = arith.constant 0 : i32
    %c0_i32_0 = arith.constant 0 : i32
    %c0_i32_1 = arith.constant 0 : i32
    return %arg0, %c0_i32, %c0_i32_0 : i32, i32, i32
  }
  func.func @transform_2(%arg0: i32, %arg1: i32) -> (i32, i32) {
    %c0_i32 = arith.constant 0 : i32
    %c0_i32_0 = arith.constant 0 : i32
    %c0_i32_1 = arith.constant 0 : i32
    return %c0_i32, %c0_i32_0 : i32, i32
  }
  func.func @transform_3(%arg0: i32, %arg1: i32) -> (i32, i32, i32) {
    %c0_i32 = arith.constant 0 : i32
    %c0_i32_0 = arith.constant 0 : i32
    return %arg0, %arg1, %c0_i32 : i32, i32, i32
  }
}

</mosaic_0001>

<bundles_post_ra>
// kernel: tile.118
= control target key start
LH: loop header
LB: loop body
LE: loop exit
PB: predicated region body
PF: predicated region fallthrough
CT: control target
= control target key end

     0   :  { %s1012_s0 = inlined_call_operand.vmem [shape: f32[32,32], index: 0, kind: input, shape index: {}]   ;;  %s1013_s1 = inlined_call_operand.vmem [shape: f32[4,32,4,32], index: 1, kind: output, shape index: {}]  }
   0x1   :  { %v4_v0 = vld [vmem:[%s1012_s0] ss:$0 sm:$0xff]  ;;  %v367_v1 = vld [vmem:[%s1012_s0 + $0x1] ss:$0 sm:$0xff]  ;;  %v372_v2 = vld [vmem:[%s1012_s0 + $0x2] ss:$0 sm:$0xff] }
   0x2   :  { %5 = vst [vmem:[%s1013_s1] sm:$0xf] %v4_v0  ;;  %364 = vst [vmem:[%s1013_s1 + $0x80] sm:$0xf] %v4_v0  ;;  %v377_v3 = vld [vmem:[%s1012_s0 + $0x3] ss:$0 sm:$0xff] }
   0x3   :  { %365 = vst [vmem:[%s1013_s1 + $0x100] sm:$0xf] %v4_v0  ;;  %366 = vst [vmem:[%s1013_s1 + $0x180] sm:$0xf] %v4_v0  ;;  %v382_v4 = vld [vmem:[%s1012_s0 + $0x4] ss:$0 sm:$0xff] }
   0x4   :  { %368 = vst [vmem:[%s1013_s1 + $0x4] sm:$0xf] %v367_v1  ;;  %369 = vst [vmem:[%s1013_s1 + $0x84] sm:$0xf] %v367_v1  ;;  %v387_v5 = vld [vmem:[%s1012_s0 + $0x5] ss:$0 sm:$0xff] }
   0x5   :  { %370 = vst [vmem:[%s1013_s1 + $0x104] sm:$0xf] %v367_v1  ;;  %371 = vst [vmem:[%s1013_s1 + $0x184] sm:$0xf] %v367_v1  ;;  %v392_v6 = vld [vmem:[%s1012_s0 + $0x6] ss:$0 sm:$0xff] }
   0x6   :  { %373 = vst [vmem:[%s1013_s1 + $0x8] sm:$0xf] %v372_v2  ;;  %374 = vst [vmem:[%s1013_s1 + $0x88] sm:$0xf] %v372_v2  ;;  %v397_v7 = vld [vmem:[%s1012_s0 + $0x7] ss:$0 sm:$0xff] }
   0x7   :  { %375 = vst [vmem:[%s1013_s1 + $0x108] sm:$0xf] %v372_v2  ;;  %376 = vst [vmem:[%s1013_s1 + $0x188] sm:$0xf] %v372_v2  ;;  %v402_v8 = vld [vmem:[%s1012_s0 + $0x8] ss:$0 sm:$0xff] }
   0x8   :  { %378 = vst [vmem:[%s1013_s1 + $0xc] sm:$0xf] %v377_v3  ;;  %379 = vst [vmem:[%s1013_s1 + $0x8c] sm:$0xf] %v377_v3  ;;  %v407_v9 = vld [vmem:[%s1012_s0 + $0x9] ss:$0 sm:$0xff] }
   0x9   :  { %380 = vst [vmem:[%s1013_s1 + $0x10c] sm:$0xf] %v377_v3  ;;  %381 = vst [vmem:[%s1013_s1 + $0x18c] sm:$0xf] %v377_v3  ;;  %v412_v10 = vld [vmem:[%s1012_s0 + $0xa] ss:$0 sm:$0xff] }
   0xa   :  { %383 = vst [vmem:[%s1013_s1 + $0x10] sm:$0xf] %v382_v4  ;;  %384 = vst [vmem:[%s1013_s1 + $0x90] sm:$0xf] %v382_v4  ;;  %v417_v11 = vld [vmem:[%s1012_s0 + $0xb] ss:$0 sm:$0xff] }
   0xb   :  { %385 = vst [vmem:[%s1013_s1 + $0x110] sm:$0xf] %v382_v4  ;;  %386 = vst [vmem:[%s1013_s1 + $0x190] sm:$0xf] %v382_v4  ;;  %v422_v12 = vld [vmem:[%s1012_s0 + $0xc] ss:$0 sm:$0xff] }
   0xc   :  { %388 = vst [vmem:[%s1013_s1 + $0x14] sm:$0xf] %v387_v5  ;;  %389 = vst [vmem:[%s1013_s1 + $0x94] sm:$0xf] %v387_v5  ;;  %v427_v13 = vld [vmem:[%s1012_s0 + $0xd] ss:$0 sm:$0xff] }
   0xd   :  { %390 = vst [vmem:[%s1013_s1 + $0x114] sm:$0xf] %v387_v5  ;;  %391 = vst [vmem:[%s1013_s1 + $0x194] sm:$0xf] %v387_v5  ;;  %v432_v14 = vld [vmem:[%s1012_s0 + $0xe] ss:$0 sm:$0xff] }
   0xe   :  { %393 = vst [vmem:[%s1013_s1 + $0x18] sm:$0xf] %v392_v6  ;;  %394 = vst [vmem:[%s1013_s1 + $0x98] sm:$0xf] %v392_v6  ;;  %v437_v15 = vld [vmem:[%s1012_s0 + $0xf] ss:$0 sm:$0xff] }
   0xf   :  { %395 = vst [vmem:[%s1013_s1 + $0x118] sm:$0xf] %v392_v6  ;;  %396 = vst [vmem:[%s1013_s1 + $0x198] sm:$0xf] %v392_v6  ;;  %v442_v16 = vld [vmem:[%s1012_s0 + $0x10] ss:$0 sm:$0xff] }
  0x10   :  { %398 = vst [vmem:[%s1013_s1 + $0x1c] sm:$0xf] %v397_v7  ;;  %399 = vst [vmem:[%s1013_s1 + $0x9c] sm:$0xf] %v397_v7  ;;  %v447_v17 = vld [vmem:[%s1012_s0 + $0x11] ss:$0 sm:$0xff] }
  0x11   :  { %400 = vst [vmem:[%s1013_s1 + $0x11c] sm:$0xf] %v397_v7  ;;  %401 = vst [vmem:[%s1013_s1 + $0x19c] sm:$0xf] %v397_v7  ;;  %v452_v18 = vld [vmem:[%s1012_s0 + $0x12] ss:$0 sm:$0xff] }
  0x12   :  { %403 = vst [vmem:[%s1013_s1 + $0x20] sm:$0xf] %v402_v8  ;;  %404 = vst [vmem:[%s1013_s1 + $0xa0] sm:$0xf] %v402_v8  ;;  %v457_v19 = vld [vmem:[%s1012_s0 + $0x13] ss:$0 sm:$0xff] }
  0x13   :  { %405 = vst [vmem:[%s1013_s1 + $0x120] sm:$0xf] %v402_v8  ;;  %406 = vst [vmem:[%s1013_s1 + $0x1a0] sm:$0xf] %v402_v8  ;;  %v462_v20 = vld [vmem:[%s1012_s0 + $0x14] ss:$0 sm:$0xff] }
  0x14   :  { %408 = vst [vmem:[%s1013_s1 + $0x24] sm:$0xf] %v407_v9  ;;  %409 = vst [vmem:[%s1013_s1 + $0xa4] sm:$0xf] %v407_v9  ;;  %v467_v21 = vld [vmem:[%s1012_s0 + $0x15] ss:$0 sm:$0xff] }
  0x15   :  { %410 = vst [vmem:[%s1013_s1 + $0x124] sm:$0xf] %v407_v9  ;;  %411 = vst [vmem:[%s1013_s1 + $0x1a4] sm:$0xf] %v407_v9  ;;  %v472_v22 = vld [vmem:[%s1012_s0 + $0x16] ss:$0 sm:$0xff] }
  0x16   :  { %413 = vst [vmem:[%s1013_s1 + $0x28] sm:$0xf] %v412_v10  ;;  %414 = vst [vmem:[%s1013_s1 + $0xa8] sm:$0xf] %v412_v10  ;;  %v477_v23 = vld [vmem:[%s1012_s0 + $0x17] ss:$0 sm:$0xff] }
  0x17   :  { %415 = vst [vmem:[%s1013_s1 + $0x128] sm:$0xf] %v412_v10  ;;  %416 = vst [vmem:[%s1013_s1 + $0x1a8] sm:$0xf] %v412_v10  ;;  %v482_v24 = vld [vmem:[%s1012_s0 + $0x18] ss:$0 sm:$0xff] }
  0x18   :  { %418 = vst [vmem:[%s1013_s1 + $0x2c] sm:$0xf] %v417_v11  ;;  %419 = vst [vmem:[%s1013_s1 + $0xac] sm:$0xf] %v417_v11  ;;  %v487_v25 = vld [vmem:[%s1012_s0 + $0x19] ss:$0 sm:$0xff] }
  0x19   :  { %420 = vst [vmem:[%s1013_s1 + $0x12c] sm:$0xf] %v417_v11  ;;  %421 = vst [vmem:[%s1013_s1 + $0x1ac] sm:$0xf] %v417_v11  ;;  %v492_v26 = vld [vmem:[%s1012_s0 + $0x1a] ss:$0 sm:$0xff] }
  0x1a   :  { %423 = vst [vmem:[%s1013_s1 + $0x30] sm:$0xf] %v422_v12  ;;  %424 = vst [vmem:[%s1013_s1 + $0xb0] sm:$0xf] %v422_v12  ;;  %v497_v27 = vld [vmem:[%s1012_s0 + $0x1b] ss:$0 sm:$0xff] }
  0x1b   :  { %425 = vst [vmem:[%s1013_s1 + $0x130] sm:$0xf] %v422_v12  ;;  %426 = vst [vmem:[%s1013_s1 + $0x1b0] sm:$0xf] %v422_v12  ;;  %v502_v28 = vld [vmem:[%s1012_s0 + $0x1c] ss:$0 sm:$0xff] }
  0x1c   :  { %428 = vst [vmem:[%s1013_s1 + $0x34] sm:$0xf] %v427_v13  ;;  %429 = vst [vmem:[%s1013_s1 + $0xb4] sm:$0xf] %v427_v13  ;;  %v507_v29 = vld [vmem:[%s1012_s0 + $0x1d] ss:$0 sm:$0xff] }
  0x1d   :  { %430 = vst [vmem:[%s1013_s1 + $0x134] sm:$0xf] %v427_v13  ;;  %431 = vst [vmem:[%s1013_s1 + $0x1b4] sm:$0xf] %v427_v13  ;;  %v512_v30 = vld [vmem:[%s1012_s0 + $0x1e] ss:$0 sm:$0xff] }
  0x1e   :  { %433 = vst [vmem:[%s1013_s1 + $0x38] sm:$0xf] %v432_v14  ;;  %434 = vst [vmem:[%s1013_s1 + $0xb8] sm:$0xf] %v432_v14  ;;  %v517_v31 = vld [vmem:[%s1012_s0 + $0x1f] ss:$0 sm:$0xff] }
  0x1f   :  { %435 = vst [vmem:[%s1013_s1 + $0x138] sm:$0xf] %v432_v14  ;;  %436 = vst [vmem:[%s1013_s1 + $0x1b8] sm:$0xf] %v432_v14 }
  0x20   :  { %438 = vst [vmem:[%s1013_s1 + $0x3c] sm:$0xf] %v437_v15  ;;  %439 = vst [vmem:[%s1013_s1 + $0xbc] sm:$0xf] %v437_v15 }
  0x21   :  { %440 = vst [vmem:[%s1013_s1 + $0x13c] sm:$0xf] %v437_v15  ;;  %441 = vst [vmem:[%s1013_s1 + $0x1bc] sm:$0xf] %v437_v15 }
  0x22   :  { %443 = vst [vmem:[%s1013_s1 + $0x40] sm:$0xf] %v442_v16  ;;  %444 = vst [vmem:[%s1013_s1 + $0xc0] sm:$0xf] %v442_v16 }
  0x23   :  { %445 = vst [vmem:[%s1013_s1 + $0x140] sm:$0xf] %v442_v16  ;;  %446 = vst [vmem:[%s1013_s1 + $0x1c0] sm:$0xf] %v442_v16 }
  0x24   :  { %448 = vst [vmem:[%s1013_s1 + $0x44] sm:$0xf] %v447_v17  ;;  %449 = vst [vmem:[%s1013_s1 + $0xc4] sm:$0xf] %v447_v17 }
  0x25   :  { %450 = vst [vmem:[%s1013_s1 + $0x144] sm:$0xf] %v447_v17  ;;  %451 = vst [vmem:[%s1013_s1 + $0x1c4] sm:$0xf] %v447_v17 }
  0x26   :  { %453 = vst [vmem:[%s1013_s1 + $0x48] sm:$0xf] %v452_v18  ;;  %454 = vst [vmem:[%s1013_s1 + $0xc8] sm:$0xf] %v452_v18 }
  0x27   :  { %455 = vst [vmem:[%s1013_s1 + $0x148] sm:$0xf] %v452_v18  ;;  %456 = vst [vmem:[%s1013_s1 + $0x1c8] sm:$0xf] %v452_v18 }
  0x28   :  { %458 = vst [vmem:[%s1013_s1 + $0x4c] sm:$0xf] %v457_v19  ;;  %459 = vst [vmem:[%s1013_s1 + $0xcc] sm:$0xf] %v457_v19 }
  0x29   :  { %460 = vst [vmem:[%s1013_s1 + $0x14c] sm:$0xf] %v457_v19  ;;  %461 = vst [vmem:[%s1013_s1 + $0x1cc] sm:$0xf] %v457_v19 }
  0x2a   :  { %463 = vst [vmem:[%s1013_s1 + $0x50] sm:$0xf] %v462_v20  ;;  %464 = vst [vmem:[%s1013_s1 + $0xd0] sm:$0xf] %v462_v20 }
  0x2b   :  { %465 = vst [vmem:[%s1013_s1 + $0x150] sm:$0xf] %v462_v20  ;;  %466 = vst [vmem:[%s1013_s1 + $0x1d0] sm:$0xf] %v462_v20 }
  0x2c   :  { %468 = vst [vmem:[%s1013_s1 + $0x54] sm:$0xf] %v467_v21  ;;  %469 = vst [vmem:[%s1013_s1 + $0xd4] sm:$0xf] %v467_v21 }
  0x2d   :  { %470 = vst [vmem:[%s1013_s1 + $0x154] sm:$0xf] %v467_v21  ;;  %471 = vst [vmem:[%s1013_s1 + $0x1d4] sm:$0xf] %v467_v21 }
  0x2e   :  { %473 = vst [vmem:[%s1013_s1 + $0x58] sm:$0xf] %v472_v22  ;;  %474 = vst [vmem:[%s1013_s1 + $0xd8] sm:$0xf] %v472_v22 }
  0x2f   :  { %475 = vst [vmem:[%s1013_s1 + $0x158] sm:$0xf] %v472_v22  ;;  %476 = vst [vmem:[%s1013_s1 + $0x1d8] sm:$0xf] %v472_v22 }
  0x30   :  { %478 = vst [vmem:[%s1013_s1 + $0x5c] sm:$0xf] %v477_v23  ;;  %479 = vst [vmem:[%s1013_s1 + $0xdc] sm:$0xf] %v477_v23 }
  0x31   :  { %480 = vst [vmem:[%s1013_s1 + $0x15c] sm:$0xf] %v477_v23  ;;  %481 = vst [vmem:[%s1013_s1 + $0x1dc] sm:$0xf] %v477_v23 }
  0x32   :  { %483 = vst [vmem:[%s1013_s1 + $0x60] sm:$0xf] %v482_v24  ;;  %484 = vst [vmem:[%s1013_s1 + $0xe0] sm:$0xf] %v482_v24 }
  0x33   :  { %485 = vst [vmem:[%s1013_s1 + $0x160] sm:$0xf] %v482_v24  ;;  %486 = vst [vmem:[%s1013_s1 + $0x1e0] sm:$0xf] %v482_v24 }
  0x34   :  { %488 = vst [vmem:[%s1013_s1 + $0x64] sm:$0xf] %v487_v25  ;;  %489 = vst [vmem:[%s1013_s1 + $0xe4] sm:$0xf] %v487_v25 }
  0x35   :  { %490 = vst [vmem:[%s1013_s1 + $0x164] sm:$0xf] %v487_v25  ;;  %491 = vst [vmem:[%s1013_s1 + $0x1e4] sm:$0xf] %v487_v25 }
  0x36   :  { %493 = vst [vmem:[%s1013_s1 + $0x68] sm:$0xf] %v492_v26  ;;  %494 = vst [vmem:[%s1013_s1 + $0xe8] sm:$0xf] %v492_v26 }
  0x37   :  { %495 = vst [vmem:[%s1013_s1 + $0x168] sm:$0xf] %v492_v26  ;;  %496 = vst [vmem:[%s1013_s1 + $0x1e8] sm:$0xf] %v492_v26 }
  0x38   :  { %498 = vst [vmem:[%s1013_s1 + $0x6c] sm:$0xf] %v497_v27  ;;  %499 = vst [vmem:[%s1013_s1 + $0xec] sm:$0xf] %v497_v27 }
  0x39   :  { %500 = vst [vmem:[%s1013_s1 + $0x16c] sm:$0xf] %v497_v27  ;;  %501 = vst [vmem:[%s1013_s1 + $0x1ec] sm:$0xf] %v497_v27 }
  0x3a   :  { %503 = vst [vmem:[%s1013_s1 + $0x70] sm:$0xf] %v502_v28  ;;  %504 = vst [vmem:[%s1013_s1 + $0xf0] sm:$0xf] %v502_v28 }
  0x3b   :  { %505 = vst [vmem:[%s1013_s1 + $0x170] sm:$0xf] %v502_v28  ;;  %506 = vst [vmem:[%s1013_s1 + $0x1f0] sm:$0xf] %v502_v28 }
  0x3c   :  { %508 = vst [vmem:[%s1013_s1 + $0x74] sm:$0xf] %v507_v29  ;;  %509 = vst [vmem:[%s1013_s1 + $0xf4] sm:$0xf] %v507_v29 }
  0x3d   :  { %510 = vst [vmem:[%s1013_s1 + $0x174] sm:$0xf] %v507_v29  ;;  %511 = vst [vmem:[%s1013_s1 + $0x1f4] sm:$0xf] %v507_v29 }
  0x3e   :  { %513 = vst [vmem:[%s1013_s1 + $0x78] sm:$0xf] %v512_v30  ;;  %514 = vst [vmem:[%s1013_s1 + $0xf8] sm:$0xf] %v512_v30 }
  0x3f   :  { %515 = vst [vmem:[%s1013_s1 + $0x178] sm:$0xf] %v512_v30  ;;  %516 = vst [vmem:[%s1013_s1 + $0x1f8] sm:$0xf] %v512_v30 }
  0x40   :  { %518 = vst [vmem:[%s1013_s1 + $0x7c] sm:$0xf] %v517_v31  ;;  %519 = vst [vmem:[%s1013_s1 + $0xfc] sm:$0xf] %v517_v31 }
  0x41   :  { %520 = vst [vmem:[%s1013_s1 + $0x17c] sm:$0xf] %v517_v31  ;;  %521 = vst [vmem:[%s1013_s1 + $0x1fc] sm:$0xf] %v517_v31 }

// kernel: tile.119
= control target key start
LH: loop header
LB: loop body
LE: loop exit
PB: predicated region body
PF: predicated region fallthrough
CT: control target
= control target key end

     0   :  { %vm642_vm0 = vcmask 1047556   ;;  %s1622_s10 = smov 96   ;;  %vm644_vm1 = vcmask 261120   ;;  %s1624_s16 = smov 32   ;;  %vm789_vm2 = vcmask 1048320   ;;  %vm964_vm3 = vcmask 785920   ;;  %s2387_s0 = inlined_call_operand.vmem [shape: f32[4,32,4,32], index: 0, kind: input, shape index: {}]   ;;  %s2388_s1 = inlined_call_operand.vmem [shape: f32[128,128], index: 1, kind: output, shape index: {}]  }
   0x1   :  { %v1552_v0 = vld [vmem:[%s2387_s0 + $0x1c] sm:$0xf]  ;;  %v1553_v1 = vld [vmem:[%s2387_s0 + $0x18] sm:$0xf]  ;;  %v1554_v2 = vld [vmem:[%s2387_s0 + $0x14] sm:$0xf] }
   0x2   :  { %608 = vst [vmem:[#allocation0 + $0x38] sm:$0xf] %v1552_v0  ;;  %613 = vst [vmem:[#allocation0 + $0x30] sm:$0xf] %v1553_v1  ;;  %v1555_v3 = vld [vmem:[%s2387_s0 + $0x10] sm:$0xf] }
   0x3   :  { %618 = vst [vmem:[#allocation0 + $0x28] sm:$0xf] %v1554_v2  ;;  %v1556_v4 = vld [vmem:[%s2387_s0 + $0xc] sm:$0xf]  ;;  %v1557_v5 = vld [vmem:[%s2387_s0 + $0x8] sm:$0xf] }
   0x4   :  { %623 = vst [vmem:[#allocation0 + $0x20] sm:$0xf] %v1555_v3  ;;  %628 = vst [vmem:[#allocation0 + $0x18] sm:$0xf] %v1556_v4  ;;  %v1558_v6 = vld [vmem:[%s2387_s0 + $0x4] sm:$0xf] }
   0x5   :  { %633 = vst [vmem:[#allocation0 + $0x10] sm:$0xf] %v1557_v5  ;;  %v638_v7 = vld [vmem:[%s2387_s0] sm:$0xf]  ;;  %637 = vst [vmem:[#allocation0 + $0x8] sm:$0xf] %v1558_v6 }
   0x6   :  { %639 = vst [vmem:[#allocation0] sm:$0xf] %v638_v7  ;;  %v1488_v8 = vld [vmem:[%s2387_s0 + $0x11c] sm:$0xf]  ;;  %v1489_v9 = vld [vmem:[%s2387_s0 + $0x118] sm:$0xf] }
   0x7   :  { %v1490_v10 = vld [vmem:[%s2387_s0 + $0x114] sm:$0xf]  ;;  %288 = vst [vmem:[#allocation0 + $0x238] sm:$0xf] %v1488_v8  ;;  %293 = vst [vmem:[#allocation0 + $0x230] sm:$0xf] %v1489_v9 }
   0x8   :  { %298 = vst [vmem:[#allocation0 + $0x228] sm:$0xf] %v1490_v10  ;;  %v1491_v11 = vld [vmem:[%s2387_s0 + $0x110] sm:$0xf]  ;;  %v1492_v12 = vld [vmem:[%s2387_s0 + $0x10c] sm:$0xf] }
   0x9   :  { %v1493_v13 = vld [vmem:[%s2387_s0 + $0x108] sm:$0xf]  ;;  %303 = vst [vmem:[#allocation0 + $0x220] sm:$0xf] %v1491_v11  ;;  %308 = vst [vmem:[#allocation0 + $0x218] sm:$0xf] %v1492_v12 }
   0xa   :  { %313 = vst [vmem:[#allocation0 + $0x210] sm:$0xf] %v1493_v13  ;;  %v1494_v14 = vld [vmem:[%s2387_s0 + $0x104] sm:$0xf]  ;;  %v1495_v15 = vld [vmem:[%s2387_s0 + $0x100] sm:$0xf] }
   0xb   :  { %v1520_v16 = vld [vmem:[%s2387_s0 + $0x9c] sm:$0xf]  ;;  %318 = vst [vmem:[#allocation0 + $0x208] sm:$0xf] %v1494_v14  ;;  %323 = vst [vmem:[#allocation0 + $0x200] sm:$0xf] %v1495_v15 }
   0xc   :  { %448 = vst [vmem:[#allocation0 + $0x138] sm:$0xf] %v1520_v16  ;;  %v1521_v17 = vld [vmem:[%s2387_s0 + $0x98] sm:$0xf]  ;;  %v1522_v18 = vld [vmem:[%s2387_s0 + $0x94] sm:$0xf] }
   0xd   :  { %v1523_v19 = vld [vmem:[%s2387_s0 + $0x90] sm:$0xf]  ;;  %453 = vst [vmem:[#allocation0 + $0x130] sm:$0xf] %v1521_v17  ;;  %458 = vst [vmem:[#allocation0 + $0x128] sm:$0xf] %v1522_v18 }
   0xe   :  { %463 = vst [vmem:[#allocation0 + $0x120] sm:$0xf] %v1523_v19  ;;  %v1524_v20 = vld [vmem:[%s2387_s0 + $0x8c] sm:$0xf]  ;;  %v1525_v21 = vld [vmem:[%s2387_s0 + $0x88] sm:$0xf] }
   0xf   :  { %v1526_v22 = vld [vmem:[%s2387_s0 + $0x84] sm:$0xf]  ;;  %468 = vst [vmem:[#allocation0 + $0x118] sm:$0xf] %v1524_v20  ;;  %473 = vst [vmem:[#allocation0 + $0x110] sm:$0xf] %v1525_v21 }
  0x10   :  { %478 = vst [vmem:[#allocation0 + $0x108] sm:$0xf] %v1526_v22  ;;  %v1527_v23 = vld [vmem:[%s2387_s0 + $0x80] sm:$0xf]  ;;  %v1456_v24 = vld [vmem:[%s2387_s0 + $0x19c] sm:$0xf] }
  0x11   :  { %v1457_v25 = vld [vmem:[%s2387_s0 + $0x198] sm:$0xf]  ;;  %483 = vst [vmem:[#allocation0 + $0x100] sm:$0xf] %v1527_v23  ;;  %128 = vst [vmem:[#allocation0 + $0x338] sm:$0xf] %v1456_v24 }
  0x12   :  { %v784_v26 = vld [vmem:[#allocation0 + $0x3] ss:$8 sm:$0xf0]   ;;  %133 = vst [vmem:[#allocation0 + $0x330] sm:$0xf] %v1457_v25  ;;  %vm1139_vm4 = vcmask 523520  }
  0x13   :  { %v1458_v27 = vld [vmem:[%s2387_s0 + $0x194] sm:$0xf]  ;;  %v782_v28 = vld [vmem:[#allocation0 + $0x3] ss:$8 sm:$0xf]  }
  0x14   :  { %138 = vst [vmem:[#allocation0 + $0x328] sm:$0xf] %v1458_v27  ;;  %v1459_v29 = vld [vmem:[%s2387_s0 + $0x190] sm:$0xf]  ;;  %v786_v30 = vsel %vm642_vm0, %v784_v26, %v782_v28  ;;  %v1460_v31 = vld [vmem:[%s2387_s0 + $0x18c] sm:$0xf] }
  0x15   :  { %143 = vst [vmem:[#allocation0 + $0x320] sm:$0xf] %v1459_v29  ;;  %v1461_v32 = vld [vmem:[%s2387_s0 + $0x188] sm:$0xf]  ;;  %v1462_v33 = vld [vmem:[%s2387_s0 + $0x184] sm:$0xf]  ;;  %787 = vrot.lane.b32.xlu0 %v786_v30, %s1622_s10 }
  0x16   :  { %v805_v34 = vld [vmem:[#allocation0 + $0x203] ss:$8 sm:$0xf0]   ;;  %148 = vst [vmem:[#allocation0 + $0x318] sm:$0xf] %v1460_v31 }
  0x17   :  { %153 = vst [vmem:[#allocation0 + $0x310] sm:$0xf] %v1461_v32  ;;  %158 = vst [vmem:[#allocation0 + $0x308] sm:$0xf] %v1462_v33  ;;  %v1463_v35 = vld [vmem:[%s2387_s0 + $0x180] sm:$0xf] }
  0x18   :  { %v803_v36 = vld [vmem:[#allocation0 + $0x203] ss:$8 sm:$0xf]   ;;  %163 = vst [vmem:[#allocation0 + $0x300] sm:$0xf] %v1463_v35 }
  0x19   :  { %v1544_v37 = vld [vmem:[%s2387_s0 + $0x3c] sm:$0xf]  ;;  %v807_v38 = vsel %vm642_vm0, %v805_v34, %v803_v36  ;;  %v794_v39 = vld [vmem:[#allocation0 + $0x103] ss:$8 sm:$0xf0]  }
  0x1a   :  { %568 = vst [vmem:[#allocation0 + $0x78] sm:$0xf] %v1544_v37  ;;  %v1545_v40 = vld [vmem:[%s2387_s0 + $0x38] sm:$0xf]  ;;  %808 = vrot.lane.b32.xlu1 %v807_v38, %s1622_s10  ;;  %v1546_v41 = vld [vmem:[%s2387_s0 + $0x34] sm:$0xf] }
  0x1b   :  { %573 = vst [vmem:[#allocation0 + $0x70] sm:$0xf] %v1545_v40  ;;  %v1547_v42 = vld [vmem:[%s2387_s0 + $0x30] sm:$0xf]  ;;  %v1548_v43 = vld [vmem:[%s2387_s0 + $0x2c] sm:$0xf] }
  0x1c   :  { %v792_v44 = vld [vmem:[#allocation0 + $0x103] ss:$8 sm:$0xf]   ;;  %578 = vst [vmem:[#allocation0 + $0x68] sm:$0xf] %v1546_v41 }
  0x1d   :  { %583 = vst [vmem:[#allocation0 + $0x60] sm:$0xf] %v1547_v42  ;;  %588 = vst [vmem:[#allocation0 + $0x58] sm:$0xf] %v1548_v43  ;;  %v1549_v45 = vld [vmem:[%s2387_s0 + $0x28] sm:$0xf]  ;;  %v796_v46 = vsel %vm642_vm0, %v794_v39, %v792_v44 }
  0x1e   :  { %593 = vst [vmem:[#allocation0 + $0x50] sm:$0xf] %v1549_v45  ;;  %v1550_v47 = vld [vmem:[%s2387_s0 + $0x24] sm:$0xf]  ;;  %v1551_v48 = vld [vmem:[%s2387_s0 + $0x20] sm:$0xf]  ;;  %797 = vrot.lane.b32.xlu0 %v796_v46, %s1622_s10 }
  0x1f   :  { %v1512_v49 = vld [vmem:[%s2387_s0 + $0xbc] sm:$0xf]  ;;  %v816_v50 = vld [vmem:[#allocation0 + $0x303] ss:$8 sm:$0xf0]  }
  0x20   :  { %598 = vst [vmem:[#allocation0 + $0x48] sm:$0xf] %v1550_v47  ;;  %603 = vst [vmem:[#allocation0 + $0x40] sm:$0xf] %v1551_v48  ;;  %v1513_v51 = vld [vmem:[%s2387_s0 + $0xb8] sm:$0xf] }
  0x21   :  { %408 = vst [vmem:[#allocation0 + $0x178] sm:$0xf] %v1512_v49  ;;  %413 = vst [vmem:[#allocation0 + $0x170] sm:$0xf] %v1513_v51  ;;  %v1514_v52 = vld [vmem:[%s2387_s0 + $0xb4] sm:$0xf] }
  0x22   :  { %v1515_v53 = vld [vmem:[%s2387_s0 + $0xb0] sm:$0xf]  ;;  %v1516_v54 = vld [vmem:[%s2387_s0 + $0xac] sm:$0xf]  ;;  %418 = vst [vmem:[#allocation0 + $0x168] sm:$0xf] %v1514_v52 }
  0x23   :  { %v814_v55 = vld [vmem:[#allocation0 + $0x303] ss:$8 sm:$0xf]   ;;  %423 = vst [vmem:[#allocation0 + $0x160] sm:$0xf] %v1515_v53 }
  0x24   :  { %428 = vst [vmem:[#allocation0 + $0x158] sm:$0xf] %v1516_v54  ;;  %v1517_v56 = vld [vmem:[%s2387_s0 + $0xa8] sm:$0xf]  ;;  %v818_v57 = vsel %vm642_vm0, %v816_v50, %v814_v55  ;;  %v1518_v58 = vld [vmem:[%s2387_s0 + $0xa4] sm:$0xf] }
  0x25   :  { %433 = vst [vmem:[#allocation0 + $0x150] sm:$0xf] %v1517_v56  ;;  %v1519_v59 = vld [vmem:[%s2387_s0 + $0xa0] sm:$0xf]  ;;  %v1480_v60 = vld [vmem:[%s2387_s0 + $0x13c] sm:$0xf]  ;;  %819 = vrot.lane.b32.xlu1 %v818_v57, %s1622_s10 }
  0x26   :  { %438 = vst [vmem:[#allocation0 + $0x148] sm:$0xf] %v1518_v58  ;;  %443 = vst [vmem:[#allocation0 + $0x140] sm:$0xf] %v1519_v59  ;;  %v1481_v61 = vld [vmem:[%s2387_s0 + $0x138] sm:$0xf] }
  0x27   :  { %248 = vst [vmem:[#allocation0 + $0x278] sm:$0xf] %v1480_v60  ;;  %v1482_v62 = vld [vmem:[%s2387_s0 + $0x134] sm:$0xf]  ;;  %v1483_v63 = vld [vmem:[%s2387_s0 + $0x130] sm:$0xf] }
  0x28   :  { %v827_v0 = vld [vmem:[#allocation0 + $0x43] ss:$8 sm:$0xf0]   ;;  %253 = vst [vmem:[#allocation0 + $0x270] sm:$0xf] %v1481_v61 }
  0x29   :  { %258 = vst [vmem:[#allocation0 + $0x268] sm:$0xf] %v1482_v62  ;;  %263 = vst [vmem:[#allocation0 + $0x260] sm:$0xf] %v1483_v63  ;;  %v1484_v1 = vld [vmem:[%s2387_s0 + $0x12c] sm:$0xf] }
  0x2a   :  { %268 = vst [vmem:[#allocation0 + $0x258] sm:$0xf] %v1484_v1  ;;  %v1485_v2 = vld [vmem:[%s2387_s0 + $0x128] sm:$0xf]  ;;  %v1486_v3 = vld [vmem:[%s2387_s0 + $0x124] sm:$0xf] }
  0x2b   :  { %v1487_v4 = vld [vmem:[%s2387_s0 + $0x120] sm:$0xf]  ;;  %273 = vst [vmem:[#allocation0 + $0x250] sm:$0xf] %v1485_v2  ;;  %278 = vst [vmem:[#allocation0 + $0x248] sm:$0xf] %v1486_v3 }
  0x2c   :  { %v825_v5 = vld [vmem:[#allocation0 + $0x43] ss:$8 sm:$0xf]   ;;  %283 = vst [vmem:[#allocation0 + $0x240] sm:$0xf] %v1487_v4 }
  0x2d   :  { %v1448_v6 = vld [vmem:[%s2387_s0 + $0x1bc] sm:$0xf]  ;;  %v829_v7 = vsel %vm642_vm0, %v827_v0, %v825_v5  ;;  %v1449_v8 = vld [vmem:[%s2387_s0 + $0x1b8] sm:$0xf]  ;;  %v1450_v9 = vld [vmem:[%s2387_s0 + $0x1b4] sm:$0xf] }
  0x2e   :  { %88 = vst [vmem:[#allocation0 + $0x378] sm:$0xf] %v1448_v6  ;;  %v1451_v10 = vld [vmem:[%s2387_s0 + $0x1b0] sm:$0xf]  ;;  %830 = vrot.lane.b32.xlu0 %v829_v7, %s1622_s10  ;;  %93 = vst [vmem:[#allocation0 + $0x370] sm:$0xf] %v1449_v8 }
  0x2f   :  { %v838_v11 = vld [vmem:[#allocation0 + $0x143] ss:$8 sm:$0xf0]   ;;  %98 = vst [vmem:[#allocation0 + $0x368] sm:$0xf] %v1450_v9 }
  0x30   :  { %103 = vst [vmem:[#allocation0 + $0x360] sm:$0xf] %v1451_v10  ;;  %v1452_v12 = vld [vmem:[%s2387_s0 + $0x1ac] sm:$0xf]  ;;  %v1453_v13 = vld [vmem:[%s2387_s0 + $0x1a8] sm:$0xf] }
  0x31   :  { %108 = vst [vmem:[#allocation0 + $0x358] sm:$0xf] %v1452_v12  ;;  %v1454_v14 = vld [vmem:[%s2387_s0 + $0x1a4] sm:$0xf]  ;;  %v1455_v15 = vld [vmem:[%s2387_s0 + $0x1a0] sm:$0xf] }
  0x32   :  { %v836_v16 = vld [vmem:[#allocation0 + $0x143] ss:$8 sm:$0xf]   ;;  %113 = vst [vmem:[#allocation0 + $0x350] sm:$0xf] %v1453_v13 }
  0x33   :  { %118 = vst [vmem:[#allocation0 + $0x348] sm:$0xf] %v1454_v14  ;;  %123 = vst [vmem:[#allocation0 + $0x340] sm:$0xf] %v1455_v15  ;;  %v1536_v17 = vld [vmem:[%s2387_s0 + $0x5c] sm:$0xf]  ;;  %v840_v18 = vsel %vm642_vm0, %v838_v11, %v836_v16 }
  0x34   :  { %v849_v19 = vld [vmem:[#allocation0 + $0x243] ss:$8 sm:$0xf0]   ;;  %528 = vst [vmem:[#allocation0 + $0xb8] sm:$0xf] %v1536_v17  ;;  %841 = vrot.lane.b32.xlu1 %v840_v18, %s1622_s10 }
  0x35   :  { %v1537_v20 = vld [vmem:[%s2387_s0 + $0x58] sm:$0xf]  ;;  %v1538_v21 = vld [vmem:[%s2387_s0 + $0x54] sm:$0xf]  ;;  %v1539_v22 = vld [vmem:[%s2387_s0 + $0x50] sm:$0xf] }
  0x36   :  { %533 = vst [vmem:[#allocation0 + $0xb0] sm:$0xf] %v1537_v20  ;;  %v1540_v23 = vld [vmem:[%s2387_s0 + $0x4c] sm:$0xf]  ;;  %538 = vst [vmem:[#allocation0 + $0xa8] sm:$0xf] %v1538_v21 }
  0x37   :  { %v847_v24 = vld [vmem:[#allocation0 + $0x243] ss:$8 sm:$0xf]   ;;  %543 = vst [vmem:[#allocation0 + $0xa0] sm:$0xf] %v1539_v22 }
  0x38   :  { %548 = vst [vmem:[#allocation0 + $0x98] sm:$0xf] %v1540_v23  ;;  %v1541_v25 = vld [vmem:[%s2387_s0 + $0x48] sm:$0xf]  ;;  %v851_v26 = vsel %vm642_vm0, %v849_v19, %v847_v24  ;;  %v1542_v27 = vld [vmem:[%s2387_s0 + $0x44] sm:$0xf] }
  0x39   :  { %553 = vst [vmem:[#allocation0 + $0x90] sm:$0xf] %v1541_v25  ;;  %v1543_v28 = vld [vmem:[%s2387_s0 + $0x40] sm:$0xf]  ;;  %v1504_v29 = vld [vmem:[%s2387_s0 + $0xdc] sm:$0xf]  ;;  %852 = vrot.lane.b32.xlu0 %v851_v26, %s1622_s10 }
  0x3a   :  { %v860_v30 = vld [vmem:[#allocation0 + $0x343] ss:$8 sm:$0xf0]   ;;  %558 = vst [vmem:[#allocation0 + $0x88] sm:$0xf] %v1542_v27 }
  0x3b   :  { %563 = vst [vmem:[#allocation0 + $0x80] sm:$0xf] %v1543_v28  ;;  %368 = vst [vmem:[#allocation0 + $0x1b8] sm:$0xf] %v1504_v29  ;;  %v1505_v31 = vld [vmem:[%s2387_s0 + $0xd8] sm:$0xf] }
  0x3c   :  { %373 = vst [vmem:[#allocation0 + $0x1b0] sm:$0xf] %v1505_v31  ;;  %v1506_v32 = vld [vmem:[%s2387_s0 + $0xd4] sm:$0xf]  ;;  %v1507_v33 = vld [vmem:[%s2387_s0 + $0xd0] sm:$0xf] }
  0x3d   :  { %v1508_v34 = vld [vmem:[%s2387_s0 + $0xcc] sm:$0xf]  ;;  %v858_v35 = vld [vmem:[#allocation0 + $0x343] ss:$8 sm:$0xf]  }
  0x3e   :  { %378 = vst [vmem:[#allocation0 + $0x1a8] sm:$0xf] %v1506_v32  ;;  %383 = vst [vmem:[#allocation0 + $0x1a0] sm:$0xf] %v1507_v33  ;;  %v1509_v36 = vld [vmem:[%s2387_s0 + $0xc8] sm:$0xf]  ;;  %v862_v37 = vsel %vm642_vm0, %v860_v30, %v858_v35 }
  0x3f   :  { %388 = vst [vmem:[#allocation0 + $0x198] sm:$0xf] %v1508_v34  ;;  %393 = vst [vmem:[#allocation0 + $0x190] sm:$0xf] %v1509_v36  ;;  %v1510_v38 = vld [vmem:[%s2387_s0 + $0xc4] sm:$0xf]  ;;  %863 = vrot.lane.b32.xlu1 %v862_v37, %s1622_s10 }
  0x40   :  { %v1511_v39 = vld [vmem:[%s2387_s0 + $0xc0] sm:$0xf]  ;;  %v1472_v40 = vld [vmem:[%s2387_s0 + $0x15c] sm:$0xf]  ;;  %398 = vst [vmem:[#allocation0 + $0x188] sm:$0xf] %v1510_v38 }
  0x41   :  { %403 = vst [vmem:[#allocation0 + $0x180] sm:$0xf] %v1511_v39  ;;  %208 = vst [vmem:[#allocation0 + $0x2b8] sm:$0xf] %v1472_v40  ;;  %v1473_v41 = vld [vmem:[%s2387_s0 + $0x158] sm:$0xf] }
  0x42   :  { %v1474_v42 = vld [vmem:[%s2387_s0 + $0x154] sm:$0xf]  ;;  %v1475_v43 = vld [vmem:[%s2387_s0 + $0x150] sm:$0xf]  ;;  %213 = vst [vmem:[#allocation0 + $0x2b0] sm:$0xf] %v1473_v41 }
  0x43   :  { %v871_v44 = vld [vmem:[#allocation0 + $0x83] ss:$8 sm:$0xf0]   ;;  %218 = vst [vmem:[#allocation0 + $0x2a8] sm:$0xf] %v1474_v42 }
  0x44   :  { %223 = vst [vmem:[#allocation0 + $0x2a0] sm:$0xf] %v1475_v43  ;;  %v1476_v45 = vld [vmem:[%s2387_s0 + $0x14c] sm:$0xf]  ;;  %v1477_v46 = vld [vmem:[%s2387_s0 + $0x148] sm:$0xf] }
  0x45   :  { %228 = vst [vmem:[#allocation0 + $0x298] sm:$0xf] %v1476_v45  ;;  %v1478_v47 = vld [vmem:[%s2387_s0 + $0x144] sm:$0xf]  ;;  %v1479_v48 = vld [vmem:[%s2387_s0 + $0x140] sm:$0xf] }
  0x46   :  { %v869_v49 = vld [vmem:[#allocation0 + $0x83] ss:$8 sm:$0xf]   ;;  %233 = vst [vmem:[#allocation0 + $0x290] sm:$0xf] %v1477_v46 }
  0x47   :  { %238 = vst [vmem:[#allocation0 + $0x288] sm:$0xf] %v1478_v47  ;;  %243 = vst [vmem:[#allocation0 + $0x280] sm:$0xf] %v1479_v48  ;;  %v1440_v50 = vld [vmem:[%s2387_s0 + $0x1dc] sm:$0xf]  ;;  %v873_v51 = vsel %vm642_vm0, %v871_v44, %v869_v49 }
  0x48   :  { %48 = vst [vmem:[#allocation0 + $0x3b8] sm:$0xf] %v1440_v50  ;;  %v1441_v52 = vld [vmem:[%s2387_s0 + $0x1d8] sm:$0xf]  ;;  %v1442_v53 = vld [vmem:[%s2387_s0 + $0x1d4] sm:$0xf]  ;;  %874 = vrot.lane.b32.xlu0 %v873_v51, %s1622_s10 }
  0x49   :  { %v1443_v54 = vld [vmem:[%s2387_s0 + $0x1d0] sm:$0xf]  ;;  %53 = vst [vmem:[#allocation0 + $0x3b0] sm:$0xf] %v1441_v52  ;;  %58 = vst [vmem:[#allocation0 + $0x3a8] sm:$0xf] %v1442_v53 }
  0x4a   :  { %v882_v55 = vld [vmem:[#allocation0 + $0x183] ss:$8 sm:$0xf0]   ;;  %63 = vst [vmem:[#allocation0 + $0x3a0] sm:$0xf] %v1443_v54 }
  0x4b   :  { %v1444_v56 = vld [vmem:[%s2387_s0 + $0x1cc] sm:$0xf]  ;;  %v1445_v57 = vld [vmem:[%s2387_s0 + $0x1c8] sm:$0xf]  ;;  %v1446_v58 = vld [vmem:[%s2387_s0 + $0x1c4] sm:$0xf] }
  0x4c   :  { %68 = vst [vmem:[#allocation0 + $0x398] sm:$0xf] %v1444_v56  ;;  %v1447_v59 = vld [vmem:[%s2387_s0 + $0x1c0] sm:$0xf]  ;;  %73 = vst [vmem:[#allocation0 + $0x390] sm:$0xf] %v1445_v57 }
  0x4d   :  { %v880_v60 = vld [vmem:[#allocation0 + $0x183] ss:$8 sm:$0xf]   ;;  %78 = vst [vmem:[#allocation0 + $0x388] sm:$0xf] %v1446_v58 }
  0x4e   :  { %83 = vst [vmem:[#allocation0 + $0x380] sm:$0xf] %v1447_v59  ;;  %v1528_v61 = vld [vmem:[%s2387_s0 + $0x7c] sm:$0xf]  ;;  %v884_v62 = vsel %vm642_vm0, %v882_v55, %v880_v60  ;;  %v1529_v0 = vld [vmem:[%s2387_s0 + $0x78] sm:$0xf] }
  0x4f   :  { %v893_v63 = vld [vmem:[#allocation0 + $0x283] ss:$8 sm:$0xf0]   ;;  %488 = vst [vmem:[#allocation0 + $0xf8] sm:$0xf] %v1528_v61  ;;  %885 = vrot.lane.b32.xlu1 %v884_v62, %s1622_s10 }
  0x50   :  { %493 = vst [vmem:[#allocation0 + $0xf0] sm:$0xf] %v1529_v0  ;;  %v1530_v1 = vld [vmem:[%s2387_s0 + $0x74] sm:$0xf]  ;;  %v1531_v2 = vld [vmem:[%s2387_s0 + $0x70] sm:$0xf] }
  0x51   :  { %v1532_v3 = vld [vmem:[%s2387_s0 + $0x6c] sm:$0xf]  ;;  %v891_v4 = vld [vmem:[#allocation0 + $0x283] ss:$8 sm:$0xf]  }
  0x52   :  { %498 = vst [vmem:[#allocation0 + $0xe8] sm:$0xf] %v1530_v1  ;;  %503 = vst [vmem:[#allocation0 + $0xe0] sm:$0xf] %v1531_v2  ;;  %v1533_v5 = vld [vmem:[%s2387_s0 + $0x68] sm:$0xf]  ;;  %v895_v6 = vsel %vm642_vm0, %v893_v63, %v891_v4 }
  0x53   :  { %508 = vst [vmem:[#allocation0 + $0xd8] sm:$0xf] %v1532_v3  ;;  %513 = vst [vmem:[#allocation0 + $0xd0] sm:$0xf] %v1533_v5  ;;  %v1534_v7 = vld [vmem:[%s2387_s0 + $0x64] sm:$0xf]  ;;  %896 = vrot.lane.b32.xlu0 %v895_v6, %s1622_s10 }
  0x54   :  { %v1535_v8 = vld [vmem:[%s2387_s0 + $0x60] sm:$0xf]  ;;  %v1496_v9 = vld [vmem:[%s2387_s0 + $0xfc] sm:$0xf]  ;;  %518 = vst [vmem:[#allocation0 + $0xc8] sm:$0xf] %v1534_v7 }
  0x55   :  { %v904_v10 = vld [vmem:[#allocation0 + $0x383] ss:$8 sm:$0xf0]   ;;  %523 = vst [vmem:[#allocation0 + $0xc0] sm:$0xf] %v1535_v8 }
  0x56   :  { %328 = vst [vmem:[#allocation0 + $0x1f8] sm:$0xf] %v1496_v9  ;;  %v1497_v11 = vld [vmem:[%s2387_s0 + $0xf8] sm:$0xf]  ;;  %v1498_v12 = vld [vmem:[%s2387_s0 + $0xf4] sm:$0xf] }
  0x57   :  { %333 = vst [vmem:[#allocation0 + $0x1f0] sm:$0xf] %v1497_v11  ;;  %v1499_v13 = vld [vmem:[%s2387_s0 + $0xf0] sm:$0xf]  ;;  %v1500_v14 = vld [vmem:[%s2387_s0 + $0xec] sm:$0xf] }
  0x58   :  { %v902_v15 = vld [vmem:[#allocation0 + $0x383] ss:$8 sm:$0xf]   ;;  %338 = vst [vmem:[#allocation0 + $0x1e8] sm:$0xf] %v1498_v12 }
  0x59   :  { %343 = vst [vmem:[#allocation0 + $0x1e0] sm:$0xf] %v1499_v13  ;;  %348 = vst [vmem:[#allocation0 + $0x1d8] sm:$0xf] %v1500_v14  ;;  %v1501_v16 = vld [vmem:[%s2387_s0 + $0xe8] sm:$0xf]  ;;  %v906_v17 = vsel %vm642_vm0, %v904_v10, %v902_v15 }
  0x5a   :  { %353 = vst [vmem:[#allocation0 + $0x1d0] sm:$0xf] %v1501_v16  ;;  %v1502_v18 = vld [vmem:[%s2387_s0 + $0xe4] sm:$0xf]  ;;  %v1503_v19 = vld [vmem:[%s2387_s0 + $0xe0] sm:$0xf]  ;;  %907 = vrot.lane.b32.xlu1 %v906_v17, %s1622_s10 }
  0x5b   :  { %v1464_v20 = vld [vmem:[%s2387_s0 + $0x17c] sm:$0xf]  ;;  %358 = vst [vmem:[#allocation0 + $0x1c8] sm:$0xf] %v1502_v18  ;;  %363 = vst [vmem:[#allocation0 + $0x1c0] sm:$0xf] %v1503_v19 }
  0x5c   :  { %168 = vst [vmem:[#allocation0 + $0x2f8] sm:$0xf] %v1464_v20  ;;  %v1465_v21 = vld [vmem:[%s2387_s0 + $0x178] sm:$0xf]  ;;  %v1466_v22 = vld [vmem:[%s2387_s0 + $0x174] sm:$0xf] }
  0x5d   :  { %v1467_v23 = vld [vmem:[%s2387_s0 + $0x170] sm:$0xf]  ;;  %173 = vst [vmem:[#allocation0 + $0x2f0] sm:$0xf] %v1465_v21  ;;  %178 = vst [vmem:[#allocation0 + $0x2e8] sm:$0xf] %v1466_v22 }
  0x5e   :  { %v915_v24 = vld [vmem:[#allocation0 + $0xc3] ss:$8 sm:$0xf0]   ;;  %183 = vst [vmem:[#allocation0 + $0x2e0] sm:$0xf] %v1467_v23 }
  0x5f   :  { %v1468_v25 = vld [vmem:[%s2387_s0 + $0x16c] sm:$0xf]  ;;  %v1469_v26 = vld [vmem:[%s2387_s0 + $0x168] sm:$0xf]  ;;  %v1470_v27 = vld [vmem:[%s2387_s0 + $0x164] sm:$0xf] }
  0x60   :  { %188 = vst [vmem:[#allocation0 + $0x2d8] sm:$0xf] %v1468_v25  ;;  %v1471_v28 = vld [vmem:[%s2387_s0 + $0x160] sm:$0xf]  ;;  %193 = vst [vmem:[#allocation0 + $0x2d0] sm:$0xf] %v1469_v26 }
  0x61   :  { %v913_v29 = vld [vmem:[#allocation0 + $0xc3] ss:$8 sm:$0xf]   ;;  %198 = vst [vmem:[#allocation0 + $0x2c8] sm:$0xf] %v1470_v27 }
  0x62   :  { %203 = vst [vmem:[#allocation0 + $0x2c0] sm:$0xf] %v1471_v28  ;;  %v1432_v30 = vld [vmem:[%s2387_s0 + $0x1fc] sm:$0xf]  ;;  %v917_v31 = vsel %vm642_vm0, %v915_v24, %v913_v29  ;;  %v1433_v32 = vld [vmem:[%s2387_s0 + $0x1f8] sm:$0xf] }
  0x63   :  { %8 = vst [vmem:[#allocation0 + $0x3f8] sm:$0xf] %v1432_v30  ;;  %v1434_v33 = vld [vmem:[%s2387_s0 + $0x1f4] sm:$0xf]  ;;  %v1435_v34 = vld [vmem:[%s2387_s0 + $0x1f0] sm:$0xf]  ;;  %918 = vrot.lane.b32.xlu0 %v917_v31, %s1622_s10 }
  0x64   :  { %v926_v35 = vld [vmem:[#allocation0 + $0x1c3] ss:$8 sm:$0xf0]   ;;  %13 = vst [vmem:[#allocation0 + $0x3f0] sm:$0xf] %v1433_v32 }
  0x65   :  { %18 = vst [vmem:[#allocation0 + $0x3e8] sm:$0xf] %v1434_v33  ;;  %23 = vst [vmem:[#allocation0 + $0x3e0] sm:$0xf] %v1435_v34  ;;  %v1436_v36 = vld [vmem:[%s2387_s0 + $0x1ec] sm:$0xf] }
  0x66   :  { %28 = vst [vmem:[#allocation0 + $0x3d8] sm:$0xf] %v1436_v36  ;;  %v1437_v37 = vld [vmem:[%s2387_s0 + $0x1e8] sm:$0xf]  ;;  %v1438_v38 = vld [vmem:[%s2387_s0 + $0x1e4] sm:$0xf] }
  0x67   :  { %v1439_v39 = vld [vmem:[%s2387_s0 + $0x1e0] sm:$0xf]  ;;  %33 = vst [vmem:[#allocation0 + $0x3d0] sm:$0xf] %v1437_v37  ;;  %38 = vst [vmem:[#allocation0 + $0x3c8] sm:$0xf] %v1438_v38 }
  0x68   :  { %v924_v40 = vld [vmem:[#allocation0 + $0x1c3] ss:$8 sm:$0xf]   ;;  %43 = vst [vmem:[#allocation0 + $0x3c0] sm:$0xf] %v1439_v39  ;;  %s1623_s0 = smov 64  }
  0x69   :  { %v928_v41 = vsel %vm642_vm0, %v926_v35, %v924_v40  ;;  %v937_v42 = vld [vmem:[#allocation0 + $0x2c3] ss:$8 sm:$0xf0]   ;;  %v957_v43 = vld [vmem:[#allocation0 + $0x2] ss:$8 sm:$0xf]  }
  0x6a   :  { %929 = vrot.lane.b32.xlu1 %v928_v41, %s1622_s10  ;;  %v935_v44 = vld [vmem:[#allocation0 + $0x2c3] ss:$8 sm:$0xf]   ;;  %v959_v45 = vld [vmem:[#allocation0 + $0x2] ss:$8 sm:$0xf0]  }
  0x6b   :  { %v939_v46 = vsel %vm642_vm0, %v937_v42, %v935_v44  ;;  %v967_v48 = vld [vmem:[#allocation0 + $0x102] ss:$8 sm:$0xf]   ;;  %v961_v49 = vsel %vm642_vm0, %v959_v45, %v957_v43  ;;  %v1132_v29 = vld [vmem:[#allocation0 + $0x1] ss:$8 sm:$0xf]  }
  0x6c   :  { %940 = vrot.lane.b32.xlu0 %v939_v46, %s1622_s10  ;;  %v948_v47 = vld [vmem:[#allocation0 + $0x3c3] ss:$8 sm:$0xf0]   ;;  %v969_v50 = vld [vmem:[#allocation0 + $0x102] ss:$8 sm:$0xf0]  }
  0x6d   :  { %v978_v51 = vld [vmem:[#allocation0 + $0x202] ss:$8 sm:$0xf]   ;;  %v971_v55 = vsel %vm642_vm0, %v969_v50, %v967_v48  ;;  %v1134_v32 = vld [vmem:[#allocation0 + $0x1] ss:$8 sm:$0xf0]  }
  0x6e   :  { %v980_v53 = vld [vmem:[#allocation0 + $0x202] ss:$8 sm:$0xf0]   ;;  %v640_v33 = vld [vmem:[#allocation0] ss:$8 sm:$0xf]  }
  0x6f   :  { %v946_v52 = vld [vmem:[#allocation0 + $0x3c3] ss:$8 sm:$0xf]   ;;  %v982_v56 = vsel %vm642_vm0, %v980_v53, %v978_v51  ;;  %v989_v57 = vld [vmem:[#allocation0 + $0x302] ss:$8 sm:$0xf]  }
  0x70   :  { %v950_v54 = vsel %vm642_vm0, %v948_v47, %v946_v52  ;;  %962 = vrot.lane.b32.xlu0 %v961_v49, %s1623_s0  ;;  %v991_v58 = vld [vmem:[#allocation0 + $0x302] ss:$8 sm:$0xf0]   ;;  %v641_v34 = vld [vmem:[#allocation0] ss:$8 sm:$0xf0]   ;;  %v1136_v47 = vsel %vm642_vm0, %v1134_v32, %v1132_v29 }
  0x71   :  { %951 = vrot.lane.b32.xlu1 %v950_v54, %s1622_s10  ;;  %v1000_v59 = vld [vmem:[#allocation0 + $0x42] ss:$8 sm:$0xf]   ;;  %v993_v61 = vsel %vm642_vm0, %v991_v58, %v989_v57  ;;  %v710_v35 = vld [vmem:[#allocation0 + $0x200] ss:$8 sm:$0xf]   ;;  %v643_v36 = vsel %vm642_vm0, %v641_v34, %v640_v33 }
  0x72   :  { %v1002_v60 = vld [vmem:[#allocation0 + $0x42] ss:$8 sm:$0xf0]   ;;  %v712_v37 = vld [vmem:[#allocation0 + $0x200] ss:$8 sm:$0xf0]  }
  0x73   :  { %v1004_v62 = vsel %vm642_vm0, %v1002_v60, %v1000_v59  ;;  %v1011_v63 = vld [vmem:[#allocation0 + $0x142] ss:$8 sm:$0xf]   ;;  %v674_v38 = vld [vmem:[#allocation0 + $0x100] ss:$8 sm:$0xf]   ;;  %v714_v43 = vsel %vm642_vm0, %v712_v37, %v710_v35 }
  0x74   :  { %983 = vrot.lane.b32.xlu0 %v982_v56, %s1623_s0  ;;  %v1013_v0 = vld [vmem:[#allocation0 + $0x142] ss:$8 sm:$0xf0]   ;;  %v1142_v39 = vld [vmem:[#allocation0 + $0x101] ss:$8 sm:$0xf]  }
  0x75   :  { %972 = vrot.lane.b32.xlu1 %v971_v55, %s1623_s0  ;;  %v1022_v1 = vld [vmem:[#allocation0 + $0x242] ss:$8 sm:$0xf]   ;;  %v1015_v3 = vsel %vm642_vm0, %v1013_v0, %v1011_v63  ;;  %v1144_v40 = vld [vmem:[#allocation0 + $0x101] ss:$8 sm:$0xf0]  }
  0x76   :  { %v1024_v2 = vld [vmem:[#allocation0 + $0x242] ss:$8 sm:$0xf0]   ;;  %v1153_v41 = vld [vmem:[#allocation0 + $0x201] ss:$8 sm:$0xf]   ;;  %v1146_v0 = vsel %vm642_vm0, %v1144_v40, %v1142_v39 }
  0x77   :  { %v1026_v4 = vsel %vm642_vm0, %v1024_v2, %v1022_v1  ;;  %v1033_v5 = vld [vmem:[#allocation0 + $0x342] ss:$8 sm:$0xf]   ;;  %v1155_v42 = vld [vmem:[#allocation0 + $0x201] ss:$8 sm:$0xf0]  }
  0x78   :  { %1005 = vrot.lane.b32.xlu0 %v1004_v62, %s1623_s0  ;;  %v1035_v6 = vld [vmem:[#allocation0 + $0x342] ss:$8 sm:$0xf0]   ;;  %645 = vst.msk [vmem:[%s2388_s1] sm:$0xff] %vm644_vm1, %v643_v36   ;;  %1566 = vst.msk [vmem:[%s2388_s1 + $0x40] sm:$0xff] %vm644_vm1, %v714_v43   ;;  %v1157_v1 = vsel %vm642_vm0, %v1155_v42, %v1153_v41 }
  0x79   :  { %994 = vrot.lane.b32.xlu1 %v993_v61, %s1623_s0  ;;  %v1044_v7 = vld [vmem:[#allocation0 + $0x82] ss:$8 sm:$0xf]   ;;  %v1037_v9 = vsel %vm642_vm0, %v1035_v6, %v1033_v5  ;;  %v676_v44 = vld [vmem:[#allocation0 + $0x100] ss:$8 sm:$0xf0]  }
  0x7a   :  { %v1046_v8 = vld [vmem:[#allocation0 + $0x82] ss:$8 sm:$0xf0]   ;;  %v746_v45 = vld [vmem:[#allocation0 + $0x300] ss:$8 sm:$0xf]   ;;  %v678_v48 = vsel %vm642_vm0, %v676_v44, %v674_v38 }
  0x7b   :  { %v1048_v10 = vsel %vm642_vm0, %v1046_v8, %v1044_v7  ;;  %v1055_v11 = vld [vmem:[#allocation0 + $0x182] ss:$8 sm:$0xf]   ;;  %v748_v49 = vld [vmem:[#allocation0 + $0x300] ss:$8 sm:$0xf0]  }
  0x7c   :  { %1027 = vrot.lane.b32.xlu0 %v1026_v4, %s1623_s0  ;;  %v1057_v12 = vld [vmem:[#allocation0 + $0x182] ss:$8 sm:$0xf0]   ;;  %v647_v50 = vld [vmem:[#allocation0 + $0x40] ss:$8 sm:$0xf]   ;;  %v750_v51 = vsel %vm642_vm0, %v748_v49, %v746_v45 }
  0x7d   :  { %1016 = vrot.lane.b32.xlu1 %v1015_v3, %s1623_s0  ;;  %v1066_v13 = vld [vmem:[#allocation0 + $0x282] ss:$8 sm:$0xf]   ;;  %v1059_v15 = vsel %vm642_vm0, %v1057_v12, %v1055_v11  ;;  %1562 = vst.msk [vmem:[%s2388_s1 + $0x20] sm:$0xff] %vm644_vm1, %v678_v48   ;;  %1570 = vst.msk [vmem:[%s2388_s1 + $0x60] sm:$0xff] %vm644_vm1, %v750_v51  }
  0x7e   :  { %v1068_v14 = vld [vmem:[#allocation0 + $0x282] ss:$8 sm:$0xf0]   ;;  %v649_v52 = vld [vmem:[#allocation0 + $0x40] ss:$8 sm:$0xf0]  }
  0x7f   :  { %v1070_v16 = vsel %vm642_vm0, %v1068_v14, %v1066_v13  ;;  %v1077_v17 = vld [vmem:[#allocation0 + $0x382] ss:$8 sm:$0xf]   ;;  %v683_v53 = vld [vmem:[#allocation0 + $0x140] ss:$8 sm:$0xf]   ;;  %v651_v54 = vsel %vm642_vm0, %v649_v52, %v647_v50 }
  0x80   :  { %1049 = vrot.lane.b32.xlu0 %v1048_v10, %s1623_s0  ;;  %v1079_v18 = vld [vmem:[#allocation0 + $0x382] ss:$8 sm:$0xf0]   ;;  %v685_v55 = vld [vmem:[#allocation0 + $0x140] ss:$8 sm:$0xf0]  }
  0x81   :  { %1038 = vrot.lane.b32.xlu1 %v1037_v9, %s1623_s0  ;;  %v1088_v19 = vld [vmem:[#allocation0 + $0xc2] ss:$8 sm:$0xf]   ;;  %v1081_v21 = vsel %vm642_vm0, %v1079_v18, %v1077_v17  ;;  %v719_v56 = vld [vmem:[#allocation0 + $0x240] ss:$8 sm:$0xf]   ;;  %v687_v61 = vsel %vm642_vm0, %v685_v55, %v683_v53 }
  0x82   :  { %v1090_v20 = vld [vmem:[#allocation0 + $0xc2] ss:$8 sm:$0xf0]   ;;  %v1164_v57 = vld [vmem:[#allocation0 + $0x301] ss:$8 sm:$0xf]  }
  0x83   :  { %v1092_v22 = vsel %vm642_vm0, %v1090_v20, %v1088_v19  ;;  %v1099_v23 = vld [vmem:[#allocation0 + $0x1c2] ss:$8 sm:$0xf]   ;;  %v1166_v58 = vld [vmem:[#allocation0 + $0x301] ss:$8 sm:$0xf0]  }
  0x84   :  { %1071 = vrot.lane.b32.xlu0 %v1070_v16, %s1623_s0  ;;  %v1101_v24 = vld [vmem:[#allocation0 + $0x1c2] ss:$8 sm:$0xf0]   ;;  %v1175_v59 = vld [vmem:[#allocation0 + $0x41] ss:$8 sm:$0xf]   ;;  %v1168_v18 = vsel %vm642_vm0, %v1166_v58, %v1164_v57 }
  0x85   :  { %1060 = vrot.lane.b32.xlu1 %v1059_v15, %s1623_s0  ;;  %v1110_v25 = vld [vmem:[#allocation0 + $0x2c2] ss:$8 sm:$0xf]   ;;  %v1103_v30 = vsel %vm642_vm0, %v1101_v24, %v1099_v23  ;;  %v1177_v60 = vld [vmem:[#allocation0 + $0x41] ss:$8 sm:$0xf0]  }
  0x86   :  { %v1112_v26 = vld [vmem:[#allocation0 + $0x2c2] ss:$8 sm:$0xf0]   ;;  %1559 = vst.msk [vmem:[%s2388_s1 + $0x8] sm:$0xff] %vm644_vm1, %v651_v54   ;;  %1563 = vst.msk [vmem:[%s2388_s1 + $0x28] sm:$0xff] %vm644_vm1, %v687_v61   ;;  %v1179_v19 = vsel %vm642_vm0, %v1177_v60, %v1175_v59 }
  0x87   :  { %v1121_v27 = vld [vmem:[#allocation0 + $0x3c2] ss:$8 sm:$0xf]   ;;  %v1114_v31 = vsel %vm642_vm0, %v1112_v26, %v1110_v25  ;;  %v721_v62 = vld [vmem:[#allocation0 + $0x240] ss:$8 sm:$0xf0]   ;;  %v788_v59 = vpop.permute.xlu0 %787  }
  0x88   :  { %1093 = vrot.lane.b32.xlu0 %v1092_v22, %s1623_s0  ;;  %v1123_v28 = vld [vmem:[#allocation0 + $0x3c2] ss:$8 sm:$0xf0]   ;;  %v755_v63 = vld [vmem:[#allocation0 + $0x340] ss:$8 sm:$0xf]   ;;  %v723_v2 = vsel %vm642_vm0, %v721_v62, %v719_v56 }
  0x89   :  { %1082 = vrot.lane.b32.xlu1 %v1081_v21, %s1623_s0  ;;  %v1125_v46 = vsel %vm642_vm0, %v1123_v28, %v1121_v27  ;;  %v757_v3 = vld [vmem:[#allocation0 + $0x340] ss:$8 sm:$0xf0]   ;;  %1567 = vst.msk [vmem:[%s2388_s1 + $0x48] sm:$0xff] %vm644_vm1, %v723_v2  }
  0x8a   :  { %v656_v4 = vld [vmem:[#allocation0 + $0x80] ss:$8 sm:$0xf]   ;;  %v759_v5 = vsel %vm642_vm0, %v757_v3, %v755_v63  ;;  %v1186_v11 = vld [vmem:[#allocation0 + $0x141] ss:$8 sm:$0xf]  }
  0x8b   :  { %v658_v6 = vld [vmem:[#allocation0 + $0x80] ss:$8 sm:$0xf0]   ;;  %1571 = vst.msk [vmem:[%s2388_s1 + $0x68] sm:$0xff] %vm644_vm1, %v759_v5  }
  0x8c   :  { %1115 = vrot.lane.b32.xlu0 %v1114_v31, %s1623_s0  ;;  %v692_v7 = vld [vmem:[#allocation0 + $0x180] ss:$8 sm:$0xf]   ;;  %v660_v8 = vsel %vm642_vm0, %v658_v6, %v656_v4  ;;  %v1188_v12 = vld [vmem:[#allocation0 + $0x141] ss:$8 sm:$0xf0]  }
  0x8d   :  { %1104 = vrot.lane.b32.xlu1 %v1103_v30, %s1623_s0  ;;  %v694_v9 = vld [vmem:[#allocation0 + $0x180] ss:$8 sm:$0xf0]   ;;  %v1197_v13 = vld [vmem:[#allocation0 + $0x241] ss:$8 sm:$0xf]   ;;  %v1190_v33 = vsel %vm642_vm0, %v1188_v12, %v1186_v11 }
  0x8e   :  { %v728_v10 = vld [vmem:[#allocation0 + $0x280] ss:$8 sm:$0xf]   ;;  %v1199_v14 = vld [vmem:[#allocation0 + $0x241] ss:$8 sm:$0xf0]   ;;  %v696_v15 = vsel %vm642_vm0, %v694_v9, %v692_v7 }
  0x8f   :  { %1560 = vst.msk [vmem:[%s2388_s1 + $0x10] sm:$0xff] %vm644_vm1, %v660_v8   ;;  %v730_v16 = vld [vmem:[#allocation0 + $0x280] ss:$8 sm:$0xf0]   ;;  %1564 = vst.msk [vmem:[%s2388_s1 + $0x30] sm:$0xff] %vm644_vm1, %v696_v15   ;;  %v1201_v34 = vsel %vm642_vm0, %v1199_v14, %v1197_v13 }
  0x90   :  { %1137 = vrot.lane.b32.xlu0 %v1136_v47, %s1624_s16  ;;  %v764_v17 = vld [vmem:[#allocation0 + $0x380] ss:$8 sm:$0xf]   ;;  %v732_v20 = vsel %vm642_vm0, %v730_v16, %v728_v10  ;;  %v1208_v29 = vld [vmem:[#allocation0 + $0x341] ss:$8 sm:$0xf]   ;;  %v798_v2 = vpop.permute.xlu0 %797  }
  0x91   :  { %1126 = vrot.lane.b32.xlu1 %v1125_v46, %s1623_s0  ;;  %v766_v21 = vld [vmem:[#allocation0 + $0x380] ss:$8 sm:$0xf0]   ;;  %1568 = vst.msk [vmem:[%s2388_s1 + $0x50] sm:$0xff] %vm644_vm1, %v732_v20  }
  0x92   :  { %v665_v22 = vld [vmem:[#allocation0 + $0xc0] ss:$8 sm:$0xf]   ;;  %v768_v23 = vsel %vm642_vm0, %v766_v21, %v764_v17  ;;  %v1210_v35 = vld [vmem:[#allocation0 + $0x341] ss:$8 sm:$0xf0]  }
  0x93   :  { %v667_v24 = vld [vmem:[#allocation0 + $0xc0] ss:$8 sm:$0xf0]   ;;  %1572 = vst.msk [vmem:[%s2388_s1 + $0x70] sm:$0xff] %vm644_vm1, %v768_v23   ;;  %v1212_v41 = vsel %vm642_vm0, %v1210_v35, %v1208_v29 }
  0x94   :  { %1158 = vrot.lane.b32.xlu0 %v1157_v1, %s1624_s16  ;;  %v701_v25 = vld [vmem:[#allocation0 + $0x1c0] ss:$8 sm:$0xf]   ;;  %v669_v26 = vsel %vm642_vm0, %v667_v24, %v665_v22  ;;  %v1219_v38 = vld [vmem:[#allocation0 + $0x81] ss:$8 sm:$0xf]  }
  0x95   :  { %1147 = vrot.lane.b32.xlu1 %v1146_v0, %s1624_s16  ;;  %v703_v27 = vld [vmem:[#allocation0 + $0x1c0] ss:$8 sm:$0xf0]   ;;  %1561 = vst.msk [vmem:[%s2388_s1 + $0x18] sm:$0xff] %vm644_vm1, %v669_v26   ;;  %v809_v0 = vpop.permute.xlu1 %808  }
  0x96   :  { %v737_v28 = vld [vmem:[#allocation0 + $0x2c0] ss:$8 sm:$0xf]   ;;  %v705_v30 = vsel %vm642_vm0, %v703_v27, %v701_v25  ;;  %v1221_v39 = vld [vmem:[#allocation0 + $0x81] ss:$8 sm:$0xf0]  }
  0x97   :  { %v739_v31 = vld [vmem:[#allocation0 + $0x2c0] ss:$8 sm:$0xf0]   ;;  %1565 = vst.msk [vmem:[%s2388_s1 + $0x38] sm:$0xff] %vm644_vm1, %v705_v30   ;;  %v1223_v42 = vsel %vm642_vm0, %v1221_v39, %v1219_v38 }
  0x98   :  { %1180 = vrot.lane.b32.xlu0 %v1179_v19, %s1624_s16  ;;  %v773_v32 = vld [vmem:[#allocation0 + $0x3c0] ss:$8 sm:$0xf]   ;;  %v741_v36 = vsel %vm642_vm0, %v739_v31, %v737_v28  ;;  %v1230_v43 = vld [vmem:[#allocation0 + $0x181] ss:$8 sm:$0xf]  }
  0x99   :  { %1169 = vrot.lane.b32.xlu1 %v1168_v18, %s1624_s16  ;;  %v775_v37 = vld [vmem:[#allocation0 + $0x3c0] ss:$8 sm:$0xf0]   ;;  %1569 = vst.msk [vmem:[%s2388_s1 + $0x58] sm:$0xff] %vm644_vm1, %v741_v36   ;;  %v820_v3 = vpop.permute.xlu1 %819  }
  0x9a   :  { %v777_v40 = vsel %vm642_vm0, %v775_v37, %v773_v32  ;;  %v1232_v44 = vld [vmem:[#allocation0 + $0x181] ss:$8 sm:$0xf0]   ;;  %790 = vst.msk [vmem:[%s2388_s1] sm:$0xff] %vm789_vm2, %v788_v59   ;;  %1575 = vst.msk [vmem:[%s2388_s1 + $0x40] sm:$0xff] %vm789_vm2, %v809_v0  }
  0x9b   :  { %1573 = vst.msk [vmem:[%s2388_s1 + $0x78] sm:$0xff] %vm644_vm1, %v777_v40   ;;  %v1241_v45 = vld [vmem:[#allocation0 + $0x281] ss:$8 sm:$0xf]   ;;  %v1234_v47 = vsel %vm642_vm0, %v1232_v44, %v1230_v43 }
  0x9c   :  { %1202 = vrot.lane.b32.xlu0 %v1201_v34, %s1624_s16  ;;  %v1243_v46 = vld [vmem:[#allocation0 + $0x281] ss:$8 sm:$0xf0]   ;;  %1574 = vst.msk [vmem:[%s2388_s1 + $0x20] sm:$0xff] %vm789_vm2, %v798_v2   ;;  %1576 = vst.msk [vmem:[%s2388_s1 + $0x60] sm:$0xff] %vm789_vm2, %v820_v3  }
  0x9d   :  { %1191 = vrot.lane.b32.xlu1 %v1190_v33, %s1624_s16  ;;  %v1245_v48 = vsel %vm642_vm0, %v1243_v46, %v1241_v45  ;;  %v1252_v49 = vld [vmem:[#allocation0 + $0x381] ss:$8 sm:$0xf]  }
  0x9e   :  { %v1254_v50 = vld [vmem:[#allocation0 + $0x381] ss:$8 sm:$0xf0]  }
  0x9f   :  { %v1263_v51 = vld [vmem:[#allocation0 + $0xc1] ss:$8 sm:$0xf]   ;;  %v1256_v53 = vsel %vm642_vm0, %v1254_v50, %v1252_v49 }
  0xa0   :  { %1224 = vrot.lane.b32.xlu0 %v1223_v42, %s1624_s16  ;;  %v1265_v52 = vld [vmem:[#allocation0 + $0xc1] ss:$8 sm:$0xf0]   ;;  %v831_v4 = vpop.permute.xlu0 %830  }
  0xa1   :  { %1213 = vrot.lane.b32.xlu1 %v1212_v41, %s1624_s16  ;;  %v1267_v54 = vsel %vm642_vm0, %v1265_v52, %v1263_v51  ;;  %v1274_v55 = vld [vmem:[#allocation0 + $0x1c1] ss:$8 sm:$0xf]   ;;  %1577 = vst.msk [vmem:[%s2388_s1 + $0x8] sm:$0xff] %vm789_vm2, %v831_v4  }
  0xa2   :  { %v1276_v56 = vld [vmem:[#allocation0 + $0x1c1] ss:$8 sm:$0xf0]  }
  0xa3   :  { %v1285_v57 = vld [vmem:[#allocation0 + $0x2c1] ss:$8 sm:$0xf]   ;;  %v1278_v60 = vsel %vm642_vm0, %v1276_v56, %v1274_v55 }
  0xa4   :  { %1246 = vrot.lane.b32.xlu0 %v1245_v48, %s1624_s16  ;;  %v1287_v58 = vld [vmem:[#allocation0 + $0x2c1] ss:$8 sm:$0xf0]  }
  0xa5   :  { %1235 = vrot.lane.b32.xlu1 %v1234_v47, %s1624_s16  ;;  %v1289_v61 = vsel %vm642_vm0, %v1287_v58, %v1285_v57  ;;  %v1296_v62 = vld [vmem:[#allocation0 + $0x3c1] ss:$8 sm:$0xf]  }
  0xa6   :  { %v1298_v63 = vld [vmem:[#allocation0 + $0x3c1] ss:$8 sm:$0xf0]   ;;  %v842_v5 = vpop.permute.xlu1 %841  }
  0xa7   :  { %v1300_v1 = vsel %vm642_vm0, %v1298_v63, %v1296_v62  ;;  %1578 = vst.msk [vmem:[%s2388_s1 + $0x28] sm:$0xff] %vm789_vm2, %v842_v5  }
  0xa8   :  { %1268 = vrot.lane.b32.xlu0 %v1267_v54, %s1624_s16 }
  0xa9   :  { %1257 = vrot.lane.b32.xlu1 %v1256_v53, %s1624_s16 }
  0xab   :  { %v853_v6 = vpop.permute.xlu0 %852  }
  0xac   :  { %1290 = vrot.lane.b32.xlu0 %v1289_v61, %s1624_s16  ;;  %1579 = vst.msk [vmem:[%s2388_s1 + $0x48] sm:$0xff] %vm789_vm2, %v853_v6  }
  0xad   :  { %1279 = vrot.lane.b32.xlu1 %v1278_v60, %s1624_s16 }
  0xb1   :  { %1301 = vrot.lane.b32.xlu1 %v1300_v1, %s1624_s16  ;;  %v864_v7 = vpop.permute.xlu1 %863  }
  0xb2   :  { %1580 = vst.msk [vmem:[%s2388_s1 + $0x68] sm:$0xff] %vm789_vm2, %v864_v7  }
  0xba   :  { %v875_v8 = vpop.permute.xlu0 %874  }
  0xbb   :  { %1581 = vst.msk [vmem:[%s2388_s1 + $0x10] sm:$0xff] %vm789_vm2, %v875_v8  }
  0xc1   :  { %v886_v9 = vpop.permute.xlu1 %885  }
  0xc2   :  { %1582 = vst.msk [vmem:[%s2388_s1 + $0x30] sm:$0xff] %vm789_vm2, %v886_v9  }
  0xc5   :  { %v897_v10 = vpop.permute.xlu0 %896  }
  0xc6   :  { %1583 = vst.msk [vmem:[%s2388_s1 + $0x50] sm:$0xff] %vm789_vm2, %v897_v10  }
  0xcc   :  { %v908_v11 = vpop.permute.xlu1 %907  }
  0xcd   :  { %1584 = vst.msk [vmem:[%s2388_s1 + $0x70] sm:$0xff] %vm789_vm2, %v908_v11  }
  0xd5   :  { %v919_v12 = vpop.permute.xlu0 %918  }
  0xd6   :  { %1585 = vst.msk [vmem:[%s2388_s1 + $0x18] sm:$0xff] %vm789_vm2, %v919_v12  }
  0xdc   :  { %v930_v13 = vpop.permute.xlu1 %929  }
  0xdd   :  { %1586 = vst.msk [vmem:[%s2388_s1 + $0x38] sm:$0xff] %vm789_vm2, %v930_v13  }
  0xde   :  { %v941_v14 = vpop.permute.xlu0 %940  }
  0xdf   :  { %1587 = vst.msk [vmem:[%s2388_s1 + $0x58] sm:$0xff] %vm789_vm2, %v941_v14  }
  0xe2   :  { %v963_v16 = vpop.permute.xlu0 %962  }
  0xe3   :  { %v952_v15 = vpop.permute.xlu1 %951   ;;  %965 = vst.msk [vmem:[%s2388_s1] sm:$0xff] %vm964_vm3, %v963_v16  }
  0xe4   :  { %1588 = vst.msk [vmem:[%s2388_s1 + $0x78] sm:$0xff] %vm789_vm2, %v952_v15  }
  0xe6   :  { %v984_v18 = vpop.permute.xlu0 %983  }
  0xe7   :  { %v973_v17 = vpop.permute.xlu1 %972   ;;  %1590 = vst.msk [vmem:[%s2388_s1 + $0x40] sm:$0xff] %vm964_vm3, %v984_v18  }
  0xe8   :  { %1589 = vst.msk [vmem:[%s2388_s1 + $0x20] sm:$0xff] %vm964_vm3, %v973_v17  }
  0xea   :  { %v1006_v20 = vpop.permute.xlu0 %1005  }
  0xeb   :  { %v995_v19 = vpop.permute.xlu1 %994   ;;  %1592 = vst.msk [vmem:[%s2388_s1 + $0x8] sm:$0xff] %vm964_vm3, %v1006_v20  }
  0xec   :  { %1591 = vst.msk [vmem:[%s2388_s1 + $0x60] sm:$0xff] %vm964_vm3, %v995_v19  }
  0xee   :  { %v1028_v22 = vpop.permute.xlu0 %1027  }
  0xef   :  { %v1017_v21 = vpop.permute.xlu1 %1016   ;;  %1594 = vst.msk [vmem:[%s2388_s1 + $0x48] sm:$0xff] %vm964_vm3, %v1028_v22  }
  0xf0   :  { %1593 = vst.msk [vmem:[%s2388_s1 + $0x28] sm:$0xff] %vm964_vm3, %v1017_v21  }
  0xf2   :  { %v1050_v24 = vpop.permute.xlu0 %1049  }
  0xf3   :  { %v1039_v23 = vpop.permute.xlu1 %1038   ;;  %1596 = vst.msk [vmem:[%s2388_s1 + $0x10] sm:$0xff] %vm964_vm3, %v1050_v24  }
  0xf4   :  { %1595 = vst.msk [vmem:[%s2388_s1 + $0x68] sm:$0xff] %vm964_vm3, %v1039_v23  }
  0xf6   :  { %v1072_v26 = vpop.permute.xlu0 %1071  }
  0xf7   :  { %v1061_v25 = vpop.permute.xlu1 %1060   ;;  %1598 = vst.msk [vmem:[%s2388_s1 + $0x50] sm:$0xff] %vm964_vm3, %v1072_v26  }
  0xf8   :  { %1597 = vst.msk [vmem:[%s2388_s1 + $0x30] sm:$0xff] %vm964_vm3, %v1061_v25  }
  0xfa   :  { %v1094_v28 = vpop.permute.xlu0 %1093  }
  0xfb   :  { %v1083_v27 = vpop.permute.xlu1 %1082   ;;  %1600 = vst.msk [vmem:[%s2388_s1 + $0x18] sm:$0xff] %vm964_vm3, %v1094_v28  }
  0xfc   :  { %1599 = vst.msk [vmem:[%s2388_s1 + $0x70] sm:$0xff] %vm964_vm3, %v1083_v27  }
  0xfe   :  { %v1116_v30 = vpop.permute.xlu0 %1115  }
  0xff   :  { %v1105_v29 = vpop.permute.xlu1 %1104   ;;  %1602 = vst.msk [vmem:[%s2388_s1 + $0x58] sm:$0xff] %vm964_vm3, %v1116_v30  }
 0x100   :  { %1601 = vst.msk [vmem:[%s2388_s1 + $0x38] sm:$0xff] %vm964_vm3, %v1105_v29  }
 0x102   :  { %v1138_v32 = vpop.permute.xlu0 %1137  }
 0x103   :  { %v1127_v31 = vpop.permute.xlu1 %1126   ;;  %1140 = vst.msk [vmem:[%s2388_s1] sm:$0xff] %vm1139_vm4, %v1138_v32  }
 0x104   :  { %1603 = vst.msk [vmem:[%s2388_s1 + $0x78] sm:$0xff] %vm964_vm3, %v1127_v31  }
 0x106   :  { %v1159_v34 = vpop.permute.xlu0 %1158  }
 0x107   :  { %v1148_v33 = vpop.permute.xlu1 %1147   ;;  %1605 = vst.msk [vmem:[%s2388_s1 + $0x40] sm:$0xff] %vm1139_vm4, %v1159_v34  }
 0x108   :  { %1604 = vst.msk [vmem:[%s2388_s1 + $0x20] sm:$0xff] %vm1139_vm4, %v1148_v33  }
 0x10a   :  { %v1181_v36 = vpop.permute.xlu0 %1180  }
 0x10b   :  { %v1170_v35 = vpop.permute.xlu1 %1169   ;;  %1607 = vst.msk [vmem:[%s2388_s1 + $0x8] sm:$0xff] %vm1139_vm4, %v1181_v36  }
 0x10c   :  { %1606 = vst.msk [vmem:[%s2388_s1 + $0x60] sm:$0xff] %vm1139_vm4, %v1170_v35  }
 0x10e   :  { %v1203_v38 = vpop.permute.xlu0 %1202  }
 0x10f   :  { %v1192_v37 = vpop.permute.xlu1 %1191   ;;  %1609 = vst.msk [vmem:[%s2388_s1 + $0x48] sm:$0xff] %vm1139_vm4, %v1203_v38  }
 0x110   :  { %1608 = vst.msk [vmem:[%s2388_s1 + $0x28] sm:$0xff] %vm1139_vm4, %v1192_v37  }
 0x112   :  { %v1225_v40 = vpop.permute.xlu0 %1224  }
 0x113   :  { %v1214_v39 = vpop.permute.xlu1 %1213   ;;  %1611 = vst.msk [vmem:[%s2388_s1 + $0x10] sm:$0xff] %vm1139_vm4, %v1225_v40  }
 0x114   :  { %1610 = vst.msk [vmem:[%s2388_s1 + $0x68] sm:$0xff] %vm1139_vm4, %v1214_v39  }
 0x116   :  { %v1247_v42 = vpop.permute.xlu0 %1246  }
 0x117   :  { %v1236_v41 = vpop.permute.xlu1 %1235   ;;  %1613 = vst.msk [vmem:[%s2388_s1 + $0x50] sm:$0xff] %vm1139_vm4, %v1247_v42  }
 0x118   :  { %1612 = vst.msk [vmem:[%s2388_s1 + $0x30] sm:$0xff] %vm1139_vm4, %v1236_v41  }
 0x11a   :  { %v1269_v44 = vpop.permute.xlu0 %1268  }
 0x11b   :  { %v1258_v43 = vpop.permute.xlu1 %1257   ;;  %1615 = vst.msk [vmem:[%s2388_s1 + $0x18] sm:$0xff] %vm1139_vm4, %v1269_v44  }
 0x11c   :  { %1614 = vst.msk [vmem:[%s2388_s1 + $0x70] sm:$0xff] %vm1139_vm4, %v1258_v43  }
 0x11e   :  { %v1291_v46 = vpop.permute.xlu0 %1290  }
 0x11f   :  { %v1280_v45 = vpop.permute.xlu1 %1279   ;;  %1617 = vst.msk [vmem:[%s2388_s1 + $0x58] sm:$0xff] %vm1139_vm4, %v1291_v46  }
 0x120   :  { %1616 = vst.msk [vmem:[%s2388_s1 + $0x38] sm:$0xff] %vm1139_vm4, %v1280_v45  }
 0x123   :  { %v1302_v47 = vpop.permute.xlu1 %1301  }
 0x124   :  { %1618 = vst.msk [vmem:[%s2388_s1 + $0x78] sm:$0xff] %vm1139_vm4, %v1302_v47  }

// kernel: forward.18
= control target key start
LH: loop header
LB: loop body
LE: loop exit
PB: predicated region body
PF: predicated region fallthrough
CT: control target
= control target key end

     0   :  { %v399_v0 = vmov 0.0|0.0   ;;  %vm400_vm0 = vmmov 0   ;;  %v401_v6 = vmov 0.0   ;;  %v212_v62 = vlaneseq  ;;  %s545_s3 = inlined_call_operand.vmem [shape: f32[128,128], index: 3, kind: input, shape index: {}]   ;;  %s546_s0 = inlined_call_operand.vmem [shape: f32[32,128], index: 0, kind: input, shape index: {}]   ;;  %s547_s1 = inlined_call_operand.vmem [shape: f32[1,128], index: 1, kind: input, shape index: {}]   ;;  %s548_s2 = inlined_call_operand.vmem [shape: f32[1,128], index: 2, kind: input, shape index: {}]   ;;  %s549_s4 = inlined_call_operand.vmem [shape: f32[32,128], index: 4, kind: output, shape index: {}]  }
   0x1   :  { %346 = vmatprep.subr.bf16.mxu0 %v399_v0  ;;  %v43_v1 = vld [vmem:[%s545_s3] sm:$0xff]  ;;  %v44_v2 = vld [vmem:[%s545_s3 + $0x8] sm:$0xff]  ;;  %370 = vmatprep.subr.bf16.mxu1 %v399_v0  ;;  %v45_v3 = vld [vmem:[%s545_s3 + $0x10] sm:$0xff] }
   0x2   :  { %v347_v4 = vpack.c.bf16 %v44_v2, %v43_v1  ;;  %v46_v5 = vld [vmem:[%s545_s3 + $0x18] sm:$0xff]  ;;  %308 = vmatprep.mubr.msk.f32.mxu0 %vm400_vm0, %v401_v6  ;;  %343 = vmatprep.mubr.msk.f32.mxu1 %vm400_vm0, %v401_v6  ;;  %v47_v8 = vld [vmem:[%s545_s3 + $0x20] sm:$0xff]  ;;  %v48_v9 = vld [vmem:[%s545_s3 + $0x28] sm:$0xff]  ;;  %v213_v63 = vshrl.u32 %v212_v62, 7 }
   0x3   :  { %v350_v7 = vpack.c.bf16 %v46_v5, %v45_v3  ;;  %v452_v10 = vld [vmem:[%s546_s0] sm:$0xff]  ;;  %v457_v11 = vld [vmem:[%s546_s0 + $0x8] sm:$0xff]  ;;  %v462_v12 = vld [vmem:[%s546_s0 + $0x10] sm:$0xff]  ;;  %v353_v17 = vpack.c.bf16 %v48_v9, %v47_v8 }
   0x4   :  { %348 = vmatpush3.bf16.msra.mxu0 %v347_v4  ;;  %372 = vmatpush3.bf16.msra.mxu1 %v347_v4  ;;  %v467_v13 = vld [vmem:[%s546_s0 + $0x18] sm:$0xff]  ;;  %v21_v14 = vadd.f32 %v457_v11, %v452_v10  ;;  %v30_v15 = vmul.f32 %v452_v10, %v452_v10  ;;  %v31_v16 = vmul.f32 %v457_v11, %v457_v11  ;;  %v49_v19 = vld [vmem:[%s545_s3 + $0x30] sm:$0xff]  ;;  %v51_v27 = vld [vmem:[%s545_s3 + $0x40] sm:$0xff]  ;;  %v214_v1 = vsub.s32 0, %v213_v63 }
   0x5   :  { %349 = vmatprep.subr.bf16.mxu0 %v399_v0  ;;  %373 = vmatprep.subr.bf16.mxu1 %v399_v0  ;;  %v32_v18 = vmul.f32 %v462_v12, %v462_v12  ;;  %v50_v20 = vld [vmem:[%s545_s3 + $0x38] sm:$0xff]  ;;  %v33_v22 = vmul.f32 %v467_v13, %v467_v13  ;;  %v52_v28 = vld [vmem:[%s545_s3 + $0x48] sm:$0xff]  ;;  %v53_v34 = vld [vmem:[%s545_s3 + $0x50] sm:$0xff] }
   0x6   :  { %v22_v21 = vadd.f32 %v21_v14, %v462_v12  ;;  %v34_v23 = vadd.f32 %v31_v16, %v30_v15  ;;  %v356_v26 = vpack.c.bf16 %v50_v20, %v49_v19  ;;  %v359_v33 = vpack.c.bf16 %v52_v28, %v51_v27  ;;  %v54_v35 = vld [vmem:[%s545_s3 + $0x58] sm:$0xff]  ;;  %v55_v40 = vld [vmem:[%s545_s3 + $0x60] sm:$0xff]  ;;  %v56_v41 = vld [vmem:[%s545_s3 + $0x68] sm:$0xff] }
   0x7   :  { %v362_v39 = vpack.c.bf16 %v54_v35, %v53_v34  ;;  %v365_v44 = vpack.c.bf16 %v56_v41, %v55_v40  ;;  %v57_v45 = vld [vmem:[%s545_s3 + $0x70] sm:$0xff]  ;;  %v58_v46 = vld [vmem:[%s545_s3 + $0x78] sm:$0xff]  ;;  %v209_v4 = vld [vmem:[%s548_s2] sm:$0x1] }
   0x8   :  { %351 = vmatpush3.bf16.msra.mxu0 %v350_v7  ;;  %375 = vmatpush3.bf16.msra.mxu1 %v350_v7  ;;  %v23_v24 = vadd.f32 %v22_v21, %v467_v13  ;;  %v35_v25 = vadd.f32 %v34_v23, %v32_v18  ;;  %v368_v49 = vpack.c.bf16 %v58_v46, %v57_v45 }
   0x9   :  { %352 = vmatprep.subr.bf16.mxu0 %v399_v0  ;;  %376 = vmatprep.subr.bf16.mxu1 %v399_v0 }
   0xa   :  { %v24_v29 = vrot.slane %v23_v24, 4  ;;  %v36_v30 = vadd.f32 %v35_v25, %v33_v22 }
   0xc   :  { %354 = vmatpush3.bf16.msra.mxu0 %v353_v17  ;;  %378 = vmatpush3.bf16.msra.mxu1 %v353_v17  ;;  %v25_v31 = vadd.f32 %v24_v29, %v23_v24  ;;  %v37_v32 = vrot.slane %v36_v30, 4 }
   0xd   :  { %355 = vmatprep.subr.bf16.mxu0 %v399_v0  ;;  %379 = vmatprep.subr.bf16.mxu1 %v399_v0 }
   0xe   :  { %v38_v36 = vadd.f32 %v37_v32, %v36_v30  ;;  %v26_v37 = vrot.slane %v25_v31, 2 }
  0x10   :  { %357 = vmatpush3.bf16.msra.mxu0 %v356_v26  ;;  %381 = vmatpush3.bf16.msra.mxu1 %v356_v26  ;;  %v39_v38 = vrot.slane %v38_v36, 2  ;;  %v27_v42 = vadd.f32 %v26_v37, %v25_v31 }
  0x11   :  { %358 = vmatprep.subr.bf16.mxu0 %v399_v0  ;;  %382 = vmatprep.subr.bf16.mxu1 %v399_v0 }
  0x12   :  { %v40_v43 = vadd.f32 %v39_v38, %v38_v36  ;;  %v28_v47 = vrot.slane %v27_v42, 1 }
  0x14   :  { %360 = vmatpush3.bf16.msra.mxu0 %v359_v33  ;;  %384 = vmatpush3.bf16.msra.mxu1 %v359_v33  ;;  %v41_v48 = vrot.slane %v40_v43, 1  ;;  %v29_v50 = vadd.f32 %v28_v47, %v27_v42 }
  0x15   :  { %361 = vmatprep.subr.bf16.mxu0 %v399_v0  ;;  %385 = vmatprep.subr.bf16.mxu1 %v399_v0 }
  0x16   :  { %v42_v51 = vadd.f32 %v41_v48, %v40_v43 }
  0x18   :  { %363 = vmatpush3.bf16.msra.mxu0 %v362_v39  ;;  %387 = vmatpush3.bf16.msra.mxu1 %v362_v39 }
  0x19   :  { %364 = vmatprep.subr.bf16.mxu0 %v399_v0  ;;  %388 = vmatprep.subr.bf16.mxu1 %v399_v0 }
  0x1c   :  { %366 = vmatpush3.bf16.msra.mxu0 %v365_v44  ;;  %390 = vmatpush3.bf16.msra.mxu1 %v365_v44 }
  0x1d   :  { %367 = vmatprep.subr.bf16.mxu0 %v399_v0  ;;  %391 = vmatprep.subr.bf16.mxu1 %v399_v0  ;;  %v207_v0 = vld [vmem:[%s547_s1] sm:$0x1] }
  0x20   :  { %369 = vmatpush3.bf16.msra.mxu0 %v368_v49  ;;  %393 = vmatpush3.bf16.msra.mxu1 %v368_v49 }
  0x23   :  { %309 = vmatmul.mubr.f32.vlgmr.msra.gmra.mrb[0].mxu0 %v29_v50  ;;  %344 = vmatmul.mubr.f32.vlgmr.msra.gmra.mrb[0].mxu1 %v42_v51 }
  0xf6   :  { %v125_v52 = vpop.f32.mrb[0].mxu0  ;;  %v195_v53 = vpop.f32.mrb[0].mxu1 }
  0xf7   :  { %v200_v54 = vmul.f32 0.0078125, %v125_v52  ;;  %v310_v55 = vpop.f32.mrb[1].mxu0  ;;  %v201_v56 = vmul.f32 0.0078125, %v195_v53  ;;  %v345_v57 = vpop.f32.mrb[1].mxu1 }
  0xf9   :  { %v202_v58 = vmul.f32 %v200_v54, %v200_v54 }
  0xfb   :  { %v203_v59 = vsub.f32 %v201_v56, %v202_v58 }
  0xfd   :  { %v204_v60 = vmax.f32 %v203_v59, 0.0 }
  0xff   :  { %v205_v61 = vadd.f32 1e-05, %v204_v60 }
 0x101   :  { %397 = vrsqrt.f32 %v205_v61 }
 0x10b   :  { %v398_v2 = vpop.eup %397 }
 0x10c   :  { %v208_v3 = vmul.f32 %v398_v2, %v207_v0 }
 0x10e   :  { %v210_v5 = vmul.f32 %v208_v3, %v200_v54  ;;  %v215_v6 = vrot.slane %v208_v3, %v214_v1 }
 0x110   :  { %v211_v7 = vsub.f32 %v209_v4, %v210_v5  ;;  %v216_v8 = vmul.f32 %v215_v6, %v452_v10  ;;  %v217_v9 = vmul.f32 %v215_v6, %v457_v11  ;;  %v218_v14 = vmul.f32 %v215_v6, %v462_v12 }
 0x111   :  { %v219_v15 = vmul.f32 %v215_v6, %v467_v13 }
 0x112   :  { %v224_v16 = vrot.slane %v211_v7, %v214_v1 }
 0x114   :  { %v226_v17 = vadd.f32 %v224_v16, %v216_v8  ;;  %v227_v18 = vadd.f32 %v224_v16, %v217_v9  ;;  %v228_v19 = vadd.f32 %v224_v16, %v218_v14  ;;  %v229_v20 = vadd.f32 %v224_v16, %v219_v15 }
 0x116   :  { %v230_v21 = vmax.f32 %v226_v17, 0.0  ;;  %v231_v22 = vmax.f32 %v227_v18, 0.0  ;;  %v232_v23 = vmax.f32 %v228_v19, 0.0  ;;  %v233_v24 = vmax.f32 %v229_v20, 0.0 }
 0x118   :  { %234 = vst [vmem:[%s549_s4] sm:$0xff] %v230_v21  ;;  %235 = vst [vmem:[%s549_s4 + $0x8] sm:$0xff] %v231_v22 }
 0x119   :  { %236 = vst [vmem:[%s549_s4 + $0x10] sm:$0xff] %v232_v23  ;;  %237 = vst [vmem:[%s549_s4 + $0x18] sm:$0xff] %v233_v24 }

// kernel: tile.133
= control target key start
LH: loop header
LB: loop body
LE: loop exit
PB: predicated region body
PF: predicated region fallthrough
CT: control target
= control target key end

     0   :  { %s888_s0 = inlined_call_operand.vmem [shape: f32[16,16], index: 0, kind: input, shape index: {}]   ;;  %s889_s1 = inlined_call_operand.vmem [shape: f32[8,16,8,16], index: 1, kind: output, shape index: {}]  }
   0x1   :  { %v4_v0 = vld [vmem:[%s888_s0] ss:$0 sm:$0xff]  ;;  %v311_v1 = vld [vmem:[%s888_s0 + $0x1] ss:$0 sm:$0xff]  ;;  %v320_v2 = vld [vmem:[%s888_s0 + $0x2] ss:$0 sm:$0xff] }
   0x2   :  { %5 = vst [vmem:[%s889_s1] sm:$0xff] %v4_v0  ;;  %304 = vst [vmem:[%s889_s1 + $0x80] sm:$0xff] %v4_v0  ;;  %v329_v3 = vld [vmem:[%s888_s0 + $0x3] ss:$0 sm:$0xff]  ;;  %v338_v4 = vld [vmem:[%s888_s0 + $0x4] ss:$0 sm:$0xff] }
   0x3   :  { %305 = vst [vmem:[%s889_s1 + $0x100] sm:$0xff] %v4_v0  ;;  %306 = vst [vmem:[%s889_s1 + $0x180] sm:$0xff] %v4_v0  ;;  %v347_v5 = vld [vmem:[%s888_s0 + $0x5] ss:$0 sm:$0xff]  ;;  %v356_v6 = vld [vmem:[%s888_s0 + $0x6] ss:$0 sm:$0xff] }
   0x4   :  { %307 = vst [vmem:[%s889_s1 + $0x200] sm:$0xff] %v4_v0  ;;  %308 = vst [vmem:[%s889_s1 + $0x280] sm:$0xff] %v4_v0  ;;  %v365_v7 = vld [vmem:[%s888_s0 + $0x7] ss:$0 sm:$0xff]  ;;  %v374_v8 = vld [vmem:[%s888_s0 + $0x8] ss:$0 sm:$0xff] }
   0x5   :  { %309 = vst [vmem:[%s889_s1 + $0x300] sm:$0xff] %v4_v0  ;;  %310 = vst [vmem:[%s889_s1 + $0x380] sm:$0xff] %v4_v0  ;;  %v383_v9 = vld [vmem:[%s888_s0 + $0x9] ss:$0 sm:$0xff]  ;;  %v392_v10 = vld [vmem:[%s888_s0 + $0xa] ss:$0 sm:$0xff] }
   0x6   :  { %312 = vst [vmem:[%s889_s1 + $0x8] sm:$0xff] %v311_v1  ;;  %313 = vst [vmem:[%s889_s1 + $0x88] sm:$0xff] %v311_v1  ;;  %v401_v11 = vld [vmem:[%s888_s0 + $0xb] ss:$0 sm:$0xff]  ;;  %v410_v12 = vld [vmem:[%s888_s0 + $0xc] ss:$0 sm:$0xff] }
   0x7   :  { %314 = vst [vmem:[%s889_s1 + $0x108] sm:$0xff] %v311_v1  ;;  %315 = vst [vmem:[%s889_s1 + $0x188] sm:$0xff] %v311_v1  ;;  %v419_v13 = vld [vmem:[%s888_s0 + $0xd] ss:$0 sm:$0xff]  ;;  %v428_v14 = vld [vmem:[%s888_s0 + $0xe] ss:$0 sm:$0xff] }
   0x8   :  { %316 = vst [vmem:[%s889_s1 + $0x208] sm:$0xff] %v311_v1  ;;  %317 = vst [vmem:[%s889_s1 + $0x288] sm:$0xff] %v311_v1  ;;  %v437_v15 = vld [vmem:[%s888_s0 + $0xf] ss:$0 sm:$0xff] }
   0x9   :  { %318 = vst [vmem:[%s889_s1 + $0x308] sm:$0xff] %v311_v1  ;;  %319 = vst [vmem:[%s889_s1 + $0x388] sm:$0xff] %v311_v1 }
   0xa   :  { %321 = vst [vmem:[%s889_s1 + $0x10] sm:$0xff] %v320_v2  ;;  %322 = vst [vmem:[%s889_s1 + $0x90] sm:$0xff] %v320_v2 }
   0xb   :  { %323 = vst [vmem:[%s889_s1 + $0x110] sm:$0xff] %v320_v2  ;;  %324 = vst [vmem:[%s889_s1 + $0x190] sm:$0xff] %v320_v2 }
   0xc   :  { %325 = vst [vmem:[%s889_s1 + $0x210] sm:$0xff] %v320_v2  ;;  %326 = vst [vmem:[%s889_s1 + $0x290] sm:$0xff] %v320_v2 }
   0xd   :  { %327 = vst [vmem:[%s889_s1 + $0x310] sm:$0xff] %v320_v2  ;;  %328 = vst [vmem:[%s889_s1 + $0x390] sm:$0xff] %v320_v2 }
   0xe   :  { %330 = vst [vmem:[%s889_s1 + $0x18] sm:$0xff] %v329_v3  ;;  %331 = vst [vmem:[%s889_s1 + $0x98] sm:$0xff] %v329_v3 }
   0xf   :  { %332 = vst [vmem:[%s889_s1 + $0x118] sm:$0xff] %v329_v3  ;;  %333 = vst [vmem:[%s889_s1 + $0x198] sm:$0xff] %v329_v3 }
  0x10   :  { %334 = vst [vmem:[%s889_s1 + $0x218] sm:$0xff] %v329_v3  ;;  %335 = vst [vmem:[%s889_s1 + $0x298] sm:$0xff] %v329_v3 }
  0x11   :  { %336 = vst [vmem:[%s889_s1 + $0x318] sm:$0xff] %v329_v3  ;;  %337 = vst [vmem:[%s889_s1 + $0x398] sm:$0xff] %v329_v3 }
  0x12   :  { %339 = vst [vmem:[%s889_s1 + $0x20] sm:$0xff] %v338_v4  ;;  %340 = vst [vmem:[%s889_s1 + $0xa0] sm:$0xff] %v338_v4 }
  0x13   :  { %341 = vst [vmem:[%s889_s1 + $0x120] sm:$0xff] %v338_v4  ;;  %342 = vst [vmem:[%s889_s1 + $0x1a0] sm:$0xff] %v338_v4 }
  0x14   :  { %343 = vst [vmem:[%s889_s1 + $0x220] sm:$0xff] %v338_v4  ;;  %344 = vst [vmem:[%s889_s1 + $0x2a0] sm:$0xff] %v338_v4 }
  0x15   :  { %345 = vst [vmem:[%s889_s1 + $0x320] sm:$0xff] %v338_v4  ;;  %346 = vst [vmem:[%s889_s1 + $0x3a0] sm:$0xff] %v338_v4 }
  0x16   :  { %348 = vst [vmem:[%s889_s1 + $0x28] sm:$0xff] %v347_v5  ;;  %349 = vst [vmem:[%s889_s1 + $0xa8] sm:$0xff] %v347_v5 }
  0x17   :  { %350 = vst [vmem:[%s889_s1 + $0x128] sm:$0xff] %v347_v5  ;;  %351 = vst [vmem:[%s889_s1 + $0x1a8] sm:$0xff] %v347_v5 }
  0x18   :  { %352 = vst [vmem:[%s889_s1 + $0x228] sm:$0xff] %v347_v5  ;;  %353 = vst [vmem:[%s889_s1 + $0x2a8] sm:$0xff] %v347_v5 }
  0x19   :  { %354 = vst [vmem:[%s889_s1 + $0x328] sm:$0xff] %v347_v5  ;;  %355 = vst [vmem:[%s889_s1 + $0x3a8] sm:$0xff] %v347_v5 }
  0x1a   :  { %357 = vst [vmem:[%s889_s1 + $0x30] sm:$0xff] %v356_v6  ;;  %358 = vst [vmem:[%s889_s1 + $0xb0] sm:$0xff] %v356_v6 }
  0x1b   :  { %359 = vst [vmem:[%s889_s1 + $0x130] sm:$0xff] %v356_v6  ;;  %360 = vst [vmem:[%s889_s1 + $0x1b0] sm:$0xff] %v356_v6 }
  0x1c   :  { %361 = vst [vmem:[%s889_s1 + $0x230] sm:$0xff] %v356_v6  ;;  %362 = vst [vmem:[%s889_s1 + $0x2b0] sm:$0xff] %v356_v6 }
  0x1d   :  { %363 = vst [vmem:[%s889_s1 + $0x330] sm:$0xff] %v356_v6  ;;  %364 = vst [vmem:[%s889_s1 + $0x3b0] sm:$0xff] %v356_v6 }
  0x1e   :  { %366 = vst [vmem:[%s889_s1 + $0x38] sm:$0xff] %v365_v7  ;;  %367 = vst [vmem:[%s889_s1 + $0xb8] sm:$0xff] %v365_v7 }
  0x1f   :  { %368 = vst [vmem:[%s889_s1 + $0x138] sm:$0xff] %v365_v7  ;;  %369 = vst [vmem:[%s889_s1 + $0x1b8] sm:$0xff] %v365_v7 }
  0x20   :  { %370 = vst [vmem:[%s889_s1 + $0x238] sm:$0xff] %v365_v7  ;;  %371 = vst [vmem:[%s889_s1 + $0x2b8] sm:$0xff] %v365_v7 }
  0x21   :  { %372 = vst [vmem:[%s889_s1 + $0x338] sm:$0xff] %v365_v7  ;;  %373 = vst [vmem:[%s889_s1 + $0x3b8] sm:$0xff] %v365_v7 }
  0x22   :  { %375 = vst [vmem:[%s889_s1 + $0x40] sm:$0xff] %v374_v8  ;;  %376 = vst [vmem:[%s889_s1 + $0xc0] sm:$0xff] %v374_v8 }
  0x23   :  { %377 = vst [vmem:[%s889_s1 + $0x140] sm:$0xff] %v374_v8  ;;  %378 = vst [vmem:[%s889_s1 + $0x1c0] sm:$0xff] %v374_v8 }
  0x24   :  { %379 = vst [vmem:[%s889_s1 + $0x240] sm:$0xff] %v374_v8  ;;  %380 = vst [vmem:[%s889_s1 + $0x2c0] sm:$0xff] %v374_v8 }
  0x25   :  { %381 = vst [vmem:[%s889_s1 + $0x340] sm:$0xff] %v374_v8  ;;  %382 = vst [vmem:[%s889_s1 + $0x3c0] sm:$0xff] %v374_v8 }
  0x26   :  { %384 = vst [vmem:[%s889_s1 + $0x48] sm:$0xff] %v383_v9  ;;  %385 = vst [vmem:[%s889_s1 + $0xc8] sm:$0xff] %v383_v9 }
  0x27   :  { %386 = vst [vmem:[%s889_s1 + $0x148] sm:$0xff] %v383_v9  ;;  %387 = vst [vmem:[%s889_s1 + $0x1c8] sm:$0xff] %v383_v9 }
  0x28   :  { %388 = vst [vmem:[%s889_s1 + $0x248] sm:$0xff] %v383_v9  ;;  %389 = vst [vmem:[%s889_s1 + $0x2c8] sm:$0xff] %v383_v9 }
  0x29   :  { %390 = vst [vmem:[%s889_s1 + $0x348] sm:$0xff] %v383_v9  ;;  %391 = vst [vmem:[%s889_s1 + $0x3c8] sm:$0xff] %v383_v9 }
  0x2a   :  { %393 = vst [vmem:[%s889_s1 + $0x50] sm:$0xff] %v392_v10  ;;  %394 = vst [vmem:[%s889_s1 + $0xd0] sm:$0xff] %v392_v10 }
  0x2b   :  { %395 = vst [vmem:[%s889_s1 + $0x150] sm:$0xff] %v392_v10  ;;  %396 = vst [vmem:[%s889_s1 + $0x1d0] sm:$0xff] %v392_v10 }
  0x2c   :  { %397 = vst [vmem:[%s889_s1 + $0x250] sm:$0xff] %v392_v10  ;;  %398 = vst [vmem:[%s889_s1 + $0x2d0] sm:$0xff] %v392_v10 }
  0x2d   :  { %399 = vst [vmem:[%s889_s1 + $0x350] sm:$0xff] %v392_v10  ;;  %400 = vst [vmem:[%s889_s1 + $0x3d0] sm:$0xff] %v392_v10 }
  0x2e   :  { %402 = vst [vmem:[%s889_s1 + $0x58] sm:$0xff] %v401_v11  ;;  %403 = vst [vmem:[%s889_s1 + $0xd8] sm:$0xff] %v401_v11 }
  0x2f   :  { %404 = vst [vmem:[%s889_s1 + $0x158] sm:$0xff] %v401_v11  ;;  %405 = vst [vmem:[%s889_s1 + $0x1d8] sm:$0xff] %v401_v11 }
  0x30   :  { %406 = vst [vmem:[%s889_s1 + $0x258] sm:$0xff] %v401_v11  ;;  %407 = vst [vmem:[%s889_s1 + $0x2d8] sm:$0xff] %v401_v11 }
  0x31   :  { %408 = vst [vmem:[%s889_s1 + $0x358] sm:$0xff] %v401_v11  ;;  %409 = vst [vmem:[%s889_s1 + $0x3d8] sm:$0xff] %v401_v11 }
  0x32   :  { %411 = vst [vmem:[%s889_s1 + $0x60] sm:$0xff] %v410_v12  ;;  %412 = vst [vmem:[%s889_s1 + $0xe0] sm:$0xff] %v410_v12 }
  0x33   :  { %413 = vst [vmem:[%s889_s1 + $0x160] sm:$0xff] %v410_v12  ;;  %414 = vst [vmem:[%s889_s1 + $0x1e0] sm:$0xff] %v410_v12 }
  0x34   :  { %415 = vst [vmem:[%s889_s1 + $0x260] sm:$0xff] %v410_v12  ;;  %416 = vst [vmem:[%s889_s1 + $0x2e0] sm:$0xff] %v410_v12 }
  0x35   :  { %417 = vst [vmem:[%s889_s1 + $0x360] sm:$0xff] %v410_v12  ;;  %418 = vst [vmem:[%s889_s1 + $0x3e0] sm:$0xff] %v410_v12 }
  0x36   :  { %420 = vst [vmem:[%s889_s1 + $0x68] sm:$0xff] %v419_v13  ;;  %421 = vst [vmem:[%s889_s1 + $0xe8] sm:$0xff] %v419_v13 }
  0x37   :  { %422 = vst [vmem:[%s889_s1 + $0x168] sm:$0xff] %v419_v13  ;;  %423 = vst [vmem:[%s889_s1 + $0x1e8] sm:$0xff] %v419_v13 }
  0x38   :  { %424 = vst [vmem:[%s889_s1 + $0x268] sm:$0xff] %v419_v13  ;;  %425 = vst [vmem:[%s889_s1 + $0x2e8] sm:$0xff] %v419_v13 }
  0x39   :  { %426 = vst [vmem:[%s889_s1 + $0x368] sm:$0xff] %v419_v13  ;;  %427 = vst [vmem:[%s889_s1 + $0x3e8] sm:$0xff] %v419_v13 }
  0x3a   :  { %429 = vst [vmem:[%s889_s1 + $0x70] sm:$0xff] %v428_v14  ;;  %430 = vst [vmem:[%s889_s1 + $0xf0] sm:$0xff] %v428_v14 }
  0x3b   :  { %431 = vst [vmem:[%s889_s1 + $0x170] sm:$0xff] %v428_v14  ;;  %432 = vst [vmem:[%s889_s1 + $0x1f0] sm:$0xff] %v428_v14 }
  0x3c   :  { %433 = vst [vmem:[%s889_s1 + $0x270] sm:$0xff] %v428_v14  ;;  %434 = vst [vmem:[%s889_s1 + $0x2f0] sm:$0xff] %v428_v14 }
  0x3d   :  { %435 = vst [vmem:[%s889_s1 + $0x370] sm:$0xff] %v428_v14  ;;  %436 = vst [vmem:[%s889_s1 + $0x3f0] sm:$0xff] %v428_v14 }
  0x3e   :  { %438 = vst [vmem:[%s889_s1 + $0x78] sm:$0xff] %v437_v15  ;;  %439 = vst [vmem:[%s889_s1 + $0xf8] sm:$0xff] %v437_v15 }
  0x3f   :  { %440 = vst [vmem:[%s889_s1 + $0x178] sm:$0xff] %v437_v15  ;;  %441 = vst [vmem:[%s889_s1 + $0x1f8] sm:$0xff] %v437_v15 }
  0x40   :  { %442 = vst [vmem:[%s889_s1 + $0x278] sm:$0xff] %v437_v15  ;;  %443 = vst [vmem:[%s889_s1 + $0x2f8] sm:$0xff] %v437_v15 }
  0x41   :  { %444 = vst [vmem:[%s889_s1 + $0x378] sm:$0xff] %v437_v15  ;;  %445 = vst [vmem:[%s889_s1 + $0x3f8] sm:$0xff] %v437_v15 }

// kernel: tile.134
= control target key start
LH: loop header
LB: loop body
LE: loop exit
PB: predicated region body
PF: predicated region fallthrough
CT: control target
= control target key end

     0   :  { %vm4_vm0 = vcmask 1047556   ;;  %s1749_s14 = smov 112   ;;  %s1750_s30 = smov 96   ;;  %vm6_vm1 = vcmask 130048   ;;  %vm151_vm2 = vcmask 1048448   ;;  %vm326_vm3 = vcmask 917248   ;;  %s3286_s0 = inlined_call_operand.vmem [shape: f32[8,16,8,16], index: 0, kind: input, shape index: {}]   ;;  %s3287_s1 = inlined_call_operand.vmem [shape: f32[128,128], index: 1, kind: output, shape index: {}]  }
   0x1   :  { %v1418_v0 = vld [vmem:[%s3286_s0 + $0x207] ss:$8 sm:$0xf]   ;;  %v1462_v48 = vld [vmem:[%s3286_s0 + $0x106] ss:$8 sm:$0xf]  }
   0x2   :  { %v1419_v1 = vld [vmem:[%s3286_s0 + $0x207] ss:$8 sm:$0xf0]   ;;  %v1463_v49 = vld [vmem:[%s3286_s0 + $0x106] ss:$8 sm:$0xf0]  }
   0x3   :  { %v169_v2 = vsel %vm4_vm0, %v1419_v1, %v1418_v0  ;;  %v1413_v3 = vld [vmem:[%s3286_s0 + $0x7] ss:$8 sm:$0xf]   ;;  %v1460_v50 = vld [vmem:[%s3286_s0 + $0x6] ss:$8 sm:$0xf]   ;;  %v333_v52 = vsel %vm4_vm0, %v1463_v49, %v1462_v48 }
   0x4   :  { %v1414_v4 = vld [vmem:[%s3286_s0 + $0x7] ss:$8 sm:$0xf0]   ;;  %170 = vrot.lane.b32.xlu1 %v169_v2, %s1749_s14  ;;  %v1461_v51 = vld [vmem:[%s3286_s0 + $0x6] ss:$8 sm:$0xf0]  }
   0x5   :  { %v148_v5 = vsel %vm4_vm0, %v1414_v4, %v1413_v3  ;;  %v1421_v6 = vld [vmem:[%s3286_s0 + $0x307] ss:$8 sm:$0xf]   ;;  %v323_v53 = vsel %vm4_vm0, %v1461_v51, %v1460_v50  ;;  %v1468_v54 = vld [vmem:[%s3286_s0 + $0x306] ss:$8 sm:$0xf]  }
   0x6   :  { %v1422_v7 = vld [vmem:[%s3286_s0 + $0x307] ss:$8 sm:$0xf0]   ;;  %149 = vrot.lane.b32.xlu0 %v148_v5, %s1749_s14  ;;  %v1469_v55 = vld [vmem:[%s3286_s0 + $0x306] ss:$8 sm:$0xf0]  }
   0x7   :  { %v180_v8 = vsel %vm4_vm0, %v1422_v7, %v1421_v6  ;;  %v1415_v9 = vld [vmem:[%s3286_s0 + $0x107] ss:$8 sm:$0xf]   ;;  %v1465_v56 = vld [vmem:[%s3286_s0 + $0x206] ss:$8 sm:$0xf]   ;;  %v355_v58 = vsel %vm4_vm0, %v1469_v55, %v1468_v54 }
   0x8   :  { %v1416_v10 = vld [vmem:[%s3286_s0 + $0x107] ss:$8 sm:$0xf0]   ;;  %181 = vrot.lane.b32.xlu1 %v180_v8, %s1749_s14  ;;  %v1466_v57 = vld [vmem:[%s3286_s0 + $0x206] ss:$8 sm:$0xf0]  }
   0x9   :  { %v158_v11 = vsel %vm4_vm0, %v1416_v10, %v1415_v9  ;;  %v1427_v12 = vld [vmem:[%s3286_s0 + $0x147] ss:$8 sm:$0xf]   ;;  %v344_v59 = vsel %vm4_vm0, %v1466_v57, %v1465_v56  ;;  %v1474_v60 = vld [vmem:[%s3286_s0 + $0x146] ss:$8 sm:$0xf]  }
   0xa   :  { %v1428_v13 = vld [vmem:[%s3286_s0 + $0x147] ss:$8 sm:$0xf0]   ;;  %159 = vrot.lane.b32.xlu0 %v158_v11, %s1749_s14  ;;  %v1475_v61 = vld [vmem:[%s3286_s0 + $0x146] ss:$8 sm:$0xf0]  }
   0xb   :  { %v1424_v14 = vld [vmem:[%s3286_s0 + $0x47] ss:$8 sm:$0xf]   ;;  %v202_v16 = vsel %vm4_vm0, %v1428_v13, %v1427_v12  ;;  %v1471_v62 = vld [vmem:[%s3286_s0 + $0x46] ss:$8 sm:$0xf]   ;;  %v377_v0 = vsel %vm4_vm0, %v1475_v61, %v1474_v60 }
   0xc   :  { %v1425_v15 = vld [vmem:[%s3286_s0 + $0x47] ss:$8 sm:$0xf0]   ;;  %203 = vrot.lane.b32.xlu1 %v202_v16, %s1749_s14  ;;  %v1472_v63 = vld [vmem:[%s3286_s0 + $0x46] ss:$8 sm:$0xf0]  }
   0xd   :  { %v191_v17 = vsel %vm4_vm0, %v1425_v15, %v1424_v14  ;;  %v1433_v18 = vld [vmem:[%s3286_s0 + $0x347] ss:$8 sm:$0xf]   ;;  %v366_v1 = vsel %vm4_vm0, %v1472_v63, %v1471_v62  ;;  %v1480_v2 = vld [vmem:[%s3286_s0 + $0x346] ss:$8 sm:$0xf]  }
   0xe   :  { %v1434_v19 = vld [vmem:[%s3286_s0 + $0x347] ss:$8 sm:$0xf0]   ;;  %192 = vrot.lane.b32.xlu0 %v191_v17, %s1749_s14  ;;  %v1481_v3 = vld [vmem:[%s3286_s0 + $0x346] ss:$8 sm:$0xf0]  }
   0xf   :  { %v1430_v20 = vld [vmem:[%s3286_s0 + $0x247] ss:$8 sm:$0xf]   ;;  %v224_v22 = vsel %vm4_vm0, %v1434_v19, %v1433_v18  ;;  %v1477_v4 = vld [vmem:[%s3286_s0 + $0x246] ss:$8 sm:$0xf]   ;;  %v399_v6 = vsel %vm4_vm0, %v1481_v3, %v1480_v2 }
  0x10   :  { %v1431_v21 = vld [vmem:[%s3286_s0 + $0x247] ss:$8 sm:$0xf0]   ;;  %225 = vrot.lane.b32.xlu1 %v224_v22, %s1749_s14  ;;  %v1478_v5 = vld [vmem:[%s3286_s0 + $0x246] ss:$8 sm:$0xf0]  }
  0x11   :  { %v213_v23 = vsel %vm4_vm0, %v1431_v21, %v1430_v20  ;;  %v1439_v24 = vld [vmem:[%s3286_s0 + $0x187] ss:$8 sm:$0xf]   ;;  %v388_v7 = vsel %vm4_vm0, %v1478_v5, %v1477_v4  ;;  %v1486_v8 = vld [vmem:[%s3286_s0 + $0x186] ss:$8 sm:$0xf]  }
  0x12   :  { %v1440_v25 = vld [vmem:[%s3286_s0 + $0x187] ss:$8 sm:$0xf0]   ;;  %214 = vrot.lane.b32.xlu0 %v213_v23, %s1749_s14  ;;  %v1487_v9 = vld [vmem:[%s3286_s0 + $0x186] ss:$8 sm:$0xf0]  }
  0x13   :  { %v1436_v26 = vld [vmem:[%s3286_s0 + $0x87] ss:$8 sm:$0xf]   ;;  %v246_v28 = vsel %vm4_vm0, %v1440_v25, %v1439_v24  ;;  %v1483_v10 = vld [vmem:[%s3286_s0 + $0x86] ss:$8 sm:$0xf]   ;;  %v421_v12 = vsel %vm4_vm0, %v1487_v9, %v1486_v8 }
  0x14   :  { %v1437_v27 = vld [vmem:[%s3286_s0 + $0x87] ss:$8 sm:$0xf0]   ;;  %247 = vrot.lane.b32.xlu1 %v246_v28, %s1749_s14  ;;  %v1484_v11 = vld [vmem:[%s3286_s0 + $0x86] ss:$8 sm:$0xf0]  }
  0x15   :  { %v235_v29 = vsel %vm4_vm0, %v1437_v27, %v1436_v26  ;;  %v1445_v30 = vld [vmem:[%s3286_s0 + $0x387] ss:$8 sm:$0xf]   ;;  %v410_v13 = vsel %vm4_vm0, %v1484_v11, %v1483_v10  ;;  %v1492_v14 = vld [vmem:[%s3286_s0 + $0x386] ss:$8 sm:$0xf]  }
  0x16   :  { %v1446_v31 = vld [vmem:[%s3286_s0 + $0x387] ss:$8 sm:$0xf0]   ;;  %236 = vrot.lane.b32.xlu0 %v235_v29, %s1749_s14  ;;  %v1493_v15 = vld [vmem:[%s3286_s0 + $0x386] ss:$8 sm:$0xf0]  }
  0x17   :  { %v1442_v32 = vld [vmem:[%s3286_s0 + $0x287] ss:$8 sm:$0xf]   ;;  %v268_v34 = vsel %vm4_vm0, %v1446_v31, %v1445_v30  ;;  %v1489_v16 = vld [vmem:[%s3286_s0 + $0x286] ss:$8 sm:$0xf]   ;;  %v443_v18 = vsel %vm4_vm0, %v1493_v15, %v1492_v14 }
  0x18   :  { %v1443_v33 = vld [vmem:[%s3286_s0 + $0x287] ss:$8 sm:$0xf0]   ;;  %269 = vrot.lane.b32.xlu1 %v268_v34, %s1749_s14  ;;  %v1490_v17 = vld [vmem:[%s3286_s0 + $0x286] ss:$8 sm:$0xf0]  }
  0x19   :  { %v257_v35 = vsel %vm4_vm0, %v1443_v33, %v1442_v32  ;;  %v1451_v36 = vld [vmem:[%s3286_s0 + $0x1c7] ss:$8 sm:$0xf]   ;;  %v432_v19 = vsel %vm4_vm0, %v1490_v17, %v1489_v16  ;;  %v1498_v20 = vld [vmem:[%s3286_s0 + $0x1c6] ss:$8 sm:$0xf]  }
  0x1a   :  { %v1452_v37 = vld [vmem:[%s3286_s0 + $0x1c7] ss:$8 sm:$0xf0]   ;;  %258 = vrot.lane.b32.xlu0 %v257_v35, %s1749_s14  ;;  %v1499_v21 = vld [vmem:[%s3286_s0 + $0x1c6] ss:$8 sm:$0xf0]  }
  0x1b   :  { %v1448_v38 = vld [vmem:[%s3286_s0 + $0xc7] ss:$8 sm:$0xf]   ;;  %v290_v40 = vsel %vm4_vm0, %v1452_v37, %v1451_v36  ;;  %v1495_v22 = vld [vmem:[%s3286_s0 + $0xc6] ss:$8 sm:$0xf]   ;;  %v465_v24 = vsel %vm4_vm0, %v1499_v21, %v1498_v20 }
  0x1c   :  { %v1449_v39 = vld [vmem:[%s3286_s0 + $0xc7] ss:$8 sm:$0xf0]   ;;  %291 = vrot.lane.b32.xlu1 %v290_v40, %s1749_s14  ;;  %v1496_v23 = vld [vmem:[%s3286_s0 + $0xc6] ss:$8 sm:$0xf0]  }
  0x1d   :  { %v279_v41 = vsel %vm4_vm0, %v1449_v39, %v1448_v38  ;;  %v1457_v42 = vld [vmem:[%s3286_s0 + $0x3c7] ss:$8 sm:$0xf]   ;;  %v1504_v25 = vld [vmem:[%s3286_s0 + $0x3c6] ss:$8 sm:$0xf]   ;;  %v454_v26 = vsel %vm4_vm0, %v1496_v23, %v1495_v22 }
  0x1e   :  { %v1458_v43 = vld [vmem:[%s3286_s0 + $0x3c7] ss:$8 sm:$0xf0]   ;;  %280 = vrot.lane.b32.xlu0 %v279_v41, %s1749_s14  ;;  %v1505_v27 = vld [vmem:[%s3286_s0 + $0x3c6] ss:$8 sm:$0xf0]  }
  0x1f   :  { %v1454_v44 = vld [vmem:[%s3286_s0 + $0x2c7] ss:$8 sm:$0xf]   ;;  %v312_v46 = vsel %vm4_vm0, %v1458_v43, %v1457_v42  ;;  %v1501_v28 = vld [vmem:[%s3286_s0 + $0x2c6] ss:$8 sm:$0xf]   ;;  %v487_v32 = vsel %vm4_vm0, %v1505_v27, %v1504_v25 }
  0x20   :  { %v1455_v45 = vld [vmem:[%s3286_s0 + $0x2c7] ss:$8 sm:$0xf0]   ;;  %313 = vrot.lane.b32.xlu1 %v312_v46, %s1749_s14  ;;  %v1502_v29 = vld [vmem:[%s3286_s0 + $0x2c6] ss:$8 sm:$0xf0]  }
  0x21   :  { %v301_v47 = vsel %vm4_vm0, %v1455_v45, %v1454_v44  ;;  %v1509_v30 = vld [vmem:[%s3286_s0 + $0x105] ss:$8 sm:$0xf]   ;;  %v1389_v31 = vld [vmem:[%s3286_s0 + $0x200] ss:$8 sm:$0xf]   ;;  %v476_v35 = vsel %vm4_vm0, %v1502_v29, %v1501_v28 }
  0x22   :  { %302 = vrot.lane.b32.xlu0 %v301_v47, %s1749_s14  ;;  %v1390_v33 = vld [vmem:[%s3286_s0 + $0x200] ss:$8 sm:$0xf0]   ;;  %v1510_v36 = vld [vmem:[%s3286_s0 + $0x105] ss:$8 sm:$0xf0]  }
  0x23   :  { %v2_v34 = vld [vmem:[%s3286_s0] ss:$8 sm:$0xf]   ;;  %v76_v37 = vsel %vm4_vm0, %v1390_v33, %v1389_v31  ;;  %v1507_v39 = vld [vmem:[%s3286_s0 + $0x5] ss:$8 sm:$0xf]   ;;  %v508_v44 = vsel %vm4_vm0, %v1510_v36, %v1509_v30 }
  0x24   :  { %334 = vrot.lane.b32.xlu1 %v333_v52, %s1750_s30  ;;  %v3_v38 = vld [vmem:[%s3286_s0] ss:$8 sm:$0xf0]   ;;  %v1508_v40 = vld [vmem:[%s3286_s0 + $0x5] ss:$8 sm:$0xf0]  }
  0x25   :  { %1391 = vst.msk [vmem:[%s3287_s1 + $0x40] sm:$0xff] %vm6_vm1, %v76_v37   ;;  %v5_v41 = vsel %vm4_vm0, %v3_v38, %v2_v34  ;;  %v1515_v42 = vld [vmem:[%s3286_s0 + $0x305] ss:$8 sm:$0xf]   ;;  %v498_v47 = vsel %vm4_vm0, %v1508_v40, %v1507_v39  ;;  %s1751_s3 = smov 80   ;;  %s1752_s28 = smov 64  }
  0x26   :  { %324 = vrot.lane.b32.xlu0 %v323_v53, %s1750_s30  ;;  %7 = vst.msk [vmem:[%s3287_s1] sm:$0xff] %vm6_vm1, %v5_v41   ;;  %v1401_v43 = vld [vmem:[%s3286_s0 + $0x300] ss:$8 sm:$0xf]   ;;  %s1753_s23 = smov 48   ;;  %s1754_s9 = smov 32  }
  0x27   :  { %v1402_v45 = vld [vmem:[%s3286_s0 + $0x300] ss:$8 sm:$0xf0]   ;;  %v1516_v48 = vld [vmem:[%s3286_s0 + $0x305] ss:$8 sm:$0xf0]  }
  0x28   :  { %356 = vrot.lane.b32.xlu1 %v355_v58, %s1750_s30  ;;  %v1377_v46 = vld [vmem:[%s3286_s0 + $0x100] ss:$8 sm:$0xf]   ;;  %v112_v49 = vsel %vm4_vm0, %v1402_v45, %v1401_v43  ;;  %v1512_v51 = vld [vmem:[%s3286_s0 + $0x205] ss:$8 sm:$0xf]   ;;  %v530_v56 = vsel %vm4_vm0, %v1516_v48, %v1515_v42 }
  0x29   :  { %v1378_v50 = vld [vmem:[%s3286_s0 + $0x100] ss:$8 sm:$0xf0]   ;;  %v1513_v52 = vld [vmem:[%s3286_s0 + $0x205] ss:$8 sm:$0xf0]  }
  0x2a   :  { %345 = vrot.lane.b32.xlu0 %v344_v59, %s1750_s30  ;;  %1403 = vst.msk [vmem:[%s3287_s1 + $0x60] sm:$0xff] %vm6_vm1, %v112_v49   ;;  %v40_v53 = vsel %vm4_vm0, %v1378_v50, %v1377_v46  ;;  %v1521_v54 = vld [vmem:[%s3286_s0 + $0x145] ss:$8 sm:$0xf]   ;;  %v519_v59 = vsel %vm4_vm0, %v1513_v52, %v1512_v51  ;;  %vm501_vm4 = vcmask 786048   ;;  %s1755_s20 = smov 16  }
  0x2b   :  { %1379 = vst.msk [vmem:[%s3287_s1 + $0x20] sm:$0xff] %vm6_vm1, %v40_v53   ;;  %v1380_v55 = vld [vmem:[%s3286_s0 + $0x140] ss:$8 sm:$0xf]   ;;  %vm676_vm5 = vcmask 654848   ;;  %vm851_vm6 = vcmask 523648  }
  0x2c   :  { %378 = vrot.lane.b32.xlu1 %v377_v0, %s1750_s30  ;;  %v1381_v57 = vld [vmem:[%s3286_s0 + $0x140] ss:$8 sm:$0xf0]   ;;  %v1522_v60 = vld [vmem:[%s3286_s0 + $0x145] ss:$8 sm:$0xf0]  }
  0x2d   :  { %v1368_v58 = vld [vmem:[%s3286_s0 + $0x40] ss:$8 sm:$0xf]   ;;  %v49_v61 = vsel %vm4_vm0, %v1381_v57, %v1380_v55  ;;  %v1518_v63 = vld [vmem:[%s3286_s0 + $0x45] ss:$8 sm:$0xf]   ;;  %v552_v4 = vsel %vm4_vm0, %v1522_v60, %v1521_v54 }
  0x2e   :  { %367 = vrot.lane.b32.xlu0 %v366_v1, %s1750_s30  ;;  %v1369_v62 = vld [vmem:[%s3286_s0 + $0x40] ss:$8 sm:$0xf0]   ;;  %v1519_v0 = vld [vmem:[%s3286_s0 + $0x45] ss:$8 sm:$0xf0]  }
  0x2f   :  { %1382 = vst.msk [vmem:[%s3287_s1 + $0x28] sm:$0xff] %vm6_vm1, %v49_v61   ;;  %v13_v1 = vsel %vm4_vm0, %v1369_v62, %v1368_v58  ;;  %v1527_v2 = vld [vmem:[%s3286_s0 + $0x345] ss:$8 sm:$0xf]   ;;  %vm1026_vm7 = vcmask 392448   ;;  %vm1201_vm8 = vcmask 261248  }
  0x30   :  { %400 = vrot.lane.b32.xlu1 %v399_v6, %s1750_s30  ;;  %1370 = vst.msk [vmem:[%s3287_s1 + $0x8] sm:$0xff] %vm6_vm1, %v13_v1   ;;  %v1404_v3 = vld [vmem:[%s3286_s0 + $0x340] ss:$8 sm:$0xf]  }
  0x31   :  { %v1405_v5 = vld [vmem:[%s3286_s0 + $0x340] ss:$8 sm:$0xf0]   ;;  %v1528_v8 = vld [vmem:[%s3286_s0 + $0x345] ss:$8 sm:$0xf0]  }
  0x32   :  { %389 = vrot.lane.b32.xlu0 %v388_v7, %s1750_s30  ;;  %v1392_v6 = vld [vmem:[%s3286_s0 + $0x240] ss:$8 sm:$0xf]   ;;  %v541_v7 = vsel %vm4_vm0, %v1519_v0, %v1518_v63  ;;  %v121_v9 = vsel %vm4_vm0, %v1405_v5, %v1404_v3  ;;  %v1524_v11 = vld [vmem:[%s3286_s0 + $0x245] ss:$8 sm:$0xf]   ;;  %v574_v16 = vsel %vm4_vm0, %v1528_v8, %v1527_v2 }
  0x33   :  { %v1393_v10 = vld [vmem:[%s3286_s0 + $0x240] ss:$8 sm:$0xf0]   ;;  %1406 = vst.msk [vmem:[%s3287_s1 + $0x68] sm:$0xff] %vm6_vm1, %v121_v9  }
  0x34   :  { %422 = vrot.lane.b32.xlu1 %v421_v12, %s1750_s30  ;;  %v1525_v12 = vld [vmem:[%s3286_s0 + $0x245] ss:$8 sm:$0xf0]   ;;  %v1383_v17 = vld [vmem:[%s3286_s0 + $0x180] ss:$8 sm:$0xf]  }
  0x35   :  { %v1533_v14 = vld [vmem:[%s3286_s0 + $0x185] ss:$8 sm:$0xf]   ;;  %v1371_v21 = vld [vmem:[%s3286_s0 + $0x80] ss:$8 sm:$0xf]  }
  0x36   :  { %411 = vrot.lane.b32.xlu0 %v410_v13, %s1750_s30  ;;  %v85_v13 = vsel %vm4_vm0, %v1393_v10, %v1392_v6  ;;  %v1534_v15 = vld [vmem:[%s3286_s0 + $0x185] ss:$8 sm:$0xf0]   ;;  %v1372_v22 = vld [vmem:[%s3286_s0 + $0x80] ss:$8 sm:$0xf0]  }
  0x37   :  { %1394 = vst.msk [vmem:[%s3287_s1 + $0x48] sm:$0xff] %vm6_vm1, %v85_v13   ;;  %v1530_v23 = vld [vmem:[%s3286_s0 + $0x85] ss:$8 sm:$0xf]   ;;  %v22_v25 = vsel %vm4_vm0, %v1372_v22, %v1371_v21  ;;  %v596_v28 = vsel %vm4_vm0, %v1534_v15, %v1533_v14 }
  0x38   :  { %444 = vrot.lane.b32.xlu1 %v443_v18, %s1750_s30  ;;  %v1384_v18 = vld [vmem:[%s3286_s0 + $0x180] ss:$8 sm:$0xf0]   ;;  %v1540_v27 = vld [vmem:[%s3286_s0 + $0x385] ss:$8 sm:$0xf0]  }
  0x39   :  { %v58_v20 = vsel %vm4_vm0, %v1384_v18, %v1383_v17  ;;  %1373 = vst.msk [vmem:[%s3287_s1 + $0x10] sm:$0xff] %vm6_vm1, %v22_v25   ;;  %v1407_v29 = vld [vmem:[%s3286_s0 + $0x380] ss:$8 sm:$0xf]  }
  0x3a   :  { %433 = vrot.lane.b32.xlu0 %v432_v19, %s1750_s30  ;;  %v563_v19 = vsel %vm4_vm0, %v1525_v12, %v1524_v11  ;;  %1385 = vst.msk [vmem:[%s3287_s1 + $0x30] sm:$0xff] %vm6_vm1, %v58_v20   ;;  %v1408_v30 = vld [vmem:[%s3286_s0 + $0x380] ss:$8 sm:$0xf0]  }
  0x3b   :  { %v1395_v33 = vld [vmem:[%s3286_s0 + $0x280] ss:$8 sm:$0xf]   ;;  %v1537_v36 = vld [vmem:[%s3286_s0 + $0x285] ss:$8 sm:$0xf0]  }
  0x3c   :  { %466 = vrot.lane.b32.xlu1 %v465_v24, %s1750_s30  ;;  %v1531_v24 = vld [vmem:[%s3286_s0 + $0x85] ss:$8 sm:$0xf0]   ;;  %v1396_v34 = vld [vmem:[%s3286_s0 + $0x280] ss:$8 sm:$0xf0]  }
  0x3d   :  { %v585_v31 = vsel %vm4_vm0, %v1531_v24, %v1530_v23  ;;  %v94_v37 = vsel %vm4_vm0, %v1396_v34, %v1395_v33  ;;  %v1545_v38 = vld [vmem:[%s3286_s0 + $0x1c5] ss:$8 sm:$0xf]   ;;  %v1386_v41 = vld [vmem:[%s3286_s0 + $0x1c0] ss:$8 sm:$0xf]  }
  0x3e   :  { %455 = vrot.lane.b32.xlu0 %v454_v26, %s1750_s30  ;;  %v1539_v26 = vld [vmem:[%s3286_s0 + $0x385] ss:$8 sm:$0xf]   ;;  %1397 = vst.msk [vmem:[%s3287_s1 + $0x50] sm:$0xff] %vm6_vm1, %v94_v37  }
  0x3f   :  { %v1546_v39 = vld [vmem:[%s3286_s0 + $0x1c5] ss:$8 sm:$0xf0]   ;;  %v618_v40 = vsel %vm4_vm0, %v1540_v27, %v1539_v26  ;;  %v1387_v42 = vld [vmem:[%s3286_s0 + $0x1c0] ss:$8 sm:$0xf0]  }
  0x40   :  { %488 = vrot.lane.b32.xlu1 %v487_v32, %s1750_s30  ;;  %v130_v32 = vsel %vm4_vm0, %v1408_v30, %v1407_v29  ;;  %v1374_v45 = vld [vmem:[%s3286_s0 + $0xc0] ss:$8 sm:$0xf]   ;;  %v1543_v48 = vld [vmem:[%s3286_s0 + $0xc5] ss:$8 sm:$0xf0]   ;;  %v640_v52 = vsel %vm4_vm0, %v1546_v39, %v1545_v38 }
  0x41   :  { %1409 = vst.msk [vmem:[%s3287_s1 + $0x70] sm:$0xff] %vm6_vm1, %v130_v32   ;;  %v1375_v46 = vld [vmem:[%s3286_s0 + $0xc0] ss:$8 sm:$0xf0]  }
  0x42   :  { %477 = vrot.lane.b32.xlu0 %v476_v35, %s1750_s30  ;;  %v1536_v35 = vld [vmem:[%s3286_s0 + $0x285] ss:$8 sm:$0xf]   ;;  %v31_v49 = vsel %vm4_vm0, %v1375_v46, %v1374_v45  ;;  %v1410_v53 = vld [vmem:[%s3286_s0 + $0x3c0] ss:$8 sm:$0xf]  }
  0x43   :  { %v607_v43 = vsel %vm4_vm0, %v1537_v36, %v1536_v35  ;;  %v1551_v50 = vld [vmem:[%s3286_s0 + $0x3c5] ss:$8 sm:$0xf]   ;;  %1376 = vst.msk [vmem:[%s3287_s1 + $0x18] sm:$0xff] %vm6_vm1, %v31_v49  }
  0x44   :  { %509 = vrot.lane.b32.xlu1 %v508_v44, %s1751_s3  ;;  %v67_v44 = vsel %vm4_vm0, %v1387_v42, %v1386_v41  ;;  %v1552_v51 = vld [vmem:[%s3286_s0 + $0x3c5] ss:$8 sm:$0xf0]   ;;  %v1411_v54 = vld [vmem:[%s3286_s0 + $0x3c0] ss:$8 sm:$0xf0]  }
  0x45   :  { %1388 = vst.msk [vmem:[%s3287_s1 + $0x38] sm:$0xff] %vm6_vm1, %v67_v44   ;;  %v1398_v57 = vld [vmem:[%s3286_s0 + $0x2c0] ss:$8 sm:$0xf]   ;;  %v662_v62 = vsel %vm4_vm0, %v1552_v51, %v1551_v50 }
  0x46   :  { %499 = vrot.lane.b32.xlu0 %v498_v47, %s1751_s3  ;;  %v1542_v47 = vld [vmem:[%s3286_s0 + $0xc5] ss:$8 sm:$0xf]   ;;  %v1399_v58 = vld [vmem:[%s3286_s0 + $0x2c0] ss:$8 sm:$0xf0]  }
  0x47   :  { %v629_v55 = vsel %vm4_vm0, %v1543_v48, %v1542_v47  ;;  %v1549_v60 = vld [vmem:[%s3286_s0 + $0x2c5] ss:$8 sm:$0xf0]   ;;  %v103_v61 = vsel %vm4_vm0, %v1399_v58, %v1398_v57  ;;  %v1556_v0 = vld [vmem:[%s3286_s0 + $0x104] ss:$8 sm:$0xf]  }
  0x48   :  { %531 = vrot.lane.b32.xlu1 %v530_v56, %s1751_s3  ;;  %v139_v56 = vsel %vm4_vm0, %v1411_v54, %v1410_v53  ;;  %1400 = vst.msk [vmem:[%s3287_s1 + $0x58] sm:$0xff] %vm6_vm1, %v103_v61   ;;  %v1557_v1 = vld [vmem:[%s3286_s0 + $0x104] ss:$8 sm:$0xf0]  }
  0x49   :  { %1412 = vst.msk [vmem:[%s3287_s1 + $0x78] sm:$0xff] %vm6_vm1, %v139_v56   ;;  %v1554_v2 = vld [vmem:[%s3286_s0 + $0x4] ss:$8 sm:$0xf]  }
  0x4a   :  { %520 = vrot.lane.b32.xlu0 %v519_v59, %s1751_s3  ;;  %v1548_v59 = vld [vmem:[%s3286_s0 + $0x2c5] ss:$8 sm:$0xf]   ;;  %v1555_v3 = vld [vmem:[%s3286_s0 + $0x4] ss:$8 sm:$0xf0]  }
  0x4b   :  { %v651_v63 = vsel %vm4_vm0, %v1549_v60, %v1548_v59  ;;  %v673_v5 = vsel %vm4_vm0, %v1555_v3, %v1554_v2  ;;  %v1562_v6 = vld [vmem:[%s3286_s0 + $0x304] ss:$8 sm:$0xf]   ;;  %v1603_v53 = vld [vmem:[%s3286_s0 + $0x103] ss:$8 sm:$0xf]  }
  0x4c   :  { %553 = vrot.lane.b32.xlu1 %v552_v4, %s1751_s3  ;;  %v683_v4 = vsel %vm4_vm0, %v1557_v1, %v1556_v0  ;;  %v1559_v8 = vld [vmem:[%s3286_s0 + $0x204] ss:$8 sm:$0xf]   ;;  %v1604_v54 = vld [vmem:[%s3286_s0 + $0x103] ss:$8 sm:$0xf0]  }
  0x4d   :  { %v1560_v9 = vld [vmem:[%s3286_s0 + $0x204] ss:$8 sm:$0xf0]   ;;  %v1601_v56 = vld [vmem:[%s3286_s0 + $0x3] ss:$8 sm:$0xf]   ;;  %v858_v58 = vsel %vm4_vm0, %v1604_v54, %v1603_v53 }
  0x4e   :  { %542 = vrot.lane.b32.xlu0 %v541_v7, %s1751_s3  ;;  %v1563_v7 = vld [vmem:[%s3286_s0 + $0x304] ss:$8 sm:$0xf0]   ;;  %v694_v11 = vsel %vm4_vm0, %v1560_v9, %v1559_v8  ;;  %v1602_v57 = vld [vmem:[%s3286_s0 + $0x3] ss:$8 sm:$0xf0]  }
  0x4f   :  { %v705_v10 = vsel %vm4_vm0, %v1563_v7, %v1562_v6  ;;  %v1568_v12 = vld [vmem:[%s3286_s0 + $0x144] ss:$8 sm:$0xf]   ;;  %v848_v60 = vsel %vm4_vm0, %v1602_v57, %v1601_v56  ;;  %v1609_v61 = vld [vmem:[%s3286_s0 + $0x303] ss:$8 sm:$0xf]  }
  0x50   :  { %575 = vrot.lane.b32.xlu1 %v574_v16, %s1751_s3  ;;  %v1569_v13 = vld [vmem:[%s3286_s0 + $0x144] ss:$8 sm:$0xf0]   ;;  %v1606_v0 = vld [vmem:[%s3286_s0 + $0x203] ss:$8 sm:$0xf]  }
  0x51   :  { %v1565_v14 = vld [vmem:[%s3286_s0 + $0x44] ss:$8 sm:$0xf]   ;;  %v727_v16 = vsel %vm4_vm0, %v1569_v13, %v1568_v12  ;;  %v1607_v1 = vld [vmem:[%s3286_s0 + $0x203] ss:$8 sm:$0xf0]  }
  0x52   :  { %564 = vrot.lane.b32.xlu0 %v563_v19, %s1751_s3  ;;  %v1566_v15 = vld [vmem:[%s3286_s0 + $0x44] ss:$8 sm:$0xf0]   ;;  %v1616_v6 = vld [vmem:[%s3286_s0 + $0x143] ss:$8 sm:$0xf0]  }
  0x53   :  { %v716_v17 = vsel %vm4_vm0, %v1566_v15, %v1565_v14  ;;  %v1574_v18 = vld [vmem:[%s3286_s0 + $0x344] ss:$8 sm:$0xf]   ;;  %v1612_v8 = vld [vmem:[%s3286_s0 + $0x43] ss:$8 sm:$0xf]  }
  0x54   :  { %597 = vrot.lane.b32.xlu1 %v596_v28, %s1751_s3  ;;  %v1575_v19 = vld [vmem:[%s3286_s0 + $0x344] ss:$8 sm:$0xf0]   ;;  %v1613_v9 = vld [vmem:[%s3286_s0 + $0x43] ss:$8 sm:$0xf0]  }
  0x55   :  { %v1571_v20 = vld [vmem:[%s3286_s0 + $0x244] ss:$8 sm:$0xf]   ;;  %v749_v22 = vsel %vm4_vm0, %v1575_v19, %v1574_v18  ;;  %v891_v12 = vsel %vm4_vm0, %v1613_v9, %v1612_v8  ;;  %v1621_v13 = vld [vmem:[%s3286_s0 + $0x343] ss:$8 sm:$0xf]  }
  0x56   :  { %586 = vrot.lane.b32.xlu0 %v585_v31, %s1751_s3  ;;  %v1572_v21 = vld [vmem:[%s3286_s0 + $0x244] ss:$8 sm:$0xf0]   ;;  %v1622_v14 = vld [vmem:[%s3286_s0 + $0x343] ss:$8 sm:$0xf0]  }
  0x57   :  { %v738_v23 = vsel %vm4_vm0, %v1572_v21, %v1571_v20  ;;  %v1580_v24 = vld [vmem:[%s3286_s0 + $0x184] ss:$8 sm:$0xf]   ;;  %v924_v18 = vsel %vm4_vm0, %v1622_v14, %v1621_v13  ;;  %v1627_v21 = vld [vmem:[%s3286_s0 + $0x183] ss:$8 sm:$0xf]  }
  0x58   :  { %619 = vrot.lane.b32.xlu1 %v618_v40, %s1751_s3  ;;  %v1581_v25 = vld [vmem:[%s3286_s0 + $0x184] ss:$8 sm:$0xf0]   ;;  %v1650_v53 = vld [vmem:[%s3286_s0 + $0x102] ss:$8 sm:$0xf]  }
  0x59   :  { %v1577_v26 = vld [vmem:[%s3286_s0 + $0x84] ss:$8 sm:$0xf]   ;;  %v771_v28 = vsel %vm4_vm0, %v1581_v25, %v1580_v24  ;;  %v1624_v24 = vld [vmem:[%s3286_s0 + $0x83] ss:$8 sm:$0xf]  }
  0x5a   :  { %608 = vrot.lane.b32.xlu0 %v607_v43, %s1751_s3  ;;  %v1578_v27 = vld [vmem:[%s3286_s0 + $0x84] ss:$8 sm:$0xf0]   ;;  %v1625_v25 = vld [vmem:[%s3286_s0 + $0x83] ss:$8 sm:$0xf0]  }
  0x5b   :  { %v760_v29 = vsel %vm4_vm0, %v1578_v27, %v1577_v26  ;;  %v1586_v30 = vld [vmem:[%s3286_s0 + $0x384] ss:$8 sm:$0xf]   ;;  %v1651_v54 = vld [vmem:[%s3286_s0 + $0x102] ss:$8 sm:$0xf0]  }
  0x5c   :  { %641 = vrot.lane.b32.xlu1 %v640_v52, %s1751_s3  ;;  %v1587_v31 = vld [vmem:[%s3286_s0 + $0x384] ss:$8 sm:$0xf0]   ;;  %v1648_v56 = vld [vmem:[%s3286_s0 + $0x2] ss:$8 sm:$0xf]  }
  0x5d   :  { %v1583_v32 = vld [vmem:[%s3286_s0 + $0x284] ss:$8 sm:$0xf]   ;;  %v793_v34 = vsel %vm4_vm0, %v1587_v31, %v1586_v30  ;;  %v1634_v30 = vld [vmem:[%s3286_s0 + $0x383] ss:$8 sm:$0xf0]  }
  0x5e   :  { %630 = vrot.lane.b32.xlu0 %v629_v55, %s1751_s3  ;;  %v1584_v33 = vld [vmem:[%s3286_s0 + $0x284] ss:$8 sm:$0xf0]   ;;  %v1649_v57 = vld [vmem:[%s3286_s0 + $0x2] ss:$8 sm:$0xf0]  }
  0x5f   :  { %v782_v36 = vsel %vm4_vm0, %v1584_v33, %v1583_v32  ;;  %v1592_v37 = vld [vmem:[%s3286_s0 + $0x1c4] ss:$8 sm:$0xf]   ;;  %v1630_v32 = vld [vmem:[%s3286_s0 + $0x283] ss:$8 sm:$0xf]  }
  0x60   :  { %663 = vrot.lane.b32.xlu1 %v662_v62, %s1751_s3  ;;  %v1593_v38 = vld [vmem:[%s3286_s0 + $0x1c4] ss:$8 sm:$0xf0]   ;;  %v1610_v62 = vld [vmem:[%s3286_s0 + $0x303] ss:$8 sm:$0xf0]  }
  0x61   :  { %v1589_v40 = vld [vmem:[%s3286_s0 + $0xc4] ss:$8 sm:$0xf]   ;;  %v815_v42 = vsel %vm4_vm0, %v1593_v38, %v1592_v37  ;;  %v880_v2 = vsel %vm4_vm0, %v1610_v62, %v1609_v61  ;;  %v1631_v33 = vld [vmem:[%s3286_s0 + $0x283] ss:$8 sm:$0xf0]  }
  0x62   :  { %652 = vrot.lane.b32.xlu0 %v651_v63, %s1751_s3  ;;  %v1590_v41 = vld [vmem:[%s3286_s0 + $0xc4] ss:$8 sm:$0xf0]   ;;  %v1639_v37 = vld [vmem:[%s3286_s0 + $0x1c3] ss:$8 sm:$0xf]  }
  0x63   :  { %v804_v44 = vsel %vm4_vm0, %v1590_v41, %v1589_v40  ;;  %v1598_v45 = vld [vmem:[%s3286_s0 + $0x3c4] ss:$8 sm:$0xf]   ;;  %v1640_v38 = vld [vmem:[%s3286_s0 + $0x1c3] ss:$8 sm:$0xf0]  }
  0x64   :  { %684 = vrot.lane.b32.xlu1 %v683_v4, %s1752_s28  ;;  %v1599_v46 = vld [vmem:[%s3286_s0 + $0x3c4] ss:$8 sm:$0xf0]   ;;  %v869_v4 = vsel %vm4_vm0, %v1607_v1, %v1606_v0  ;;  %v1636_v40 = vld [vmem:[%s3286_s0 + $0xc3] ss:$8 sm:$0xf]  }
  0x65   :  { %v1595_v48 = vld [vmem:[%s3286_s0 + $0x2c4] ss:$8 sm:$0xf]   ;;  %v837_v50 = vsel %vm4_vm0, %v1599_v46, %v1598_v45  ;;  %v1637_v41 = vld [vmem:[%s3286_s0 + $0xc3] ss:$8 sm:$0xf0]  }
  0x66   :  { %674 = vrot.lane.b32.xlu0 %v673_v5, %s1752_s28  ;;  %v1596_v49 = vld [vmem:[%s3286_s0 + $0x2c4] ss:$8 sm:$0xf0]   ;;  %v1615_v5 = vld [vmem:[%s3286_s0 + $0x143] ss:$8 sm:$0xf]  }
  0x67   :  { %v826_v52 = vsel %vm4_vm0, %v1596_v49, %v1595_v48  ;;  %v1645_v45 = vld [vmem:[%s3286_s0 + $0x3c3] ss:$8 sm:$0xf]   ;;  %v1656_v61 = vld [vmem:[%s3286_s0 + $0x302] ss:$8 sm:$0xf]  }
  0x68   :  { %706 = vrot.lane.b32.xlu1 %v705_v10, %s1752_s28  ;;  %v902_v10 = vsel %vm4_vm0, %v1616_v6, %v1615_v5  ;;  %v1646_v46 = vld [vmem:[%s3286_s0 + $0x3c3] ss:$8 sm:$0xf0]   ;;  %v1657_v62 = vld [vmem:[%s3286_s0 + $0x302] ss:$8 sm:$0xf0]  }
  0x69   :  { %v1642_v48 = vld [vmem:[%s3286_s0 + $0x2c3] ss:$8 sm:$0xf]   ;;  %v1653_v0 = vld [vmem:[%s3286_s0 + $0x202] ss:$8 sm:$0xf]  }
  0x6a   :  { %695 = vrot.lane.b32.xlu0 %v694_v11, %s1752_s28  ;;  %v1643_v49 = vld [vmem:[%s3286_s0 + $0x2c3] ss:$8 sm:$0xf0]   ;;  %v1654_v1 = vld [vmem:[%s3286_s0 + $0x202] ss:$8 sm:$0xf0]  }
  0x6b   :  { %v1662_v5 = vld [vmem:[%s3286_s0 + $0x142] ss:$8 sm:$0xf]  }
  0x6c   :  { %728 = vrot.lane.b32.xlu1 %v727_v16, %s1752_s28  ;;  %v1618_v16 = vld [vmem:[%s3286_s0 + $0x243] ss:$8 sm:$0xf]   ;;  %v1663_v6 = vld [vmem:[%s3286_s0 + $0x142] ss:$8 sm:$0xf0]  }
  0x6d   :  { %v1659_v8 = vld [vmem:[%s3286_s0 + $0x42] ss:$8 sm:$0xf]  }
  0x6e   :  { %717 = vrot.lane.b32.xlu0 %v716_v17, %s1752_s28  ;;  %v1619_v17 = vld [vmem:[%s3286_s0 + $0x243] ss:$8 sm:$0xf0]   ;;  %v1660_v9 = vld [vmem:[%s3286_s0 + $0x42] ss:$8 sm:$0xf0]  }
  0x6f   :  { %v913_v20 = vsel %vm4_vm0, %v1619_v17, %v1618_v16  ;;  %v1668_v13 = vld [vmem:[%s3286_s0 + $0x342] ss:$8 sm:$0xf]  }
  0x70   :  { %750 = vrot.lane.b32.xlu1 %v749_v22, %s1752_s28  ;;  %v1628_v22 = vld [vmem:[%s3286_s0 + $0x183] ss:$8 sm:$0xf0]   ;;  %v1669_v14 = vld [vmem:[%s3286_s0 + $0x342] ss:$8 sm:$0xf0]  }
  0x71   :  { %v946_v26 = vsel %vm4_vm0, %v1628_v22, %v1627_v21  ;;  %v1665_v16 = vld [vmem:[%s3286_s0 + $0x242] ss:$8 sm:$0xf]  }
  0x72   :  { %739 = vrot.lane.b32.xlu0 %v738_v23, %s1752_s28  ;;  %v1666_v17 = vld [vmem:[%s3286_s0 + $0x242] ss:$8 sm:$0xf0]  }
  0x73   :  { %v1674_v21 = vld [vmem:[%s3286_s0 + $0x182] ss:$8 sm:$0xf]  }
  0x74   :  { %772 = vrot.lane.b32.xlu1 %v771_v28, %s1752_s28  ;;  %v935_v28 = vsel %vm4_vm0, %v1625_v25, %v1624_v24  ;;  %v1675_v22 = vld [vmem:[%s3286_s0 + $0x182] ss:$8 sm:$0xf0]  }
  0x75   :  { %v1671_v24 = vld [vmem:[%s3286_s0 + $0x82] ss:$8 sm:$0xf]  }
  0x76   :  { %761 = vrot.lane.b32.xlu0 %v760_v29, %s1752_s28  ;;  %v171_v35 = vpop.permute.xlu1 %170   ;;  %v1633_v29 = vld [vmem:[%s3286_s0 + $0x383] ss:$8 sm:$0xf]   ;;  %v1672_v25 = vld [vmem:[%s3286_s0 + $0x82] ss:$8 sm:$0xf0]  }
  0x77   :  { %1420 = vst.msk [vmem:[%s3287_s1 + $0x40] sm:$0xff] %vm151_vm2, %v171_v35  }
  0x78   :  { %v150_v39 = vpop.permute.xlu0 %149   ;;  %794 = vrot.lane.b32.xlu1 %v793_v34, %s1752_s28  ;;  %v968_v34 = vsel %vm4_vm0, %v1634_v30, %v1633_v29  ;;  %v1680_v29 = vld [vmem:[%s3286_s0 + $0x382] ss:$8 sm:$0xf]  }
  0x79   :  { %152 = vst.msk [vmem:[%s3287_s1] sm:$0xff] %vm151_vm2, %v150_v39   ;;  %v1681_v30 = vld [vmem:[%s3286_s0 + $0x382] ss:$8 sm:$0xf0]  }
  0x7a   :  { %783 = vrot.lane.b32.xlu0 %v782_v36, %s1752_s28  ;;  %v182_v43 = vpop.permute.xlu1 %181   ;;  %v957_v36 = vsel %vm4_vm0, %v1631_v33, %v1630_v32  ;;  %v1677_v32 = vld [vmem:[%s3286_s0 + $0x282] ss:$8 sm:$0xf]  }
  0x7b   :  { %1423 = vst.msk [vmem:[%s3287_s1 + $0x60] sm:$0xff] %vm151_vm2, %v182_v43   ;;  %v1678_v33 = vld [vmem:[%s3286_s0 + $0x282] ss:$8 sm:$0xf0]  }
  0x7c   :  { %v160_v47 = vpop.permute.xlu0 %159   ;;  %816 = vrot.lane.b32.xlu1 %v815_v42, %s1752_s28  ;;  %v990_v42 = vsel %vm4_vm0, %v1640_v38, %v1639_v37  ;;  %v1686_v37 = vld [vmem:[%s3286_s0 + $0x1c2] ss:$8 sm:$0xf]  }
  0x7d   :  { %1417 = vst.msk [vmem:[%s3287_s1 + $0x20] sm:$0xff] %vm151_vm2, %v160_v47   ;;  %v1687_v38 = vld [vmem:[%s3286_s0 + $0x1c2] ss:$8 sm:$0xf0]  }
  0x7e   :  { %805 = vrot.lane.b32.xlu0 %v804_v44, %s1752_s28  ;;  %v204_v51 = vpop.permute.xlu1 %203   ;;  %v979_v44 = vsel %vm4_vm0, %v1637_v41, %v1636_v40  ;;  %v1683_v40 = vld [vmem:[%s3286_s0 + $0xc2] ss:$8 sm:$0xf]  }
  0x7f   :  { %1429 = vst.msk [vmem:[%s3287_s1 + $0x28] sm:$0xff] %vm151_vm2, %v204_v51   ;;  %v1684_v41 = vld [vmem:[%s3286_s0 + $0xc2] ss:$8 sm:$0xf0]  }
  0x80   :  { %v193_v55 = vpop.permute.xlu0 %192   ;;  %838 = vrot.lane.b32.xlu1 %v837_v50, %s1752_s28  ;;  %v1012_v50 = vsel %vm4_vm0, %v1646_v46, %v1645_v45  ;;  %v1692_v45 = vld [vmem:[%s3286_s0 + $0x3c2] ss:$8 sm:$0xf]  }
  0x81   :  { %1426 = vst.msk [vmem:[%s3287_s1 + $0x8] sm:$0xff] %vm151_vm2, %v193_v55   ;;  %v1693_v46 = vld [vmem:[%s3286_s0 + $0x3c2] ss:$8 sm:$0xf0]  }
  0x82   :  { %827 = vrot.lane.b32.xlu0 %v826_v52, %s1752_s28  ;;  %v226_v59 = vpop.permute.xlu1 %225   ;;  %v1001_v52 = vsel %vm4_vm0, %v1643_v49, %v1642_v48  ;;  %v1689_v48 = vld [vmem:[%s3286_s0 + $0x2c2] ss:$8 sm:$0xf]  }
  0x83   :  { %1435 = vst.msk [vmem:[%s3287_s1 + $0x68] sm:$0xff] %vm151_vm2, %v226_v59   ;;  %v1690_v49 = vld [vmem:[%s3286_s0 + $0x2c2] ss:$8 sm:$0xf0]  }
  0x84   :  { %v215_v63 = vpop.permute.xlu0 %214   ;;  %859 = vrot.lane.b32.xlu1 %v858_v58, %s1753_s23  ;;  %v1033_v58 = vsel %vm4_vm0, %v1651_v54, %v1650_v53  ;;  %v1697_v53 = vld [vmem:[%s3286_s0 + $0x101] ss:$8 sm:$0xf]  }
  0x85   :  { %1432 = vst.msk [vmem:[%s3287_s1 + $0x48] sm:$0xff] %vm151_vm2, %v215_v63   ;;  %v1698_v54 = vld [vmem:[%s3286_s0 + $0x101] ss:$8 sm:$0xf0]  }
  0x86   :  { %849 = vrot.lane.b32.xlu0 %v848_v60, %s1753_s23  ;;  %v248_v3 = vpop.permute.xlu1 %247   ;;  %v1023_v60 = vsel %vm4_vm0, %v1649_v57, %v1648_v56  ;;  %v1695_v56 = vld [vmem:[%s3286_s0 + $0x1] ss:$8 sm:$0xf]  }
  0x87   :  { %1441 = vst.msk [vmem:[%s3287_s1 + $0x30] sm:$0xff] %vm151_vm2, %v248_v3   ;;  %v1696_v57 = vld [vmem:[%s3286_s0 + $0x1] ss:$8 sm:$0xf0]  }
  0x88   :  { %v237_v7 = vpop.permute.xlu0 %236   ;;  %881 = vrot.lane.b32.xlu1 %v880_v2, %s1753_s23  ;;  %v1055_v2 = vsel %vm4_vm0, %v1657_v62, %v1656_v61  ;;  %v1703_v61 = vld [vmem:[%s3286_s0 + $0x301] ss:$8 sm:$0xf]  }
  0x89   :  { %1438 = vst.msk [vmem:[%s3287_s1 + $0x10] sm:$0xff] %vm151_vm2, %v237_v7   ;;  %v1704_v62 = vld [vmem:[%s3286_s0 + $0x301] ss:$8 sm:$0xf0]  }
  0x8a   :  { %870 = vrot.lane.b32.xlu0 %v869_v4, %s1753_s23  ;;  %v270_v11 = vpop.permute.xlu1 %269   ;;  %v1044_v4 = vsel %vm4_vm0, %v1654_v1, %v1653_v0  ;;  %v1700_v0 = vld [vmem:[%s3286_s0 + $0x201] ss:$8 sm:$0xf]  }
  0x8b   :  { %1447 = vst.msk [vmem:[%s3287_s1 + $0x70] sm:$0xff] %vm151_vm2, %v270_v11   ;;  %v1701_v1 = vld [vmem:[%s3286_s0 + $0x201] ss:$8 sm:$0xf0]  }
  0x8c   :  { %v259_v15 = vpop.permute.xlu0 %258   ;;  %903 = vrot.lane.b32.xlu1 %v902_v10, %s1753_s23  ;;  %v1077_v10 = vsel %vm4_vm0, %v1663_v6, %v1662_v5  ;;  %v1709_v5 = vld [vmem:[%s3286_s0 + $0x141] ss:$8 sm:$0xf]  }
  0x8d   :  { %1444 = vst.msk [vmem:[%s3287_s1 + $0x50] sm:$0xff] %vm151_vm2, %v259_v15   ;;  %v1710_v6 = vld [vmem:[%s3286_s0 + $0x141] ss:$8 sm:$0xf0]  }
  0x8e   :  { %892 = vrot.lane.b32.xlu0 %v891_v12, %s1753_s23  ;;  %v292_v19 = vpop.permute.xlu1 %291   ;;  %v1066_v12 = vsel %vm4_vm0, %v1660_v9, %v1659_v8  ;;  %v1706_v8 = vld [vmem:[%s3286_s0 + $0x41] ss:$8 sm:$0xf]  }
  0x8f   :  { %1453 = vst.msk [vmem:[%s3287_s1 + $0x38] sm:$0xff] %vm151_vm2, %v292_v19   ;;  %v1707_v9 = vld [vmem:[%s3286_s0 + $0x41] ss:$8 sm:$0xf0]  }
  0x90   :  { %v281_v23 = vpop.permute.xlu0 %280   ;;  %925 = vrot.lane.b32.xlu1 %v924_v18, %s1753_s23  ;;  %v1099_v18 = vsel %vm4_vm0, %v1669_v14, %v1668_v13  ;;  %v1715_v13 = vld [vmem:[%s3286_s0 + $0x341] ss:$8 sm:$0xf]  }
  0x91   :  { %1450 = vst.msk [vmem:[%s3287_s1 + $0x18] sm:$0xff] %vm151_vm2, %v281_v23   ;;  %v1716_v14 = vld [vmem:[%s3286_s0 + $0x341] ss:$8 sm:$0xf0]  }
  0x92   :  { %914 = vrot.lane.b32.xlu0 %v913_v20, %s1753_s23  ;;  %v314_v27 = vpop.permute.xlu1 %313   ;;  %v1088_v20 = vsel %vm4_vm0, %v1666_v17, %v1665_v16  ;;  %v1712_v16 = vld [vmem:[%s3286_s0 + $0x241] ss:$8 sm:$0xf]  }
  0x93   :  { %1459 = vst.msk [vmem:[%s3287_s1 + $0x78] sm:$0xff] %vm151_vm2, %v314_v27   ;;  %v1713_v17 = vld [vmem:[%s3286_s0 + $0x241] ss:$8 sm:$0xf0]  }
  0x94   :  { %v303_v31 = vpop.permute.xlu0 %302   ;;  %947 = vrot.lane.b32.xlu1 %v946_v26, %s1753_s23  ;;  %v1121_v26 = vsel %vm4_vm0, %v1675_v22, %v1674_v21  ;;  %v1721_v21 = vld [vmem:[%s3286_s0 + $0x181] ss:$8 sm:$0xf]  }
  0x95   :  { %1456 = vst.msk [vmem:[%s3287_s1 + $0x58] sm:$0xff] %vm151_vm2, %v303_v31   ;;  %v1722_v22 = vld [vmem:[%s3286_s0 + $0x181] ss:$8 sm:$0xf0]  }
  0x96   :  { %936 = vrot.lane.b32.xlu0 %v935_v28, %s1753_s23  ;;  %v335_v35 = vpop.permute.xlu1 %334   ;;  %v1110_v28 = vsel %vm4_vm0, %v1672_v25, %v1671_v24  ;;  %v1718_v24 = vld [vmem:[%s3286_s0 + $0x81] ss:$8 sm:$0xf]  }
  0x97   :  { %1464 = vst.msk [vmem:[%s3287_s1 + $0x20] sm:$0xff] %vm326_vm3, %v335_v35   ;;  %v1719_v25 = vld [vmem:[%s3286_s0 + $0x81] ss:$8 sm:$0xf0]  }
  0x98   :  { %v325_v39 = vpop.permute.xlu0 %324   ;;  %969 = vrot.lane.b32.xlu1 %v968_v34, %s1753_s23  ;;  %v1143_v34 = vsel %vm4_vm0, %v1681_v30, %v1680_v29  ;;  %v1727_v29 = vld [vmem:[%s3286_s0 + $0x381] ss:$8 sm:$0xf]  }
  0x99   :  { %327 = vst.msk [vmem:[%s3287_s1] sm:$0xff] %vm326_vm3, %v325_v39   ;;  %v1728_v30 = vld [vmem:[%s3286_s0 + $0x381] ss:$8 sm:$0xf0]  }
  0x9a   :  { %958 = vrot.lane.b32.xlu0 %v957_v36, %s1753_s23  ;;  %v357_v43 = vpop.permute.xlu1 %356   ;;  %v1132_v36 = vsel %vm4_vm0, %v1678_v33, %v1677_v32  ;;  %v1724_v32 = vld [vmem:[%s3286_s0 + $0x281] ss:$8 sm:$0xf]  }
  0x9b   :  { %1470 = vst.msk [vmem:[%s3287_s1 + $0x60] sm:$0xff] %vm326_vm3, %v357_v43   ;;  %v1725_v33 = vld [vmem:[%s3286_s0 + $0x281] ss:$8 sm:$0xf0]  }
  0x9c   :  { %v346_v47 = vpop.permute.xlu0 %345   ;;  %991 = vrot.lane.b32.xlu1 %v990_v42, %s1753_s23  ;;  %v1165_v42 = vsel %vm4_vm0, %v1687_v38, %v1686_v37  ;;  %v1733_v37 = vld [vmem:[%s3286_s0 + $0x1c1] ss:$8 sm:$0xf]  }
  0x9d   :  { %1467 = vst.msk [vmem:[%s3287_s1 + $0x40] sm:$0xff] %vm326_vm3, %v346_v47   ;;  %v1734_v38 = vld [vmem:[%s3286_s0 + $0x1c1] ss:$8 sm:$0xf0]  }
  0x9e   :  { %980 = vrot.lane.b32.xlu0 %v979_v44, %s1753_s23  ;;  %v379_v51 = vpop.permute.xlu1 %378   ;;  %v1154_v44 = vsel %vm4_vm0, %v1684_v41, %v1683_v40  ;;  %v1730_v40 = vld [vmem:[%s3286_s0 + $0xc1] ss:$8 sm:$0xf]  }
  0x9f   :  { %1476 = vst.msk [vmem:[%s3287_s1 + $0x28] sm:$0xff] %vm326_vm3, %v379_v51   ;;  %v1731_v41 = vld [vmem:[%s3286_s0 + $0xc1] ss:$8 sm:$0xf0]  }
  0xa0   :  { %v368_v55 = vpop.permute.xlu0 %367   ;;  %1013 = vrot.lane.b32.xlu1 %v1012_v50, %s1753_s23  ;;  %v1187_v50 = vsel %vm4_vm0, %v1693_v46, %v1692_v45  ;;  %v1739_v45 = vld [vmem:[%s3286_s0 + $0x3c1] ss:$8 sm:$0xf]  }
  0xa1   :  { %1473 = vst.msk [vmem:[%s3287_s1 + $0x8] sm:$0xff] %vm326_vm3, %v368_v55   ;;  %v1740_v46 = vld [vmem:[%s3286_s0 + $0x3c1] ss:$8 sm:$0xf0]  }
  0xa2   :  { %1002 = vrot.lane.b32.xlu0 %v1001_v52, %s1753_s23  ;;  %v401_v59 = vpop.permute.xlu1 %400   ;;  %v1176_v52 = vsel %vm4_vm0, %v1690_v49, %v1689_v48  ;;  %v1736_v48 = vld [vmem:[%s3286_s0 + $0x2c1] ss:$8 sm:$0xf]  }
  0xa3   :  { %1482 = vst.msk [vmem:[%s3287_s1 + $0x68] sm:$0xff] %vm326_vm3, %v401_v59   ;;  %v1737_v49 = vld [vmem:[%s3286_s0 + $0x2c1] ss:$8 sm:$0xf0]  }
  0xa4   :  { %v390_v63 = vpop.permute.xlu0 %389   ;;  %1034 = vrot.lane.b32.xlu1 %v1033_v58, %s1754_s9  ;;  %v1208_v58 = vsel %vm4_vm0, %v1698_v54, %v1697_v53 }
  0xa5   :  { %1479 = vst.msk [vmem:[%s3287_s1 + $0x48] sm:$0xff] %vm326_vm3, %v390_v63  }
  0xa6   :  { %1024 = vrot.lane.b32.xlu0 %v1023_v60, %s1754_s9  ;;  %v423_v3 = vpop.permute.xlu1 %422   ;;  %v1198_v60 = vsel %vm4_vm0, %v1696_v57, %v1695_v56 }
  0xa7   :  { %1488 = vst.msk [vmem:[%s3287_s1 + $0x30] sm:$0xff] %vm326_vm3, %v423_v3  }
  0xa8   :  { %v412_v7 = vpop.permute.xlu0 %411   ;;  %1056 = vrot.lane.b32.xlu1 %v1055_v2, %s1754_s9  ;;  %v1230_v2 = vsel %vm4_vm0, %v1704_v62, %v1703_v61 }
  0xa9   :  { %1485 = vst.msk [vmem:[%s3287_s1 + $0x10] sm:$0xff] %vm326_vm3, %v412_v7  }
  0xaa   :  { %1045 = vrot.lane.b32.xlu0 %v1044_v4, %s1754_s9  ;;  %v445_v11 = vpop.permute.xlu1 %444   ;;  %v1219_v4 = vsel %vm4_vm0, %v1701_v1, %v1700_v0 }
  0xab   :  { %1494 = vst.msk [vmem:[%s3287_s1 + $0x70] sm:$0xff] %vm326_vm3, %v445_v11  }
  0xac   :  { %v434_v15 = vpop.permute.xlu0 %433   ;;  %1078 = vrot.lane.b32.xlu1 %v1077_v10, %s1754_s9  ;;  %v1252_v10 = vsel %vm4_vm0, %v1710_v6, %v1709_v5 }
  0xad   :  { %1491 = vst.msk [vmem:[%s3287_s1 + $0x50] sm:$0xff] %vm326_vm3, %v434_v15  }
  0xae   :  { %1067 = vrot.lane.b32.xlu0 %v1066_v12, %s1754_s9  ;;  %v467_v19 = vpop.permute.xlu1 %466   ;;  %v1241_v12 = vsel %vm4_vm0, %v1707_v9, %v1706_v8 }
  0xaf   :  { %1500 = vst.msk [vmem:[%s3287_s1 + $0x38] sm:$0xff] %vm326_vm3, %v467_v19  }
  0xb0   :  { %v456_v23 = vpop.permute.xlu0 %455   ;;  %1100 = vrot.lane.b32.xlu1 %v1099_v18, %s1754_s9  ;;  %v1274_v18 = vsel %vm4_vm0, %v1716_v14, %v1715_v13 }
  0xb1   :  { %1497 = vst.msk [vmem:[%s3287_s1 + $0x18] sm:$0xff] %vm326_vm3, %v456_v23  }
  0xb2   :  { %1089 = vrot.lane.b32.xlu0 %v1088_v20, %s1754_s9  ;;  %v489_v27 = vpop.permute.xlu1 %488   ;;  %v1263_v20 = vsel %vm4_vm0, %v1713_v17, %v1712_v16 }
  0xb3   :  { %1506 = vst.msk [vmem:[%s3287_s1 + $0x78] sm:$0xff] %vm326_vm3, %v489_v27  }
  0xb4   :  { %v478_v31 = vpop.permute.xlu0 %477   ;;  %1122 = vrot.lane.b32.xlu1 %v1121_v26, %s1754_s9  ;;  %v1296_v26 = vsel %vm4_vm0, %v1722_v22, %v1721_v21 }
  0xb5   :  { %1503 = vst.msk [vmem:[%s3287_s1 + $0x58] sm:$0xff] %vm326_vm3, %v478_v31  }
  0xb6   :  { %1111 = vrot.lane.b32.xlu0 %v1110_v28, %s1754_s9  ;;  %v510_v35 = vpop.permute.xlu1 %509   ;;  %v1285_v28 = vsel %vm4_vm0, %v1719_v25, %v1718_v24 }
  0xb7   :  { %1511 = vst.msk [vmem:[%s3287_s1 + $0x20] sm:$0xff] %vm501_vm4, %v510_v35  }
  0xb8   :  { %v500_v39 = vpop.permute.xlu0 %499   ;;  %1144 = vrot.lane.b32.xlu1 %v1143_v34, %s1754_s9  ;;  %v1318_v34 = vsel %vm4_vm0, %v1728_v30, %v1727_v29 }
  0xb9   :  { %502 = vst.msk [vmem:[%s3287_s1] sm:$0xff] %vm501_vm4, %v500_v39  }
  0xba   :  { %1133 = vrot.lane.b32.xlu0 %v1132_v36, %s1754_s9  ;;  %v532_v43 = vpop.permute.xlu1 %531   ;;  %v1307_v36 = vsel %vm4_vm0, %v1725_v33, %v1724_v32 }
  0xbb   :  { %1517 = vst.msk [vmem:[%s3287_s1 + $0x60] sm:$0xff] %vm501_vm4, %v532_v43  }
  0xbc   :  { %v521_v47 = vpop.permute.xlu0 %520   ;;  %1166 = vrot.lane.b32.xlu1 %v1165_v42, %s1754_s9  ;;  %v1340_v42 = vsel %vm4_vm0, %v1734_v38, %v1733_v37 }
  0xbd   :  { %1514 = vst.msk [vmem:[%s3287_s1 + $0x40] sm:$0xff] %vm501_vm4, %v521_v47  }
  0xbe   :  { %1155 = vrot.lane.b32.xlu0 %v1154_v44, %s1754_s9  ;;  %v554_v51 = vpop.permute.xlu1 %553   ;;  %v1329_v44 = vsel %vm4_vm0, %v1731_v41, %v1730_v40 }
  0xbf   :  { %1523 = vst.msk [vmem:[%s3287_s1 + $0x28] sm:$0xff] %vm501_vm4, %v554_v51  }
  0xc0   :  { %v543_v55 = vpop.permute.xlu0 %542   ;;  %1188 = vrot.lane.b32.xlu1 %v1187_v50, %s1754_s9  ;;  %v1362_v50 = vsel %vm4_vm0, %v1740_v46, %v1739_v45 }
  0xc1   :  { %1520 = vst.msk [vmem:[%s3287_s1 + $0x8] sm:$0xff] %vm501_vm4, %v543_v55  }
  0xc2   :  { %1177 = vrot.lane.b32.xlu0 %v1176_v52, %s1754_s9  ;;  %v576_v59 = vpop.permute.xlu1 %575   ;;  %v1351_v52 = vsel %vm4_vm0, %v1737_v49, %v1736_v48 }
  0xc3   :  { %1529 = vst.msk [vmem:[%s3287_s1 + $0x68] sm:$0xff] %vm501_vm4, %v576_v59  }
  0xc4   :  { %v565_v63 = vpop.permute.xlu0 %564   ;;  %1209 = vrot.lane.b32.xlu1 %v1208_v58, %s1755_s20 }
  0xc5   :  { %1526 = vst.msk [vmem:[%s3287_s1 + $0x48] sm:$0xff] %vm501_vm4, %v565_v63  }
  0xc6   :  { %1199 = vrot.lane.b32.xlu0 %v1198_v60, %s1755_s20  ;;  %v598_v3 = vpop.permute.xlu1 %597  }
  0xc7   :  { %1535 = vst.msk [vmem:[%s3287_s1 + $0x30] sm:$0xff] %vm501_vm4, %v598_v3  }
  0xc8   :  { %v587_v7 = vpop.permute.xlu0 %586   ;;  %1231 = vrot.lane.b32.xlu1 %v1230_v2, %s1755_s20 }
  0xc9   :  { %1532 = vst.msk [vmem:[%s3287_s1 + $0x10] sm:$0xff] %vm501_vm4, %v587_v7  }
  0xca   :  { %1220 = vrot.lane.b32.xlu0 %v1219_v4, %s1755_s20  ;;  %v620_v11 = vpop.permute.xlu1 %619  }
  0xcb   :  { %1541 = vst.msk [vmem:[%s3287_s1 + $0x70] sm:$0xff] %vm501_vm4, %v620_v11  }
  0xcc   :  { %v609_v15 = vpop.permute.xlu0 %608   ;;  %1253 = vrot.lane.b32.xlu1 %v1252_v10, %s1755_s20 }
  0xcd   :  { %1538 = vst.msk [vmem:[%s3287_s1 + $0x50] sm:$0xff] %vm501_vm4, %v609_v15  }
  0xce   :  { %1242 = vrot.lane.b32.xlu0 %v1241_v12, %s1755_s20  ;;  %v642_v19 = vpop.permute.xlu1 %641  }
  0xcf   :  { %1547 = vst.msk [vmem:[%s3287_s1 + $0x38] sm:$0xff] %vm501_vm4, %v642_v19  }
  0xd0   :  { %v631_v23 = vpop.permute.xlu0 %630   ;;  %1275 = vrot.lane.b32.xlu1 %v1274_v18, %s1755_s20 }
  0xd1   :  { %1544 = vst.msk [vmem:[%s3287_s1 + $0x18] sm:$0xff] %vm501_vm4, %v631_v23  }
  0xd2   :  { %1264 = vrot.lane.b32.xlu0 %v1263_v20, %s1755_s20  ;;  %v664_v27 = vpop.permute.xlu1 %663  }
  0xd3   :  { %1553 = vst.msk [vmem:[%s3287_s1 + $0x78] sm:$0xff] %vm501_vm4, %v664_v27  }
  0xd4   :  { %v653_v31 = vpop.permute.xlu0 %652   ;;  %1297 = vrot.lane.b32.xlu1 %v1296_v26, %s1755_s20 }
  0xd5   :  { %1550 = vst.msk [vmem:[%s3287_s1 + $0x58] sm:$0xff] %vm501_vm4, %v653_v31  }
  0xd6   :  { %1286 = vrot.lane.b32.xlu0 %v1285_v28, %s1755_s20  ;;  %v685_v35 = vpop.permute.xlu1 %684  }
  0xd7   :  { %1558 = vst.msk [vmem:[%s3287_s1 + $0x20] sm:$0xff] %vm676_vm5, %v685_v35  }
  0xd8   :  { %v675_v39 = vpop.permute.xlu0 %674   ;;  %1319 = vrot.lane.b32.xlu1 %v1318_v34, %s1755_s20 }
  0xd9   :  { %677 = vst.msk [vmem:[%s3287_s1] sm:$0xff] %vm676_vm5, %v675_v39  }
  0xda   :  { %1308 = vrot.lane.b32.xlu0 %v1307_v36, %s1755_s20  ;;  %v707_v43 = vpop.permute.xlu1 %706  }
  0xdb   :  { %1564 = vst.msk [vmem:[%s3287_s1 + $0x60] sm:$0xff] %vm676_vm5, %v707_v43  }
  0xdc   :  { %v696_v47 = vpop.permute.xlu0 %695   ;;  %1341 = vrot.lane.b32.xlu1 %v1340_v42, %s1755_s20 }
  0xdd   :  { %1561 = vst.msk [vmem:[%s3287_s1 + $0x40] sm:$0xff] %vm676_vm5, %v696_v47  }
  0xde   :  { %1330 = vrot.lane.b32.xlu0 %v1329_v44, %s1755_s20  ;;  %v729_v51 = vpop.permute.xlu1 %728  }
  0xdf   :  { %1570 = vst.msk [vmem:[%s3287_s1 + $0x28] sm:$0xff] %vm676_vm5, %v729_v51  }
  0xe0   :  { %v718_v53 = vpop.permute.xlu0 %717   ;;  %1363 = vrot.lane.b32.xlu1 %v1362_v50, %s1755_s20 }
  0xe1   :  { %1567 = vst.msk [vmem:[%s3287_s1 + $0x8] sm:$0xff] %vm676_vm5, %v718_v53  }
  0xe2   :  { %1352 = vrot.lane.b32.xlu0 %v1351_v52, %s1755_s20  ;;  %v751_v54 = vpop.permute.xlu1 %750  }
  0xe3   :  { %1576 = vst.msk [vmem:[%s3287_s1 + $0x68] sm:$0xff] %vm676_vm5, %v751_v54  }
  0xe4   :  { %v740_v55 = vpop.permute.xlu0 %739  }
  0xe5   :  { %1573 = vst.msk [vmem:[%s3287_s1 + $0x48] sm:$0xff] %vm676_vm5, %v740_v55  }
  0xe6   :  { %v773_v56 = vpop.permute.xlu1 %772  }
  0xe7   :  { %1582 = vst.msk [vmem:[%s3287_s1 + $0x30] sm:$0xff] %vm676_vm5, %v773_v56  }
  0xe8   :  { %v762_v57 = vpop.permute.xlu0 %761  }
  0xe9   :  { %1579 = vst.msk [vmem:[%s3287_s1 + $0x10] sm:$0xff] %vm676_vm5, %v762_v57  }
  0xea   :  { %v795_v58 = vpop.permute.xlu1 %794  }
  0xeb   :  { %1588 = vst.msk [vmem:[%s3287_s1 + $0x70] sm:$0xff] %vm676_vm5, %v795_v58  }
  0xec   :  { %v784_v59 = vpop.permute.xlu0 %783  }
  0xed   :  { %1585 = vst.msk [vmem:[%s3287_s1 + $0x50] sm:$0xff] %vm676_vm5, %v784_v59  }
  0xee   :  { %v817_v60 = vpop.permute.xlu1 %816  }
  0xef   :  { %1594 = vst.msk [vmem:[%s3287_s1 + $0x38] sm:$0xff] %vm676_vm5, %v817_v60  }
  0xf0   :  { %v806_v61 = vpop.permute.xlu0 %805  }
  0xf1   :  { %1591 = vst.msk [vmem:[%s3287_s1 + $0x18] sm:$0xff] %vm676_vm5, %v806_v61  }
  0xf2   :  { %v839_v62 = vpop.permute.xlu1 %838  }
  0xf3   :  { %1600 = vst.msk [vmem:[%s3287_s1 + $0x78] sm:$0xff] %vm676_vm5, %v839_v62  }
  0xf4   :  { %v828_v63 = vpop.permute.xlu0 %827  }
  0xf5   :  { %1597 = vst.msk [vmem:[%s3287_s1 + $0x58] sm:$0xff] %vm676_vm5, %v828_v63  }
  0xf6   :  { %v860_v0 = vpop.permute.xlu1 %859  }
  0xf7   :  { %1605 = vst.msk [vmem:[%s3287_s1 + $0x20] sm:$0xff] %vm851_vm6, %v860_v0  }
  0xf8   :  { %v850_v1 = vpop.permute.xlu0 %849  }
  0xf9   :  { %852 = vst.msk [vmem:[%s3287_s1] sm:$0xff] %vm851_vm6, %v850_v1  }
  0xfa   :  { %v882_v2 = vpop.permute.xlu1 %881  }
  0xfb   :  { %1611 = vst.msk [vmem:[%s3287_s1 + $0x60] sm:$0xff] %vm851_vm6, %v882_v2  }
  0xfc   :  { %v871_v3 = vpop.permute.xlu0 %870  }
  0xfd   :  { %1608 = vst.msk [vmem:[%s3287_s1 + $0x40] sm:$0xff] %vm851_vm6, %v871_v3  }
  0xfe   :  { %v904_v4 = vpop.permute.xlu1 %903  }
  0xff   :  { %1617 = vst.msk [vmem:[%s3287_s1 + $0x28] sm:$0xff] %vm851_vm6, %v904_v4  }
 0x100   :  { %v893_v5 = vpop.permute.xlu0 %892  }
 0x101   :  { %1614 = vst.msk [vmem:[%s3287_s1 + $0x8] sm:$0xff] %vm851_vm6, %v893_v5  }
 0x102   :  { %v926_v6 = vpop.permute.xlu1 %925  }
 0x103   :  { %1623 = vst.msk [vmem:[%s3287_s1 + $0x68] sm:$0xff] %vm851_vm6, %v926_v6  }
 0x104   :  { %v915_v7 = vpop.permute.xlu0 %914  }
 0x105   :  { %1620 = vst.msk [vmem:[%s3287_s1 + $0x48] sm:$0xff] %vm851_vm6, %v915_v7  }
 0x106   :  { %v948_v8 = vpop.permute.xlu1 %947  }
 0x107   :  { %1629 = vst.msk [vmem:[%s3287_s1 + $0x30] sm:$0xff] %vm851_vm6, %v948_v8  }
 0x108   :  { %v937_v9 = vpop.permute.xlu0 %936  }
 0x109   :  { %1626 = vst.msk [vmem:[%s3287_s1 + $0x10] sm:$0xff] %vm851_vm6, %v937_v9  }
 0x10a   :  { %v970_v10 = vpop.permute.xlu1 %969  }
 0x10b   :  { %1635 = vst.msk [vmem:[%s3287_s1 + $0x70] sm:$0xff] %vm851_vm6, %v970_v10  }
 0x10c   :  { %v959_v11 = vpop.permute.xlu0 %958  }
 0x10d   :  { %1632 = vst.msk [vmem:[%s3287_s1 + $0x50] sm:$0xff] %vm851_vm6, %v959_v11  }
 0x10e   :  { %v992_v12 = vpop.permute.xlu1 %991  }
 0x10f   :  { %1641 = vst.msk [vmem:[%s3287_s1 + $0x38] sm:$0xff] %vm851_vm6, %v992_v12  }
 0x110   :  { %v981_v13 = vpop.permute.xlu0 %980  }
 0x111   :  { %1638 = vst.msk [vmem:[%s3287_s1 + $0x18] sm:$0xff] %vm851_vm6, %v981_v13  }
 0x112   :  { %v1014_v14 = vpop.permute.xlu1 %1013  }
 0x113   :  { %1647 = vst.msk [vmem:[%s3287_s1 + $0x78] sm:$0xff] %vm851_vm6, %v1014_v14  }
 0x114   :  { %v1003_v15 = vpop.permute.xlu0 %1002  }
 0x115   :  { %1644 = vst.msk [vmem:[%s3287_s1 + $0x58] sm:$0xff] %vm851_vm6, %v1003_v15  }
 0x116   :  { %v1035_v16 = vpop.permute.xlu1 %1034  }
 0x117   :  { %1652 = vst.msk [vmem:[%s3287_s1 + $0x20] sm:$0xff] %vm1026_vm7, %v1035_v16  }
 0x118   :  { %v1025_v17 = vpop.permute.xlu0 %1024  }
 0x119   :  { %1027 = vst.msk [vmem:[%s3287_s1] sm:$0xff] %vm1026_vm7, %v1025_v17  }
 0x11a   :  { %v1057_v18 = vpop.permute.xlu1 %1056  }
 0x11b   :  { %1658 = vst.msk [vmem:[%s3287_s1 + $0x60] sm:$0xff] %vm1026_vm7, %v1057_v18  }
 0x11c   :  { %v1046_v19 = vpop.permute.xlu0 %1045  }
 0x11d   :  { %1655 = vst.msk [vmem:[%s3287_s1 + $0x40] sm:$0xff] %vm1026_vm7, %v1046_v19  }
 0x11e   :  { %v1079_v20 = vpop.permute.xlu1 %1078  }
 0x11f   :  { %1664 = vst.msk [vmem:[%s3287_s1 + $0x28] sm:$0xff] %vm1026_vm7, %v1079_v20  }
 0x120   :  { %v1068_v21 = vpop.permute.xlu0 %1067  }
 0x121   :  { %1661 = vst.msk [vmem:[%s3287_s1 + $0x8] sm:$0xff] %vm1026_vm7, %v1068_v21  }
 0x122   :  { %v1101_v22 = vpop.permute.xlu1 %1100  }
 0x123   :  { %1670 = vst.msk [vmem:[%s3287_s1 + $0x68] sm:$0xff] %vm1026_vm7, %v1101_v22  }
 0x124   :  { %v1090_v23 = vpop.permute.xlu0 %1089  }
 0x125   :  { %1667 = vst.msk [vmem:[%s3287_s1 + $0x48] sm:$0xff] %vm1026_vm7, %v1090_v23  }
 0x126   :  { %v1123_v24 = vpop.permute.xlu1 %1122  }
 0x127   :  { %1676 = vst.msk [vmem:[%s3287_s1 + $0x30] sm:$0xff] %vm1026_vm7, %v1123_v24  }
 0x128   :  { %v1112_v25 = vpop.permute.xlu0 %1111  }
 0x129   :  { %1673 = vst.msk [vmem:[%s3287_s1 + $0x10] sm:$0xff] %vm1026_vm7, %v1112_v25  }
 0x12a   :  { %v1145_v26 = vpop.permute.xlu1 %1144  }
 0x12b   :  { %1682 = vst.msk [vmem:[%s3287_s1 + $0x70] sm:$0xff] %vm1026_vm7, %v1145_v26  }
 0x12c   :  { %v1134_v27 = vpop.permute.xlu0 %1133  }
 0x12d   :  { %1679 = vst.msk [vmem:[%s3287_s1 + $0x50] sm:$0xff] %vm1026_vm7, %v1134_v27  }
 0x12e   :  { %v1167_v28 = vpop.permute.xlu1 %1166  }
 0x12f   :  { %1688 = vst.msk [vmem:[%s3287_s1 + $0x38] sm:$0xff] %vm1026_vm7, %v1167_v28  }
 0x130   :  { %v1156_v29 = vpop.permute.xlu0 %1155  }
 0x131   :  { %1685 = vst.msk [vmem:[%s3287_s1 + $0x18] sm:$0xff] %vm1026_vm7, %v1156_v29  }
 0x132   :  { %v1189_v30 = vpop.permute.xlu1 %1188  }
 0x133   :  { %1694 = vst.msk [vmem:[%s3287_s1 + $0x78] sm:$0xff] %vm1026_vm7, %v1189_v30  }
 0x134   :  { %v1178_v31 = vpop.permute.xlu0 %1177  }
 0x135   :  { %1691 = vst.msk [vmem:[%s3287_s1 + $0x58] sm:$0xff] %vm1026_vm7, %v1178_v31  }
 0x136   :  { %v1210_v32 = vpop.permute.xlu1 %1209  }
 0x137   :  { %1699 = vst.msk [vmem:[%s3287_s1 + $0x20] sm:$0xff] %vm1201_vm8, %v1210_v32  }
 0x138   :  { %v1200_v33 = vpop.permute.xlu0 %1199  }
 0x139   :  { %1202 = vst.msk [vmem:[%s3287_s1] sm:$0xff] %vm1201_vm8, %v1200_v33  }
 0x13a   :  { %v1232_v34 = vpop.permute.xlu1 %1231  }
 0x13b   :  { %1705 = vst.msk [vmem:[%s3287_s1 + $0x60] sm:$0xff] %vm1201_vm8, %v1232_v34  }
 0x13c   :  { %v1221_v35 = vpop.permute.xlu0 %1220  }
 0x13d   :  { %1702 = vst.msk [vmem:[%s3287_s1 + $0x40] sm:$0xff] %vm1201_vm8, %v1221_v35  }
 0x13e   :  { %v1254_v36 = vpop.permute.xlu1 %1253  }
 0x13f   :  { %1711 = vst.msk [vmem:[%s3287_s1 + $0x28] sm:$0xff] %vm1201_vm8, %v1254_v36  }
 0x140   :  { %v1243_v37 = vpop.permute.xlu0 %1242  }
 0x141   :  { %1708 = vst.msk [vmem:[%s3287_s1 + $0x8] sm:$0xff] %vm1201_vm8, %v1243_v37  }
 0x142   :  { %v1276_v38 = vpop.permute.xlu1 %1275  }
 0x143   :  { %1717 = vst.msk [vmem:[%s3287_s1 + $0x68] sm:$0xff] %vm1201_vm8, %v1276_v38  }
 0x144   :  { %v1265_v39 = vpop.permute.xlu0 %1264  }
 0x145   :  { %1714 = vst.msk [vmem:[%s3287_s1 + $0x48] sm:$0xff] %vm1201_vm8, %v1265_v39  }
 0x146   :  { %v1298_v40 = vpop.permute.xlu1 %1297  }
 0x147   :  { %1723 = vst.msk [vmem:[%s3287_s1 + $0x30] sm:$0xff] %vm1201_vm8, %v1298_v40  }
 0x148   :  { %v1287_v41 = vpop.permute.xlu0 %1286  }
 0x149   :  { %1720 = vst.msk [vmem:[%s3287_s1 + $0x10] sm:$0xff] %vm1201_vm8, %v1287_v41  }
 0x14a   :  { %v1320_v42 = vpop.permute.xlu1 %1319  }
 0x14b   :  { %1729 = vst.msk [vmem:[%s3287_s1 + $0x70] sm:$0xff] %vm1201_vm8, %v1320_v42  }
 0x14c   :  { %v1309_v43 = vpop.permute.xlu0 %1308  }
 0x14d   :  { %1726 = vst.msk [vmem:[%s3287_s1 + $0x50] sm:$0xff] %vm1201_vm8, %v1309_v43  }
 0x14e   :  { %v1342_v44 = vpop.permute.xlu1 %1341  }
 0x14f   :  { %1735 = vst.msk [vmem:[%s3287_s1 + $0x38] sm:$0xff] %vm1201_vm8, %v1342_v44  }
 0x150   :  { %v1331_v45 = vpop.permute.xlu0 %1330  }
 0x151   :  { %1732 = vst.msk [vmem:[%s3287_s1 + $0x18] sm:$0xff] %vm1201_vm8, %v1331_v45  }
 0x152   :  { %v1364_v46 = vpop.permute.xlu1 %1363  }
 0x153   :  { %1741 = vst.msk [vmem:[%s3287_s1 + $0x78] sm:$0xff] %vm1201_vm8, %v1364_v46  }
 0x154   :  { %v1353_v47 = vpop.permute.xlu0 %1352  }
 0x155   :  { %1738 = vst.msk [vmem:[%s3287_s1 + $0x58] sm:$0xff] %vm1201_vm8, %v1353_v47  }

// kernel: forward.19
= control target key start
LH: loop header
LB: loop body
LE: loop exit
PB: predicated region body
PF: predicated region fallthrough
CT: control target
= control target key end

     0   :  { %vm788_vm0 = vcmask 785408   ;;  %vm1201_vm1 = vcmask 130048   ;;  %s2173_s1 = inlined_call_operand.vmem [shape: bf16[864,16], index: 1, kind: input, shape index: {}]   ;;  %s2174_s0 = inlined_call_operand.vmem [shape: bf16[128,864], index: 0, kind: input, shape index: {}]   ;;  %s2175_s2 = inlined_call_operand.vmem [shape: f32[128,16], index: 2, kind: output, shape index: {}]  }
   0x1   :  { %v1574_v0 = vld [vmem:[%s2173_s1 + $0x40] sm:$0xff]   ;;  %v1578_v4 = vld [vmem:[%s2173_s1 + $0x48] sm:$0xff]   ;;  %v1582_v8 = vld [vmem:[%s2173_s1 + $0x50] sm:$0xff]  }
   0x2   :  { %v1575_v1 = vld [vmem:[%s2173_s1 + $0xc0] sm:$0xff]   ;;  %1340 = vmatprep.subr.bf16.mxu0 %v1574_v0  ;;  %v1579_v5 = vld [vmem:[%s2173_s1 + $0xc8] sm:$0xff]   ;;  %v1583_v9 = vld [vmem:[%s2173_s1 + $0xd0] sm:$0xff]  }
   0x3   :  { %v1576_v2 = vld [vmem:[%s2173_s1] sm:$0xff]   ;;  %1404 = vmatprep.subr.bf16.mxu1 %v1575_v1  ;;  %v1580_v6 = vld [vmem:[%s2173_s1 + $0x8] sm:$0xff]   ;;  %v1584_v10 = vld [vmem:[%s2173_s1 + $0x10] sm:$0xff]  }
   0x4   :  { %v1577_v3 = vld [vmem:[%s2173_s1 + $0x80] sm:$0xff]   ;;  %1341 = vmatpush3.bf16.msra.mxu0 %v1576_v2  ;;  %v1581_v7 = vld [vmem:[%s2173_s1 + $0x88] sm:$0xff]   ;;  %v1585_v11 = vld [vmem:[%s2173_s1 + $0x90] sm:$0xff]  }
   0x5   :  { %1405 = vmatpush3.bf16.msra.mxu1 %v1577_v3  ;;  %1342 = vmatprep.subr.bf16.mxu0 %v1578_v4  ;;  %v1586_v12 = vld [vmem:[%s2173_s1 + $0x58] sm:$0xff]   ;;  %v1590_v16 = vld [vmem:[%s2173_s1 + $0x60] sm:$0xff]   ;;  %v1594_v20 = vld [vmem:[%s2173_s1 + $0x68] sm:$0xff]  }
   0x6   :  { %1406 = vmatprep.subr.bf16.mxu1 %v1579_v5  ;;  %v1587_v13 = vld [vmem:[%s2173_s1 + $0xd8] sm:$0xff]   ;;  %v1591_v17 = vld [vmem:[%s2173_s1 + $0xe0] sm:$0xff]   ;;  %v1595_v21 = vld [vmem:[%s2173_s1 + $0xe8] sm:$0xff]  }
   0x7   :  { %v1588_v14 = vld [vmem:[%s2173_s1 + $0x18] sm:$0xff]   ;;  %v1592_v18 = vld [vmem:[%s2173_s1 + $0x20] sm:$0xff]   ;;  %v1596_v22 = vld [vmem:[%s2173_s1 + $0x28] sm:$0xff]  }
   0x8   :  { %1343 = vmatpush3.bf16.msra.mxu0 %v1580_v6  ;;  %v1589_v15 = vld [vmem:[%s2173_s1 + $0x98] sm:$0xff]   ;;  %v1593_v19 = vld [vmem:[%s2173_s1 + $0xa0] sm:$0xff]   ;;  %v1597_v23 = vld [vmem:[%s2173_s1 + $0xa8] sm:$0xff]  }
   0x9   :  { %1407 = vmatpush3.bf16.msra.mxu1 %v1581_v7  ;;  %1344 = vmatprep.subr.bf16.mxu0 %v1582_v8  ;;  %v1598_v24 = vld [vmem:[%s2173_s1 + $0x70] sm:$0xff]   ;;  %v1602_v28 = vld [vmem:[%s2173_s1 + $0x78] sm:$0xff]   ;;  %v1608_v33 = vld [vmem:[%s2174_s0 + $0x4] ss:$28 sps:$4 sm:$0xff]  }
   0xa   :  { %1408 = vmatprep.subr.bf16.mxu1 %v1583_v9  ;;  %v1599_v25 = vld [vmem:[%s2173_s1 + $0xf0] sm:$0xff]   ;;  %v1603_v29 = vld [vmem:[%s2173_s1 + $0xf8] sm:$0xff]   ;;  %v1609_v34 = vld [vmem:[%s2174_s0 + $0x8] ss:$28 sps:$4 sm:$0xff]   ;;  %845 = vmatprep.mubr.bf16.mxu0 %v1608_v33 }
   0xb   :  { %v1600_v26 = vld [vmem:[%s2173_s1 + $0x30] sm:$0xff]   ;;  %v1604_v30 = vld [vmem:[%s2173_s1 + $0x38] sm:$0xff]   ;;  %v1611_v35 = vld [vmem:[%s2174_s0 + $0xc] ss:$28 sps:$4 sm:$0xff]  }
   0xc   :  { %1345 = vmatpush3.bf16.msra.mxu0 %v1584_v10  ;;  %v1601_v27 = vld [vmem:[%s2173_s1 + $0xb0] sm:$0xff]   ;;  %v1605_v31 = vld [vmem:[%s2173_s1 + $0xb8] sm:$0xff]   ;;  %v1612_v36 = vld [vmem:[%s2173_s1 + $0x140] sm:$0xff]   ;;  %942 = vmatprep.mubr.bf16.mxu1 %v1611_v35 }
   0xd   :  { %1409 = vmatpush3.bf16.msra.mxu1 %v1585_v11  ;;  %1346 = vmatprep.subr.bf16.mxu0 %v1586_v12  ;;  %v1606_v32 = vld [vmem:[%s2174_s0] ss:$28 sps:$4 sm:$0xff]   ;;  %v1618_v40 = vld [vmem:[%s2174_s0 + $0x38] ss:$28 sps:$4 sm:$0xff]   ;;  %v1620_v42 = vld [vmem:[%s2173_s1 + $0x148] sm:$0xff]  }
   0xe   :  { %1410 = vmatprep.subr.bf16.mxu1 %v1587_v13  ;;  %v1613_v37 = vld [vmem:[%s2173_s1 + $0x100] sm:$0xff]   ;;  %v1614_v38 = vld [vmem:[%s2174_s0 + $0x3c] ss:$28 sps:$4 sm:$0xff]   ;;  %v1621_v43 = vld [vmem:[%s2173_s1 + $0x108] sm:$0xff]  }
   0xf   :  { %v1616_v39 = vld [vmem:[%s2174_s0 + $0x44] ss:$28 sps:$4 sm:$0xff]   ;;  %v1622_v44 = vld [vmem:[%s2174_s0 + $0x74] ss:$28 sps:$4 sm:$0xff]   ;;  %v1624_v45 = vld [vmem:[%s2174_s0 + $0x7c] ss:$28 sps:$4 sm:$0xff]  }
  0x10   :  { %1347 = vmatpush3.bf16.msra.mxu0 %v1588_v14  ;;  %v1619_v41 = vld [vmem:[%s2174_s0 + $0x40] ss:$28 sps:$4 sm:$0xff]   ;;  %v1628_v46 = vld [vmem:[%s2173_s1 + $0x150] sm:$0xff]   ;;  %v1630_v50 = vld [vmem:[%s2174_s0 + $0xac] ss:$28 sps:$4 sm:$0xff]  }
  0x11   :  { %1411 = vmatpush3.bf16.msra.mxu1 %v1589_v15  ;;  %1348 = vmatprep.subr.bf16.mxu0 %v1590_v16  ;;  %v1629_v47 = vld [vmem:[%s2173_s1 + $0x110] sm:$0xff]   ;;  %v1636_v52 = vld [vmem:[%s2173_s1 + $0x158] sm:$0xff]   ;;  %v1634_v54 = vld [vmem:[%s2174_s0 + $0xa8] ss:$28 sps:$4 sm:$0xff]  }
  0x12   :  { %1412 = vmatprep.subr.bf16.mxu1 %v1591_v17  ;;  %v1626_v48 = vld [vmem:[%s2174_s0 + $0x70] ss:$28 sps:$4 sm:$0xff]   ;;  %v1627_v49 = vld [vmem:[%s2174_s0 + $0x78] ss:$28 sps:$4 sm:$0xff]   ;;  %v1644_v55 = vld [vmem:[%s2173_s1 + $0x160] sm:$0xff]  }
  0x13   :  { %v1632_v51 = vld [vmem:[%s2174_s0 + $0xb4] ss:$28 sps:$4 sm:$0xff]   ;;  %v1637_v53 = vld [vmem:[%s2173_s1 + $0x118] sm:$0xff]   ;;  %v1645_v57 = vld [vmem:[%s2173_s1 + $0x120] sm:$0xff]  }
  0x14   :  { %1349 = vmatpush3.bf16.msra.mxu0 %v1592_v18  ;;  %v1635_v56 = vld [vmem:[%s2174_s0 + $0xb0] ss:$28 sps:$4 sm:$0xff]   ;;  %v1646_v58 = vld [vmem:[%s2173_s1 + $0x180] sm:$0xff]   ;;  %v1647_v2 = vld [vmem:[%s2174_s0 + $0x11c] ss:$28 sps:$4 sm:$0xff]  }
  0x15   :  { %1413 = vmatpush3.bf16.msra.mxu1 %v1593_v19  ;;  %1350 = vmatprep.subr.bf16.mxu0 %v1594_v20  ;;  %v1638_v59 = vld [vmem:[%s2174_s0 + $0xe4] ss:$28 sps:$4 sm:$0xff]   ;;  %v1640_v60 = vld [vmem:[%s2174_s0 + $0xec] ss:$28 sps:$4 sm:$0xff]   ;;  %v1662_v4 = vld [vmem:[%s2173_s1 + $0x170] sm:$0xff]  }
  0x16   :  { %1414 = vmatprep.subr.bf16.mxu1 %v1595_v21  ;;  %v1653_v61 = vld [vmem:[%s2173_s1 + $0x168] sm:$0xff]   ;;  %v1642_v63 = vld [vmem:[%s2174_s0 + $0xe0] ss:$28 sps:$4 sm:$0xff]   ;;  %v1663_v5 = vld [vmem:[%s2173_s1 + $0x130] sm:$0xff]  }
  0x17   :  { %v1654_v62 = vld [vmem:[%s2173_s1 + $0x128] sm:$0xff]   ;;  %v1649_v3 = vld [vmem:[%s2174_s0 + $0x124] ss:$28 sps:$4 sm:$0xff]   ;;  %v1664_v6 = vld [vmem:[%s2173_s1 + $0x190] sm:$0xff]  }
  0x18   :  { %1351 = vmatpush3.bf16.msra.mxu0 %v1596_v22  ;;  %v1643_v0 = vld [vmem:[%s2174_s0 + $0xe8] ss:$28 sps:$4 sm:$0xff]   ;;  %v1651_v7 = vld [vmem:[%s2174_s0 + $0x118] ss:$28 sps:$4 sm:$0xff]   ;;  %v1652_v8 = vld [vmem:[%s2174_s0 + $0x120] ss:$28 sps:$4 sm:$0xff]  }
  0x19   :  { %1415 = vmatpush3.bf16.msra.mxu1 %v1597_v23  ;;  %1352 = vmatprep.subr.bf16.mxu0 %v1598_v24  ;;  %v1659_v1 = vld [vmem:[%s2173_s1 + $0x188] sm:$0xff]   ;;  %v1655_v9 = vld [vmem:[%s2174_s0 + $0x154] ss:$28 sps:$4 sm:$0xff]   ;;  %v1671_v10 = vld [vmem:[%s2173_s1 + $0x178] sm:$0xff]  }
  0x1a   :  { %1416 = vmatprep.subr.bf16.mxu1 %v1599_v25  ;;  %v1657_v11 = vld [vmem:[%s2174_s0 + $0x15c] ss:$28 sps:$4 sm:$0xff]   ;;  %v1674_v14 = vld [vmem:[%s2173_s1 + $0x1a0] sm:$0xff]   ;;  %v1678_v15 = vld [vmem:[%s2173_s1 + $0x1a8] sm:$0xff]  }
  0x1b   :  { %v1672_v12 = vld [vmem:[%s2173_s1 + $0x198] sm:$0xff]   ;;  %v1660_v16 = vld [vmem:[%s2174_s0 + $0x150] ss:$28 sps:$4 sm:$0xff]   ;;  %v1669_v20 = vld [vmem:[%s2174_s0 + $0x188] ss:$28 sps:$4 sm:$0xff]  }
  0x1c   :  { %1353 = vmatpush3.bf16.msra.mxu0 %v1600_v26  ;;  %v1673_v13 = vld [vmem:[%s2173_s1 + $0x138] sm:$0xff]   ;;  %v1665_v18 = vld [vmem:[%s2174_s0 + $0x18c] ss:$28 sps:$4 sm:$0xff]   ;;  %v1667_v19 = vld [vmem:[%s2174_s0 + $0x194] ss:$28 sps:$4 sm:$0xff]  }
  0x1d   :  { %1417 = vmatpush3.bf16.msra.mxu1 %v1601_v27  ;;  %1354 = vmatprep.subr.bf16.mxu0 %v1602_v28  ;;  %v1661_v17 = vld [vmem:[%s2174_s0 + $0x158] ss:$28 sps:$4 sm:$0xff]   ;;  %v1670_v21 = vld [vmem:[%s2174_s0 + $0x190] ss:$28 sps:$4 sm:$0xff]   ;;  %v1687_v27 = vld [vmem:[%s2174_s0 + $0x88] ss:$28 sps:$4 sm:$0xff]  }
  0x1e   :  { %1418 = vmatprep.subr.bf16.mxu1 %v1603_v29  ;;  %v1677_v22 = vld [vmem:[%s2174_s0 + $0x14] ss:$28 sps:$4 sm:$0xff]   ;;  %v1681_v26 = vld [vmem:[%s2174_s0 + $0x4c] ss:$28 sps:$4 sm:$0xff]   ;;  %v1684_v29 = vld [vmem:[%s2174_s0 + $0x84] ss:$28 sps:$4 sm:$0xff]  }
  0x1f   :  { %v1679_v23 = vld [vmem:[%s2174_s0 + $0x18] ss:$28 sps:$4 sm:$0xff]   ;;  %v1675_v24 = vld [vmem:[%s2174_s0 + $0x10] ss:$28 sps:$4 sm:$0xff]   ;;  %v1683_v28 = vld [vmem:[%s2174_s0 + $0x48] ss:$28 sps:$4 sm:$0xff]  }
  0x20   :  { %1355 = vmatpush3.bf16.msra.mxu0 %v1604_v30  ;;  %v1680_v25 = vld [vmem:[%s2174_s0 + $0x50] ss:$28 sps:$4 sm:$0xff]   ;;  %v1688_v30 = vld [vmem:[%s2174_s0 + $0xc0] ss:$28 sps:$4 sm:$0xff]   ;;  %v1703_v35 = vld [vmem:[%s2174_s0 + $0x168] ss:$28 sps:$4 sm:$0xff]  }
  0x21   :  { %1419 = vmatpush3.bf16.msra.mxu1 %v1605_v31  ;;  %1468 = vmatprep.subr.bf16.mxu0 %v1612_v36  ;;  %v1695_v31 = vld [vmem:[%s2174_s0 + $0xf8] ss:$28 sps:$4 sm:$0xff]  }
  0x22   :  { %1546 = vmatprep.subr.bf16.mxu1 %v1646_v58  ;;  %v1689_v33 = vld [vmem:[%s2174_s0 + $0xbc] ss:$28 sps:$4 sm:$0xff]  }
  0x23   :  { %846 = vmatmul.mubr.bf16.vlgmr.msra.gmra.mrb[0].mxu0 %v1606_v32  ;;  %v1686_v32 = vld [vmem:[%s2174_s0 + $0x80] ss:$28 sps:$4 sm:$0xff]   ;;  %v1691_v36 = vld [vmem:[%s2174_s0 + $0xb8] ss:$28 sps:$4 sm:$0xff]  }
  0x24   :  { %943 = vmatmul.mubr.bf16.vlgmr.msra.gmra.mrb[0].mxu1 %v1609_v34  ;;  %1469 = vmatpush3.bf16.msra.mxu0 %v1613_v37  ;;  %v1696_v34 = vld [vmem:[%s2174_s0 + $0x130] ss:$28 sps:$4 sm:$0xff]  }
  0x25   :  { %853 = vmatprep.mubr.bf16.mxu0 %v1614_v38  ;;  %950 = vmatprep.mubr.bf16.mxu1 %v1616_v39  ;;  %v1692_v37 = vld [vmem:[%s2174_s0 + $0xf4] ss:$28 sps:$4 sm:$0xff]   ;;  %v1704_v38 = vld [vmem:[%s2174_s0 + $0x1a0] ss:$28 sps:$4 sm:$0xff]  }
  0x26   :  { %1470 = vmatprep.subr.bf16.mxu0 %v1620_v42  ;;  %1547 = vmatpush3.bf16.msra.mxu1 %v1646_v58  ;;  %v1694_v39 = vld [vmem:[%s2174_s0 + $0xf0] ss:$28 sps:$4 sm:$0xff]   ;;  %v1700_v42 = vld [vmem:[%s2174_s0 + $0x164] ss:$28 sps:$4 sm:$0xff]  }
  0x27   :  { %1548 = vmatprep.subr.bf16.mxu1 %v1659_v1 }
  0x28   :  { %1471 = vmatpush3.bf16.msra.mxu0 %v1621_v43  ;;  %v1702_v43 = vld [vmem:[%s2174_s0 + $0x160] ss:$28 sps:$4 sm:$0xff]  }
  0x29   :  { %1472 = vmatprep.subr.bf16.mxu0 %v1628_v46 }
  0x2a   :  { %1549 = vmatpush3.bf16.msra.mxu1 %v1659_v1 }
  0x2b   :  { %854 = vmatmul.mubr.bf16.gmra.mrb[4].mxu0 %v1618_v40  ;;  %1550 = vmatprep.subr.bf16.mxu1 %v1664_v6  ;;  %v1697_v40 = vld [vmem:[%s2174_s0 + $0x12c] ss:$28 sps:$4 sm:$0xff]  }
  0x2c   :  { %951 = vmatmul.mubr.bf16.gmra.mrb[4].mxu1 %v1619_v41  ;;  %861 = vmatprep.mubr.bf16.mxu0 %v1622_v44  ;;  %v1699_v41 = vld [vmem:[%s2174_s0 + $0x128] ss:$28 sps:$4 sm:$0xff]   ;;  %v1705_v44 = vld [vmem:[%s2174_s0 + $0x19c] ss:$28 sps:$4 sm:$0xff]  }
  0x2d   :  { %958 = vmatprep.mubr.bf16.mxu1 %v1624_v45  ;;  %1473 = vmatpush3.bf16.msra.mxu0 %v1629_v47  ;;  %v1707_v45 = vld [vmem:[%s2174_s0 + $0x198] ss:$28 sps:$4 sm:$0xff]  }
  0x2e   :  { %1474 = vmatprep.subr.bf16.mxu0 %v1636_v52  ;;  %1551 = vmatpush3.bf16.msra.mxu1 %v1664_v6 }
  0x2f   :  { %1552 = vmatprep.subr.bf16.mxu1 %v1672_v12 }
  0x31   :  { %1475 = vmatpush3.bf16.msra.mxu0 %v1637_v53 }
  0x32   :  { %1476 = vmatprep.subr.bf16.mxu0 %v1644_v55  ;;  %1553 = vmatpush3.bf16.msra.mxu1 %v1672_v12 }
  0x33   :  { %862 = vmatmul.mubr.bf16.gmra.mrb[8].mxu0 %v1626_v48  ;;  %1554 = vmatprep.subr.bf16.mxu1 %v1674_v14 }
  0x34   :  { %959 = vmatmul.mubr.bf16.gmra.mrb[8].mxu1 %v1627_v49  ;;  %869 = vmatprep.mubr.bf16.mxu0 %v1630_v50 }
  0x35   :  { %966 = vmatprep.mubr.bf16.mxu1 %v1632_v51  ;;  %1477 = vmatpush3.bf16.msra.mxu0 %v1645_v57 }
  0x36   :  { %1478 = vmatprep.subr.bf16.mxu0 %v1653_v61  ;;  %1555 = vmatpush3.bf16.msra.mxu1 %v1674_v14 }
  0x37   :  { %1556 = vmatprep.subr.bf16.mxu1 %v1678_v15 }
  0x39   :  { %1479 = vmatpush3.bf16.msra.mxu0 %v1654_v62 }
  0x3a   :  { %1480 = vmatprep.subr.bf16.mxu0 %v1662_v4  ;;  %1557 = vmatpush3.bf16.msra.mxu1 %v1678_v15 }
  0x3b   :  { %870 = vmatmul.mubr.bf16.gmra.mrb[12].mxu0 %v1634_v54 }
  0x3c   :  { %967 = vmatmul.mubr.bf16.gmra.mrb[12].mxu1 %v1635_v56  ;;  %877 = vmatprep.mubr.bf16.mxu0 %v1638_v59 }
  0x3d   :  { %974 = vmatprep.mubr.bf16.mxu1 %v1640_v60  ;;  %1481 = vmatpush3.bf16.msra.mxu0 %v1663_v5 }
  0x3e   :  { %1482 = vmatprep.subr.bf16.mxu0 %v1671_v10 }
  0x41   :  { %1483 = vmatpush3.bf16.msra.mxu0 %v1673_v13 }
  0x43   :  { %878 = vmatmul.mubr.bf16.gmra.mrb[16].mxu0 %v1642_v63 }
  0x44   :  { %975 = vmatmul.mubr.bf16.gmra.mrb[16].mxu1 %v1643_v0  ;;  %885 = vmatprep.mubr.bf16.mxu0 %v1647_v2 }
  0x45   :  { %982 = vmatprep.mubr.bf16.mxu1 %v1649_v3 }
  0x4b   :  { %886 = vmatmul.mubr.bf16.gmra.mrb[20].mxu0 %v1651_v7 }
  0x4c   :  { %983 = vmatmul.mubr.bf16.gmra.mrb[20].mxu1 %v1652_v8  ;;  %893 = vmatprep.mubr.bf16.mxu0 %v1655_v9 }
  0x4d   :  { %990 = vmatprep.mubr.bf16.mxu1 %v1657_v11 }
  0x53   :  { %894 = vmatmul.mubr.bf16.gmra.mrb[24].mxu0 %v1660_v16 }
  0x54   :  { %991 = vmatmul.mubr.bf16.gmra.mrb[24].mxu1 %v1661_v17  ;;  %901 = vmatprep.mubr.bf16.mxu0 %v1665_v18 }
  0x55   :  { %998 = vmatprep.mubr.bf16.mxu1 %v1667_v19 }
  0x5b   :  { %902 = vmatmul.mubr.bf16.gmra.mrb[28].mxu0 %v1669_v20 }
  0x5c   :  { %999 = vmatmul.mubr.bf16.gmra.mrb[28].mxu1 %v1670_v21  ;;  %1039 = vmatprep.mubr.bf16.mxu0 %v1677_v22 }
  0x5d   :  { %1558 = vmatprep.mubr.msk.bf16.mxu1 %vm788_vm0, %v1679_v23 }
  0x63   :  { %1040 = vmatmul.mubr.bf16.vlgmr.msra.gmra.mrb[32].mxu0 %v1675_v24 }
  0x64   :  { %1559 = vmatmul.mubr.msk.bf16.vlgmr.msra.gmra.mrb[32].mxu1 %vm788_vm0, %v1680_v25  ;;  %1047 = vmatprep.mubr.bf16.mxu0 %v1681_v26 }
  0x65   :  { %1562 = vmatprep.mubr.msk.bf16.mxu1 %vm788_vm0, %v1687_v27 }
  0x6b   :  { %1048 = vmatmul.mubr.bf16.gmra.mrb[36].mxu0 %v1683_v28 }
  0x6c   :  { %1055 = vmatprep.mubr.bf16.mxu0 %v1684_v29  ;;  %1563 = vmatmul.mubr.msk.bf16.gmra.mrb[36].mxu1 %vm788_vm0, %v1688_v30 }
  0x6d   :  { %1566 = vmatprep.mubr.msk.bf16.mxu1 %vm788_vm0, %v1695_v31 }
  0x73   :  { %1056 = vmatmul.mubr.bf16.gmra.mrb[40].mxu0 %v1686_v32 }
  0x74   :  { %1063 = vmatprep.mubr.bf16.mxu0 %v1689_v33  ;;  %1567 = vmatmul.mubr.msk.bf16.gmra.mrb[40].mxu1 %vm788_vm0, %v1696_v34 }
  0x75   :  { %1570 = vmatprep.mubr.msk.bf16.mxu1 %vm788_vm0, %v1703_v35 }
  0x7b   :  { %1064 = vmatmul.mubr.bf16.gmra.mrb[44].mxu0 %v1691_v36 }
  0x7c   :  { %1071 = vmatprep.mubr.bf16.mxu0 %v1692_v37  ;;  %1571 = vmatmul.mubr.msk.bf16.gmra.mrb[44].mxu1 %vm788_vm0, %v1704_v38 }
  0x83   :  { %1072 = vmatmul.mubr.bf16.gmra.mrb[48].mxu0 %v1694_v39 }
  0x84   :  { %1079 = vmatprep.mubr.bf16.mxu0 %v1697_v40 }
  0x8b   :  { %1080 = vmatmul.mubr.bf16.gmra.mrb[52].mxu0 %v1699_v41 }
  0x8c   :  { %1087 = vmatprep.mubr.bf16.mxu0 %v1700_v42 }
  0x93   :  { %1088 = vmatmul.mubr.bf16.gmra.mrb[56].mxu0 %v1702_v43 }
  0x94   :  { %1095 = vmatprep.mubr.bf16.mxu0 %v1705_v44 }
  0x9b   :  { %1096 = vmatmul.mubr.bf16.gmra.mrb[60].mxu0 %v1707_v45 }
  0xf6   :  { %v1356_v46 = vpop.f32.mrb[0].mxu0 }
  0xf7   :  { %v1420_v47 = vpop.f32.mrb[0].mxu1  ;;  %v1357_v48 = vpop.f32.mrb[1].mxu0 }
  0xf8   :  { %v1358_v49 = vadd.f32 %v1357_v48, %v1356_v46  ;;  %v1421_v50 = vpop.f32.mrb[1].mxu1  ;;  %v1359_v51 = vpop.f32.mrb[2].mxu0 }
  0xf9   :  { %v1422_v52 = vadd.f32 %v1421_v50, %v1420_v47  ;;  %v1423_v53 = vpop.f32.mrb[2].mxu1  ;;  %v1360_v54 = vpop.f32.mrb[3].mxu0 }
  0xfa   :  { %v1361_v55 = vadd.f32 %v1360_v54, %v1359_v51  ;;  %v1424_v56 = vpop.f32.mrb[3].mxu1 }
  0xfb   :  { %v2061_v57 = vadd.f32 %v1422_v52, %v1358_v49  ;;  %v1425_v58 = vadd.f32 %v1424_v56, %v1423_v53 }
  0xfd   :  { %v2063_v59 = vadd.f32 %v1425_v58, %v1361_v55 }
  0xfe   :  { %v1362_v60 = vpop.f32.mrb[4].mxu0 }
  0xff   :  { %v1426_v61 = vpop.f32.mrb[4].mxu1  ;;  %v1363_v62 = vpop.f32.mrb[5].mxu0 }
 0x100   :  { %v1364_v63 = vadd.f32 %v1363_v62, %v1362_v60  ;;  %v1427_v0 = vpop.f32.mrb[5].mxu1  ;;  %v1365_v1 = vpop.f32.mrb[6].mxu0 }
 0x101   :  { %v1428_v2 = vadd.f32 %v1427_v0, %v1426_v61  ;;  %v1429_v3 = vpop.f32.mrb[6].mxu1  ;;  %v1366_v4 = vpop.f32.mrb[7].mxu0 }
 0x102   :  { %v1367_v5 = vadd.f32 %v1366_v4, %v1365_v1  ;;  %v1430_v6 = vpop.f32.mrb[7].mxu1 }
 0x103   :  { %v2065_v7 = vadd.f32 %v1428_v2, %v1364_v63  ;;  %v1431_v8 = vadd.f32 %v1430_v6, %v1429_v3 }
 0x105   :  { %v2067_v9 = vadd.f32 %v1431_v8, %v1367_v5 }
 0x106   :  { %v1368_v10 = vpop.f32.mrb[8].mxu0 }
 0x107   :  { %v1432_v11 = vpop.f32.mrb[8].mxu1  ;;  %v1369_v12 = vpop.f32.mrb[9].mxu0 }
 0x108   :  { %v1370_v13 = vadd.f32 %v1369_v12, %v1368_v10  ;;  %v1433_v14 = vpop.f32.mrb[9].mxu1  ;;  %v1371_v15 = vpop.f32.mrb[10].mxu0 }
 0x109   :  { %v1434_v16 = vadd.f32 %v1433_v14, %v1432_v11  ;;  %v1435_v17 = vpop.f32.mrb[10].mxu1  ;;  %v1372_v18 = vpop.f32.mrb[11].mxu0 }
 0x10a   :  { %v1373_v19 = vadd.f32 %v1372_v18, %v1371_v15  ;;  %v1436_v20 = vpop.f32.mrb[11].mxu1 }
 0x10b   :  { %v2069_v21 = vadd.f32 %v1434_v16, %v1370_v13  ;;  %v1437_v22 = vadd.f32 %v1436_v20, %v1435_v17 }
 0x10d   :  { %v2071_v23 = vadd.f32 %v1437_v22, %v1373_v19 }
 0x10e   :  { %v1374_v24 = vpop.f32.mrb[12].mxu0 }
 0x10f   :  { %v1438_v25 = vpop.f32.mrb[12].mxu1  ;;  %v1375_v26 = vpop.f32.mrb[13].mxu0 }
 0x110   :  { %v1376_v27 = vadd.f32 %v1375_v26, %v1374_v24  ;;  %v1439_v28 = vpop.f32.mrb[13].mxu1  ;;  %v1377_v29 = vpop.f32.mrb[14].mxu0 }
 0x111   :  { %v1440_v30 = vadd.f32 %v1439_v28, %v1438_v25  ;;  %v1441_v31 = vpop.f32.mrb[14].mxu1  ;;  %v1378_v32 = vpop.f32.mrb[15].mxu0 }
 0x112   :  { %v1379_v33 = vadd.f32 %v1378_v32, %v1377_v29  ;;  %v1442_v34 = vpop.f32.mrb[15].mxu1 }
 0x113   :  { %v2073_v35 = vadd.f32 %v1440_v30, %v1376_v27  ;;  %v1443_v36 = vadd.f32 %v1442_v34, %v1441_v31 }
 0x115   :  { %v2075_v37 = vadd.f32 %v1443_v36, %v1379_v33 }
 0x116   :  { %v1380_v38 = vpop.f32.mrb[16].mxu0 }
 0x117   :  { %v1444_v39 = vpop.f32.mrb[16].mxu1  ;;  %v1381_v40 = vpop.f32.mrb[17].mxu0 }
 0x118   :  { %v1382_v41 = vadd.f32 %v1381_v40, %v1380_v38  ;;  %v1445_v42 = vpop.f32.mrb[17].mxu1  ;;  %v1383_v43 = vpop.f32.mrb[18].mxu0 }
 0x119   :  { %v1446_v44 = vadd.f32 %v1445_v42, %v1444_v39  ;;  %v1447_v45 = vpop.f32.mrb[18].mxu1  ;;  %v1384_v46 = vpop.f32.mrb[19].mxu0 }
 0x11a   :  { %v1385_v47 = vadd.f32 %v1384_v46, %v1383_v43  ;;  %v1448_v48 = vpop.f32.mrb[19].mxu1 }
 0x11b   :  { %v2077_v49 = vadd.f32 %v1446_v44, %v1382_v41  ;;  %v1449_v50 = vadd.f32 %v1448_v48, %v1447_v45 }
 0x11d   :  { %v2079_v51 = vadd.f32 %v1449_v50, %v1385_v47 }
 0x11e   :  { %v1386_v52 = vpop.f32.mrb[20].mxu0 }
 0x11f   :  { %v1450_v53 = vpop.f32.mrb[20].mxu1  ;;  %v1387_v54 = vpop.f32.mrb[21].mxu0 }
 0x120   :  { %v1388_v55 = vadd.f32 %v1387_v54, %v1386_v52  ;;  %v1451_v56 = vpop.f32.mrb[21].mxu1  ;;  %v1389_v58 = vpop.f32.mrb[22].mxu0 }
 0x121   :  { %v1452_v60 = vadd.f32 %v1451_v56, %v1450_v53  ;;  %v1453_v61 = vpop.f32.mrb[22].mxu1  ;;  %v1390_v62 = vpop.f32.mrb[23].mxu0 }
 0x122   :  { %v1391_v63 = vadd.f32 %v1390_v62, %v1389_v58  ;;  %v1454_v0 = vpop.f32.mrb[23].mxu1 }
 0x123   :  { %v2081_v1 = vadd.f32 %v1452_v60, %v1388_v55  ;;  %v1455_v2 = vadd.f32 %v1454_v0, %v1453_v61 }
 0x125   :  { %v2083_v3 = vadd.f32 %v1455_v2, %v1391_v63 }
 0x126   :  { %v1392_v4 = vpop.f32.mrb[24].mxu0 }
 0x127   :  { %v1456_v5 = vpop.f32.mrb[24].mxu1  ;;  %v1393_v6 = vpop.f32.mrb[25].mxu0 }
 0x128   :  { %v1394_v8 = vadd.f32 %v1393_v6, %v1392_v4  ;;  %v1457_v10 = vpop.f32.mrb[25].mxu1  ;;  %v1395_v11 = vpop.f32.mrb[26].mxu0 }
 0x129   :  { %v1458_v12 = vadd.f32 %v1457_v10, %v1456_v5  ;;  %v1459_v13 = vpop.f32.mrb[26].mxu1  ;;  %v1396_v14 = vpop.f32.mrb[27].mxu0 }
 0x12a   :  { %v1397_v15 = vadd.f32 %v1396_v14, %v1395_v11  ;;  %v1460_v16 = vpop.f32.mrb[27].mxu1 }
 0x12b   :  { %v2085_v17 = vadd.f32 %v1458_v12, %v1394_v8  ;;  %v1461_v18 = vadd.f32 %v1460_v16, %v1459_v13 }
 0x12d   :  { %v2087_v19 = vadd.f32 %v1461_v18, %v1397_v15 }
 0x12e   :  { %v1398_v20 = vpop.f32.mrb[28].mxu0 }
 0x12f   :  { %v1462_v22 = vpop.f32.mrb[28].mxu1  ;;  %v1399_v24 = vpop.f32.mrb[29].mxu0 }
 0x130   :  { %v1400_v25 = vadd.f32 %v1399_v24, %v1398_v20  ;;  %v1463_v26 = vpop.f32.mrb[29].mxu1  ;;  %v1401_v27 = vpop.f32.mrb[30].mxu0 }
 0x131   :  { %v1464_v28 = vadd.f32 %v1463_v26, %v1462_v22  ;;  %v1465_v29 = vpop.f32.mrb[30].mxu1  ;;  %v1402_v30 = vpop.f32.mrb[31].mxu0 }
 0x132   :  { %v1403_v31 = vadd.f32 %v1402_v30, %v1401_v27  ;;  %v1466_v32 = vpop.f32.mrb[31].mxu1 }
 0x133   :  { %v2089_v33 = vadd.f32 %v1464_v28, %v1400_v25  ;;  %v1467_v34 = vadd.f32 %v1466_v32, %v1465_v29 }
 0x135   :  { %v2091_v36 = vadd.f32 %v1467_v34, %v1403_v31 }
 0x136   :  { %v1484_v38 = vpop.f32.mrb[32].mxu0 }
 0x137   :  { %v1485_v39 = vpop.f32.mrb[33].mxu0  ;;  %v1560_v40 = vpop.f32.mrb[32].mxu1 }
 0x138   :  { %v1486_v41 = vadd.f32 %v1485_v39, %v1484_v38  ;;  %v1487_v42 = vpop.f32.mrb[34].mxu0  ;;  %v1138_v43 = vpop.f32.mrb[33].mxu1 }
 0x139   :  { %v1488_v44 = vpop.f32.mrb[35].mxu0  ;;  %v1561_v45 = vpop.f32.mrb[34].mxu1 }
 0x13a   :  { %v1489_v46 = vadd.f32 %v1488_v44, %v1487_v42  ;;  %v1042_v47 = vadd.f32 %v1486_v41, %v2061_v57  ;;  %v1141_v48 = vpop.f32.mrb[35].mxu1 }
 0x13c   :  { %v1139_v50 = vadd.f32 %v1138_v43, %v1042_v47  ;;  %v1045_v52 = vadd.f32 %v1489_v46, %v2063_v59 }
 0x13e   :  { %1202 = vst.msk [vmem:[%s2175_s2] sm:$0xff] %vm1201_vm1, %v1139_v50  ;;  %v1142_v53 = vadd.f32 %v1141_v48, %v1045_v52  ;;  %v1490_v54 = vpop.f32.mrb[36].mxu0 }
 0x13f   :  { %v1491_v55 = vpop.f32.mrb[37].mxu0  ;;  %v1564_v56 = vpop.f32.mrb[36].mxu1 }
 0x140   :  { %1203 = vst.msk [vmem:[%s2175_s2 + $0x8] sm:$0xff] %vm1201_vm1, %v1142_v53  ;;  %v1492_v57 = vadd.f32 %v1491_v55, %v1490_v54  ;;  %v1493_v58 = vpop.f32.mrb[38].mxu0  ;;  %v1154_v60 = vpop.f32.mrb[37].mxu1 }
 0x141   :  { %v1494_v61 = vpop.f32.mrb[39].mxu0  ;;  %v1565_v62 = vpop.f32.mrb[38].mxu1 }
 0x142   :  { %v1050_v59 = vadd.f32 %v1492_v57, %v2065_v7  ;;  %v1495_v63 = vadd.f32 %v1494_v61, %v1493_v58  ;;  %v1157_v0 = vpop.f32.mrb[39].mxu1 }
 0x144   :  { %v1147_v2 = vadd.f32 %v1560_v40, %v1050_v59  ;;  %v1053_v4 = vadd.f32 %v1495_v63, %v2067_v9 }
 0x146   :  { %1204 = vst.msk [vmem:[%s2175_s2 + $0x10] sm:$0xff] %vm1201_vm1, %v1147_v2  ;;  %v1150_v5 = vadd.f32 %v1561_v45, %v1053_v4  ;;  %v1496_v6 = vpop.f32.mrb[40].mxu0 }
 0x147   :  { %v1497_v8 = vpop.f32.mrb[41].mxu0  ;;  %v1568_v10 = vpop.f32.mrb[40].mxu1 }
 0x148   :  { %1205 = vst.msk [vmem:[%s2175_s2 + $0x18] sm:$0xff] %vm1201_vm1, %v1150_v5  ;;  %v1498_v7 = vadd.f32 %v1497_v8, %v1496_v6  ;;  %v1499_v11 = vpop.f32.mrb[42].mxu0  ;;  %v1170_v12 = vpop.f32.mrb[41].mxu1 }
 0x149   :  { %v1500_v13 = vpop.f32.mrb[43].mxu0  ;;  %v1569_v14 = vpop.f32.mrb[42].mxu1 }
 0x14a   :  { %v1501_v9 = vadd.f32 %v1500_v13, %v1499_v11  ;;  %v1058_v15 = vadd.f32 %v1498_v7, %v2069_v21  ;;  %v1173_v16 = vpop.f32.mrb[43].mxu1 }
 0x14c   :  { %v1155_v18 = vadd.f32 %v1154_v60, %v1058_v15  ;;  %v1061_v20 = vadd.f32 %v1501_v9, %v2071_v23 }
 0x14e   :  { %1206 = vst.msk [vmem:[%s2175_s2 + $0x20] sm:$0xff] %vm1201_vm1, %v1155_v18  ;;  %v1158_v22 = vadd.f32 %v1157_v0, %v1061_v20  ;;  %v1502_v24 = vpop.f32.mrb[44].mxu0 }
 0x14f   :  { %v1503_v25 = vpop.f32.mrb[45].mxu0  ;;  %v1572_v26 = vpop.f32.mrb[44].mxu1 }
 0x150   :  { %1207 = vst.msk [vmem:[%s2175_s2 + $0x28] sm:$0xff] %vm1201_vm1, %v1158_v22  ;;  %v1504_v27 = vadd.f32 %v1503_v25, %v1502_v24  ;;  %v1505_v21 = vpop.f32.mrb[46].mxu0  ;;  %v1186_v28 = vpop.f32.mrb[45].mxu1 }
 0x151   :  { %v1506_v29 = vpop.f32.mrb[47].mxu0  ;;  %v1573_v30 = vpop.f32.mrb[46].mxu1 }
 0x152   :  { %v1066_v23 = vadd.f32 %v1504_v27, %v2073_v35  ;;  %v1507_v31 = vadd.f32 %v1506_v29, %v1505_v21  ;;  %v1189_v32 = vpop.f32.mrb[47].mxu1 }
 0x154   :  { %v1163_v34 = vadd.f32 %v1564_v56, %v1066_v23  ;;  %v1069_v38 = vadd.f32 %v1507_v31, %v2075_v37 }
 0x156   :  { %1208 = vst.msk [vmem:[%s2175_s2 + $0x30] sm:$0xff] %vm1201_vm1, %v1163_v34  ;;  %v1166_v39 = vadd.f32 %v1565_v62, %v1069_v38  ;;  %v1508_v40 = vpop.f32.mrb[48].mxu0 }
 0x157   :  { %v1509_v41 = vpop.f32.mrb[49].mxu0 }
 0x158   :  { %1209 = vst.msk [vmem:[%s2175_s2 + $0x38] sm:$0xff] %vm1201_vm1, %v1166_v39  ;;  %v1510_v42 = vadd.f32 %v1509_v41, %v1508_v40  ;;  %v1511_v35 = vpop.f32.mrb[50].mxu0 }
 0x159   :  { %v1512_v43 = vpop.f32.mrb[51].mxu0 }
 0x15a   :  { %v1513_v44 = vadd.f32 %v1512_v43, %v1511_v35  ;;  %v1074_v45 = vadd.f32 %v1510_v42, %v2077_v49 }
 0x15c   :  { %v1171_v37 = vadd.f32 %v1170_v12, %v1074_v45  ;;  %v1077_v46 = vadd.f32 %v1513_v44, %v2079_v51 }
 0x15e   :  { %1210 = vst.msk [vmem:[%s2175_s2 + $0x40] sm:$0xff] %vm1201_vm1, %v1171_v37  ;;  %v1174_v47 = vadd.f32 %v1173_v16, %v1077_v46  ;;  %v1514_v48 = vpop.f32.mrb[52].mxu0 }
 0x15f   :  { %v1515_v50 = vpop.f32.mrb[53].mxu0 }
 0x160   :  { %1211 = vst.msk [vmem:[%s2175_s2 + $0x48] sm:$0xff] %vm1201_vm1, %v1174_v47  ;;  %v1516_v52 = vadd.f32 %v1515_v50, %v1514_v48  ;;  %v1517_v53 = vpop.f32.mrb[54].mxu0 }
 0x161   :  { %v1518_v54 = vpop.f32.mrb[55].mxu0 }
 0x162   :  { %v1082_v49 = vadd.f32 %v1516_v52, %v2081_v1  ;;  %v1519_v55 = vadd.f32 %v1518_v54, %v1517_v53 }
 0x164   :  { %v1179_v51 = vadd.f32 %v1568_v10, %v1082_v49  ;;  %v1085_v56 = vadd.f32 %v1519_v55, %v2083_v3 }
 0x166   :  { %1212 = vst.msk [vmem:[%s2175_s2 + $0x50] sm:$0xff] %vm1201_vm1, %v1179_v51  ;;  %v1182_v57 = vadd.f32 %v1569_v14, %v1085_v56  ;;  %v1520_v58 = vpop.f32.mrb[56].mxu0 }
 0x167   :  { %v1521_v60 = vpop.f32.mrb[57].mxu0 }
 0x168   :  { %1213 = vst.msk [vmem:[%s2175_s2 + $0x58] sm:$0xff] %vm1201_vm1, %v1182_v57  ;;  %v1522_v61 = vadd.f32 %v1521_v60, %v1520_v58  ;;  %v1523_v62 = vpop.f32.mrb[58].mxu0 }
 0x169   :  { %v1524_v1 = vpop.f32.mrb[59].mxu0 }
 0x16a   :  { %v1525_v59 = vadd.f32 %v1524_v1, %v1523_v62  ;;  %v1090_v63 = vadd.f32 %v1522_v61, %v2085_v17 }
 0x16c   :  { %v1187_v3 = vadd.f32 %v1186_v28, %v1090_v63  ;;  %v1093_v0 = vadd.f32 %v1525_v59, %v2087_v19 }
 0x16e   :  { %1214 = vst.msk [vmem:[%s2175_s2 + $0x60] sm:$0xff] %vm1201_vm1, %v1187_v3  ;;  %v1190_v2 = vadd.f32 %v1189_v32, %v1093_v0  ;;  %v1526_v4 = vpop.f32.mrb[60].mxu0 }
 0x16f   :  { %v1527_v5 = vpop.f32.mrb[61].mxu0 }
 0x170   :  { %1215 = vst.msk [vmem:[%s2175_s2 + $0x68] sm:$0xff] %vm1201_vm1, %v1190_v2  ;;  %v1528_v6 = vadd.f32 %v1527_v5, %v1526_v4  ;;  %v1529_v8 = vpop.f32.mrb[62].mxu0 }
 0x171   :  { %v1530_v10 = vpop.f32.mrb[63].mxu0 }
 0x172   :  { %v1098_v17 = vadd.f32 %v1528_v6, %v2089_v33  ;;  %v1531_v7 = vadd.f32 %v1530_v10, %v1529_v8 }
 0x174   :  { %v1195_v19 = vadd.f32 %v1572_v26, %v1098_v17  ;;  %v1101_v11 = vadd.f32 %v1531_v7, %v2091_v36 }
 0x176   :  { %1216 = vst.msk [vmem:[%s2175_s2 + $0x70] sm:$0xff] %vm1201_vm1, %v1195_v19  ;;  %v1198_v12 = vadd.f32 %v1573_v30, %v1101_v11 }
 0x178   :  { %1217 = vst.msk [vmem:[%s2175_s2 + $0x78] sm:$0xff] %vm1201_vm1, %v1198_v12 }

// kernel: forward.20
= control target key start
LH: loop header
LB: loop body
LE: loop exit
PB: predicated region body
PF: predicated region fallthrough
CT: control target
= control target key end

     0   :  { %v383_v0 = vmov 0.0|0.0   ;;  %vm384_vm0 = vmmov 0   ;;  %v385_v6 = vmov 0.0   ;;  %v204_v54 = vlaneseq  ;;  %s505_s3 = inlined_call_operand.vmem [shape: f32[128,128], index: 3, kind: input, shape index: {}]   ;;  %s506_s0 = inlined_call_operand.vmem [shape: f32[16,128], index: 0, kind: input, shape index: {}]   ;;  %s507_s1 = inlined_call_operand.vmem [shape: f32[1,128], index: 1, kind: input, shape index: {}]   ;;  %s508_s2 = inlined_call_operand.vmem [shape: f32[1,128], index: 2, kind: input, shape index: {}]   ;;  %s509_s4 = inlined_call_operand.vmem [shape: f32[16,128], index: 4, kind: output, shape index: {}]  }
   0x1   :  { %330 = vmatprep.subr.bf16.mxu0 %v383_v0  ;;  %v35_v1 = vld [vmem:[%s505_s3] sm:$0xff]  ;;  %v36_v2 = vld [vmem:[%s505_s3 + $0x8] sm:$0xff]  ;;  %354 = vmatprep.subr.bf16.mxu1 %v383_v0  ;;  %v37_v3 = vld [vmem:[%s505_s3 + $0x10] sm:$0xff] }
   0x2   :  { %v331_v4 = vpack.c.bf16 %v36_v2, %v35_v1  ;;  %v38_v5 = vld [vmem:[%s505_s3 + $0x18] sm:$0xff]  ;;  %292 = vmatprep.mubr.msk.f32.mxu0 %vm384_vm0, %v385_v6  ;;  %327 = vmatprep.mubr.msk.f32.mxu1 %vm384_vm0, %v385_v6  ;;  %v39_v8 = vld [vmem:[%s505_s3 + $0x20] sm:$0xff]  ;;  %v40_v9 = vld [vmem:[%s505_s3 + $0x28] sm:$0xff]  ;;  %v205_v55 = vshrl.u32 %v204_v54, 7 }
   0x3   :  { %v334_v7 = vpack.c.bf16 %v38_v5, %v37_v3  ;;  %v436_v10 = vld [vmem:[%s506_s0] sm:$0xff]  ;;  %v441_v11 = vld [vmem:[%s506_s0 + $0x8] sm:$0xff]  ;;  %v337_v15 = vpack.c.bf16 %v40_v9, %v39_v8  ;;  %v41_v16 = vld [vmem:[%s505_s3 + $0x30] sm:$0xff] }
   0x4   :  { %332 = vmatpush3.bf16.msra.mxu0 %v331_v4  ;;  %356 = vmatpush3.bf16.msra.mxu1 %v331_v4  ;;  %v19_v12 = vadd.f32 %v441_v11, %v436_v10  ;;  %v26_v13 = vmul.f32 %v436_v10, %v436_v10  ;;  %v27_v14 = vmul.f32 %v441_v11, %v441_v11  ;;  %v42_v17 = vld [vmem:[%s505_s3 + $0x38] sm:$0xff]  ;;  %v43_v22 = vld [vmem:[%s505_s3 + $0x40] sm:$0xff]  ;;  %v44_v23 = vld [vmem:[%s505_s3 + $0x48] sm:$0xff]  ;;  %v206_v57 = vsub.s32 0, %v205_v55 }
   0x5   :  { %333 = vmatprep.subr.bf16.mxu0 %v383_v0  ;;  %357 = vmatprep.subr.bf16.mxu1 %v383_v0  ;;  %v340_v21 = vpack.c.bf16 %v42_v17, %v41_v16  ;;  %v343_v26 = vpack.c.bf16 %v44_v23, %v43_v22  ;;  %v45_v27 = vld [vmem:[%s505_s3 + $0x50] sm:$0xff]  ;;  %v46_v28 = vld [vmem:[%s505_s3 + $0x58] sm:$0xff]  ;;  %v47_v32 = vld [vmem:[%s505_s3 + $0x60] sm:$0xff] }
   0x6   :  { %v28_v18 = vadd.f32 %v27_v14, %v26_v13  ;;  %v20_v19 = vrot.slane %v19_v12, 4  ;;  %v346_v31 = vpack.c.bf16 %v46_v28, %v45_v27  ;;  %v48_v33 = vld [vmem:[%s505_s3 + $0x68] sm:$0xff]  ;;  %v49_v37 = vld [vmem:[%s505_s3 + $0x70] sm:$0xff]  ;;  %v50_v38 = vld [vmem:[%s505_s3 + $0x78] sm:$0xff] }
   0x7   :  { %v349_v36 = vpack.c.bf16 %v48_v33, %v47_v32  ;;  %v352_v41 = vpack.c.bf16 %v50_v38, %v49_v37  ;;  %v199_v56 = vld [vmem:[%s507_s1] sm:$0x1] }
   0x8   :  { %335 = vmatpush3.bf16.msra.mxu0 %v334_v7  ;;  %359 = vmatpush3.bf16.msra.mxu1 %v334_v7  ;;  %v29_v20 = vrot.slane %v28_v18, 4  ;;  %v21_v24 = vadd.f32 %v20_v19, %v19_v12  ;;  %v201_v60 = vld [vmem:[%s508_s2] sm:$0x1] }
   0x9   :  { %336 = vmatprep.subr.bf16.mxu0 %v383_v0  ;;  %360 = vmatprep.subr.bf16.mxu1 %v383_v0 }
   0xa   :  { %v30_v25 = vadd.f32 %v29_v20, %v28_v18  ;;  %v22_v29 = vrot.slane %v21_v24, 2 }
   0xc   :  { %338 = vmatpush3.bf16.msra.mxu0 %v337_v15  ;;  %362 = vmatpush3.bf16.msra.mxu1 %v337_v15  ;;  %v31_v30 = vrot.slane %v30_v25, 2  ;;  %v23_v34 = vadd.f32 %v22_v29, %v21_v24 }
   0xd   :  { %339 = vmatprep.subr.bf16.mxu0 %v383_v0  ;;  %363 = vmatprep.subr.bf16.mxu1 %v383_v0 }
   0xe   :  { %v32_v35 = vadd.f32 %v31_v30, %v30_v25  ;;  %v24_v39 = vrot.slane %v23_v34, 1 }
  0x10   :  { %341 = vmatpush3.bf16.msra.mxu0 %v340_v21  ;;  %365 = vmatpush3.bf16.msra.mxu1 %v340_v21  ;;  %v33_v40 = vrot.slane %v32_v35, 1  ;;  %v25_v42 = vadd.f32 %v24_v39, %v23_v34 }
  0x11   :  { %342 = vmatprep.subr.bf16.mxu0 %v383_v0  ;;  %366 = vmatprep.subr.bf16.mxu1 %v383_v0 }
  0x12   :  { %v34_v43 = vadd.f32 %v33_v40, %v32_v35 }
  0x14   :  { %344 = vmatpush3.bf16.msra.mxu0 %v343_v26  ;;  %368 = vmatpush3.bf16.msra.mxu1 %v343_v26 }
  0x15   :  { %345 = vmatprep.subr.bf16.mxu0 %v383_v0  ;;  %369 = vmatprep.subr.bf16.mxu1 %v383_v0 }
  0x18   :  { %347 = vmatpush3.bf16.msra.mxu0 %v346_v31  ;;  %371 = vmatpush3.bf16.msra.mxu1 %v346_v31 }
  0x19   :  { %348 = vmatprep.subr.bf16.mxu0 %v383_v0  ;;  %372 = vmatprep.subr.bf16.mxu1 %v383_v0 }
  0x1c   :  { %350 = vmatpush3.bf16.msra.mxu0 %v349_v36  ;;  %374 = vmatpush3.bf16.msra.mxu1 %v349_v36 }
  0x1d   :  { %351 = vmatprep.subr.bf16.mxu0 %v383_v0  ;;  %375 = vmatprep.subr.bf16.mxu1 %v383_v0 }
  0x20   :  { %353 = vmatpush3.bf16.msra.mxu0 %v352_v41  ;;  %377 = vmatpush3.bf16.msra.mxu1 %v352_v41 }
  0x23   :  { %293 = vmatmul.mubr.f32.vlgmr.msra.gmra.mrb[0].mxu0 %v25_v42  ;;  %328 = vmatmul.mubr.f32.vlgmr.msra.gmra.mrb[0].mxu1 %v34_v43 }
  0xf6   :  { %v117_v44 = vpop.f32.mrb[0].mxu0  ;;  %v187_v45 = vpop.f32.mrb[0].mxu1 }
  0xf7   :  { %v192_v46 = vmul.f32 0.0078125, %v117_v44  ;;  %v294_v47 = vpop.f32.mrb[1].mxu0  ;;  %v193_v48 = vmul.f32 0.0078125, %v187_v45  ;;  %v329_v49 = vpop.f32.mrb[1].mxu1 }
  0xf9   :  { %v194_v50 = vmul.f32 %v192_v46, %v192_v46 }
  0xfb   :  { %v195_v51 = vsub.f32 %v193_v48, %v194_v50 }
  0xfd   :  { %v196_v52 = vmax.f32 %v195_v51, 0.0 }
  0xff   :  { %v197_v53 = vadd.f32 1e-05, %v196_v52 }
 0x101   :  { %381 = vrsqrt.f32 %v197_v53 }
 0x10b   :  { %v382_v58 = vpop.eup %381 }
 0x10c   :  { %v200_v59 = vmul.f32 %v382_v58, %v199_v56 }
 0x10e   :  { %v202_v61 = vmul.f32 %v200_v59, %v192_v46  ;;  %v207_v62 = vrot.slane %v200_v59, %v206_v57 }
 0x110   :  { %v203_v63 = vsub.f32 %v201_v60, %v202_v61  ;;  %v208_v0 = vmul.f32 %v207_v62, %v436_v10  ;;  %v209_v1 = vmul.f32 %v207_v62, %v441_v11 }
 0x112   :  { %v214_v2 = vrot.slane %v203_v63, %v206_v57 }
 0x114   :  { %v216_v3 = vadd.f32 %v214_v2, %v208_v0  ;;  %v217_v4 = vadd.f32 %v214_v2, %v209_v1 }
 0x116   :  { %v218_v5 = vmax.f32 %v216_v3, 0.0  ;;  %v219_v6 = vmax.f32 %v217_v4, 0.0 }
 0x118   :  { %220 = vst [vmem:[%s509_s4] sm:$0xff] %v218_v5  ;;  %221 = vst [vmem:[%s509_s4 + $0x8] sm:$0xff] %v219_v6 }

// kernel: forward.21
= control target key start
LH: loop header
LB: loop body
LE: loop exit
PB: predicated region body
PF: predicated region fallthrough
CT: control target
= control target key end

     0   :  { %vm76_vm0 = vcmask 130048   ;;  %vm198_vm1 = vcmask 261120   ;;  %s388_s1 = inlined_call_operand.vmem [shape: bf16[16,32], index: 1, kind: input, shape index: {}]   ;;  %s389_s0 = inlined_call_operand.vmem [shape: bf16[128,16], index: 0, kind: input, shape index: {}]   ;;  %s390_s2 = inlined_call_operand.vmem [shape: f32[128,32], index: 2, kind: output, shape index: {}]  }
   0x1   :  { %v265_v0 = vld [vmem:[%s388_s1] sm:$0xff]   ;;  %v268_v3 = vld [vmem:[%s389_s0 + $0x8] sm:$0xff]   ;;  %v270_v5 = vld [vmem:[%s389_s0 + $0x10] sm:$0xff]  }
   0x2   :  { %v266_v1 = vld [vmem:[%s389_s0] sm:$0xff]   ;;  %245 = vmatprep.subr.bf16.mxu0 %v265_v0  ;;  %263 = vmatprep.subr.bf16.mxu1 %v265_v0  ;;  %v269_v4 = vld [vmem:[%s389_s0 + $0x28] sm:$0xff]   ;;  %v271_v6 = vld [vmem:[%s389_s0 + $0x30] sm:$0xff]  }
   0x3   :  { %v267_v2 = vld [vmem:[%s389_s0 + $0x20] sm:$0xff]   ;;  %246 = vmatpush3.bf16.msra.mxu0 %v265_v0  ;;  %264 = vmatpush3.bf16.msra.mxu1 %v265_v0  ;;  %v272_v7 = vld [vmem:[%s389_s0 + $0x18] sm:$0xff]  }
   0x4   :  { %247 = vmatprep.mubr.msk.bf16.mxu0 %vm76_vm0, %v266_v1  ;;  %255 = vmatprep.mubr.msk.bf16.mxu1 %vm76_vm0, %v267_v2  ;;  %v273_v8 = vld [vmem:[%s389_s0 + $0x38] sm:$0xff]  }
   0x6   :  { %248 = vmatmul.mubr.msk.bf16.vlgmr.msra.gmra.mrb[0].mxu0 %vm76_vm0, %v268_v3  ;;  %256 = vmatmul.mubr.msk.bf16.vlgmr.msra.gmra.mrb[0].mxu1 %vm76_vm0, %v269_v4 }
   0x7   :  { %251 = vmatprep.mubr.msk.bf16.mxu0 %vm76_vm0, %v270_v5  ;;  %259 = vmatprep.mubr.msk.bf16.mxu1 %vm76_vm0, %v271_v6 }
   0xe   :  { %252 = vmatmul.mubr.msk.bf16.gmra.mrb[4].mxu0 %vm76_vm0, %v272_v7  ;;  %260 = vmatmul.mubr.msk.bf16.gmra.mrb[4].mxu1 %vm76_vm0, %v273_v8 }
  0xd9   :  { %v249_v9 = vpop.f32.mrb[0].mxu0  ;;  %v257_v10 = vpop.f32.mrb[0].mxu1 }
  0xda   :  { %201 = vst.msk [vmem:[%s390_s2 + $0x10] sm:$0xff] %vm198_vm1, %v249_v9  ;;  %209 = vst.msk [vmem:[%s390_s2 + $0x50] sm:$0xff] %vm198_vm1, %v257_v10  ;;  %v135_v11 = vpop.f32.mrb[1].mxu0  ;;  %v167_v12 = vpop.f32.mrb[1].mxu1 }
  0xdb   :  { %199 = vst.msk [vmem:[%s390_s2] sm:$0xff] %vm198_vm1, %v135_v11  ;;  %207 = vst.msk [vmem:[%s390_s2 + $0x40] sm:$0xff] %vm198_vm1, %v167_v12  ;;  %v250_v13 = vpop.f32.mrb[2].mxu0  ;;  %v258_v14 = vpop.f32.mrb[2].mxu1 }
  0xdc   :  { %202 = vst.msk [vmem:[%s390_s2 + $0x18] sm:$0xff] %vm198_vm1, %v250_v13  ;;  %210 = vst.msk [vmem:[%s390_s2 + $0x58] sm:$0xff] %vm198_vm1, %v258_v14  ;;  %v138_v15 = vpop.f32.mrb[3].mxu0  ;;  %v170_v16 = vpop.f32.mrb[3].mxu1 }
  0xdd   :  { %200 = vst.msk [vmem:[%s390_s2 + $0x8] sm:$0xff] %vm198_vm1, %v138_v15  ;;  %208 = vst.msk [vmem:[%s390_s2 + $0x48] sm:$0xff] %vm198_vm1, %v170_v16 }
  0xe1   :  { %v253_v17 = vpop.f32.mrb[4].mxu0  ;;  %v261_v18 = vpop.f32.mrb[4].mxu1 }
  0xe2   :  { %205 = vst.msk [vmem:[%s390_s2 + $0x30] sm:$0xff] %vm198_vm1, %v253_v17  ;;  %213 = vst.msk [vmem:[%s390_s2 + $0x70] sm:$0xff] %vm198_vm1, %v261_v18  ;;  %v151_v19 = vpop.f32.mrb[5].mxu0  ;;  %v183_v20 = vpop.f32.mrb[5].mxu1 }
  0xe3   :  { %203 = vst.msk [vmem:[%s390_s2 + $0x20] sm:$0xff] %vm198_vm1, %v151_v19  ;;  %211 = vst.msk [vmem:[%s390_s2 + $0x60] sm:$0xff] %vm198_vm1, %v183_v20  ;;  %v254_v21 = vpop.f32.mrb[6].mxu0  ;;  %v262_v22 = vpop.f32.mrb[6].mxu1 }
  0xe4   :  { %206 = vst.msk [vmem:[%s390_s2 + $0x38] sm:$0xff] %vm198_vm1, %v254_v21  ;;  %214 = vst.msk [vmem:[%s390_s2 + $0x78] sm:$0xff] %vm198_vm1, %v262_v22  ;;  %v154_v23 = vpop.f32.mrb[7].mxu0  ;;  %v186_v24 = vpop.f32.mrb[7].mxu1 }
  0xe5   :  { %204 = vst.msk [vmem:[%s390_s2 + $0x28] sm:$0xff] %vm198_vm1, %v154_v23  ;;  %212 = vst.msk [vmem:[%s390_s2 + $0x68] sm:$0xff] %vm198_vm1, %v186_v24 }

// kernel: forward.23
= control target key start
LH: loop header
LB: loop body
LE: loop exit
PB: predicated region body
PF: predicated region fallthrough
CT: control target
= control target key end

     0   :  { %v476_v1 = vmov 0   ;;  %vm108_vm0 = vcmask 261120   ;;  %s710_s1 = inlined_call_operand.vmem [shape: bf16[32,288], index: 1, kind: input, shape index: {}]   ;;  %s711_s0 = inlined_call_operand.vmem [shape: bf16[128,32], index: 0, kind: input, shape index: {}]   ;;  %s712_s2 = inlined_call_operand.vmem [shape: f32[128,288], index: 2, kind: output, shape index: {}]  }
   0x1   :  { %v460_v0 = vld [vmem:[%s710_s1 + $0x4] ss:$12 sps:$4 sm:$0xff]   ;;  %165 = vmatprep.mubr.bf16.mxu0 %v476_v1  ;;  %225 = vmatprep.mubr.bf16.mxu1 %v476_v1  ;;  %v462_v2 = vld [vmem:[%s710_s1] ss:$12 sps:$4 sm:$0xff]   ;;  %v463_v3 = vld [vmem:[%s710_s1 + $0x1c] ss:$12 sps:$4 sm:$0xff]  }
   0x2   :  { %133 = vmatprep.subr.bf16.mxu0 %v460_v0  ;;  %455 = vmatprep.subr.bf16.mxu1 %v460_v0  ;;  %v465_v4 = vld [vmem:[%s710_s1 + $0x18] ss:$12 sps:$4 sm:$0xff]   ;;  %v468_v6 = vld [vmem:[%s710_s1 + $0x8] ss:$12 sps:$4 sm:$0xff]   ;;  %v471_v8 = vld [vmem:[%s710_s1 + $0x20] ss:$12 sps:$4 sm:$0xff]  }
   0x3   :  { %134 = vmatpush1.bf16.msra.mxu0 %v462_v2  ;;  %457 = vmatpush1.bf16.msra.mxu1 %v462_v2  ;;  %v466_v5 = vld [vmem:[%s711_s0] sm:$0xff]   ;;  %v467_v7 = vld [vmem:[%s711_s0 + $0x30] sm:$0xff]   ;;  %v469_v9 = vld [vmem:[%s711_s0 + $0x8] sm:$0xff]  }
   0x4   :  { %135 = vmatprep.subr.bf16.mxu0 %v463_v3  ;;  %456 = vmatprep.subr.bf16.mxu1 %v463_v3  ;;  %v470_v10 = vld [vmem:[%s711_s0 + $0x38] sm:$0xff]   ;;  %v472_v11 = vld [vmem:[%s711_s0 + $0x10] sm:$0xff]   ;;  %v474_v13 = vld [vmem:[%s711_s0 + $0x20] sm:$0xff]  }
   0x5   :  { %v473_v12 = vld [vmem:[%s711_s0 + $0x18] sm:$0xff]   ;;  %v475_v14 = vld [vmem:[%s711_s0 + $0x28] sm:$0xff]  }
   0x7   :  { %136 = vmatpush1.bf16.msra.mxu0 %v465_v4  ;;  %458 = vmatpush1.bf16.msra.mxu1 %v465_v4 }
   0x8   :  { %435 = vmatprep.subr.bf16.mxu1 %v468_v6 }
   0xa   :  { %409 = vmatmul.mubr.msk.bf16.vlgmr.msra.gmra.mrb[0].mxu0 %vm108_vm0, %v466_v5  ;;  %415 = vmatmul.mubr.msk.bf16.vlgmr.msra.gmra.mrb[0].mxu1 %vm108_vm0, %v467_v7 }
   0xb   :  { %436 = vmatpush3.bf16.msra.mxu1 %v468_v6  ;;  %175 = vmatprep.mubr.bf16.mxu0 %v476_v1 }
   0xc   :  { %235 = vmatprep.mubr.bf16.mxu1 %v476_v1  ;;  %437 = vmatprep.subr.bf16.mxu1 %v471_v8 }
   0xf   :  { %438 = vmatpush3.bf16.msra.mxu1 %v471_v8 }
  0x12   :  { %410 = vmatmul.mubr.msk.bf16.gmra.mrb[4].mxu0 %vm108_vm0, %v469_v9  ;;  %416 = vmatmul.mubr.msk.bf16.gmra.mrb[4].mxu1 %vm108_vm0, %v470_v10 }
  0x13   :  { %185 = vmatprep.mubr.bf16.mxu0 %v476_v1  ;;  %439 = vmatprep.mubr.msk.bf16.mxu1 %vm108_vm0, %v466_v5 }
  0x1a   :  { %411 = vmatmul.mubr.msk.bf16.gmra.mrb[8].mxu0 %vm108_vm0, %v472_v11  ;;  %440 = vmatmul.mubr.msk.bf16.vlgmr.msra.gmra.mrb[8].mxu1 %vm108_vm0, %v469_v9 }
  0x1b   :  { %195 = vmatprep.mubr.bf16.mxu0 %v476_v1  ;;  %443 = vmatprep.mubr.msk.bf16.mxu1 %vm108_vm0, %v472_v11 }
  0x22   :  { %412 = vmatmul.mubr.msk.bf16.gmra.mrb[12].mxu0 %vm108_vm0, %v473_v12  ;;  %444 = vmatmul.mubr.msk.bf16.gmra.mrb[12].mxu1 %vm108_vm0, %v473_v12 }
  0x23   :  { %205 = vmatprep.mubr.bf16.mxu0 %v476_v1  ;;  %447 = vmatprep.mubr.msk.bf16.mxu1 %vm108_vm0, %v474_v13 }
  0x2a   :  { %413 = vmatmul.mubr.msk.bf16.gmra.mrb[16].mxu0 %vm108_vm0, %v474_v13  ;;  %448 = vmatmul.mubr.msk.bf16.gmra.mrb[16].mxu1 %vm108_vm0, %v475_v14 }
  0x2b   :  { %215 = vmatprep.mubr.bf16.mxu0 %v476_v1  ;;  %451 = vmatprep.mubr.msk.bf16.mxu1 %vm108_vm0, %v467_v7 }
  0x32   :  { %414 = vmatmul.mubr.msk.bf16.gmra.mrb[20].mxu0 %vm108_vm0, %v475_v14  ;;  %452 = vmatmul.mubr.msk.bf16.gmra.mrb[20].mxu1 %vm108_vm0, %v470_v10 }
  0xdd   :  { %v167_v15 = vpop.f32.mrb[0].mxu0  ;;  %v227_v16 = vpop.f32.mrb[0].mxu1 }
  0xde   :  { %343 = vst [vmem:[%s712_s2] sm:$0xff] %v167_v15  ;;  %379 = vst [vmem:[%s712_s2 + $0x120] sm:$0xff] %v227_v16  ;;  %v169_v17 = vpop.f32.mrb[1].mxu0  ;;  %v229_v18 = vpop.f32.mrb[1].mxu1 }
  0xdf   :  { %344 = vst [vmem:[%s712_s2 + $0x8] sm:$0xff] %v169_v17  ;;  %380 = vst [vmem:[%s712_s2 + $0x128] sm:$0xff] %v229_v18  ;;  %v171_v19 = vpop.f32.mrb[2].mxu0  ;;  %v231_v20 = vpop.f32.mrb[2].mxu1 }
  0xe0   :  { %346 = vst [vmem:[%s712_s2 + $0x18] sm:$0xff] %v171_v19  ;;  %382 = vst [vmem:[%s712_s2 + $0x138] sm:$0xff] %v231_v20  ;;  %v173_v21 = vpop.f32.mrb[3].mxu0  ;;  %v233_v22 = vpop.f32.mrb[3].mxu1 }
  0xe1   :  { %347 = vst [vmem:[%s712_s2 + $0x20] sm:$0xff] %v173_v21  ;;  %383 = vst [vmem:[%s712_s2 + $0x140] sm:$0xff] %v233_v22 }
  0xe5   :  { %v177_v23 = vpop.f32.mrb[4].mxu0  ;;  %v237_v24 = vpop.f32.mrb[4].mxu1 }
  0xe6   :  { %349 = vst [vmem:[%s712_s2 + $0x30] sm:$0xff] %v177_v23  ;;  %385 = vst [vmem:[%s712_s2 + $0x150] sm:$0xff] %v237_v24  ;;  %v179_v25 = vpop.f32.mrb[5].mxu0  ;;  %v239_v26 = vpop.f32.mrb[5].mxu1 }
  0xe7   :  { %350 = vst [vmem:[%s712_s2 + $0x38] sm:$0xff] %v179_v25  ;;  %386 = vst [vmem:[%s712_s2 + $0x158] sm:$0xff] %v239_v26  ;;  %v181_v27 = vpop.f32.mrb[6].mxu0  ;;  %v241_v28 = vpop.f32.mrb[6].mxu1 }
  0xe8   :  { %352 = vst [vmem:[%s712_s2 + $0x48] sm:$0xff] %v181_v27  ;;  %388 = vst [vmem:[%s712_s2 + $0x168] sm:$0xff] %v241_v28  ;;  %v183_v29 = vpop.f32.mrb[7].mxu0  ;;  %v243_v30 = vpop.f32.mrb[7].mxu1 }
  0xe9   :  { %353 = vst [vmem:[%s712_s2 + $0x50] sm:$0xff] %v183_v29  ;;  %389 = vst [vmem:[%s712_s2 + $0x170] sm:$0xff] %v243_v30 }
  0xed   :  { %v187_v31 = vpop.f32.mrb[8].mxu0  ;;  %v441_v32 = vpop.f32.mrb[8].mxu1 }
  0xee   :  { %355 = vst [vmem:[%s712_s2 + $0x60] sm:$0xff] %v187_v31  ;;  %351 = vst.msk [vmem:[%s712_s2 + $0x40] sm:$0xff] %vm108_vm0, %v441_v32  ;;  %v189_v33 = vpop.f32.mrb[9].mxu0  ;;  %v280_v34 = vpop.f32.mrb[9].mxu1 }
  0xef   :  { %356 = vst [vmem:[%s712_s2 + $0x68] sm:$0xff] %v189_v33  ;;  %345 = vst.msk [vmem:[%s712_s2 + $0x10] sm:$0xff] %vm108_vm0, %v280_v34  ;;  %v191_v35 = vpop.f32.mrb[10].mxu0  ;;  %v442_v36 = vpop.f32.mrb[10].mxu1 }
  0xf0   :  { %358 = vst [vmem:[%s712_s2 + $0x78] sm:$0xff] %v191_v35  ;;  %354 = vst.msk [vmem:[%s712_s2 + $0x58] sm:$0xff] %vm108_vm0, %v442_v36  ;;  %v193_v37 = vpop.f32.mrb[11].mxu0  ;;  %v283_v38 = vpop.f32.mrb[11].mxu1 }
  0xf1   :  { %359 = vst [vmem:[%s712_s2 + $0x80] sm:$0xff] %v193_v37  ;;  %348 = vst.msk [vmem:[%s712_s2 + $0x28] sm:$0xff] %vm108_vm0, %v283_v38 }
  0xf5   :  { %v197_v39 = vpop.f32.mrb[12].mxu0  ;;  %v445_v40 = vpop.f32.mrb[12].mxu1 }
  0xf6   :  { %361 = vst [vmem:[%s712_s2 + $0x90] sm:$0xff] %v197_v39  ;;  %363 = vst.msk [vmem:[%s712_s2 + $0xa0] sm:$0xff] %vm108_vm0, %v445_v40  ;;  %v199_v41 = vpop.f32.mrb[13].mxu0  ;;  %v296_v42 = vpop.f32.mrb[13].mxu1 }
  0xf7   :  { %362 = vst [vmem:[%s712_s2 + $0x98] sm:$0xff] %v199_v41  ;;  %357 = vst.msk [vmem:[%s712_s2 + $0x70] sm:$0xff] %vm108_vm0, %v296_v42  ;;  %v201_v43 = vpop.f32.mrb[14].mxu0  ;;  %v446_v44 = vpop.f32.mrb[14].mxu1 }
  0xf8   :  { %364 = vst [vmem:[%s712_s2 + $0xa8] sm:$0xff] %v201_v43  ;;  %366 = vst.msk [vmem:[%s712_s2 + $0xb8] sm:$0xff] %vm108_vm0, %v446_v44  ;;  %v203_v45 = vpop.f32.mrb[15].mxu0  ;;  %v299_v46 = vpop.f32.mrb[15].mxu1 }
  0xf9   :  { %365 = vst [vmem:[%s712_s2 + $0xb0] sm:$0xff] %v203_v45  ;;  %360 = vst.msk [vmem:[%s712_s2 + $0x88] sm:$0xff] %vm108_vm0, %v299_v46 }
  0xfd   :  { %v207_v47 = vpop.f32.mrb[16].mxu0  ;;  %v449_v48 = vpop.f32.mrb[16].mxu1 }
  0xfe   :  { %367 = vst [vmem:[%s712_s2 + $0xc0] sm:$0xff] %v207_v47  ;;  %375 = vst.msk [vmem:[%s712_s2 + $0x100] sm:$0xff] %vm108_vm0, %v449_v48  ;;  %v209_v49 = vpop.f32.mrb[17].mxu0  ;;  %v312_v50 = vpop.f32.mrb[17].mxu1 }
  0xff   :  { %368 = vst [vmem:[%s712_s2 + $0xc8] sm:$0xff] %v209_v49  ;;  %369 = vst.msk [vmem:[%s712_s2 + $0xd0] sm:$0xff] %vm108_vm0, %v312_v50  ;;  %v211_v51 = vpop.f32.mrb[18].mxu0  ;;  %v450_v52 = vpop.f32.mrb[18].mxu1 }
 0x100   :  { %370 = vst [vmem:[%s712_s2 + $0xd8] sm:$0xff] %v211_v51  ;;  %378 = vst.msk [vmem:[%s712_s2 + $0x118] sm:$0xff] %vm108_vm0, %v450_v52  ;;  %v213_v53 = vpop.f32.mrb[19].mxu0  ;;  %v315_v54 = vpop.f32.mrb[19].mxu1 }
 0x101   :  { %371 = vst [vmem:[%s712_s2 + $0xe0] sm:$0xff] %v213_v53  ;;  %372 = vst.msk [vmem:[%s712_s2 + $0xe8] sm:$0xff] %vm108_vm0, %v315_v54 }
 0x105   :  { %v217_v55 = vpop.f32.mrb[20].mxu0  ;;  %v453_v56 = vpop.f32.mrb[20].mxu1 }
 0x106   :  { %373 = vst [vmem:[%s712_s2 + $0xf0] sm:$0xff] %v217_v55  ;;  %387 = vst.msk [vmem:[%s712_s2 + $0x160] sm:$0xff] %vm108_vm0, %v453_v56  ;;  %v219_v57 = vpop.f32.mrb[21].mxu0  ;;  %v328_v58 = vpop.f32.mrb[21].mxu1 }
 0x107   :  { %374 = vst [vmem:[%s712_s2 + $0xf8] sm:$0xff] %v219_v57  ;;  %381 = vst.msk [vmem:[%s712_s2 + $0x130] sm:$0xff] %vm108_vm0, %v328_v58  ;;  %v221_v59 = vpop.f32.mrb[22].mxu0  ;;  %v454_v60 = vpop.f32.mrb[22].mxu1 }
 0x108   :  { %376 = vst [vmem:[%s712_s2 + $0x108] sm:$0xff] %v221_v59  ;;  %390 = vst.msk [vmem:[%s712_s2 + $0x178] sm:$0xff] %vm108_vm0, %v454_v60  ;;  %v223_v61 = vpop.f32.mrb[23].mxu0  ;;  %v331_v62 = vpop.f32.mrb[23].mxu1 }
 0x109   :  { %377 = vst [vmem:[%s712_s2 + $0x110] sm:$0xff] %v223_v61  ;;  %384 = vst.msk [vmem:[%s712_s2 + $0x148] sm:$0xff] %vm108_vm0, %v331_v62 }

// kernel: forward.24
= control target key start
LH: loop header
LB: loop body
LE: loop exit
PB: predicated region body
PF: predicated region fallthrough
CT: control target
= control target key end

     0   :  { %s1147_s12 = smov 0   ;;  %s1149_s13 = smov 0   ;;  %s1459_s0 = inlined_call_operand.vmem [shape: f32[4,16,256], index: 0, kind: input, shape index: {}]   ;;  %s1460_s1 = inlined_call_operand.vmem [shape: f32[4,16,256], index: 1, kind: input, shape index: {}]   ;;  %s1461_s2 = inlined_call_operand.vmem [shape: f32[4,16,256], index: 2, kind: input, shape index: {}]   ;;  %s1462_s3 = inlined_call_operand.vmem [shape: f32[4,16,256], index: 3, kind: output, shape index: {}]  }
   0x1   :  { %s1151_s14 = smov 0  }
   0x2 LB: > { %s1020_s15 = sadd.s32 4294967295, %s1125_s14   ;;  %s1164_s16 = sadd.s32 1, %s1125_s14   ;;  %s1125_s14 = sphi %s1151_s14, %s1467_s14   ;;  %s1121_s13 = sphi %s1149_s13, %s1466_s13   ;;  %s1117_s12 = sphi %s1147_s12, %s1465_s12  }
   0x3   : > { %s17_s17 = ssub.s32 %s1125_s14, %s1164_s16  ;;  %s20_s18 = sadd.s32 1, %s1121_s13 }
   0x4   : > { %p18_p0 = scmp.eq.s32.totalorder %s17_s17, 0  ;;  %p27_p1 = scmp.ne.s32.totalorder %s1121_s13, %s1117_s12 }
   0x5   : > { %p28_p2 = scmp.eq.s32.totalorder %s1125_s14, 0  ;;  %p109_p3 = scmp.eq.s32.totalorder %s1020_s15, 1 }
   0x6   : > { %s1175_s19 = scalar_select %p18_p0, %s1121_s13, %s20_s18  }
   0x7   : > { %p1177_p4 = por %p28_p2, %p27_p1  ;;  %p1181_p5 = por %p109_p3, %p27_p1 }
   0x8   : > { %p1023_p6 = scmp.ge.s32.totalorder %s1125_s14, 2 }
   0xa   : > { %131 = sbr.rel (%p1023_p6) target bundleno = 41 (0x29), region = 16 }
  0x11   : > { %134 = sbr.rel (!%p1177_p4) target bundleno = 25 (0x19), region = 20  ;;  %s136_s22 = sand.u32 (%p1177_p4), 1, %s1121_s13  }
  0x12   : > { %s1025_s23 = sshll.u32 (%p1177_p4), %s1125_s14, 3  ;;  %s1024_s24 = sshll.u32 (%p1177_p4), %s136_s22, 6 }
  0x13   : > { %s140_s27 = scalar_lea.vmem (%p1177_p4), %s1459_s0, %s1025_s23  ;;  %s138_s28 = scalar_lea.vmem (%p1177_p4), [#allocation2], %s1024_s24 }
  0x14   : > { %v182_v0 = vld [vmem:[%s140_s27] sm:$0xff] (%p1177_p4)  ;;  %v184_v1 = vld [vmem:[%s140_s27 + $0x10] sm:$0xff] (%p1177_p4) }
  0x15   : > { %v186_v2 = vld [vmem:[%s140_s27 + $0x20] sm:$0xff] (%p1177_p4)  ;;  %183 = vst [vmem:[%s138_s28] sm:$0xff] (%p1177_p4), %v182_v0  ;;  %185 = vst [vmem:[%s138_s28 + $0x8] sm:$0xff] (%p1177_p4), %v184_v1  ;;  %v188_v3 = vld [vmem:[%s140_s27 + $0x30] sm:$0xff] (%p1177_p4) }
  0x16   : > { %187 = vst [vmem:[%s138_s28 + $0x10] sm:$0xff] (%p1177_p4), %v186_v2  ;;  %v190_v4 = vld [vmem:[%s140_s27 + $0x40] sm:$0xff] (%p1177_p4)  ;;  %v192_v5 = vld [vmem:[%s140_s27 + $0x50] sm:$0xff] (%p1177_p4)  ;;  %189 = vst [vmem:[%s138_s28 + $0x18] sm:$0xff] (%p1177_p4), %v188_v3 }
  0x17   : > { %191 = vst [vmem:[%s138_s28 + $0x20] sm:$0xff] (%p1177_p4), %v190_v4  ;;  %193 = vst [vmem:[%s138_s28 + $0x28] sm:$0xff] (%p1177_p4), %v192_v5  ;;  %v194_v6 = vld [vmem:[%s140_s27 + $0x60] sm:$0xff] (%p1177_p4)  ;;  %v196_v7 = vld [vmem:[%s140_s27 + $0x70] sm:$0xff] (%p1177_p4) }
  0x18   : > { %195 = vst [vmem:[%s138_s28 + $0x30] sm:$0xff] %v194_v6  ;;  %197 = vst [vmem:[%s138_s28 + $0x38] sm:$0xff] %v196_v7 }
  0x19 PF: > { %203 = sbr.rel (!%p1177_p4) target bundleno = 33 (0x21), region = 58  ;;  %s205_s29 = sand.u32 (%p1177_p4), 1, %s1121_s13  }
  0x1a   : > { %s1027_s30 = sshll.u32 (%p1177_p4), %s1125_s14, 3  ;;  %s1026_s4 = sshll.u32 (%p1177_p4), %s205_s29, 6 }
  0x1b   : > { %s209_s7 = scalar_lea.vmem (%p1177_p4), %s1460_s1, %s1027_s30  ;;  %s207_s8 = scalar_lea.vmem (%p1177_p4), [#allocation3], %s1026_s4 }
  0x1c   : > { %v251_v8 = vld [vmem:[%s209_s7] sm:$0xff] (%p1177_p4)  ;;  %v253_v9 = vld [vmem:[%s209_s7 + $0x10] sm:$0xff] (%p1177_p4) }
  0x1d   : > { %v255_v10 = vld [vmem:[%s209_s7 + $0x20] sm:$0xff] (%p1177_p4)  ;;  %252 = vst [vmem:[%s207_s8] sm:$0xff] (%p1177_p4), %v251_v8  ;;  %254 = vst [vmem:[%s207_s8 + $0x8] sm:$0xff] (%p1177_p4), %v253_v9  ;;  %v257_v11 = vld [vmem:[%s209_s7 + $0x30] sm:$0xff] (%p1177_p4) }
  0x1e   : > { %256 = vst [vmem:[%s207_s8 + $0x10] sm:$0xff] (%p1177_p4), %v255_v10  ;;  %v259_v12 = vld [vmem:[%s209_s7 + $0x40] sm:$0xff] (%p1177_p4)  ;;  %v261_v13 = vld [vmem:[%s209_s7 + $0x50] sm:$0xff] (%p1177_p4)  ;;  %258 = vst [vmem:[%s207_s8 + $0x18] sm:$0xff] (%p1177_p4), %v257_v11 }
  0x1f   : > { %260 = vst [vmem:[%s207_s8 + $0x20] sm:$0xff] (%p1177_p4), %v259_v12  ;;  %262 = vst [vmem:[%s207_s8 + $0x28] sm:$0xff] (%p1177_p4), %v261_v13  ;;  %v263_v14 = vld [vmem:[%s209_s7 + $0x60] sm:$0xff] (%p1177_p4)  ;;  %v265_v15 = vld [vmem:[%s209_s7 + $0x70] sm:$0xff] (%p1177_p4) }
  0x20   : > { %264 = vst [vmem:[%s207_s8 + $0x30] sm:$0xff] %v263_v14  ;;  %266 = vst [vmem:[%s207_s8 + $0x38] sm:$0xff] %v265_v15 }
  0x21 PF: > { %272 = sbr.rel (!%p1177_p4) target bundleno = 41 (0x29), region = 96  ;;  %s274_s9 = sand.u32 (%p1177_p4), 1, %s1121_s13  }
  0x22   : > { %s1029_s10 = sshll.u32 (%p1177_p4), %s1125_s14, 3  ;;  %s1028_s11 = sshll.u32 (%p1177_p4), %s274_s9, 6 }
  0x23   : > { %s278_s22 = scalar_lea.vmem (%p1177_p4), %s1461_s2, %s1029_s10  ;;  %s276_s23 = scalar_lea.vmem (%p1177_p4), [#allocation4], %s1028_s11 }
  0x24   : > { %v320_v16 = vld [vmem:[%s278_s22] sm:$0xff] (%p1177_p4)  ;;  %v322_v17 = vld [vmem:[%s278_s22 + $0x10] sm:$0xff] (%p1177_p4) }
  0x25   : > { %v324_v18 = vld [vmem:[%s278_s22 + $0x20] sm:$0xff] (%p1177_p4)  ;;  %321 = vst [vmem:[%s276_s23] sm:$0xff] (%p1177_p4), %v320_v16  ;;  %323 = vst [vmem:[%s276_s23 + $0x8] sm:$0xff] (%p1177_p4), %v322_v17  ;;  %v326_v19 = vld [vmem:[%s278_s22 + $0x30] sm:$0xff] (%p1177_p4) }
  0x26   : > { %325 = vst [vmem:[%s276_s23 + $0x10] sm:$0xff] (%p1177_p4), %v324_v18  ;;  %v328_v20 = vld [vmem:[%s278_s22 + $0x40] sm:$0xff] (%p1177_p4)  ;;  %v330_v21 = vld [vmem:[%s278_s22 + $0x50] sm:$0xff] (%p1177_p4)  ;;  %327 = vst [vmem:[%s276_s23 + $0x18] sm:$0xff] (%p1177_p4), %v326_v19 }
  0x27   : > { %329 = vst [vmem:[%s276_s23 + $0x20] sm:$0xff] (%p1177_p4), %v328_v20  ;;  %331 = vst [vmem:[%s276_s23 + $0x28] sm:$0xff] (%p1177_p4), %v330_v21  ;;  %v332_v22 = vld [vmem:[%s278_s22 + $0x60] sm:$0xff] (%p1177_p4)  ;;  %v334_v23 = vld [vmem:[%s278_s22 + $0x70] sm:$0xff] (%p1177_p4) }
  0x28   : > { %333 = vst [vmem:[%s276_s23 + $0x30] sm:$0xff] %v332_v22  ;;  %335 = vst [vmem:[%s276_s23 + $0x38] sm:$0xff] %v334_v23 }
  0x29 PF: > { %p1030_p7 = scmp.ge.s32.totalorder %s1125_s14, 1  ;;  %p340_p8 = scmp.lt.s32.totalorder %s1125_s14, 3 }
  0x2b   : > { %p341_p9 = pnand %p1030_p7, %p340_p8 }
  0x2c   : > { %s347_s20 = sand.u32 (!%p341_p9), 1, %s1117_s12   ;;  %vm636_vm0 = vcmask (!%p341_p9), 1041409   ;;  %vm639_vm1 = vcmask (!%p341_p9), 1042434   ;;  %vm642_vm2 = vcmask (!%p341_p9), 1043459   ;;  %vm666_vm3 = vcmask (!%p341_p9), 1043456  }
  0x2d   : > { %344 = sbr.rel (%p341_p9) target bundleno = 183 (0xb7), region = 134  ;;  %s1210_s24 = sshll.u32 (!%p341_p9), %s347_s20, 6 }
  0x2e   : > { %s1213_s25 = scalar_lea.vmem (!%p341_p9), [#allocation2], %s1210_s24  ;;  %s356_s26 = scalar_lea.vmem (!%p341_p9), [#allocation3], %s1210_s24 }
  0x2f   : > { %v391_v24 = vld [vmem:[%s1213_s25] sm:$0xff] (!%p341_p9)  ;;  %v392_v25 = vld [vmem:[%s1213_s25 + $0x8] sm:$0xff] (!%p341_p9)  ;;  %v1222_v28 = vld [vmem:[%s356_s26 + $0x10] sm:$0xff] (!%p341_p9)  ;;  %s363_s12 = scalar_lea.vmem (!%p341_p9), [#allocation4], %s1210_s24  ;;  %s1375_s27 = scalar_lea.vmem (!%p341_p9), [#allocation5], %s1210_s24 }
  0x30   : > { %v1218_v26 = vld [vmem:[%s356_s26] sm:$0xff] (!%p341_p9)  ;;  %v1220_v27 = vld [vmem:[%s356_s26 + $0x8] sm:$0xff] (!%p341_p9)  ;;  %v1224_v29 = vld [vmem:[%s356_s26 + $0x18] sm:$0xff] (!%p341_p9)  ;;  %v417_v35 = vmul.f32 (!%p341_p9), %v1222_v28, %v391_v24 }
  0x31   : > { %v415_v30 = vmul.f32 (!%p341_p9), %v1218_v26, %v391_v24  ;;  %v1227_v31 = vld [vmem:[%s356_s26 + $0x20] sm:$0xff] (!%p341_p9)  ;;  %v1229_v32 = vld [vmem:[%s356_s26 + $0x28] sm:$0xff] (!%p341_p9)  ;;  %v1231_v33 = vld [vmem:[%s356_s26 + $0x30] sm:$0xff] (!%p341_p9)  ;;  %v416_v34 = vmul.f32 (!%p341_p9), %v1220_v27, %v392_v25  ;;  %v418_v36 = vmul.f32 (!%p341_p9), %v1224_v29, %v392_v25 }
  0x32   : > { %v1236_v37 = vld [vmem:[%s356_s26 + $0x38] sm:$0xff] (!%p341_p9)  ;;  %v419_v38 = vmul.f32 (!%p341_p9), %v1227_v31, %v391_v24  ;;  %v420_v39 = vmul.f32 (!%p341_p9), %v1229_v32, %v392_v25  ;;  %v421_v40 = vmul.f32 (!%p341_p9), %v1231_v33, %v391_v24  ;;  %v393_v48 = vld [vmem:[%s1213_s25 + $0x10] sm:$0xff] (!%p341_p9)  ;;  %v395_v22 = vld [vmem:[%s1213_s25 + $0x20] sm:$0xff] (!%p341_p9) }
  0x33   : > { %v422_v41 = vmul.f32 (!%p341_p9), %v1236_v37, %v392_v25  ;;  %v447_v42 = vadd.f32 (!%p341_p9), %v416_v34, %v415_v30  ;;  %v454_v43 = vadd.f32 (!%p341_p9), %v418_v36, %v417_v35  ;;  %v394_v49 = vld [vmem:[%s1213_s25 + $0x18] sm:$0xff] (!%p341_p9)  ;;  %v423_v51 = vmul.f32 (!%p341_p9), %v1218_v26, %v393_v48  ;;  %v396_v34 = vld [vmem:[%s1213_s25 + $0x28] sm:$0xff] (!%p341_p9) }
  0x34   : > { %v461_v44 = vadd.f32 %v420_v39, %v419_v38  ;;  %v424_v52 = vmul.f32 %v1220_v27, %v394_v49  ;;  %v425_v53 = vmul.f32 %v1222_v28, %v393_v48  ;;  %v426_v57 = vmul.f32 %v1224_v29, %v394_v49  ;;  %s1036_s28 = sshll.u32 (%p1181_p5), %s1020_s15, 3 }
  0x35   : > { %v448_v45 = vrot.slane %v447_v42, 4  ;;  %v455_v46 = vrot.slane %v454_v43, 4  ;;  %v468_v47 = vadd.f32 %v422_v41, %v421_v40  ;;  %v427_v59 = vmul.f32 %v1227_v31, %v393_v48  ;;  %s867_s4 = scalar_lea.vmem (%p1181_p5), %s1462_s3, %s1036_s28 }
  0x36   : > { %v462_v50 = vrot.slane %v461_v44, 4  ;;  %v428_v60 = vmul.f32 %v1229_v32, %v394_v49  ;;  %v429_v61 = vmul.f32 %v1231_v33, %v393_v48  ;;  %v430_v1 = vmul.f32 %v1236_v37, %v394_v49 }
  0x37   : > { %v449_v54 = vadd.f32 %v448_v45, %v447_v42  ;;  %v456_v55 = vadd.f32 %v455_v46, %v454_v43  ;;  %v469_v56 = vrot.slane %v468_v47, 4  ;;  %v475_v3 = vadd.f32 %v424_v52, %v423_v51 }
  0x38   : > { %v463_v58 = vadd.f32 %v462_v50, %v461_v44  ;;  %v482_v4 = vadd.f32 %v426_v57, %v425_v53  ;;  %v489_v5 = vadd.f32 %v428_v60, %v427_v59  ;;  %v496_v9 = vadd.f32 %v430_v1, %v429_v61 }
  0x39   : > { %v450_v62 = vrot.slane %v449_v54, 2  ;;  %v457_v63 = vrot.slane %v456_v55, 2  ;;  %v470_v0 = vadd.f32 %v469_v56, %v468_v47  ;;  %v476_v11 = vrot.slane %v475_v3, 4 }
  0x3a   : > { %v464_v2 = vrot.slane %v463_v58, 2  ;;  %v483_v12 = vrot.slane %v482_v4, 4  ;;  %v490_v13 = vrot.slane %v489_v5, 4  ;;  %v497_v17 = vrot.slane %v496_v9, 4 }
  0x3b   : > { %v451_v6 = vadd.f32 %v450_v62, %v449_v54  ;;  %v458_v7 = vadd.f32 %v457_v63, %v456_v55  ;;  %v471_v8 = vrot.slane %v470_v0, 2  ;;  %v477_v19 = vadd.f32 %v476_v11, %v475_v3 }
  0x3c   : > { %v465_v10 = vadd.f32 %v464_v2, %v463_v58  ;;  %v484_v20 = vadd.f32 %v483_v12, %v482_v4  ;;  %v491_v21 = vadd.f32 %v490_v13, %v489_v5  ;;  %v498_v30 = vadd.f32 %v497_v17, %v496_v9  ;;  %v398_v17 = vld [vmem:[%s1213_s25 + $0x38] sm:$0xff] }
  0x3d   : > { %v452_v14 = vrot.slane %v451_v6, 1  ;;  %v459_v15 = vrot.slane %v458_v7, 1  ;;  %v472_v16 = vadd.f32 %v471_v8, %v470_v0  ;;  %v478_v36 = vrot.slane %v477_v19, 2  ;;  %v397_v8 = vld [vmem:[%s1213_s25 + $0x30] sm:$0xff] }
  0x3e   : > { %v466_v18 = vrot.slane %v465_v10, 1  ;;  %v485_v38 = vrot.slane %v484_v20, 2  ;;  %v492_v39 = vrot.slane %v491_v21, 2  ;;  %v499_v42 = vrot.slane %v498_v30, 2 }
  0x3f   : > { %v453_v23 = vadd.f32 %v452_v14, %v451_v6  ;;  %v460_v24 = vadd.f32 %v459_v15, %v458_v7  ;;  %v473_v25 = vrot.slane %v472_v16, 1  ;;  %v431_v43 = vmul.f32 %v1218_v26, %v395_v22 }
  0x40   : > { %v467_v35 = vadd.f32 %v466_v18, %v465_v10  ;;  %v479_v44 = vadd.f32 %v478_v36, %v477_v19  ;;  %v486_v45 = vadd.f32 %v485_v38, %v484_v20  ;;  %v493_v46 = vadd.f32 %v492_v39, %v491_v21 }
  0x41   : > { %v474_v40 = vadd.f32 %v473_v25, %v472_v16  ;;  %v559_v41 = vmax.f32 %v453_v23, %v460_v24  ;;  %v432_v47 = vmul.f32 %v1220_v27, %v396_v34  ;;  %v500_v49 = vadd.f32 %v499_v42, %v498_v30 }
  0x42   : > { %v433_v50 = vmul.f32 %v1222_v28, %v395_v22  ;;  %v434_v51 = vmul.f32 %v1224_v29, %v396_v34  ;;  %v480_v52 = vrot.slane %v479_v44, 1  ;;  %v487_v53 = vrot.slane %v486_v45, 1 }
  0x43   : > { %v560_v48 = vmax.f32 %v559_v41, %v467_v35  ;;  %v494_v54 = vrot.slane %v493_v46, 1  ;;  %v435_v55 = vmul.f32 %v1227_v31, %v395_v22  ;;  %v501_v57 = vrot.slane %v500_v49, 1 }
  0x44   : > { %v436_v58 = vmul.f32 %v1229_v32, %v396_v34  ;;  %v437_v59 = vmul.f32 %v1231_v33, %v395_v22  ;;  %v481_v60 = vadd.f32 %v480_v52, %v479_v44  ;;  %v488_v61 = vadd.f32 %v487_v53, %v486_v45 }
  0x45   : > { %v561_v56 = vmax.f32 %v560_v48, %v474_v40  ;;  %v495_v62 = vadd.f32 %v494_v54, %v493_v46  ;;  %v438_v63 = vmul.f32 %v1236_v37, %v396_v34  ;;  %v502_v4 = vadd.f32 %v501_v57, %v500_v49 }
  0x46   : > { %v562_v5 = vmax.f32 %v481_v60, %v488_v61  ;;  %v503_v6 = vadd.f32 %v432_v47, %v431_v43  ;;  %v510_v7 = vadd.f32 %v434_v51, %v433_v50  ;;  %v517_v12 = vadd.f32 %v436_v58, %v435_v55 }
  0x47   : > { %v571_v0 = vsub.f32 %v453_v23, %v561_v56  ;;  %v572_v1 = vsub.f32 %v460_v24, %v561_v56  ;;  %v573_v2 = vsub.f32 %v467_v35, %v561_v56  ;;  %v574_v3 = vsub.f32 %v474_v40, %v561_v56 }
  0x48   : > { %v563_v14 = vmax.f32 %v562_v5, %v495_v62  ;;  %v504_v15 = vrot.slane %v503_v6, 4  ;;  %v511_v16 = vrot.slane %v510_v7, 4  ;;  %v518_v18 = vrot.slane %v517_v12, 4 }
  0x49   : > { %v587_v9 = vmul.f32 1.442695, %v571_v0  ;;  %v589_v10 = vmul.f32 1.442695, %v572_v1  ;;  %v591_v11 = vmul.f32 1.442695, %v573_v2  ;;  %v524_v19 = vadd.f32 %v438_v63, %v437_v59 }
  0x4a   : > { %v593_v13 = vmul.f32 1.442695, %v574_v3  ;;  %v439_v20 = vmul.f32 %v1218_v26, %v397_v8  ;;  %v564_v21 = vmax.f32 %v563_v14, %v502_v4  ;;  %v505_v22 = vadd.f32 %v504_v15, %v503_v6 }
  0x4b   : > { %1063 = vpow2.f32 %v587_v9  ;;  %v512_v23 = vadd.f32 %v511_v16, %v510_v7  ;;  %v519_v24 = vadd.f32 %v518_v18, %v517_v12  ;;  %v525_v25 = vrot.slane %v524_v19, 4 }
  0x4c   : > { %1065 = vpow2.f32 %v589_v10  ;;  %v440_v30 = vmul.f32 %v1220_v27, %v398_v17  ;;  %v575_v34 = vsub.f32 %v481_v60, %v564_v21  ;;  %v576_v35 = vsub.f32 %v488_v61, %v564_v21 }
  0x4d   : > { %1067 = vpow2.f32 %v591_v11  ;;  %v577_v36 = vsub.f32 %v495_v62, %v564_v21  ;;  %v578_v38 = vsub.f32 %v502_v4, %v564_v21  ;;  %v506_v39 = vrot.slane %v505_v22, 2 }
  0x4e   : > { %1069 = vpow2.f32 %v593_v13  ;;  %v513_v40 = vrot.slane %v512_v23, 2  ;;  %v520_v41 = vrot.slane %v519_v24, 2  ;;  %v595_v26 = vmul.f32 1.442695, %v575_v34 }
  0x4f   : > { %v597_v42 = vmul.f32 1.442695, %v576_v35  ;;  %v599_v43 = vmul.f32 1.442695, %v577_v36  ;;  %v526_v44 = vadd.f32 %v525_v25, %v524_v19  ;;  %v601_v45 = vmul.f32 1.442695, %v578_v38 }
  0x50   : > { %v507_v46 = vadd.f32 %v506_v39, %v505_v22  ;;  %v514_v47 = vadd.f32 %v513_v40, %v512_v23  ;;  %v521_v27 = vadd.f32 %v520_v41, %v519_v24  ;;  %1071 = vpow2.f32 %v595_v26 }
  0x51   : > { %v527_v48 = vrot.slane %v526_v44, 2  ;;  %v441_v49 = vmul.f32 %v1222_v28, %v397_v8  ;;  %v442_v50 = vmul.f32 %v1224_v29, %v398_v17  ;;  %1073 = vpow2.f32 %v597_v42 }
  0x52   : > { %v508_v51 = vrot.slane %v507_v46, 1  ;;  %v515_v52 = vrot.slane %v514_v47, 1  ;;  %v522_v53 = vrot.slane %v521_v27, 1  ;;  %1075 = vpow2.f32 %v599_v43 }
  0x53   : > { %v528_v54 = vadd.f32 %v527_v48, %v526_v44  ;;  %v443_v55 = vmul.f32 %v1227_v31, %v397_v8  ;;  %v444_v56 = vmul.f32 %v1229_v32, %v398_v17  ;;  %1077 = vpow2.f32 %v601_v45 }
  0x54   : > { %v509_v58 = vadd.f32 %v508_v51, %v507_v46  ;;  %v516_v59 = vadd.f32 %v515_v52, %v514_v47  ;;  %v523_v60 = vadd.f32 %v522_v53, %v521_v27  ;;  %v445_v29 = vmul.f32 %v1231_v33, %v397_v8 }
  0x55   : > { %v1270_v57 = vpop.eup %1063  ;;  %v529_v28 = vrot.slane %v528_v54, 1  ;;  %v446_v62 = vmul.f32 %v1236_v37, %v398_v17  ;;  %v531_v63 = vadd.f32 %v440_v30, %v439_v20  ;;  %v538_v32 = vadd.f32 %v442_v50, %v441_v49 }
  0x56   : > { %v1272_v61 = vpop.eup %1065  ;;  %v565_v1 = vmax.f32 %v509_v58, %v516_v59  ;;  %v545_v2 = vadd.f32 %v444_v56, %v443_v55 }
  0x57   : > { %v1276_v0 = vpop.eup %1067  ;;  %v635_v31 = vrot.slane %v1272_v61, 7  ;;  %v530_v5 = vadd.f32 %v529_v28, %v528_v54  ;;  %v532_v6 = vrot.slane %v531_v63, 4  ;;  %v552_v7 = vadd.f32 %v446_v62, %v445_v29 }
  0x58   : > { %v1279_v3 = vpop.eup %1069  ;;  %v638_v4 = vrot.slane %v1276_v0, 6  ;;  %v566_v8 = vmax.f32 %v565_v1, %v523_v60  ;;  %v539_v9 = vrot.slane %v538_v32, 4  ;;  %v546_v12 = vrot.slane %v545_v2, 4 }
  0x59   : > { %v637_v33 = vsel %vm636_vm0, %v635_v31, %v1270_v57  ;;  %v641_v37 = vrot.slane %v1279_v3, 5  ;;  %v533_v11 = vadd.f32 %v532_v6, %v531_v63  ;;  %v553_v13 = vrot.slane %v552_v7, 4 }
  0x5a   : > { %v640_v10 = vsel %vm639_vm1, %v638_v4, %v637_v33  ;;  %v567_v15 = vmax.f32 %v566_v8, %v530_v5  ;;  %v540_v16 = vadd.f32 %v539_v9, %v538_v32  ;;  %v1287_v17 = vpop.eup %1071  ;;  %v547_v20 = vadd.f32 %v546_v12, %v545_v2 }
  0x5b   : > { %v643_v14 = vsel %vm642_vm2, %v641_v37, %v640_v10  ;;  %v534_v19 = vrot.slane %v533_v11, 2  ;;  %v554_v21 = vadd.f32 %v553_v13, %v552_v7  ;;  %v1290_v22 = vpop.eup %1073  ;;  %v699_v29 = vlaneseq }
  0x5c   : > { %v667_v18 = vsel %vm666_vm3, %v643_v14, 0.0  ;;  %v579_v24 = vsub.f32 %v509_v58, %v567_v15  ;;  %v580_v25 = vsub.f32 %v516_v59, %v567_v15  ;;  %v581_v30 = vsub.f32 %v523_v60, %v567_v15  ;;  %v1292_v34 = vpop.eup %1075 }
  0x5d   : > { %v668_v23 = vrot.slane %v667_v18, 4  ;;  %v644_v35 = vrot.slane %v1290_v22, 7  ;;  %v582_v36 = vsub.f32 %v530_v5, %v567_v15  ;;  %v535_v38 = vadd.f32 %v534_v19, %v533_v11  ;;  %v1295_v40 = vpop.eup %1077 }
  0x5e   : > { %v541_v39 = vrot.slane %v540_v16, 2  ;;  %v646_v26 = vrot.slane %v1292_v34, 6  ;;  %v603_v42 = vmul.f32 1.442695, %v579_v24  ;;  %v605_v43 = vmul.f32 1.442695, %v580_v25 }
  0x5f   : > { %v669_v41 = vadd.f32 %v668_v23, %v667_v18  ;;  %v645_v44 = vsel %vm636_vm0, %v644_v35, %v1287_v17  ;;  %v648_v45 = vrot.slane %v1295_v40, 5  ;;  %v607_v46 = vmul.f32 1.442695, %v581_v30 }
  0x60   : > { %v609_v47 = vmul.f32 1.442695, %v582_v36  ;;  %v647_v48 = vsel %vm639_vm1, %v646_v26, %v645_v44  ;;  %1079 = vpow2.f32 %v603_v42  ;;  %v536_v49 = vrot.slane %v535_v38, 1 }
  0x61   : > { %v670_v27 = vrot.slane %v669_v41, 2  ;;  %v649_v50 = vsel %vm642_vm2, %v648_v45, %v647_v48  ;;  %1081 = vpow2.f32 %v605_v43  ;;  %v542_v51 = vadd.f32 %v541_v39, %v540_v16 }
  0x62   : > { %v548_v52 = vrot.slane %v547_v20, 2  ;;  %v674_v54 = vsel %vm666_vm3, %v649_v50, 0.0  ;;  %1083 = vpow2.f32 %v607_v46  ;;  %v537_v55 = vadd.f32 %v536_v49, %v535_v38  ;;  %v1328_v50 = vld [vmem:[%s363_s12] sm:$0xff] }
  0x63   : > { %v671_v53 = vadd.f32 %v670_v27, %v669_v41  ;;  %v675_v56 = vrot.slane %v674_v54, 4  ;;  %1085 = vpow2.f32 %v609_v47  ;;  %v543_v58 = vrot.slane %v542_v51, 1 }
  0x64   : > { %v549_v59 = vadd.f32 %v548_v52, %v547_v20  ;;  %v555_v28 = vrot.slane %v554_v21, 2  ;;  %v700_v7 = vshrl.u32 %v699_v29, 7  ;;  %v1332_v52 = vld [vmem:[%s363_s12 + $0x20] sm:$0xff] }
  0x65   : > { %v672_v60 = vrot.slane %v671_v53, 1  ;;  %v676_v62 = vadd.f32 %v675_v56, %v674_v54  ;;  %v544_v63 = vadd.f32 %v543_v58, %v542_v51  ;;  %v1330_v51 = vld [vmem:[%s363_s12 + $0x10] sm:$0xff]  ;;  %v1342_v56 = vld [vmem:[%s363_s12 + $0x28] sm:$0xff] }
  0x66   : > { %v550_v31 = vrot.slane %v549_v59, 1  ;;  %v556_v32 = vadd.f32 %v555_v28, %v554_v21  ;;  %v1313_v16 = vsub.s32 0, %v700_v7  ;;  %v1344_v58 = vld [vmem:[%s363_s12 + $0x30] sm:$0xff] }
  0x67   : > { %v673_v1 = vadd.f32 %v672_v60, %v671_v53  ;;  %v677_v2 = vrot.slane %v676_v62, 2  ;;  %v568_v5 = vmax.f32 %v537_v55, %v544_v63 }
  0x68   : > { %v551_v4 = vadd.f32 %v550_v31, %v549_v59  ;;  %v557_v6 = vrot.slane %v556_v32, 1 }
  0x69   : > { %1087 = vrcp.f32 %v673_v1  ;;  %v678_v33 = vadd.f32 %v677_v2, %v676_v62 }
  0x6a   : > { %v569_v37 = vmax.f32 %v568_v5, %v551_v4  ;;  %v1304_v8 = vpop.eup %1079  ;;  %v558_v9 = vadd.f32 %v557_v6, %v556_v32 }
  0x6b   : > { %v1306_v10 = vpop.eup %1081  ;;  %v679_v11 = vrot.slane %v678_v33, 1 }
  0x6c   : > { %v1308_v12 = vpop.eup %1083  ;;  %v650_v13 = vrot.slane %v1306_v10, 7  ;;  %v570_v14 = vmax.f32 %v569_v37, %v558_v9 }
  0x6d   : > { %v1311_v15 = vpop.eup %1085  ;;  %v680_v18 = vadd.f32 %v679_v11, %v678_v33  ;;  %v652_v19 = vrot.slane %v1308_v12, 6 }
  0x6e   : > { %v651_v20 = vsel %vm636_vm0, %v650_v13, %v1304_v8  ;;  %v654_v21 = vrot.slane %v1311_v15, 5  ;;  %v583_v23 = vsub.f32 %v537_v55, %v570_v14  ;;  %v584_v24 = vsub.f32 %v544_v63, %v570_v14  ;;  %v1349_v63 = vld [vmem:[%s363_s12 + $0x38] sm:$0xff] }
  0x6f   : > { %1089 = vrcp.f32 %v680_v18  ;;  %v653_v25 = vsel %vm639_vm1, %v652_v19, %v651_v20  ;;  %v585_v30 = vsub.f32 %v551_v4, %v570_v14  ;;  %v586_v35 = vsub.f32 %v558_v9, %v570_v14 }
  0x70   : > { %v655_v36 = vsel %vm642_vm2, %v654_v21, %v653_v25  ;;  %v611_v38 = vmul.f32 1.442695, %v583_v23  ;;  %v613_v39 = vmul.f32 1.442695, %v584_v24 }
  0x71   : > { %v681_v41 = vsel %vm666_vm3, %v655_v36, 0.0  ;;  %v615_v26 = vmul.f32 1.442695, %v585_v30  ;;  %v617_v44 = vmul.f32 1.442695, %v586_v35 }
  0x72   : > { %v682_v43 = vrot.slane %v681_v41, 4  ;;  %1091 = vpow2.f32 %v611_v38 }
  0x73   : > { %v1088_v42 = vpop.eup %1087  ;;  %1093 = vpow2.f32 %v613_v39 }
  0x74   : > { %v702_v45 = vrot.slane %v1088_v42, %v1313_v16  ;;  %v683_v46 = vadd.f32 %v682_v43, %v681_v41  ;;  %1095 = vpow2.f32 %v615_v26 }
  0x75   : > { %1097 = vpow2.f32 %v617_v44 }
  0x76   : > { %v715_v47 = vmul.f32 %v1270_v57, %v702_v45  ;;  %v716_v27 = vmul.f32 %v1272_v61, %v702_v45  ;;  %v717_v48 = vmul.f32 %v1276_v0, %v702_v45  ;;  %v718_v49 = vmul.f32 %v1279_v3, %v702_v45  ;;  %v1338_v0 = vld [vmem:[%s363_s12 + $0x8] sm:$0xff]  ;;  %v1340_v3 = vld [vmem:[%s363_s12 + $0x18] sm:$0xff] }
  0x77   : > { %v684_v53 = vrot.slane %v683_v46, 2 }
  0x78   : > { %v734_v54 = vrot.slane %v715_v47, %v1313_v16  ;;  %v738_v55 = vrot.slane %v716_v27, %v1313_v16  ;;  %v742_v57 = vrot.slane %v717_v48, %v1313_v16  ;;  %v746_v61 = vrot.slane %v718_v49, %v1313_v16 }
  0x79   : > { %v685_v59 = vadd.f32 %v684_v53, %v683_v46  ;;  %v1090_v60 = vpop.eup %1089 }
  0x7a   : > { %v795_v28 = vmul.f32 %v734_v54, %v1328_v50  ;;  %v797_v29 = vmul.f32 %v738_v55, %v1330_v51  ;;  %v799_v62 = vmul.f32 %v742_v57, %v1332_v52  ;;  %v796_v31 = vmul.f32 %v734_v54, %v1338_v0 }
  0x7b   : > { %v798_v1 = vmul.f32 %v738_v55, %v1340_v3  ;;  %v800_v32 = vmul.f32 %v742_v57, %v1342_v56  ;;  %v801_v2 = vmul.f32 %v746_v61, %v1344_v58  ;;  %v706_v5 = vrot.slane %v1090_v60, %v1313_v16 }
  0x7c   : > { %v827_v4 = vadd.f32 %v797_v29, %v795_v28  ;;  %v686_v6 = vrot.slane %v685_v59, 1  ;;  %v1356_v7 = vpop.eup %1091  ;;  %v802_v33 = vmul.f32 %v746_v61, %v1349_v63 }
  0x7d   : > { %v830_v37 = vadd.f32 %v798_v1, %v796_v31  ;;  %v1359_v9 = vpop.eup %1093  ;;  %v719_v13 = vmul.f32 %v1287_v17, %v706_v5  ;;  %v720_v14 = vmul.f32 %v1290_v22, %v706_v5  ;;  %v721_v18 = vmul.f32 %v1292_v34, %v706_v5 }
  0x7e   : > { %v828_v11 = vadd.f32 %v827_v4, %v799_v62  ;;  %v1364_v19 = vpop.eup %1095  ;;  %v722_v21 = vmul.f32 %v1295_v40, %v706_v5  ;;  %v687_v23 = vadd.f32 %v686_v6, %v685_v59  ;;  %v656_v24 = vrot.slane %v1359_v9, 7 }
  0x7f   : > { %v831_v20 = vadd.f32 %v830_v37, %v800_v32  ;;  %v750_v30 = vrot.slane %v719_v13, %v1313_v16  ;;  %v754_v35 = vrot.slane %v720_v14, %v1313_v16  ;;  %v758_v17 = vrot.slane %v721_v18, %v1313_v16  ;;  %v1371_v36 = vpop.eup %1097 }
  0x80   : > { %v829_v25 = vadd.f32 %v828_v11, %v801_v2  ;;  %v762_v34 = vrot.slane %v722_v21, %v1313_v16  ;;  %1099 = vrcp.f32 %v687_v23  ;;  %v657_v43 = vsel %vm636_vm0, %v656_v24, %v1356_v7 }
  0x81   : > { %v832_v22 = vadd.f32 %v831_v20, %v802_v33  ;;  %v803_v40 = vmul.f32 %v750_v30, %v1328_v50  ;;  %v805_v38 = vmul.f32 %v754_v35, %v1330_v51  ;;  %v807_v39 = vmul.f32 %v758_v17, %v1332_v52 }
  0x82   : > { %851 = vst [vmem:[%s1375_s27] sm:$0xff] %v829_v25  ;;  %v804_v41 = vmul.f32 %v750_v30, %v1338_v0  ;;  %v806_v26 = vmul.f32 %v754_v35, %v1340_v3  ;;  %v808_v42 = vmul.f32 %v758_v17, %v1342_v56  ;;  %v809_v44 = vmul.f32 %v762_v34, %v1344_v58 }
  0x83   : > { %852 = vst [vmem:[%s1375_s27 + $0x8] sm:$0xff] %v832_v22  ;;  %v833_v45 = vadd.f32 %v805_v38, %v803_v40  ;;  %v658_v46 = vrot.slane %v1364_v19, 6  ;;  %v660_v47 = vrot.slane %v1371_v36, 5  ;;  %v810_v27 = vmul.f32 %v762_v34, %v1349_v63 }
  0x84   : > { %v836_v48 = vadd.f32 %v806_v26, %v804_v41 }
  0x85   : > { %v834_v49 = vadd.f32 %v833_v45, %v807_v39  ;;  %v659_v53 = vsel %vm639_vm1, %v658_v46, %v657_v43 }
  0x86   : > { %v837_v54 = vadd.f32 %v836_v48, %v808_v42  ;;  %v661_v55 = vsel %vm642_vm2, %v660_v47, %v659_v53 }
  0x87   : > { %v835_v57 = vadd.f32 %v834_v49, %v809_v44  ;;  %v688_v61 = vsel %vm666_vm3, %v661_v55, 0.0 }
  0x88   : > { %v838_v59 = vadd.f32 %v837_v54, %v810_v27  ;;  %v689_v60 = vrot.slane %v688_v61, 4 }
  0x89   : > { %853 = vst [vmem:[%s1375_s27 + $0x10] sm:$0xff] %v835_v57 }
  0x8a   : > { %v1100_v28 = vpop.eup %1099  ;;  %854 = vst [vmem:[%s1375_s27 + $0x18] sm:$0xff] %v838_v59  ;;  %v690_v29 = vadd.f32 %v689_v60, %v688_v61 }
  0x8b   : > { %v710_v62 = vrot.slane %v1100_v28, %v1313_v16 }
  0x8c   : > { %v691_v31 = vrot.slane %v690_v29, 2 }
  0x8d   : > { %v723_v1 = vmul.f32 %v1304_v8, %v710_v62  ;;  %v724_v32 = vmul.f32 %v1306_v10, %v710_v62  ;;  %v725_v2 = vmul.f32 %v1308_v12, %v710_v62  ;;  %v726_v4 = vmul.f32 %v1311_v15, %v710_v62 }
  0x8e   : > { %v692_v5 = vadd.f32 %v691_v31, %v690_v29 }
  0x8f   : > { %v766_v6 = vrot.slane %v723_v1, %v1313_v16  ;;  %v770_v33 = vrot.slane %v724_v32, %v1313_v16  ;;  %v774_v37 = vrot.slane %v725_v2, %v1313_v16  ;;  %v778_v11 = vrot.slane %v726_v4, %v1313_v16 }
  0x90   : > { %v693_v13 = vrot.slane %v692_v5, 1 }
  0x91   : > { %v811_v14 = vmul.f32 %v766_v6, %v1328_v50  ;;  %v813_v8 = vmul.f32 %v770_v33, %v1330_v51  ;;  %v815_v10 = vmul.f32 %v774_v37, %v1332_v52  ;;  %v812_v12 = vmul.f32 %v766_v6, %v1338_v0 }
  0x92   : > { %v814_v15 = vmul.f32 %v770_v33, %v1340_v3  ;;  %v816_v18 = vmul.f32 %v774_v37, %v1342_v56  ;;  %v817_v20 = vmul.f32 %v778_v11, %v1344_v58  ;;  %v694_v23 = vadd.f32 %v693_v13, %v692_v5 }
  0x93   : > { %v839_v21 = vadd.f32 %v813_v8, %v811_v14  ;;  %v818_v24 = vmul.f32 %v778_v11, %v1349_v63 }
  0x94   : > { %v842_v25 = vadd.f32 %v814_v15, %v812_v12  ;;  %1101 = vrcp.f32 %v694_v23 }
  0x95   : > { %v840_v30 = vadd.f32 %v839_v21, %v815_v10 }
  0x96   : > { %v843_v35 = vadd.f32 %v842_v25, %v816_v18 }
  0x97   : > { %v841_v17 = vadd.f32 %v840_v30, %v817_v20 }
  0x98   : > { %v844_v22 = vadd.f32 %v843_v35, %v818_v24 }
  0x99   : > { %855 = vst [vmem:[%s1375_s27 + $0x20] sm:$0xff] %v841_v17 }
  0x9a   : > { %856 = vst [vmem:[%s1375_s27 + $0x28] sm:$0xff] %v844_v22 }
  0x9e   : > { %v1102_v34 = vpop.eup %1101 }
  0x9f   : > { %v714_v40 = vrot.slane %v1102_v34, %v1313_v16 }
  0xa1   : > { %v727_v38 = vmul.f32 %v1356_v7, %v714_v40  ;;  %v728_v39 = vmul.f32 %v1359_v9, %v714_v40  ;;  %v729_v41 = vmul.f32 %v1364_v19, %v714_v40  ;;  %v730_v26 = vmul.f32 %v1371_v36, %v714_v40 }
  0xa3   : > { %v782_v42 = vrot.slane %v727_v38, %v1313_v16  ;;  %v786_v43 = vrot.slane %v728_v39, %v1313_v16  ;;  %v790_v44 = vrot.slane %v729_v41, %v1313_v16  ;;  %v794_v45 = vrot.slane %v730_v26, %v1313_v16 }
  0xa5   : > { %v819_v46 = vmul.f32 %v782_v42, %v1328_v50  ;;  %v821_v7 = vmul.f32 %v786_v43, %v1330_v51  ;;  %v823_v9 = vmul.f32 %v790_v44, %v1332_v52  ;;  %v820_v19 = vmul.f32 %v782_v42, %v1338_v0  ;;  %v909_v51 = vld [vmem:[%s1375_s27] sm:$0xff] (%p1181_p5)  ;;  %v911_v52 = vld [vmem:[%s1375_s27 + $0x8] sm:$0xff] (%p1181_p5)  ;;  %v913_v0 = vld [vmem:[%s1375_s27 + $0x10] sm:$0xff] (%p1181_p5) }
  0xa6   : > { %v822_v36 = vmul.f32 %v786_v43, %v1340_v3  ;;  %v824_v47 = vmul.f32 %v790_v44, %v1342_v56  ;;  %v825_v27 = vmul.f32 %v794_v45, %v1344_v58  ;;  %v826_v49 = vmul.f32 %v794_v45, %v1349_v63  ;;  %v915_v3 = vld [vmem:[%s1375_s27 + $0x18] sm:$0xff] (%p1181_p5)  ;;  %v917_v56 = vld [vmem:[%s1375_s27 + $0x20] sm:$0xff] (%p1181_p5)  ;;  %v919_v58 = vld [vmem:[%s1375_s27 + $0x28] sm:$0xff] (%p1181_p5)  ;;  %910 = vst [vmem:[%s867_s4] sm:$0xff] (%p1181_p5), %v909_v51 }
  0xa7   : > { %v845_v48 = vadd.f32 %v821_v7, %v819_v46  ;;  %912 = vst [vmem:[%s867_s4 + $0x10] sm:$0xff] (%p1181_p5), %v911_v52  ;;  %914 = vst [vmem:[%s867_s4 + $0x20] sm:$0xff] (%p1181_p5), %v913_v0 }
  0xa8   : > { %v848_v53 = vadd.f32 %v822_v36, %v820_v19  ;;  %865 = sbr.rel (!%p1181_p5) target bundleno = 183 (0xb7), region = 150  ;;  %916 = vst [vmem:[%s867_s4 + $0x30] sm:$0xff] (%p1181_p5), %v915_v3  ;;  %918 = vst [vmem:[%s867_s4 + $0x40] sm:$0xff] (%p1181_p5), %v917_v56 }
  0xa9   : > { %v846_v16 = vadd.f32 %v845_v48, %v823_v9  ;;  %920 = vst [vmem:[%s867_s4 + $0x50] sm:$0xff] (%p1181_p5), %v919_v58 }
  0xaa   : > { %v849_v54 = vadd.f32 %v848_v53, %v824_v47 }
  0xab   : > { %v847_v55 = vadd.f32 %v846_v16, %v825_v27 }
  0xac   : > { %v850_v50 = vadd.f32 %v849_v54, %v826_v49 }
  0xad   : > { %857 = vst [vmem:[%s1375_s27 + $0x30] sm:$0xff] %v847_v55 }
  0xae   : > { %858 = vst [vmem:[%s1375_s27 + $0x38] sm:$0xff] %v850_v50 }
  0xb4   : > { %v921_v63 = vld [vmem:[%s1375_s27 + $0x30] sm:$0xff] }
  0xb5   : > { %v923_v57 = vld [vmem:[%s1375_s27 + $0x38] sm:$0xff]  ;;  %922 = vst [vmem:[%s867_s4 + $0x60] sm:$0xff] %v921_v63 }
  0xb6   : > { %924 = vst [vmem:[%s867_s4 + $0x70] sm:$0xff] %v923_v57 }
  0xb7 PF: > { %p10_p10 = scmp.ge.s32.totalorder %s1164_s16, 4   ;;  %s1465_s12 = smov %s1121_s13 }
  0xb8   : > { %s1466_s13 = smov %s1175_s19  ;;  %s1467_s14 = smov %s1164_s16 }
  0xb9   :  { %12 = sbr.rel (!%p10_p10) target bundleno = 2 (0x2), region = 235 }

// kernel: forward.25
= control target key start
LH: loop header
LB: loop body
LE: loop exit
PB: predicated region body
PF: predicated region fallthrough
CT: control target
= control target key end

     0   :  { %vm129_vm0 = vcmask 785408   ;;  %vm283_vm1 = vcmask 261120   ;;  %s603_s1 = inlined_call_operand.vmem [shape: bf16[96,32], index: 1, kind: input, shape index: {}]   ;;  %s604_s0 = inlined_call_operand.vmem [shape: bf16[128,96], index: 0, kind: input, shape index: {}]   ;;  %s605_s2 = inlined_call_operand.vmem [shape: f32[1,32], index: 2, kind: input, shape index: {}]   ;;  %s606_s3 = inlined_call_operand.vmem [shape: f32[128,32], index: 3, kind: input, shape index: {}]   ;;  %s607_s4 = inlined_call_operand.vmem [shape: f32[128,32], index: 4, kind: output, shape index: {}]  }
   0x1   :  { %v381_v0 = vld [vmem:[%s603_s1] sm:$0xff]   ;;  %v382_v1 = vld [vmem:[%s603_s1 + $0x8] sm:$0xff]   ;;  %v383_v2 = vld [vmem:[%s603_s1 + $0x10] sm:$0xff]  }
   0x2   :  { %341 = vmatprep.subr.bf16.mxu0 %v381_v0  ;;  %369 = vmatprep.subr.bf16.mxu1 %v381_v0  ;;  %v387_v3 = vld [vmem:[%s604_s0] sm:$0xff]   ;;  %v384_v5 = vld [vmem:[%s603_s1 + $0x18] sm:$0xff]   ;;  %v386_v7 = vld [vmem:[%s603_s1 + $0x28] sm:$0xff]  }
   0x3   :  { %342 = vmatpush3.bf16.msra.mxu0 %v381_v0  ;;  %375 = vmatpush3.bf16.msra.mxu1 %v381_v0  ;;  %v388_v4 = vld [vmem:[%s604_s0 + $0x20] sm:$0xff]   ;;  %v389_v8 = vld [vmem:[%s604_s0 + $0x8] sm:$0xff]   ;;  %v391_v10 = vld [vmem:[%s604_s0 + $0x10] sm:$0xff]  }
   0x4   :  { %343 = vmatprep.subr.bf16.mxu0 %v382_v1  ;;  %370 = vmatprep.subr.bf16.mxu1 %v382_v1  ;;  %v385_v6 = vld [vmem:[%s603_s1 + $0x20] sm:$0xff]   ;;  %v390_v9 = vld [vmem:[%s604_s0 + $0x28] sm:$0xff]   ;;  %v392_v11 = vld [vmem:[%s604_s0 + $0x30] sm:$0xff]  }
   0x5   :  { %353 = vmatprep.mubr.msk.bf16.mxu0 %vm129_vm0, %v387_v3  ;;  %361 = vmatprep.mubr.msk.bf16.mxu1 %vm129_vm0, %v388_v4  ;;  %v393_v12 = vld [vmem:[%s604_s0 + $0x18] sm:$0xff]   ;;  %v473_v14 = vld [vmem:[%s605_s2] ss:$0 sm:$0xff]  ;;  %v253_v16 = vld [vmem:[%s606_s3 + $0x10] sm:$0xff] }
   0x6   :  { %v394_v13 = vld [vmem:[%s604_s0 + $0x38] sm:$0xff]   ;;  %v261_v18 = vld [vmem:[%s606_s3 + $0x50] sm:$0xff]  ;;  %v251_v22 = vld [vmem:[%s606_s3] sm:$0xff] }
   0x7   :  { %344 = vmatpush3.bf16.msra.mxu0 %v382_v1  ;;  %376 = vmatpush3.bf16.msra.mxu1 %v382_v1  ;;  %v259_v24 = vld [vmem:[%s606_s3 + $0x40] sm:$0xff]  ;;  %v254_v28 = vld [vmem:[%s606_s3 + $0x18] sm:$0xff]  ;;  %v252_v36 = vld [vmem:[%s606_s3 + $0x8] sm:$0xff] }
   0x8   :  { %345 = vmatprep.subr.bf16.mxu0 %v383_v2  ;;  %371 = vmatprep.subr.bf16.mxu1 %v383_v2  ;;  %v262_v30 = vld [vmem:[%s606_s3 + $0x58] sm:$0xff]  ;;  %v260_v38 = vld [vmem:[%s606_s3 + $0x48] sm:$0xff]  ;;  %v257_v48 = vld [vmem:[%s606_s3 + $0x30] sm:$0xff] }
   0x9   :  { %v265_v50 = vld [vmem:[%s606_s3 + $0x70] sm:$0xff]  ;;  %v255_v54 = vld [vmem:[%s606_s3 + $0x20] sm:$0xff]  ;;  %v258_v60 = vld [vmem:[%s606_s3 + $0x38] sm:$0xff] }
   0xa   :  { %v263_v56 = vld [vmem:[%s606_s3 + $0x60] sm:$0xff]  ;;  %v266_v62 = vld [vmem:[%s606_s3 + $0x78] sm:$0xff]  ;;  %v256_v4 = vld [vmem:[%s606_s3 + $0x28] sm:$0xff] }
   0xb   :  { %346 = vmatpush3.bf16.msra.mxu0 %v383_v2  ;;  %377 = vmatpush3.bf16.msra.mxu1 %v383_v2 }
   0xc   :  { %347 = vmatprep.subr.bf16.mxu0 %v384_v5  ;;  %372 = vmatprep.subr.bf16.mxu1 %v384_v5 }
   0xf   :  { %348 = vmatpush3.bf16.msra.mxu0 %v384_v5  ;;  %378 = vmatpush3.bf16.msra.mxu1 %v384_v5 }
  0x10   :  { %349 = vmatprep.subr.bf16.mxu0 %v385_v6  ;;  %373 = vmatprep.subr.bf16.mxu1 %v385_v6 }
  0x13   :  { %350 = vmatpush3.bf16.msra.mxu0 %v385_v6  ;;  %379 = vmatpush3.bf16.msra.mxu1 %v385_v6  ;;  %v264_v6 = vld [vmem:[%s606_s3 + $0x68] sm:$0xff] }
  0x14   :  { %351 = vmatprep.subr.bf16.mxu0 %v386_v7  ;;  %374 = vmatprep.subr.bf16.mxu1 %v386_v7 }
  0x17   :  { %352 = vmatpush3.bf16.msra.mxu0 %v386_v7  ;;  %380 = vmatpush3.bf16.msra.mxu1 %v386_v7 }
  0x1a   :  { %354 = vmatmul.mubr.msk.bf16.vlgmr.msra.gmra.mrb[0].mxu0 %vm129_vm0, %v389_v8  ;;  %362 = vmatmul.mubr.msk.bf16.vlgmr.msra.gmra.mrb[0].mxu1 %vm129_vm0, %v390_v9 }
  0x1b   :  { %357 = vmatprep.mubr.msk.bf16.mxu0 %vm129_vm0, %v391_v10  ;;  %365 = vmatprep.mubr.msk.bf16.mxu1 %vm129_vm0, %v392_v11 }
  0x22   :  { %358 = vmatmul.mubr.msk.bf16.gmra.mrb[4].mxu0 %vm129_vm0, %v393_v12  ;;  %366 = vmatmul.mubr.msk.bf16.gmra.mrb[4].mxu1 %vm129_vm0, %v394_v13 }
  0xed   :  { %v355_v15 = vpop.f32.mrb[0].mxu0  ;;  %v363_v17 = vpop.f32.mrb[0].mxu1 }
  0xee   :  { %v197_v19 = vadd.f32 %v355_v15, %v473_v14  ;;  %v229_v20 = vadd.f32 %v363_v17, %v473_v14  ;;  %v188_v21 = vpop.f32.mrb[1].mxu0  ;;  %v220_v23 = vpop.f32.mrb[1].mxu1 }
  0xef   :  { %v189_v25 = vadd.f32 %v473_v14, %v188_v21  ;;  %v221_v26 = vadd.f32 %v473_v14, %v220_v23  ;;  %v356_v27 = vpop.f32.mrb[2].mxu0  ;;  %v364_v29 = vpop.f32.mrb[2].mxu1 }
  0xf0   :  { %v269_v31 = vadd.f32 %v253_v16, %v197_v19  ;;  %v277_v32 = vadd.f32 %v261_v18, %v229_v20  ;;  %v200_v33 = vadd.f32 %v356_v27, %v473_v14  ;;  %v232_v34 = vadd.f32 %v364_v29, %v473_v14  ;;  %v191_v35 = vpop.f32.mrb[3].mxu0  ;;  %v223_v37 = vpop.f32.mrb[3].mxu1 }
  0xf1   :  { %v267_v39 = vadd.f32 %v251_v22, %v189_v25  ;;  %v275_v40 = vadd.f32 %v259_v24, %v221_v26  ;;  %v192_v41 = vadd.f32 %v473_v14, %v191_v35  ;;  %v224_v42 = vadd.f32 %v473_v14, %v223_v37 }
  0xf2   :  { %286 = vst.msk [vmem:[%s607_s4 + $0x10] sm:$0xff] %vm283_vm1, %v269_v31  ;;  %294 = vst.msk [vmem:[%s607_s4 + $0x50] sm:$0xff] %vm283_vm1, %v277_v32  ;;  %v270_v43 = vadd.f32 %v254_v28, %v200_v33  ;;  %v278_v44 = vadd.f32 %v262_v30, %v232_v34 }
  0xf3   :  { %284 = vst.msk [vmem:[%s607_s4] sm:$0xff] %vm283_vm1, %v267_v39  ;;  %292 = vst.msk [vmem:[%s607_s4 + $0x40] sm:$0xff] %vm283_vm1, %v275_v40  ;;  %v268_v45 = vadd.f32 %v252_v36, %v192_v41  ;;  %v276_v46 = vadd.f32 %v260_v38, %v224_v42 }
  0xf4   :  { %287 = vst.msk [vmem:[%s607_s4 + $0x18] sm:$0xff] %vm283_vm1, %v270_v43  ;;  %295 = vst.msk [vmem:[%s607_s4 + $0x58] sm:$0xff] %vm283_vm1, %v278_v44 }
  0xf5   :  { %285 = vst.msk [vmem:[%s607_s4 + $0x8] sm:$0xff] %vm283_vm1, %v268_v45  ;;  %293 = vst.msk [vmem:[%s607_s4 + $0x48] sm:$0xff] %vm283_vm1, %v276_v46  ;;  %v359_v47 = vpop.f32.mrb[4].mxu0  ;;  %v367_v49 = vpop.f32.mrb[4].mxu1 }
  0xf6   :  { %v213_v51 = vadd.f32 %v359_v47, %v473_v14  ;;  %v245_v52 = vadd.f32 %v367_v49, %v473_v14  ;;  %v204_v53 = vpop.f32.mrb[5].mxu0  ;;  %v236_v55 = vpop.f32.mrb[5].mxu1 }
  0xf7   :  { %v205_v57 = vadd.f32 %v473_v14, %v204_v53  ;;  %v237_v58 = vadd.f32 %v473_v14, %v236_v55  ;;  %v360_v59 = vpop.f32.mrb[6].mxu0  ;;  %v368_v61 = vpop.f32.mrb[6].mxu1 }
  0xf8   :  { %v273_v63 = vadd.f32 %v257_v48, %v213_v51  ;;  %v281_v0 = vadd.f32 %v265_v50, %v245_v52  ;;  %v216_v1 = vadd.f32 %v360_v59, %v473_v14  ;;  %v248_v2 = vadd.f32 %v368_v61, %v473_v14  ;;  %v207_v3 = vpop.f32.mrb[7].mxu0  ;;  %v239_v5 = vpop.f32.mrb[7].mxu1 }
  0xf9   :  { %v271_v7 = vadd.f32 %v255_v54, %v205_v57  ;;  %v279_v8 = vadd.f32 %v263_v56, %v237_v58  ;;  %v208_v9 = vadd.f32 %v473_v14, %v207_v3  ;;  %v240_v10 = vadd.f32 %v473_v14, %v239_v5 }
  0xfa   :  { %290 = vst.msk [vmem:[%s607_s4 + $0x30] sm:$0xff] %vm283_vm1, %v273_v63  ;;  %298 = vst.msk [vmem:[%s607_s4 + $0x70] sm:$0xff] %vm283_vm1, %v281_v0  ;;  %v274_v11 = vadd.f32 %v258_v60, %v216_v1  ;;  %v282_v12 = vadd.f32 %v266_v62, %v248_v2 }
  0xfb   :  { %288 = vst.msk [vmem:[%s607_s4 + $0x20] sm:$0xff] %vm283_vm1, %v271_v7  ;;  %296 = vst.msk [vmem:[%s607_s4 + $0x60] sm:$0xff] %vm283_vm1, %v279_v8  ;;  %v272_v13 = vadd.f32 %v256_v4, %v208_v9  ;;  %v280_v14 = vadd.f32 %v264_v6, %v240_v10 }
  0xfc   :  { %291 = vst.msk [vmem:[%s607_s4 + $0x38] sm:$0xff] %vm283_vm1, %v274_v11  ;;  %299 = vst.msk [vmem:[%s607_s4 + $0x78] sm:$0xff] %vm283_vm1, %v282_v12 }
  0xfd   :  { %289 = vst.msk [vmem:[%s607_s4 + $0x28] sm:$0xff] %vm283_vm1, %v272_v13  ;;  %297 = vst.msk [vmem:[%s607_s4 + $0x68] sm:$0xff] %vm283_vm1, %v280_v14 }

// kernel: forward.35
= control target key start
LH: loop header
LB: loop body
LE: loop exit
PB: predicated region body
PF: predicated region fallthrough
CT: control target
= control target key end

     0   :  { %s918_s12 = smov 0   ;;  %s920_s13 = smov 0   ;;  %s1050_s0 = inlined_call_operand.vmem [shape: bf16[8,128,256], index: 0, kind: input, shape index: {}]   ;;  %s1051_s1 = inlined_call_operand.vmem [shape: bf16[8,256,3], index: 1, kind: input, shape index: {}]   ;;  %s1052_s2 = inlined_call_operand.vmem [shape: f32[1,3], index: 2, kind: input, shape index: {}]   ;;  %s1053_s3 = inlined_call_operand.vmem [shape: f32[8,128,3], index: 3, kind: output, shape index: {}]  }
   0x1   :  { %s922_s14 = smov 0  }
   0x2 LB: > { %s25_s15 = sadd.s32 1, %s892_s13  ;;  %p685_p0 = scmp.ge.s32.totalorder %s896_s14, 1  ;;  %s896_s14 = sphi %s922_s14, %s13_s14   ;;  %s892_s13 = sphi %s920_s13, %s1055_s13   ;;  %s888_s12 = sphi %s918_s12, %s1054_s12  }
   0x3   : > { %p27_p1 = scmp.ge.s32.totalorder %s25_s15, 8  ;;  %p169_p2 = scmp.lt.s32.totalorder %s896_s14, 9 }
   0x5   : > { %s1057_s15 = smov (%p27_p1, %s25_s15), 0  ;;  %p170_p3 = pnand %p685_p0, %p169_p2 }
   0x6   : > { %p208_p4 = scmp.lt.s32.totalorder (!%p170_p3), %s888_s12, 7  ;;  %v985_v34 = vld [vmem:[%s1052_s2] ss:$0 sm:$0xff] (!%p170_p3)  ;;  %vm562_vm0 = vcmask (!%p170_p3), 23552  }
   0x7   : > { %173 = sbr.rel (%p170_p3) target bundleno = 294 (0x126), region = 32 }
   0xe   : > { %s1059_s12 = smov (!%p208_p4, %s888_s12), 7 }
   0xf   : > { %s936_s16 = sshll.u32 %s1059_s12, 7 }
  0x10   : > { %s942_s19 = scalar_lea.vmem %s1051_s1, %s936_s16  ;;  %s957_s22 = scalar_lea.vmem %s1050_s0, %s936_s16 }
  0x11   : > { %v834_v0 = vld [vmem:[%s942_s19 + $0x40] sm:$0xff]   ;;  %v836_v2 = vld [vmem:[%s942_s19 + $0x48] sm:$0xff]   ;;  %v838_v4 = vld [vmem:[%s942_s19 + $0x50] sm:$0xff]   ;;  %s991_s27 = scalar_lea.vmem %s1053_s3, %s936_s16 }
  0x12   : > { %v835_v1 = vld [vmem:[%s942_s19] sm:$0xff]   ;;  %730 = vmatprep.subr.bf16.mxu0 %v834_v0  ;;  %794 = vmatprep.subr.bf16.mxu1 %v834_v0  ;;  %v837_v3 = vld [vmem:[%s942_s19 + $0x8] sm:$0xff]   ;;  %v839_v5 = vld [vmem:[%s942_s19 + $0x10] sm:$0xff]  }
  0x13   : > { %731 = vmatpush3.bf16.msra.mxu0 %v835_v1  ;;  %802 = vmatpush3.bf16.msra.mxu1 %v835_v1  ;;  %v840_v6 = vld [vmem:[%s942_s19 + $0x58] sm:$0xff]   ;;  %v842_v8 = vld [vmem:[%s942_s19 + $0x60] sm:$0xff]   ;;  %v844_v10 = vld [vmem:[%s942_s19 + $0x68] sm:$0xff]  }
  0x14   : > { %732 = vmatprep.subr.bf16.mxu0 %v836_v2  ;;  %795 = vmatprep.subr.bf16.mxu1 %v836_v2  ;;  %v841_v7 = vld [vmem:[%s942_s19 + $0x18] sm:$0xff]   ;;  %v843_v9 = vld [vmem:[%s942_s19 + $0x20] sm:$0xff]   ;;  %v845_v13 = vld [vmem:[%s942_s19 + $0x28] sm:$0xff]  }
  0x15   : > { %v852_v11 = vld [vmem:[%s957_s22 + $0x4] ss:$8 sps:$4 sm:$0xff]   ;;  %v846_v14 = vld [vmem:[%s942_s19 + $0x70] sm:$0xff]   ;;  %v848_v16 = vld [vmem:[%s942_s19 + $0x78] sm:$0xff]  }
  0x16   : > { %v855_v12 = vld [vmem:[%s957_s22 + $0x44] ss:$8 sps:$4 sm:$0xff]   ;;  %497 = vmatprep.mubr.bf16.mxu0 %v852_v11  ;;  %v847_v15 = vld [vmem:[%s942_s19 + $0x30] sm:$0xff]   ;;  %v849_v17 = vld [vmem:[%s942_s19 + $0x38] sm:$0xff]  }
  0x17   : > { %733 = vmatpush3.bf16.msra.mxu0 %v837_v3  ;;  %803 = vmatpush3.bf16.msra.mxu1 %v837_v3  ;;  %v850_v18 = vld [vmem:[%s957_s22] ss:$8 sps:$4 sm:$0xff]   ;;  %v856_v20 = vld [vmem:[%s957_s22 + $0x14] ss:$8 sps:$4 sm:$0xff]   ;;  %v860_v22 = vld [vmem:[%s957_s22 + $0x10] ss:$8 sps:$4 sm:$0xff]  }
  0x18   : > { %734 = vmatprep.subr.bf16.mxu0 %v838_v4  ;;  %796 = vmatprep.subr.bf16.mxu1 %v838_v4  ;;  %v853_v19 = vld [vmem:[%s957_s22 + $0x40] ss:$8 sps:$4 sm:$0xff]   ;;  %v858_v21 = vld [vmem:[%s957_s22 + $0x54] ss:$8 sps:$4 sm:$0xff]   ;;  %v861_v23 = vld [vmem:[%s957_s22 + $0x50] ss:$8 sps:$4 sm:$0xff]  }
  0x19   : > { %529 = vmatprep.mubr.bf16.mxu1 %v855_v12  ;;  %v862_v24 = vld [vmem:[%s957_s22 + $0x24] ss:$8 sps:$4 sm:$0xff]   ;;  %v866_v26 = vld [vmem:[%s957_s22 + $0x20] ss:$8 sps:$4 sm:$0xff]   ;;  %v868_v28 = vld [vmem:[%s957_s22 + $0x34] ss:$8 sps:$4 sm:$0xff]  }
  0x1a   : > { %v864_v25 = vld [vmem:[%s957_s22 + $0x64] ss:$8 sps:$4 sm:$0xff]   ;;  %v867_v27 = vld [vmem:[%s957_s22 + $0x60] ss:$8 sps:$4 sm:$0xff]   ;;  %v870_v29 = vld [vmem:[%s957_s22 + $0x74] ss:$8 sps:$4 sm:$0xff]  }
  0x1b   : > { %735 = vmatpush3.bf16.msra.mxu0 %v839_v5  ;;  %804 = vmatpush3.bf16.msra.mxu1 %v839_v5  ;;  %v872_v30 = vld [vmem:[%s957_s22 + $0x30] ss:$8 sps:$4 sm:$0xff]  }
  0x1c   : > { %736 = vmatprep.subr.bf16.mxu0 %v840_v6  ;;  %797 = vmatprep.subr.bf16.mxu1 %v840_v6  ;;  %v873_v31 = vld [vmem:[%s957_s22 + $0x70] ss:$8 sps:$4 sm:$0xff]  }
  0x1f   : > { %737 = vmatpush3.bf16.msra.mxu0 %v841_v7  ;;  %805 = vmatpush3.bf16.msra.mxu1 %v841_v7 }
  0x20   : > { %738 = vmatprep.subr.bf16.mxu0 %v842_v8  ;;  %798 = vmatprep.subr.bf16.mxu1 %v842_v8 }
  0x23   : > { %739 = vmatpush3.bf16.msra.mxu0 %v843_v9  ;;  %806 = vmatpush3.bf16.msra.mxu1 %v843_v9 }
  0x24   : > { %740 = vmatprep.subr.bf16.mxu0 %v844_v10  ;;  %799 = vmatprep.subr.bf16.mxu1 %v844_v10 }
  0x27   : > { %741 = vmatpush3.bf16.msra.mxu0 %v845_v13  ;;  %807 = vmatpush3.bf16.msra.mxu1 %v845_v13 }
  0x28   : > { %742 = vmatprep.subr.bf16.mxu0 %v846_v14  ;;  %800 = vmatprep.subr.bf16.mxu1 %v846_v14 }
  0x2b   : > { %743 = vmatpush3.bf16.msra.mxu0 %v847_v15  ;;  %808 = vmatpush3.bf16.msra.mxu1 %v847_v15 }
  0x2c   : > { %744 = vmatprep.subr.bf16.mxu0 %v848_v16  ;;  %801 = vmatprep.subr.bf16.mxu1 %v848_v16 }
  0x2f   : > { %745 = vmatpush3.bf16.msra.mxu0 %v849_v17  ;;  %809 = vmatpush3.bf16.msra.mxu1 %v849_v17 }
  0x32   : > { %498 = vmatmul.mubr.bf16.vlgmr.msra.gmra.mrb[0].mxu0 %v850_v18  ;;  %530 = vmatmul.mubr.bf16.vlgmr.msra.gmra.mrb[0].mxu1 %v853_v19 }
  0x33   : > { %505 = vmatprep.mubr.bf16.mxu0 %v856_v20  ;;  %537 = vmatprep.mubr.bf16.mxu1 %v858_v21 }
  0x3a   : > { %506 = vmatmul.mubr.bf16.gmra.mrb[4].mxu0 %v860_v22  ;;  %538 = vmatmul.mubr.bf16.gmra.mrb[4].mxu1 %v861_v23 }
  0x3b   : > { %513 = vmatprep.mubr.bf16.mxu0 %v862_v24  ;;  %545 = vmatprep.mubr.bf16.mxu1 %v864_v25 }
  0x42   : > { %514 = vmatmul.mubr.bf16.gmra.mrb[8].mxu0 %v866_v26  ;;  %546 = vmatmul.mubr.bf16.gmra.mrb[8].mxu1 %v867_v27 }
  0x43   : > { %521 = vmatprep.mubr.bf16.mxu0 %v868_v28  ;;  %553 = vmatprep.mubr.bf16.mxu1 %v870_v29 }
  0x4a   : > { %522 = vmatmul.mubr.bf16.gmra.mrb[12].mxu0 %v872_v30  ;;  %554 = vmatmul.mubr.bf16.gmra.mrb[12].mxu1 %v873_v31 }
 0x105   : > { %v746_v32 = vpop.f32.mrb[0].mxu0  ;;  %v770_v33 = vpop.f32.mrb[0].mxu1 }
 0x106   : > { %v747_v35 = vpop.f32.mrb[1].mxu0  ;;  %v771_v36 = vpop.f32.mrb[1].mxu1 }
 0x107   : > { %v748_v37 = vadd.f32 %v747_v35, %v746_v32  ;;  %v772_v38 = vadd.f32 %v771_v36, %v770_v33  ;;  %v749_v39 = vpop.f32.mrb[2].mxu0  ;;  %v773_v40 = vpop.f32.mrb[2].mxu1 }
 0x108   : > { %v750_v41 = vpop.f32.mrb[3].mxu0  ;;  %v774_v42 = vpop.f32.mrb[3].mxu1 }
 0x109   : > { %v500_v43 = vadd.f32 %v748_v37, %v985_v34  ;;  %v532_v44 = vadd.f32 %v772_v38, %v985_v34  ;;  %v751_v45 = vadd.f32 %v750_v41, %v749_v39  ;;  %v775_v46 = vadd.f32 %v774_v42, %v773_v40 }
 0x10b   : > { %563 = vst.msk [vmem:[%s991_s27] sm:$0xff] %vm562_vm0, %v500_v43  ;;  %571 = vst.msk [vmem:[%s991_s27 + $0x40] sm:$0xff] %vm562_vm0, %v532_v44  ;;  %v503_v47 = vadd.f32 %v751_v45, %v985_v34  ;;  %v535_v48 = vadd.f32 %v775_v46, %v985_v34 }
 0x10d   : > { %564 = vst.msk [vmem:[%s991_s27 + $0x8] sm:$0xff] %vm562_vm0, %v503_v47  ;;  %572 = vst.msk [vmem:[%s991_s27 + $0x48] sm:$0xff] %vm562_vm0, %v535_v48  ;;  %v752_v49 = vpop.f32.mrb[4].mxu0  ;;  %v776_v50 = vpop.f32.mrb[4].mxu1 }
 0x10e   : > { %v753_v51 = vpop.f32.mrb[5].mxu0  ;;  %v777_v52 = vpop.f32.mrb[5].mxu1 }
 0x10f   : > { %v754_v53 = vadd.f32 %v753_v51, %v752_v49  ;;  %v778_v54 = vadd.f32 %v777_v52, %v776_v50  ;;  %v755_v55 = vpop.f32.mrb[6].mxu0  ;;  %v779_v56 = vpop.f32.mrb[6].mxu1 }
 0x110   : > { %v756_v57 = vpop.f32.mrb[7].mxu0  ;;  %v780_v58 = vpop.f32.mrb[7].mxu1 }
 0x111   : > { %v508_v59 = vadd.f32 %v754_v53, %v985_v34  ;;  %v540_v60 = vadd.f32 %v778_v54, %v985_v34  ;;  %v757_v61 = vadd.f32 %v756_v57, %v755_v55  ;;  %v781_v62 = vadd.f32 %v780_v58, %v779_v56 }
 0x113   : > { %565 = vst.msk [vmem:[%s991_s27 + $0x10] sm:$0xff] %vm562_vm0, %v508_v59  ;;  %573 = vst.msk [vmem:[%s991_s27 + $0x50] sm:$0xff] %vm562_vm0, %v540_v60  ;;  %v511_v63 = vadd.f32 %v757_v61, %v985_v34  ;;  %v543_v0 = vadd.f32 %v781_v62, %v985_v34 }
 0x115   : > { %566 = vst.msk [vmem:[%s991_s27 + $0x18] sm:$0xff] %vm562_vm0, %v511_v63  ;;  %574 = vst.msk [vmem:[%s991_s27 + $0x58] sm:$0xff] %vm562_vm0, %v543_v0  ;;  %v758_v1 = vpop.f32.mrb[8].mxu0  ;;  %v782_v2 = vpop.f32.mrb[8].mxu1 }
 0x116   : > { %v759_v3 = vpop.f32.mrb[9].mxu0  ;;  %v783_v4 = vpop.f32.mrb[9].mxu1 }
 0x117   : > { %v760_v5 = vadd.f32 %v759_v3, %v758_v1  ;;  %v784_v6 = vadd.f32 %v783_v4, %v782_v2  ;;  %v761_v7 = vpop.f32.mrb[10].mxu0  ;;  %v785_v8 = vpop.f32.mrb[10].mxu1 }
 0x118   : > { %v762_v9 = vpop.f32.mrb[11].mxu0  ;;  %v786_v10 = vpop.f32.mrb[11].mxu1 }
 0x119   : > { %v516_v11 = vadd.f32 %v760_v5, %v985_v34  ;;  %v548_v12 = vadd.f32 %v784_v6, %v985_v34  ;;  %v763_v13 = vadd.f32 %v762_v9, %v761_v7  ;;  %v787_v14 = vadd.f32 %v786_v10, %v785_v8 }
 0x11b   : > { %567 = vst.msk [vmem:[%s991_s27 + $0x20] sm:$0xff] %vm562_vm0, %v516_v11  ;;  %575 = vst.msk [vmem:[%s991_s27 + $0x60] sm:$0xff] %vm562_vm0, %v548_v12  ;;  %v519_v15 = vadd.f32 %v763_v13, %v985_v34  ;;  %v551_v16 = vadd.f32 %v787_v14, %v985_v34 }
 0x11d   : > { %568 = vst.msk [vmem:[%s991_s27 + $0x28] sm:$0xff] %vm562_vm0, %v519_v15  ;;  %576 = vst.msk [vmem:[%s991_s27 + $0x68] sm:$0xff] %vm562_vm0, %v551_v16  ;;  %v764_v17 = vpop.f32.mrb[12].mxu0  ;;  %v788_v18 = vpop.f32.mrb[12].mxu1 }
 0x11e   : > { %v765_v19 = vpop.f32.mrb[13].mxu0  ;;  %v789_v20 = vpop.f32.mrb[13].mxu1 }
 0x11f   : > { %v766_v21 = vadd.f32 %v765_v19, %v764_v17  ;;  %v790_v22 = vadd.f32 %v789_v20, %v788_v18  ;;  %v767_v23 = vpop.f32.mrb[14].mxu0  ;;  %v791_v24 = vpop.f32.mrb[14].mxu1 }
 0x120   : > { %v768_v25 = vpop.f32.mrb[15].mxu0  ;;  %v792_v26 = vpop.f32.mrb[15].mxu1 }
 0x121   : > { %v524_v27 = vadd.f32 %v766_v21, %v985_v34  ;;  %v556_v28 = vadd.f32 %v790_v22, %v985_v34  ;;  %v769_v29 = vadd.f32 %v768_v25, %v767_v23  ;;  %v793_v30 = vadd.f32 %v792_v26, %v791_v24 }
 0x123   : > { %569 = vst.msk [vmem:[%s991_s27 + $0x30] sm:$0xff] %vm562_vm0, %v524_v27  ;;  %577 = vst.msk [vmem:[%s991_s27 + $0x70] sm:$0xff] %vm562_vm0, %v556_v28  ;;  %v527_v31 = vadd.f32 %v769_v29, %v985_v34  ;;  %v559_v32 = vadd.f32 %v793_v30, %v985_v34 }
 0x125   : > { %570 = vst.msk [vmem:[%s991_s27 + $0x38] sm:$0xff] %vm562_vm0, %v527_v31  ;;  %578 = vst.msk [vmem:[%s991_s27 + $0x78] sm:$0xff] %vm562_vm0, %v559_v32 }
 0x126 PF: > { %s13_s14 = sadd.s32 1, %s896_s14   ;;  %s1054_s12 = smov %s892_s13 }
 0x127   : > { %p10_p5 = scmp.ge.s32.totalorder %s13_s14, 10   ;;  %s1055_s13 = smov %s1057_s15 }
 0x129   :  { %12 = sbr.rel (!%p10_p5) target bundleno = 2 (0x2), region = 65 }

</bundles_post_ra>
